<compile_context>
chip_gen: v5e
topology: v5e:2x2
jax: 0.10.0
libtpu: 0.0.40
codegen_flags: <defaults>
</compile_context>

<pallas_src>
import functools

import jax
import jax.numpy as jnp
from jax.experimental import pallas as pl
from jax.experimental.pallas import tpu as pltpu


N_STYLES = 4
STYLE_DIM = 32
FEAT = 16
PAD_W = 8  # W margin = one full sublane tile -> in-kernel pads are aligned concats


# ----------------------------------------------------------------------------
# In-kernel helpers (operate on traced VMEM values)
# ----------------------------------------------------------------------------

def _zero_pad_hw(x):
    """(H, W, C) -> (H + 2, W + 2*PAD_W, C) with zero margins.

    H padding is a leading-dim concat (free vreg placement); W padding uses
    8-wide zero blocks so the sublane-dim concat is tile aligned.
    """
    H, W, C = x.shape
    zrow = jnp.zeros((1, W, C), x.dtype)
    xh = jnp.concatenate([zrow, x, zrow], axis=0)
    zcol = jnp.zeros((H + 2, PAD_W, C), x.dtype)
    return jnp.concatenate([zcol, xh, zcol], axis=1)


def _conv3x3_padded(xp, w4, H, W, bias_row=None, relu=True):
    """3x3 'same' conv on a zero-margin padded input.

    xp: (H+2, W+2*PAD_W, Cin) value, w4: (3, 3, Cin, Cout).
    Returns (H*W, Cout) float32.  bf16 MXU inputs, f32 accumulation.
    """
    Cin = xp.shape[-1]
    acc = None
    for dy in range(3):
        for dx in range(3):
            patch = xp[dy:dy + H, PAD_W - 1 + dx:PAD_W - 1 + dx + W, :]
            patch = patch.reshape(H * W, Cin).astype(jnp.bfloat16)
            part = jnp.dot(patch, w4[dy, dx].astype(jnp.bfloat16),
                           preferred_element_type=jnp.float32)
            acc = part if acc is None else acc + part
    if bias_row is not None:
        acc = acc + bias_row
    if relu:
        acc = jnp.maximum(acc, 0.0)
    return acc


# ----------------------------------------------------------------------------
# Fused forward kernel (one batch element per grid step)
# ----------------------------------------------------------------------------

def _align_fused_kernel(x_ref, g_ref, bg_ref, m_ref,
                        c1w_ref, c1b_ref, c2w_ref, c2b_ref,
                        fcw_ref, fcb_ref,
                        geow_ref, geob_ref, const_ref,
                        affw_ref, affb_ref, modw_ref,
                        rgbwt_ref, rgbb_ref,
                        o_ref, *, H, W):
    HW = H * W

    # --- encoder: conv1 -> conv2 -> GAP -> FC (all fused, no HBM) -----------
    x = x_ref[0]                                                 # (H, W, 3)
    h = _conv3x3_padded(_zero_pad_hw(x), c1w_ref[...], H, W,
                        bias_row=c1b_ref[...], relu=True)        # (HW, FEAT)
    h = _conv3x3_padded(_zero_pad_hw(h.reshape(H, W, FEAT)), c2w_ref[...],
                        H, W, bias_row=c2b_ref[...], relu=True)  # (HW, FEAT)
    pooled = (jnp.sum(h, axis=0) * (1.0 / HW))[None, :]          # (1, FEAT)
    codes = jnp.dot(pooled.astype(jnp.bfloat16),
                    fcw_ref[...].astype(jnp.bfloat16),
                    preferred_element_type=jnp.float32) + fcb_ref[...]
    codes0 = codes[:, :STYLE_DIM]                                # first W+ latent

    # --- decoder: geometry conv + const, modulated conv -----------------------
    g = g_ref[0]                                                 # (H, W, 2)
    gfeat = _conv3x3_padded(_zero_pad_hw(g), geow_ref[...], H, W,
                            bias_row=geob_ref[...], relu=True)   # (HW, FEAT)
    feat = gfeat + const_ref[...]                                # learned const add

    style = jnp.dot(codes0.astype(jnp.bfloat16),
                    affw_ref[...].astype(jnp.bfloat16),
                    preferred_element_type=jnp.float32) + affb_ref[...]  # (1, FEAT)

    # modulation + demodulation, demod folded into the weights (same math,
    # removes the per-pixel post-scale).
    wmod = modw_ref[...] * style[0][None, None, :, None]         # (3,3,Cin,Cout)
    demod = jax.lax.rsqrt(jnp.sum(wmod * wmod, axis=(0, 1, 2)) + 1e-8)  # (Cout,)
    wd = wmod * demod[None, None, None, :]
    feat = _conv3x3_padded(_zero_pad_hw(feat.reshape(H, W, FEAT)), wd, H, W,
                           bias_row=None, relu=True)             # (HW, FEAT)

    # --- to-RGB (1x1) + background composite epilogue, lane-dense output -----
    rgb = jax.lax.dot_general(
        rgbwt_ref[...].astype(jnp.bfloat16), feat.astype(jnp.bfloat16),
        dimension_numbers=(((1,), (1,)), ((), ())),
        preferred_element_type=jnp.float32) + rgbb_ref[...]      # (3, HW)
    m = m_ref[0]                                                 # (1, HW)
    img = rgb * m + bg_ref[0] * (1.0 - m)                        # (3, HW)
    o_ref[...] = img[None].astype(o_ref.dtype)                   # lane-dense store


# ----------------------------------------------------------------------------
# Parameters + forward wrapper
# ----------------------------------------------------------------------------

def init_params(key):
    ks = jax.random.split(key, 10)

    def nrm(k, shape, scale=0.1):
        return (scale * jax.random.normal(k, shape)).astype(jnp.float32)

    return {
        # encoder (stand-in for GradualStyleEncoder(50, 'ir_se'))
        "enc_conv1_w": nrm(ks[0], (3, 3, 3, FEAT)),
        "enc_conv1_b": jnp.zeros((FEAT,), jnp.float32),
        "enc_conv2_w": nrm(ks[1], (3, 3, FEAT, FEAT)),
        "enc_conv2_b": jnp.zeros((FEAT,), jnp.float32),
        "enc_fc_w": nrm(ks[2], (FEAT, N_STYLES * STYLE_DIM)),
        "enc_fc_b": jnp.zeros((N_STYLES * STYLE_DIM,), jnp.float32),
        # decoder (stand-in for TeethGenerator(256, 256, n_mlp=8, num_labels=2,
        # with_bg=True); input_is_latent=True so no MLP mapping network)
        "dec_geo_w": nrm(ks[3], (3, 3, 2, FEAT)),       # num_labels=2 geometry
        "dec_geo_b": jnp.zeros((FEAT,), jnp.float32),
        "dec_const": nrm(ks[4], (16, 16, FEAT)),        # learned const input
        "dec_affine_w": nrm(ks[5], (STYLE_DIM, FEAT)),
        "dec_affine_b": jnp.ones((FEAT,), jnp.float32),  # StyleGAN bias init 1
        "dec_mod_w": nrm(ks[6], (3, 3, FEAT, FEAT)),
        "dec_rgb_w": nrm(ks[7], (FEAT, 3)),
        "dec_rgb_b": jnp.zeros((3,), jnp.float32),
    }


def align_model_forward(params, x, geometry, background, mask):
    """x:(B,3,H,W) geometry:(B,2,H,W) background:(B,3,H,W) mask:(B,1,H,W),
    all NCHW (PyTorch convention).  Returns image (B,3,H,W)."""
    B, _, H, W = x.shape
    HW = H * W

    # One-time layout prep outside the kernel (all tiny):
    #  * x / geometry need an NHWC transpose for the HWC conv patch slicing.
    #  * background / mask / output stay in NCHW, only flattened to (C, H*W)
    #    so kernel loads and the final store are lane-dense (no transpose).
    x_nhwc = jnp.transpose(x, (0, 2, 3, 1))          # (B, H, W, 3)
    g_nhwc = jnp.transpose(geometry, (0, 2, 3, 1))   # (B, H, W, 2)
    bg_f = background.reshape(B, 3, HW)
    m_f = mask.reshape(B, 1, HW)

    c1b = params["enc_conv1_b"].reshape(1, FEAT)
    c2b = params["enc_conv2_b"].reshape(1, FEAT)
    geob = params["dec_geo_b"].reshape(1, FEAT)
    fcb = params["enc_fc_b"].reshape(1, N_STYLES * STYLE_DIM)
    affb = params["dec_affine_b"].reshape(1, FEAT)
    rgbb = params["dec_rgb_b"].reshape(3, 1)
    rgbwt = params["dec_rgb_w"].T                    # (3, FEAT): lane-dense to-RGB
    const = params["dec_const"].reshape(HW, FEAT)    # (HW, FEAT)

    def full_spec(a):
        shp = tuple(a.shape)
        n = len(shp)
        return pl.BlockSpec(shp, lambda i, _n=n: (0,) * _n)

    kernel = functools.partial(_align_fused_kernel, H=H, W=W)
    out = pl.pallas_call(
        kernel,
        out_shape=jax.ShapeDtypeStruct((B, 3, HW), jnp.float32),
        grid=(B,),
        in_specs=[
            pl.BlockSpec((1, H, W, 3), lambda i: (i, 0, 0, 0)),
            pl.BlockSpec((1, H, W, 2), lambda i: (i, 0, 0, 0)),
            pl.BlockSpec((1, 3, HW), lambda i: (i, 0, 0)),
            pl.BlockSpec((1, 1, HW), lambda i: (i, 0, 0)),
            full_spec(params["enc_conv1_w"]), full_spec(c1b),
            full_spec(params["enc_conv2_w"]), full_spec(c2b),
            full_spec(params["enc_fc_w"]), full_spec(fcb),
            full_spec(params["dec_geo_w"]), full_spec(geob),
            full_spec(const),
            full_spec(params["dec_affine_w"]), full_spec(affb),
            full_spec(params["dec_mod_w"]),
            full_spec(rgbwt), full_spec(rgbb),
        ],
        out_specs=pl.BlockSpec((1, 3, HW), lambda i: (i, 0, 0)),
        compiler_params=pltpu.CompilerParams(
            dimension_semantics=("parallel",)),
    )(x_nhwc, g_nhwc, bg_f, m_f,
      params["enc_conv1_w"], c1b,
      params["enc_conv2_w"], c2b,
      params["enc_fc_w"], fcb,
      params["dec_geo_w"], geob,
      const,
      params["dec_affine_w"], affb,
      params["dec_mod_w"],
      rgbwt, rgbb)

    return out.reshape(B, 3, H, W)                   # free reshape, already NCHW


# ----------------------------------------------------------------------------
# Main
# ----------------------------------------------------------------------------

if __name__ == "__main__":
    B, H, W = 2, 16, 16
    key = jax.random.PRNGKey(0)
    k_x, k_g, k_b, k_m, k_p = jax.random.split(key, 5)

    x = jax.random.normal(k_x, (B, 3, H, W), jnp.float32)
    geometry = jax.random.normal(k_g, (B, 2, H, W), jnp.float32)
    background = jax.random.normal(k_b, (B, 3, H, W), jnp.float32)
    mask = (jax.random.uniform(k_m, (B, 1, H, W)) > 0.5).astype(jnp.float32)

    params = init_params(k_p)

    forward = jax.jit(align_model_forward)
    image = forward(params, x, geometry, background, mask)
    image = jax.block_until_ready(image)

    assert image.shape == (B, 3, H, W), image.shape
    assert image.dtype == jnp.float32
    assert bool(jnp.all(jnp.isfinite(image)))
    print("KERNEL_OK")
</pallas_src>

<mosaic_0001>
module attributes {stable_mosaic.version = 11 : i64} {
  func.func @_align_fused_kernel(%arg0: i32, %arg1: memref<1x16x16x3xf32, #tpu.memory_space<vmem>>, %arg2: memref<1x16x16x2xf32, #tpu.memory_space<vmem>>, %arg3: memref<1x3x256xf32, #tpu.memory_space<vmem>>, %arg4: memref<1x1x256xf32, #tpu.memory_space<vmem>>, %arg5: memref<3x3x3x16xf32, #tpu.memory_space<vmem>>, %arg6: memref<1x16xf32, #tpu.memory_space<vmem>>, %arg7: memref<3x3x16x16xf32, #tpu.memory_space<vmem>>, %arg8: memref<1x16xf32, #tpu.memory_space<vmem>>, %arg9: memref<16x128xf32, #tpu.memory_space<vmem>>, %arg10: memref<1x128xf32, #tpu.memory_space<vmem>>, %arg11: memref<3x3x2x16xf32, #tpu.memory_space<vmem>>, %arg12: memref<1x16xf32, #tpu.memory_space<vmem>>, %arg13: memref<256x16xf32, #tpu.memory_space<vmem>>, %arg14: memref<32x16xf32, #tpu.memory_space<vmem>>, %arg15: memref<1x16xf32, #tpu.memory_space<vmem>>, %arg16: memref<3x3x16x16xf32, #tpu.memory_space<vmem>>, %arg17: memref<3x16xf32, #tpu.memory_space<vmem>>, %arg18: memref<3x1xf32, #tpu.memory_space<vmem>>, %arg19: memref<1x3x256xf32, #tpu.memory_space<vmem>>) attributes {dimension_semantics = [#tpu.dimension_semantics<parallel>], iteration_bounds = array<i64: 2>, scalar_prefetch = 0 : i64, scratch_operands = 0 : i64, tpu.core_type = #tpu.core_type<tc>, window_params = [{transform_indices = @transform_0, window_bounds = array<i64: 1, 16, 16, 3>}, {transform_indices = @transform_1, window_bounds = array<i64: 1, 16, 16, 2>}, {transform_indices = @transform_2, window_bounds = array<i64: 1, 3, 256>}, {transform_indices = @transform_3, window_bounds = array<i64: 1, 1, 256>}, {pipeline_mode = #tpu.pipeline_mode<synchronous>, transform_indices = @transform_4, window_bounds = array<i64: 3, 3, 3, 16>}, {pipeline_mode = #tpu.pipeline_mode<synchronous>, transform_indices = @transform_5, window_bounds = array<i64: 1, 16>}, {pipeline_mode = #tpu.pipeline_mode<synchronous>, transform_indices = @transform_6, window_bounds = array<i64: 3, 3, 16, 16>}, {pipeline_mode = #tpu.pipeline_mode<synchronous>, transform_indices = @transform_7, window_bounds = array<i64: 1, 16>}, {pipeline_mode = #tpu.pipeline_mode<synchronous>, transform_indices = @transform_8, window_bounds = array<i64: 16, 128>}, {pipeline_mode = #tpu.pipeline_mode<synchronous>, transform_indices = @transform_9, window_bounds = array<i64: 1, 128>}, {pipeline_mode = #tpu.pipeline_mode<synchronous>, transform_indices = @transform_10, window_bounds = array<i64: 3, 3, 2, 16>}, {pipeline_mode = #tpu.pipeline_mode<synchronous>, transform_indices = @transform_11, window_bounds = array<i64: 1, 16>}, {pipeline_mode = #tpu.pipeline_mode<synchronous>, transform_indices = @transform_12, window_bounds = array<i64: 256, 16>}, {pipeline_mode = #tpu.pipeline_mode<synchronous>, transform_indices = @transform_13, window_bounds = array<i64: 32, 16>}, {pipeline_mode = #tpu.pipeline_mode<synchronous>, transform_indices = @transform_14, window_bounds = array<i64: 1, 16>}, {pipeline_mode = #tpu.pipeline_mode<synchronous>, transform_indices = @transform_15, window_bounds = array<i64: 3, 3, 16, 16>}, {pipeline_mode = #tpu.pipeline_mode<synchronous>, transform_indices = @transform_16, window_bounds = array<i64: 3, 16>}, {pipeline_mode = #tpu.pipeline_mode<synchronous>, transform_indices = @transform_17, window_bounds = array<i64: 3, 1>}, {transform_indices = @transform_18, window_bounds = array<i64: 1, 3, 256>}]} {
    %c0 = arith.constant 0 : index
    %c0_0 = arith.constant 0 : index
    %c0_1 = arith.constant 0 : index
    %c0_2 = arith.constant 0 : index
    %0 = vector.load %arg1[%c0, %c0_0, %c0_1, %c0_2] : memref<1x16x16x3xf32, #tpu.memory_space<vmem>>, vector<1x16x16x3xf32>
    %1 = vector.shape_cast %0 : vector<1x16x16x3xf32> to vector<16x16x3xf32>
    %cst = arith.constant 0.000000e+00 : f32
    %2 = vector.broadcast %cst : f32 to vector<1x16x3xf32>
    %3 = tpu.concatenate %2, %1, %2 in 0 : vector<1x16x3xf32>, vector<16x16x3xf32>, vector<1x16x3xf32> -> vector<18x16x3xf32>
    %cst_3 = arith.constant 0.000000e+00 : f32
    %4 = vector.broadcast %cst_3 : f32 to vector<18x8x3xf32>
    %5 = tpu.concatenate %4, %3, %4 in 1 : vector<18x8x3xf32>, vector<18x16x3xf32>, vector<18x8x3xf32> -> vector<18x32x3xf32>
    %c0_4 = arith.constant 0 : index
    %c0_5 = arith.constant 0 : index
    %c0_6 = arith.constant 0 : index
    %c0_7 = arith.constant 0 : index
    %6 = vector.load %arg5[%c0_4, %c0_5, %c0_6, %c0_7] : memref<3x3x3x16xf32, #tpu.memory_space<vmem>>, vector<3x3x3x16xf32>
    %c0_8 = arith.constant 0 : index
    %c0_9 = arith.constant 0 : index
    %7 = vector.load %arg6[%c0_8, %c0_9] : memref<1x16xf32, #tpu.memory_space<vmem>>, vector<1x16xf32>
    %8 = vector.extract_strided_slice %5 {offsets = [0, 7, 0], sizes = [16, 16, 3], strides = [1, 1, 1]} : vector<18x32x3xf32> to vector<16x16x3xf32>
    %9 = vector.shape_cast %8 : vector<16x16x3xf32> to vector<256x3xf32>
    %10 = arith.truncf %9 : vector<256x3xf32> to vector<256x3xbf16>
    %11 = vector.extract_strided_slice %6 {offsets = [0, 0, 0, 0], sizes = [1, 1, 3, 16], strides = [1, 1, 1, 1]} : vector<3x3x3x16xf32> to vector<1x1x3x16xf32>
    %12 = vector.shape_cast %11 : vector<1x1x3x16xf32> to vector<3x16xf32>
    %13 = arith.truncf %12 : vector<3x16xf32> to vector<3x16xbf16>
    %cst_10 = arith.constant dense<0.000000e+00> : vector<256x16xf32>
    %14 = tpu.matmul %10, %13, %cst_10 {dimension_numbers = #tpu.dot_dimension_numbers<[1], [0], [0], [1], [0, 0, 1, 1], [], []>} : vector<256x3xbf16>, vector<3x16xbf16>, vector<256x16xf32> -> vector<256x16xf32>
    %15 = vector.extract_strided_slice %5 {offsets = [0, 8, 0], sizes = [16, 16, 3], strides = [1, 1, 1]} : vector<18x32x3xf32> to vector<16x16x3xf32>
    %16 = vector.shape_cast %15 : vector<16x16x3xf32> to vector<256x3xf32>
    %17 = arith.truncf %16 : vector<256x3xf32> to vector<256x3xbf16>
    %18 = vector.extract_strided_slice %6 {offsets = [0, 1, 0, 0], sizes = [1, 1, 3, 16], strides = [1, 1, 1, 1]} : vector<3x3x3x16xf32> to vector<1x1x3x16xf32>
    %19 = vector.shape_cast %18 : vector<1x1x3x16xf32> to vector<3x16xf32>
    %20 = arith.truncf %19 : vector<3x16xf32> to vector<3x16xbf16>
    %cst_11 = arith.constant dense<0.000000e+00> : vector<256x16xf32>
    %21 = tpu.matmul %17, %20, %cst_11 {dimension_numbers = #tpu.dot_dimension_numbers<[1], [0], [0], [1], [0, 0, 1, 1], [], []>} : vector<256x3xbf16>, vector<3x16xbf16>, vector<256x16xf32> -> vector<256x16xf32>
    %22 = arith.addf %14, %21 : vector<256x16xf32>
    %23 = vector.extract_strided_slice %5 {offsets = [0, 9, 0], sizes = [16, 16, 3], strides = [1, 1, 1]} : vector<18x32x3xf32> to vector<16x16x3xf32>
    %24 = vector.shape_cast %23 : vector<16x16x3xf32> to vector<256x3xf32>
    %25 = arith.truncf %24 : vector<256x3xf32> to vector<256x3xbf16>
    %26 = vector.extract_strided_slice %6 {offsets = [0, 2, 0, 0], sizes = [1, 1, 3, 16], strides = [1, 1, 1, 1]} : vector<3x3x3x16xf32> to vector<1x1x3x16xf32>
    %27 = vector.shape_cast %26 : vector<1x1x3x16xf32> to vector<3x16xf32>
    %28 = arith.truncf %27 : vector<3x16xf32> to vector<3x16xbf16>
    %cst_12 = arith.constant dense<0.000000e+00> : vector<256x16xf32>
    %29 = tpu.matmul %25, %28, %cst_12 {dimension_numbers = #tpu.dot_dimension_numbers<[1], [0], [0], [1], [0, 0, 1, 1], [], []>} : vector<256x3xbf16>, vector<3x16xbf16>, vector<256x16xf32> -> vector<256x16xf32>
    %30 = arith.addf %22, %29 : vector<256x16xf32>
    %31 = vector.extract_strided_slice %5 {offsets = [1, 7, 0], sizes = [16, 16, 3], strides = [1, 1, 1]} : vector<18x32x3xf32> to vector<16x16x3xf32>
    %32 = vector.shape_cast %31 : vector<16x16x3xf32> to vector<256x3xf32>
    %33 = arith.truncf %32 : vector<256x3xf32> to vector<256x3xbf16>
    %34 = vector.extract_strided_slice %6 {offsets = [1, 0, 0, 0], sizes = [1, 1, 3, 16], strides = [1, 1, 1, 1]} : vector<3x3x3x16xf32> to vector<1x1x3x16xf32>
    %35 = vector.shape_cast %34 : vector<1x1x3x16xf32> to vector<3x16xf32>
    %36 = arith.truncf %35 : vector<3x16xf32> to vector<3x16xbf16>
    %cst_13 = arith.constant dense<0.000000e+00> : vector<256x16xf32>
    %37 = tpu.matmul %33, %36, %cst_13 {dimension_numbers = #tpu.dot_dimension_numbers<[1], [0], [0], [1], [0, 0, 1, 1], [], []>} : vector<256x3xbf16>, vector<3x16xbf16>, vector<256x16xf32> -> vector<256x16xf32>
    %38 = arith.addf %30, %37 : vector<256x16xf32>
    %39 = vector.extract_strided_slice %5 {offsets = [1, 8, 0], sizes = [16, 16, 3], strides = [1, 1, 1]} : vector<18x32x3xf32> to vector<16x16x3xf32>
    %40 = vector.shape_cast %39 : vector<16x16x3xf32> to vector<256x3xf32>
    %41 = arith.truncf %40 : vector<256x3xf32> to vector<256x3xbf16>
    %42 = vector.extract_strided_slice %6 {offsets = [1, 1, 0, 0], sizes = [1, 1, 3, 16], strides = [1, 1, 1, 1]} : vector<3x3x3x16xf32> to vector<1x1x3x16xf32>
    %43 = vector.shape_cast %42 : vector<1x1x3x16xf32> to vector<3x16xf32>
    %44 = arith.truncf %43 : vector<3x16xf32> to vector<3x16xbf16>
    %cst_14 = arith.constant dense<0.000000e+00> : vector<256x16xf32>
    %45 = tpu.matmul %41, %44, %cst_14 {dimension_numbers = #tpu.dot_dimension_numbers<[1], [0], [0], [1], [0, 0, 1, 1], [], []>} : vector<256x3xbf16>, vector<3x16xbf16>, vector<256x16xf32> -> vector<256x16xf32>
    %46 = arith.addf %38, %45 : vector<256x16xf32>
    %47 = vector.extract_strided_slice %5 {offsets = [1, 9, 0], sizes = [16, 16, 3], strides = [1, 1, 1]} : vector<18x32x3xf32> to vector<16x16x3xf32>
    %48 = vector.shape_cast %47 : vector<16x16x3xf32> to vector<256x3xf32>
    %49 = arith.truncf %48 : vector<256x3xf32> to vector<256x3xbf16>
    %50 = vector.extract_strided_slice %6 {offsets = [1, 2, 0, 0], sizes = [1, 1, 3, 16], strides = [1, 1, 1, 1]} : vector<3x3x3x16xf32> to vector<1x1x3x16xf32>
    %51 = vector.shape_cast %50 : vector<1x1x3x16xf32> to vector<3x16xf32>
    %52 = arith.truncf %51 : vector<3x16xf32> to vector<3x16xbf16>
    %cst_15 = arith.constant dense<0.000000e+00> : vector<256x16xf32>
    %53 = tpu.matmul %49, %52, %cst_15 {dimension_numbers = #tpu.dot_dimension_numbers<[1], [0], [0], [1], [0, 0, 1, 1], [], []>} : vector<256x3xbf16>, vector<3x16xbf16>, vector<256x16xf32> -> vector<256x16xf32>
    %54 = arith.addf %46, %53 : vector<256x16xf32>
    %55 = vector.extract_strided_slice %5 {offsets = [2, 7, 0], sizes = [16, 16, 3], strides = [1, 1, 1]} : vector<18x32x3xf32> to vector<16x16x3xf32>
    %56 = vector.shape_cast %55 : vector<16x16x3xf32> to vector<256x3xf32>
    %57 = arith.truncf %56 : vector<256x3xf32> to vector<256x3xbf16>
    %58 = vector.extract_strided_slice %6 {offsets = [2, 0, 0, 0], sizes = [1, 1, 3, 16], strides = [1, 1, 1, 1]} : vector<3x3x3x16xf32> to vector<1x1x3x16xf32>
    %59 = vector.shape_cast %58 : vector<1x1x3x16xf32> to vector<3x16xf32>
    %60 = arith.truncf %59 : vector<3x16xf32> to vector<3x16xbf16>
    %cst_16 = arith.constant dense<0.000000e+00> : vector<256x16xf32>
    %61 = tpu.matmul %57, %60, %cst_16 {dimension_numbers = #tpu.dot_dimension_numbers<[1], [0], [0], [1], [0, 0, 1, 1], [], []>} : vector<256x3xbf16>, vector<3x16xbf16>, vector<256x16xf32> -> vector<256x16xf32>
    %62 = arith.addf %54, %61 : vector<256x16xf32>
    %63 = vector.extract_strided_slice %5 {offsets = [2, 8, 0], sizes = [16, 16, 3], strides = [1, 1, 1]} : vector<18x32x3xf32> to vector<16x16x3xf32>
    %64 = vector.shape_cast %63 : vector<16x16x3xf32> to vector<256x3xf32>
    %65 = arith.truncf %64 : vector<256x3xf32> to vector<256x3xbf16>
    %66 = vector.extract_strided_slice %6 {offsets = [2, 1, 0, 0], sizes = [1, 1, 3, 16], strides = [1, 1, 1, 1]} : vector<3x3x3x16xf32> to vector<1x1x3x16xf32>
    %67 = vector.shape_cast %66 : vector<1x1x3x16xf32> to vector<3x16xf32>
    %68 = arith.truncf %67 : vector<3x16xf32> to vector<3x16xbf16>
    %cst_17 = arith.constant dense<0.000000e+00> : vector<256x16xf32>
    %69 = tpu.matmul %65, %68, %cst_17 {dimension_numbers = #tpu.dot_dimension_numbers<[1], [0], [0], [1], [0, 0, 1, 1], [], []>} : vector<256x3xbf16>, vector<3x16xbf16>, vector<256x16xf32> -> vector<256x16xf32>
    %70 = arith.addf %62, %69 : vector<256x16xf32>
    %71 = vector.extract_strided_slice %5 {offsets = [2, 9, 0], sizes = [16, 16, 3], strides = [1, 1, 1]} : vector<18x32x3xf32> to vector<16x16x3xf32>
    %72 = vector.shape_cast %71 : vector<16x16x3xf32> to vector<256x3xf32>
    %73 = arith.truncf %72 : vector<256x3xf32> to vector<256x3xbf16>
    %74 = vector.extract_strided_slice %6 {offsets = [2, 2, 0, 0], sizes = [1, 1, 3, 16], strides = [1, 1, 1, 1]} : vector<3x3x3x16xf32> to vector<1x1x3x16xf32>
    %75 = vector.shape_cast %74 : vector<1x1x3x16xf32> to vector<3x16xf32>
    %76 = arith.truncf %75 : vector<3x16xf32> to vector<3x16xbf16>
    %cst_18 = arith.constant dense<0.000000e+00> : vector<256x16xf32>
    %77 = tpu.matmul %73, %76, %cst_18 {dimension_numbers = #tpu.dot_dimension_numbers<[1], [0], [0], [1], [0, 0, 1, 1], [], []>} : vector<256x3xbf16>, vector<3x16xbf16>, vector<256x16xf32> -> vector<256x16xf32>
    %78 = arith.addf %70, %77 : vector<256x16xf32>
    %79 = vector.broadcast %7 : vector<1x16xf32> to vector<256x16xf32>
    %80 = arith.addf %78, %79 : vector<256x16xf32>
    %cst_19 = arith.constant 0.000000e+00 : f32
    %81 = vector.broadcast %cst_19 : f32 to vector<256x16xf32>
    %82 = arith.maximumf %80, %81 : vector<256x16xf32>
    %83 = vector.shape_cast %82 : vector<256x16xf32> to vector<16x16x16xf32>
    %cst_20 = arith.constant 0.000000e+00 : f32
    %84 = vector.broadcast %cst_20 : f32 to vector<1x16x16xf32>
    %85 = tpu.concatenate %84, %83, %84 in 0 : vector<1x16x16xf32>, vector<16x16x16xf32>, vector<1x16x16xf32> -> vector<18x16x16xf32>
    %cst_21 = arith.constant 0.000000e+00 : f32
    %86 = vector.broadcast %cst_21 : f32 to vector<18x8x16xf32>
    %87 = tpu.concatenate %86, %85, %86 in 1 : vector<18x8x16xf32>, vector<18x16x16xf32>, vector<18x8x16xf32> -> vector<18x32x16xf32>
    %c0_22 = arith.constant 0 : index
    %c0_23 = arith.constant 0 : index
    %c0_24 = arith.constant 0 : index
    %c0_25 = arith.constant 0 : index
    %88 = vector.load %arg7[%c0_22, %c0_23, %c0_24, %c0_25] : memref<3x3x16x16xf32, #tpu.memory_space<vmem>>, vector<3x3x16x16xf32>
    %c0_26 = arith.constant 0 : index
    %c0_27 = arith.constant 0 : index
    %89 = vector.load %arg8[%c0_26, %c0_27] : memref<1x16xf32, #tpu.memory_space<vmem>>, vector<1x16xf32>
    %90 = vector.extract_strided_slice %87 {offsets = [0, 7, 0], sizes = [16, 16, 16], strides = [1, 1, 1]} : vector<18x32x16xf32> to vector<16x16x16xf32>
    %91 = vector.shape_cast %90 : vector<16x16x16xf32> to vector<256x16xf32>
    %92 = arith.truncf %91 : vector<256x16xf32> to vector<256x16xbf16>
    %93 = vector.extract_strided_slice %88 {offsets = [0, 0, 0, 0], sizes = [1, 1, 16, 16], strides = [1, 1, 1, 1]} : vector<3x3x16x16xf32> to vector<1x1x16x16xf32>
    %94 = vector.shape_cast %93 : vector<1x1x16x16xf32> to vector<16x16xf32>
    %95 = arith.truncf %94 : vector<16x16xf32> to vector<16x16xbf16>
    %cst_28 = arith.constant dense<0.000000e+00> : vector<256x16xf32>
    %96 = tpu.matmul %92, %95, %cst_28 {dimension_numbers = #tpu.dot_dimension_numbers<[1], [0], [0], [1], [0, 0, 1, 1], [], []>} : vector<256x16xbf16>, vector<16x16xbf16>, vector<256x16xf32> -> vector<256x16xf32>
    %97 = vector.extract_strided_slice %87 {offsets = [0, 8, 0], sizes = [16, 16, 16], strides = [1, 1, 1]} : vector<18x32x16xf32> to vector<16x16x16xf32>
    %98 = vector.shape_cast %97 : vector<16x16x16xf32> to vector<256x16xf32>
    %99 = arith.truncf %98 : vector<256x16xf32> to vector<256x16xbf16>
    %100 = vector.extract_strided_slice %88 {offsets = [0, 1, 0, 0], sizes = [1, 1, 16, 16], strides = [1, 1, 1, 1]} : vector<3x3x16x16xf32> to vector<1x1x16x16xf32>
    %101 = vector.shape_cast %100 : vector<1x1x16x16xf32> to vector<16x16xf32>
    %102 = arith.truncf %101 : vector<16x16xf32> to vector<16x16xbf16>
    %cst_29 = arith.constant dense<0.000000e+00> : vector<256x16xf32>
    %103 = tpu.matmul %99, %102, %cst_29 {dimension_numbers = #tpu.dot_dimension_numbers<[1], [0], [0], [1], [0, 0, 1, 1], [], []>} : vector<256x16xbf16>, vector<16x16xbf16>, vector<256x16xf32> -> vector<256x16xf32>
    %104 = arith.addf %96, %103 : vector<256x16xf32>
    %105 = vector.extract_strided_slice %87 {offsets = [0, 9, 0], sizes = [16, 16, 16], strides = [1, 1, 1]} : vector<18x32x16xf32> to vector<16x16x16xf32>
    %106 = vector.shape_cast %105 : vector<16x16x16xf32> to vector<256x16xf32>
    %107 = arith.truncf %106 : vector<256x16xf32> to vector<256x16xbf16>
    %108 = vector.extract_strided_slice %88 {offsets = [0, 2, 0, 0], sizes = [1, 1, 16, 16], strides = [1, 1, 1, 1]} : vector<3x3x16x16xf32> to vector<1x1x16x16xf32>
    %109 = vector.shape_cast %108 : vector<1x1x16x16xf32> to vector<16x16xf32>
    %110 = arith.truncf %109 : vector<16x16xf32> to vector<16x16xbf16>
    %cst_30 = arith.constant dense<0.000000e+00> : vector<256x16xf32>
    %111 = tpu.matmul %107, %110, %cst_30 {dimension_numbers = #tpu.dot_dimension_numbers<[1], [0], [0], [1], [0, 0, 1, 1], [], []>} : vector<256x16xbf16>, vector<16x16xbf16>, vector<256x16xf32> -> vector<256x16xf32>
    %112 = arith.addf %104, %111 : vector<256x16xf32>
    %113 = vector.extract_strided_slice %87 {offsets = [1, 7, 0], sizes = [16, 16, 16], strides = [1, 1, 1]} : vector<18x32x16xf32> to vector<16x16x16xf32>
    %114 = vector.shape_cast %113 : vector<16x16x16xf32> to vector<256x16xf32>
    %115 = arith.truncf %114 : vector<256x16xf32> to vector<256x16xbf16>
    %116 = vector.extract_strided_slice %88 {offsets = [1, 0, 0, 0], sizes = [1, 1, 16, 16], strides = [1, 1, 1, 1]} : vector<3x3x16x16xf32> to vector<1x1x16x16xf32>
    %117 = vector.shape_cast %116 : vector<1x1x16x16xf32> to vector<16x16xf32>
    %118 = arith.truncf %117 : vector<16x16xf32> to vector<16x16xbf16>
    %cst_31 = arith.constant dense<0.000000e+00> : vector<256x16xf32>
    %119 = tpu.matmul %115, %118, %cst_31 {dimension_numbers = #tpu.dot_dimension_numbers<[1], [0], [0], [1], [0, 0, 1, 1], [], []>} : vector<256x16xbf16>, vector<16x16xbf16>, vector<256x16xf32> -> vector<256x16xf32>
    %120 = arith.addf %112, %119 : vector<256x16xf32>
    %121 = vector.extract_strided_slice %87 {offsets = [1, 8, 0], sizes = [16, 16, 16], strides = [1, 1, 1]} : vector<18x32x16xf32> to vector<16x16x16xf32>
    %122 = vector.shape_cast %121 : vector<16x16x16xf32> to vector<256x16xf32>
    %123 = arith.truncf %122 : vector<256x16xf32> to vector<256x16xbf16>
    %124 = vector.extract_strided_slice %88 {offsets = [1, 1, 0, 0], sizes = [1, 1, 16, 16], strides = [1, 1, 1, 1]} : vector<3x3x16x16xf32> to vector<1x1x16x16xf32>
    %125 = vector.shape_cast %124 : vector<1x1x16x16xf32> to vector<16x16xf32>
    %126 = arith.truncf %125 : vector<16x16xf32> to vector<16x16xbf16>
    %cst_32 = arith.constant dense<0.000000e+00> : vector<256x16xf32>
    %127 = tpu.matmul %123, %126, %cst_32 {dimension_numbers = #tpu.dot_dimension_numbers<[1], [0], [0], [1], [0, 0, 1, 1], [], []>} : vector<256x16xbf16>, vector<16x16xbf16>, vector<256x16xf32> -> vector<256x16xf32>
    %128 = arith.addf %120, %127 : vector<256x16xf32>
    %129 = vector.extract_strided_slice %87 {offsets = [1, 9, 0], sizes = [16, 16, 16], strides = [1, 1, 1]} : vector<18x32x16xf32> to vector<16x16x16xf32>
    %130 = vector.shape_cast %129 : vector<16x16x16xf32> to vector<256x16xf32>
    %131 = arith.truncf %130 : vector<256x16xf32> to vector<256x16xbf16>
    %132 = vector.extract_strided_slice %88 {offsets = [1, 2, 0, 0], sizes = [1, 1, 16, 16], strides = [1, 1, 1, 1]} : vector<3x3x16x16xf32> to vector<1x1x16x16xf32>
    %133 = vector.shape_cast %132 : vector<1x1x16x16xf32> to vector<16x16xf32>
    %134 = arith.truncf %133 : vector<16x16xf32> to vector<16x16xbf16>
    %cst_33 = arith.constant dense<0.000000e+00> : vector<256x16xf32>
    %135 = tpu.matmul %131, %134, %cst_33 {dimension_numbers = #tpu.dot_dimension_numbers<[1], [0], [0], [1], [0, 0, 1, 1], [], []>} : vector<256x16xbf16>, vector<16x16xbf16>, vector<256x16xf32> -> vector<256x16xf32>
    %136 = arith.addf %128, %135 : vector<256x16xf32>
    %137 = vector.extract_strided_slice %87 {offsets = [2, 7, 0], sizes = [16, 16, 16], strides = [1, 1, 1]} : vector<18x32x16xf32> to vector<16x16x16xf32>
    %138 = vector.shape_cast %137 : vector<16x16x16xf32> to vector<256x16xf32>
    %139 = arith.truncf %138 : vector<256x16xf32> to vector<256x16xbf16>
    %140 = vector.extract_strided_slice %88 {offsets = [2, 0, 0, 0], sizes = [1, 1, 16, 16], strides = [1, 1, 1, 1]} : vector<3x3x16x16xf32> to vector<1x1x16x16xf32>
    %141 = vector.shape_cast %140 : vector<1x1x16x16xf32> to vector<16x16xf32>
    %142 = arith.truncf %141 : vector<16x16xf32> to vector<16x16xbf16>
    %cst_34 = arith.constant dense<0.000000e+00> : vector<256x16xf32>
    %143 = tpu.matmul %139, %142, %cst_34 {dimension_numbers = #tpu.dot_dimension_numbers<[1], [0], [0], [1], [0, 0, 1, 1], [], []>} : vector<256x16xbf16>, vector<16x16xbf16>, vector<256x16xf32> -> vector<256x16xf32>
    %144 = arith.addf %136, %143 : vector<256x16xf32>
    %145 = vector.extract_strided_slice %87 {offsets = [2, 8, 0], sizes = [16, 16, 16], strides = [1, 1, 1]} : vector<18x32x16xf32> to vector<16x16x16xf32>
    %146 = vector.shape_cast %145 : vector<16x16x16xf32> to vector<256x16xf32>
    %147 = arith.truncf %146 : vector<256x16xf32> to vector<256x16xbf16>
    %148 = vector.extract_strided_slice %88 {offsets = [2, 1, 0, 0], sizes = [1, 1, 16, 16], strides = [1, 1, 1, 1]} : vector<3x3x16x16xf32> to vector<1x1x16x16xf32>
    %149 = vector.shape_cast %148 : vector<1x1x16x16xf32> to vector<16x16xf32>
    %150 = arith.truncf %149 : vector<16x16xf32> to vector<16x16xbf16>
    %cst_35 = arith.constant dense<0.000000e+00> : vector<256x16xf32>
    %151 = tpu.matmul %147, %150, %cst_35 {dimension_numbers = #tpu.dot_dimension_numbers<[1], [0], [0], [1], [0, 0, 1, 1], [], []>} : vector<256x16xbf16>, vector<16x16xbf16>, vector<256x16xf32> -> vector<256x16xf32>
    %152 = arith.addf %144, %151 : vector<256x16xf32>
    %153 = vector.extract_strided_slice %87 {offsets = [2, 9, 0], sizes = [16, 16, 16], strides = [1, 1, 1]} : vector<18x32x16xf32> to vector<16x16x16xf32>
    %154 = vector.shape_cast %153 : vector<16x16x16xf32> to vector<256x16xf32>
    %155 = arith.truncf %154 : vector<256x16xf32> to vector<256x16xbf16>
    %156 = vector.extract_strided_slice %88 {offsets = [2, 2, 0, 0], sizes = [1, 1, 16, 16], strides = [1, 1, 1, 1]} : vector<3x3x16x16xf32> to vector<1x1x16x16xf32>
    %157 = vector.shape_cast %156 : vector<1x1x16x16xf32> to vector<16x16xf32>
    %158 = arith.truncf %157 : vector<16x16xf32> to vector<16x16xbf16>
    %cst_36 = arith.constant dense<0.000000e+00> : vector<256x16xf32>
    %159 = tpu.matmul %155, %158, %cst_36 {dimension_numbers = #tpu.dot_dimension_numbers<[1], [0], [0], [1], [0, 0, 1, 1], [], []>} : vector<256x16xbf16>, vector<16x16xbf16>, vector<256x16xf32> -> vector<256x16xf32>
    %160 = arith.addf %152, %159 : vector<256x16xf32>
    %161 = vector.broadcast %89 : vector<1x16xf32> to vector<256x16xf32>
    %162 = arith.addf %160, %161 : vector<256x16xf32>
    %cst_37 = arith.constant 0.000000e+00 : f32
    %163 = vector.broadcast %cst_37 : f32 to vector<256x16xf32>
    %164 = arith.maximumf %162, %163 : vector<256x16xf32>
    %cst_38 = arith.constant dense<0.000000e+00> : vector<16xf32>
    %165 = vector.multi_reduction <add>, %164, %cst_38 [0] : vector<256x16xf32> to vector<16xf32>
    %cst_39 = arith.constant 3.906250e-03 : f32
    %166 = vector.broadcast %cst_39 : f32 to vector<16xf32>
    %167 = arith.mulf %165, %166 : vector<16xf32>
    %168 = vector.shape_cast %167 : vector<16xf32> to vector<1x16xf32>
    %169 = arith.truncf %168 : vector<1x16xf32> to vector<1x16xbf16>
    %c0_40 = arith.constant 0 : index
    %c0_41 = arith.constant 0 : index
    %170 = vector.load %arg9[%c0_40, %c0_41] : memref<16x128xf32, #tpu.memory_space<vmem>>, vector<16x128xf32>
    %171 = arith.truncf %170 : vector<16x128xf32> to vector<16x128xbf16>
    %cst_42 = arith.constant dense<0.000000e+00> : vector<1x128xf32>
    %172 = tpu.matmul %169, %171, %cst_42 {dimension_numbers = #tpu.dot_dimension_numbers<[1], [0], [0], [1], [0, 0, 1, 1], [], []>} : vector<1x16xbf16>, vector<16x128xbf16>, vector<1x128xf32> -> vector<1x128xf32>
    %c0_43 = arith.constant 0 : index
    %c0_44 = arith.constant 0 : index
    %173 = vector.load %arg10[%c0_43, %c0_44] : memref<1x128xf32, #tpu.memory_space<vmem>>, vector<1x128xf32>
    %174 = arith.addf %172, %173 : vector<1x128xf32>
    %175 = vector.extract_strided_slice %174 {offsets = [0, 0], sizes = [1, 32], strides = [1, 1]} : vector<1x128xf32> to vector<1x32xf32>
    %c0_45 = arith.constant 0 : index
    %c0_46 = arith.constant 0 : index
    %c0_47 = arith.constant 0 : index
    %c0_48 = arith.constant 0 : index
    %176 = vector.load %arg2[%c0_45, %c0_46, %c0_47, %c0_48] : memref<1x16x16x2xf32, #tpu.memory_space<vmem>>, vector<1x16x16x2xf32>
    %177 = vector.shape_cast %176 : vector<1x16x16x2xf32> to vector<16x16x2xf32>
    %cst_49 = arith.constant 0.000000e+00 : f32
    %178 = vector.broadcast %cst_49 : f32 to vector<1x16x2xf32>
    %179 = tpu.concatenate %178, %177, %178 in 0 : vector<1x16x2xf32>, vector<16x16x2xf32>, vector<1x16x2xf32> -> vector<18x16x2xf32>
    %cst_50 = arith.constant 0.000000e+00 : f32
    %180 = vector.broadcast %cst_50 : f32 to vector<18x8x2xf32>
    %181 = tpu.concatenate %180, %179, %180 in 1 : vector<18x8x2xf32>, vector<18x16x2xf32>, vector<18x8x2xf32> -> vector<18x32x2xf32>
    %c0_51 = arith.constant 0 : index
    %c0_52 = arith.constant 0 : index
    %c0_53 = arith.constant 0 : index
    %c0_54 = arith.constant 0 : index
    %182 = vector.load %arg11[%c0_51, %c0_52, %c0_53, %c0_54] : memref<3x3x2x16xf32, #tpu.memory_space<vmem>>, vector<3x3x2x16xf32>
    %c0_55 = arith.constant 0 : index
    %c0_56 = arith.constant 0 : index
    %183 = vector.load %arg12[%c0_55, %c0_56] : memref<1x16xf32, #tpu.memory_space<vmem>>, vector<1x16xf32>
    %184 = vector.extract_strided_slice %181 {offsets = [0, 7, 0], sizes = [16, 16, 2], strides = [1, 1, 1]} : vector<18x32x2xf32> to vector<16x16x2xf32>
    %185 = vector.shape_cast %184 : vector<16x16x2xf32> to vector<256x2xf32>
    %186 = arith.truncf %185 : vector<256x2xf32> to vector<256x2xbf16>
    %187 = vector.extract_strided_slice %182 {offsets = [0, 0, 0, 0], sizes = [1, 1, 2, 16], strides = [1, 1, 1, 1]} : vector<3x3x2x16xf32> to vector<1x1x2x16xf32>
    %188 = vector.shape_cast %187 : vector<1x1x2x16xf32> to vector<2x16xf32>
    %189 = arith.truncf %188 : vector<2x16xf32> to vector<2x16xbf16>
    %cst_57 = arith.constant dense<0.000000e+00> : vector<256x16xf32>
    %190 = tpu.matmul %186, %189, %cst_57 {dimension_numbers = #tpu.dot_dimension_numbers<[1], [0], [0], [1], [0, 0, 1, 1], [], []>} : vector<256x2xbf16>, vector<2x16xbf16>, vector<256x16xf32> -> vector<256x16xf32>
    %191 = vector.extract_strided_slice %181 {offsets = [0, 8, 0], sizes = [16, 16, 2], strides = [1, 1, 1]} : vector<18x32x2xf32> to vector<16x16x2xf32>
    %192 = vector.shape_cast %191 : vector<16x16x2xf32> to vector<256x2xf32>
    %193 = arith.truncf %192 : vector<256x2xf32> to vector<256x2xbf16>
    %194 = vector.extract_strided_slice %182 {offsets = [0, 1, 0, 0], sizes = [1, 1, 2, 16], strides = [1, 1, 1, 1]} : vector<3x3x2x16xf32> to vector<1x1x2x16xf32>
    %195 = vector.shape_cast %194 : vector<1x1x2x16xf32> to vector<2x16xf32>
    %196 = arith.truncf %195 : vector<2x16xf32> to vector<2x16xbf16>
    %cst_58 = arith.constant dense<0.000000e+00> : vector<256x16xf32>
    %197 = tpu.matmul %193, %196, %cst_58 {dimension_numbers = #tpu.dot_dimension_numbers<[1], [0], [0], [1], [0, 0, 1, 1], [], []>} : vector<256x2xbf16>, vector<2x16xbf16>, vector<256x16xf32> -> vector<256x16xf32>
    %198 = arith.addf %190, %197 : vector<256x16xf32>
    %199 = vector.extract_strided_slice %181 {offsets = [0, 9, 0], sizes = [16, 16, 2], strides = [1, 1, 1]} : vector<18x32x2xf32> to vector<16x16x2xf32>
    %200 = vector.shape_cast %199 : vector<16x16x2xf32> to vector<256x2xf32>
    %201 = arith.truncf %200 : vector<256x2xf32> to vector<256x2xbf16>
    %202 = vector.extract_strided_slice %182 {offsets = [0, 2, 0, 0], sizes = [1, 1, 2, 16], strides = [1, 1, 1, 1]} : vector<3x3x2x16xf32> to vector<1x1x2x16xf32>
    %203 = vector.shape_cast %202 : vector<1x1x2x16xf32> to vector<2x16xf32>
    %204 = arith.truncf %203 : vector<2x16xf32> to vector<2x16xbf16>
    %cst_59 = arith.constant dense<0.000000e+00> : vector<256x16xf32>
    %205 = tpu.matmul %201, %204, %cst_59 {dimension_numbers = #tpu.dot_dimension_numbers<[1], [0], [0], [1], [0, 0, 1, 1], [], []>} : vector<256x2xbf16>, vector<2x16xbf16>, vector<256x16xf32> -> vector<256x16xf32>
    %206 = arith.addf %198, %205 : vector<256x16xf32>
    %207 = vector.extract_strided_slice %181 {offsets = [1, 7, 0], sizes = [16, 16, 2], strides = [1, 1, 1]} : vector<18x32x2xf32> to vector<16x16x2xf32>
    %208 = vector.shape_cast %207 : vector<16x16x2xf32> to vector<256x2xf32>
    %209 = arith.truncf %208 : vector<256x2xf32> to vector<256x2xbf16>
    %210 = vector.extract_strided_slice %182 {offsets = [1, 0, 0, 0], sizes = [1, 1, 2, 16], strides = [1, 1, 1, 1]} : vector<3x3x2x16xf32> to vector<1x1x2x16xf32>
    %211 = vector.shape_cast %210 : vector<1x1x2x16xf32> to vector<2x16xf32>
    %212 = arith.truncf %211 : vector<2x16xf32> to vector<2x16xbf16>
    %cst_60 = arith.constant dense<0.000000e+00> : vector<256x16xf32>
    %213 = tpu.matmul %209, %212, %cst_60 {dimension_numbers = #tpu.dot_dimension_numbers<[1], [0], [0], [1], [0, 0, 1, 1], [], []>} : vector<256x2xbf16>, vector<2x16xbf16>, vector<256x16xf32> -> vector<256x16xf32>
    %214 = arith.addf %206, %213 : vector<256x16xf32>
    %215 = vector.extract_strided_slice %181 {offsets = [1, 8, 0], sizes = [16, 16, 2], strides = [1, 1, 1]} : vector<18x32x2xf32> to vector<16x16x2xf32>
    %216 = vector.shape_cast %215 : vector<16x16x2xf32> to vector<256x2xf32>
    %217 = arith.truncf %216 : vector<256x2xf32> to vector<256x2xbf16>
    %218 = vector.extract_strided_slice %182 {offsets = [1, 1, 0, 0], sizes = [1, 1, 2, 16], strides = [1, 1, 1, 1]} : vector<3x3x2x16xf32> to vector<1x1x2x16xf32>
    %219 = vector.shape_cast %218 : vector<1x1x2x16xf32> to vector<2x16xf32>
    %220 = arith.truncf %219 : vector<2x16xf32> to vector<2x16xbf16>
    %cst_61 = arith.constant dense<0.000000e+00> : vector<256x16xf32>
    %221 = tpu.matmul %217, %220, %cst_61 {dimension_numbers = #tpu.dot_dimension_numbers<[1], [0], [0], [1], [0, 0, 1, 1], [], []>} : vector<256x2xbf16>, vector<2x16xbf16>, vector<256x16xf32> -> vector<256x16xf32>
    %222 = arith.addf %214, %221 : vector<256x16xf32>
    %223 = vector.extract_strided_slice %181 {offsets = [1, 9, 0], sizes = [16, 16, 2], strides = [1, 1, 1]} : vector<18x32x2xf32> to vector<16x16x2xf32>
    %224 = vector.shape_cast %223 : vector<16x16x2xf32> to vector<256x2xf32>
    %225 = arith.truncf %224 : vector<256x2xf32> to vector<256x2xbf16>
    %226 = vector.extract_strided_slice %182 {offsets = [1, 2, 0, 0], sizes = [1, 1, 2, 16], strides = [1, 1, 1, 1]} : vector<3x3x2x16xf32> to vector<1x1x2x16xf32>
    %227 = vector.shape_cast %226 : vector<1x1x2x16xf32> to vector<2x16xf32>
    %228 = arith.truncf %227 : vector<2x16xf32> to vector<2x16xbf16>
    %cst_62 = arith.constant dense<0.000000e+00> : vector<256x16xf32>
    %229 = tpu.matmul %225, %228, %cst_62 {dimension_numbers = #tpu.dot_dimension_numbers<[1], [0], [0], [1], [0, 0, 1, 1], [], []>} : vector<256x2xbf16>, vector<2x16xbf16>, vector<256x16xf32> -> vector<256x16xf32>
    %230 = arith.addf %222, %229 : vector<256x16xf32>
    %231 = vector.extract_strided_slice %181 {offsets = [2, 7, 0], sizes = [16, 16, 2], strides = [1, 1, 1]} : vector<18x32x2xf32> to vector<16x16x2xf32>
    %232 = vector.shape_cast %231 : vector<16x16x2xf32> to vector<256x2xf32>
    %233 = arith.truncf %232 : vector<256x2xf32> to vector<256x2xbf16>
    %234 = vector.extract_strided_slice %182 {offsets = [2, 0, 0, 0], sizes = [1, 1, 2, 16], strides = [1, 1, 1, 1]} : vector<3x3x2x16xf32> to vector<1x1x2x16xf32>
    %235 = vector.shape_cast %234 : vector<1x1x2x16xf32> to vector<2x16xf32>
    %236 = arith.truncf %235 : vector<2x16xf32> to vector<2x16xbf16>
    %cst_63 = arith.constant dense<0.000000e+00> : vector<256x16xf32>
    %237 = tpu.matmul %233, %236, %cst_63 {dimension_numbers = #tpu.dot_dimension_numbers<[1], [0], [0], [1], [0, 0, 1, 1], [], []>} : vector<256x2xbf16>, vector<2x16xbf16>, vector<256x16xf32> -> vector<256x16xf32>
    %238 = arith.addf %230, %237 : vector<256x16xf32>
    %239 = vector.extract_strided_slice %181 {offsets = [2, 8, 0], sizes = [16, 16, 2], strides = [1, 1, 1]} : vector<18x32x2xf32> to vector<16x16x2xf32>
    %240 = vector.shape_cast %239 : vector<16x16x2xf32> to vector<256x2xf32>
    %241 = arith.truncf %240 : vector<256x2xf32> to vector<256x2xbf16>
    %242 = vector.extract_strided_slice %182 {offsets = [2, 1, 0, 0], sizes = [1, 1, 2, 16], strides = [1, 1, 1, 1]} : vector<3x3x2x16xf32> to vector<1x1x2x16xf32>
    %243 = vector.shape_cast %242 : vector<1x1x2x16xf32> to vector<2x16xf32>
    %244 = arith.truncf %243 : vector<2x16xf32> to vector<2x16xbf16>
    %cst_64 = arith.constant dense<0.000000e+00> : vector<256x16xf32>
    %245 = tpu.matmul %241, %244, %cst_64 {dimension_numbers = #tpu.dot_dimension_numbers<[1], [0], [0], [1], [0, 0, 1, 1], [], []>} : vector<256x2xbf16>, vector<2x16xbf16>, vector<256x16xf32> -> vector<256x16xf32>
    %246 = arith.addf %238, %245 : vector<256x16xf32>
    %247 = vector.extract_strided_slice %181 {offsets = [2, 9, 0], sizes = [16, 16, 2], strides = [1, 1, 1]} : vector<18x32x2xf32> to vector<16x16x2xf32>
    %248 = vector.shape_cast %247 : vector<16x16x2xf32> to vector<256x2xf32>
    %249 = arith.truncf %248 : vector<256x2xf32> to vector<256x2xbf16>
    %250 = vector.extract_strided_slice %182 {offsets = [2, 2, 0, 0], sizes = [1, 1, 2, 16], strides = [1, 1, 1, 1]} : vector<3x3x2x16xf32> to vector<1x1x2x16xf32>
    %251 = vector.shape_cast %250 : vector<1x1x2x16xf32> to vector<2x16xf32>
    %252 = arith.truncf %251 : vector<2x16xf32> to vector<2x16xbf16>
    %cst_65 = arith.constant dense<0.000000e+00> : vector<256x16xf32>
    %253 = tpu.matmul %249, %252, %cst_65 {dimension_numbers = #tpu.dot_dimension_numbers<[1], [0], [0], [1], [0, 0, 1, 1], [], []>} : vector<256x2xbf16>, vector<2x16xbf16>, vector<256x16xf32> -> vector<256x16xf32>
    %254 = arith.addf %246, %253 : vector<256x16xf32>
    %255 = vector.broadcast %183 : vector<1x16xf32> to vector<256x16xf32>
    %256 = arith.addf %254, %255 : vector<256x16xf32>
    %cst_66 = arith.constant 0.000000e+00 : f32
    %257 = vector.broadcast %cst_66 : f32 to vector<256x16xf32>
    %258 = arith.maximumf %256, %257 : vector<256x16xf32>
    %c0_67 = arith.constant 0 : index
    %c0_68 = arith.constant 0 : index
    %259 = vector.load %arg13[%c0_67, %c0_68] : memref<256x16xf32, #tpu.memory_space<vmem>>, vector<256x16xf32>
    %260 = arith.addf %258, %259 : vector<256x16xf32>
    %261 = arith.truncf %175 : vector<1x32xf32> to vector<1x32xbf16>
    %c0_69 = arith.constant 0 : index
    %c0_70 = arith.constant 0 : index
    %262 = vector.load %arg14[%c0_69, %c0_70] : memref<32x16xf32, #tpu.memory_space<vmem>>, vector<32x16xf32>
    %263 = arith.truncf %262 : vector<32x16xf32> to vector<32x16xbf16>
    %cst_71 = arith.constant dense<0.000000e+00> : vector<1x16xf32>
    %264 = tpu.matmul %261, %263, %cst_71 {dimension_numbers = #tpu.dot_dimension_numbers<[1], [0], [0], [1], [0, 0, 1, 1], [], []>} : vector<1x32xbf16>, vector<32x16xbf16>, vector<1x16xf32> -> vector<1x16xf32>
    %c0_72 = arith.constant 0 : index
    %c0_73 = arith.constant 0 : index
    %265 = vector.load %arg15[%c0_72, %c0_73] : memref<1x16xf32, #tpu.memory_space<vmem>>, vector<1x16xf32>
    %266 = arith.addf %264, %265 : vector<1x16xf32>
    %c0_74 = arith.constant 0 : index
    %c0_75 = arith.constant 0 : index
    %c0_76 = arith.constant 0 : index
    %c0_77 = arith.constant 0 : index
    %267 = vector.load %arg16[%c0_74, %c0_75, %c0_76, %c0_77] : memref<3x3x16x16xf32, #tpu.memory_space<vmem>>, vector<3x3x16x16xf32>
    %268 = vector.shape_cast %266 : vector<1x16xf32> to vector<16xf32>
    %269 = vector.shape_cast %268 : vector<16xf32> to vector<1x1x16x1xf32>
    %270 = vector.broadcast %269 : vector<1x1x16x1xf32> to vector<3x3x16x16xf32>
    %271 = arith.mulf %267, %270 : vector<3x3x16x16xf32>
    %272 = arith.mulf %271, %271 : vector<3x3x16x16xf32>
    %cst_78 = arith.constant dense<0.000000e+00> : vector<16xf32>
    %273 = vector.multi_reduction <add>, %272, %cst_78 [0, 1, 2] : vector<3x3x16x16xf32> to vector<16xf32>
    %cst_79 = arith.constant 9.99999993E-9 : f32
    %274 = vector.broadcast %cst_79 : f32 to vector<16xf32>
    %275 = arith.addf %273, %274 : vector<16xf32>
    %276 = math.rsqrt %275 : vector<16xf32>
    %277 = vector.shape_cast %276 : vector<16xf32> to vector<1x1x1x16xf32>
    %278 = vector.broadcast %277 : vector<1x1x1x16xf32> to vector<3x3x16x16xf32>
    %279 = arith.mulf %271, %278 : vector<3x3x16x16xf32>
    %280 = vector.shape_cast %260 : vector<256x16xf32> to vector<16x16x16xf32>
    %cst_80 = arith.constant 0.000000e+00 : f32
    %281 = vector.broadcast %cst_80 : f32 to vector<1x16x16xf32>
    %282 = tpu.concatenate %281, %280, %281 in 0 : vector<1x16x16xf32>, vector<16x16x16xf32>, vector<1x16x16xf32> -> vector<18x16x16xf32>
    %cst_81 = arith.constant 0.000000e+00 : f32
    %283 = vector.broadcast %cst_81 : f32 to vector<18x8x16xf32>
    %284 = tpu.concatenate %283, %282, %283 in 1 : vector<18x8x16xf32>, vector<18x16x16xf32>, vector<18x8x16xf32> -> vector<18x32x16xf32>
    %285 = vector.extract_strided_slice %284 {offsets = [0, 7, 0], sizes = [16, 16, 16], strides = [1, 1, 1]} : vector<18x32x16xf32> to vector<16x16x16xf32>
    %286 = vector.shape_cast %285 : vector<16x16x16xf32> to vector<256x16xf32>
    %287 = arith.truncf %286 : vector<256x16xf32> to vector<256x16xbf16>
    %288 = vector.extract_strided_slice %279 {offsets = [0, 0, 0, 0], sizes = [1, 1, 16, 16], strides = [1, 1, 1, 1]} : vector<3x3x16x16xf32> to vector<1x1x16x16xf32>
    %289 = vector.shape_cast %288 : vector<1x1x16x16xf32> to vector<16x16xf32>
    %290 = arith.truncf %289 : vector<16x16xf32> to vector<16x16xbf16>
    %cst_82 = arith.constant dense<0.000000e+00> : vector<256x16xf32>
    %291 = tpu.matmul %287, %290, %cst_82 {dimension_numbers = #tpu.dot_dimension_numbers<[1], [0], [0], [1], [0, 0, 1, 1], [], []>} : vector<256x16xbf16>, vector<16x16xbf16>, vector<256x16xf32> -> vector<256x16xf32>
    %292 = vector.extract_strided_slice %284 {offsets = [0, 8, 0], sizes = [16, 16, 16], strides = [1, 1, 1]} : vector<18x32x16xf32> to vector<16x16x16xf32>
    %293 = vector.shape_cast %292 : vector<16x16x16xf32> to vector<256x16xf32>
    %294 = arith.truncf %293 : vector<256x16xf32> to vector<256x16xbf16>
    %295 = vector.extract_strided_slice %279 {offsets = [0, 1, 0, 0], sizes = [1, 1, 16, 16], strides = [1, 1, 1, 1]} : vector<3x3x16x16xf32> to vector<1x1x16x16xf32>
    %296 = vector.shape_cast %295 : vector<1x1x16x16xf32> to vector<16x16xf32>
    %297 = arith.truncf %296 : vector<16x16xf32> to vector<16x16xbf16>
    %cst_83 = arith.constant dense<0.000000e+00> : vector<256x16xf32>
    %298 = tpu.matmul %294, %297, %cst_83 {dimension_numbers = #tpu.dot_dimension_numbers<[1], [0], [0], [1], [0, 0, 1, 1], [], []>} : vector<256x16xbf16>, vector<16x16xbf16>, vector<256x16xf32> -> vector<256x16xf32>
    %299 = arith.addf %291, %298 : vector<256x16xf32>
    %300 = vector.extract_strided_slice %284 {offsets = [0, 9, 0], sizes = [16, 16, 16], strides = [1, 1, 1]} : vector<18x32x16xf32> to vector<16x16x16xf32>
    %301 = vector.shape_cast %300 : vector<16x16x16xf32> to vector<256x16xf32>
    %302 = arith.truncf %301 : vector<256x16xf32> to vector<256x16xbf16>
    %303 = vector.extract_strided_slice %279 {offsets = [0, 2, 0, 0], sizes = [1, 1, 16, 16], strides = [1, 1, 1, 1]} : vector<3x3x16x16xf32> to vector<1x1x16x16xf32>
    %304 = vector.shape_cast %303 : vector<1x1x16x16xf32> to vector<16x16xf32>
    %305 = arith.truncf %304 : vector<16x16xf32> to vector<16x16xbf16>
    %cst_84 = arith.constant dense<0.000000e+00> : vector<256x16xf32>
    %306 = tpu.matmul %302, %305, %cst_84 {dimension_numbers = #tpu.dot_dimension_numbers<[1], [0], [0], [1], [0, 0, 1, 1], [], []>} : vector<256x16xbf16>, vector<16x16xbf16>, vector<256x16xf32> -> vector<256x16xf32>
    %307 = arith.addf %299, %306 : vector<256x16xf32>
    %308 = vector.extract_strided_slice %284 {offsets = [1, 7, 0], sizes = [16, 16, 16], strides = [1, 1, 1]} : vector<18x32x16xf32> to vector<16x16x16xf32>
    %309 = vector.shape_cast %308 : vector<16x16x16xf32> to vector<256x16xf32>
    %310 = arith.truncf %309 : vector<256x16xf32> to vector<256x16xbf16>
    %311 = vector.extract_strided_slice %279 {offsets = [1, 0, 0, 0], sizes = [1, 1, 16, 16], strides = [1, 1, 1, 1]} : vector<3x3x16x16xf32> to vector<1x1x16x16xf32>
    %312 = vector.shape_cast %311 : vector<1x1x16x16xf32> to vector<16x16xf32>
    %313 = arith.truncf %312 : vector<16x16xf32> to vector<16x16xbf16>
    %cst_85 = arith.constant dense<0.000000e+00> : vector<256x16xf32>
    %314 = tpu.matmul %310, %313, %cst_85 {dimension_numbers = #tpu.dot_dimension_numbers<[1], [0], [0], [1], [0, 0, 1, 1], [], []>} : vector<256x16xbf16>, vector<16x16xbf16>, vector<256x16xf32> -> vector<256x16xf32>
    %315 = arith.addf %307, %314 : vector<256x16xf32>
    %316 = vector.extract_strided_slice %284 {offsets = [1, 8, 0], sizes = [16, 16, 16], strides = [1, 1, 1]} : vector<18x32x16xf32> to vector<16x16x16xf32>
    %317 = vector.shape_cast %316 : vector<16x16x16xf32> to vector<256x16xf32>
    %318 = arith.truncf %317 : vector<256x16xf32> to vector<256x16xbf16>
    %319 = vector.extract_strided_slice %279 {offsets = [1, 1, 0, 0], sizes = [1, 1, 16, 16], strides = [1, 1, 1, 1]} : vector<3x3x16x16xf32> to vector<1x1x16x16xf32>
    %320 = vector.shape_cast %319 : vector<1x1x16x16xf32> to vector<16x16xf32>
    %321 = arith.truncf %320 : vector<16x16xf32> to vector<16x16xbf16>
    %cst_86 = arith.constant dense<0.000000e+00> : vector<256x16xf32>
    %322 = tpu.matmul %318, %321, %cst_86 {dimension_numbers = #tpu.dot_dimension_numbers<[1], [0], [0], [1], [0, 0, 1, 1], [], []>} : vector<256x16xbf16>, vector<16x16xbf16>, vector<256x16xf32> -> vector<256x16xf32>
    %323 = arith.addf %315, %322 : vector<256x16xf32>
    %324 = vector.extract_strided_slice %284 {offsets = [1, 9, 0], sizes = [16, 16, 16], strides = [1, 1, 1]} : vector<18x32x16xf32> to vector<16x16x16xf32>
    %325 = vector.shape_cast %324 : vector<16x16x16xf32> to vector<256x16xf32>
    %326 = arith.truncf %325 : vector<256x16xf32> to vector<256x16xbf16>
    %327 = vector.extract_strided_slice %279 {offsets = [1, 2, 0, 0], sizes = [1, 1, 16, 16], strides = [1, 1, 1, 1]} : vector<3x3x16x16xf32> to vector<1x1x16x16xf32>
    %328 = vector.shape_cast %327 : vector<1x1x16x16xf32> to vector<16x16xf32>
    %329 = arith.truncf %328 : vector<16x16xf32> to vector<16x16xbf16>
    %cst_87 = arith.constant dense<0.000000e+00> : vector<256x16xf32>
    %330 = tpu.matmul %326, %329, %cst_87 {dimension_numbers = #tpu.dot_dimension_numbers<[1], [0], [0], [1], [0, 0, 1, 1], [], []>} : vector<256x16xbf16>, vector<16x16xbf16>, vector<256x16xf32> -> vector<256x16xf32>
    %331 = arith.addf %323, %330 : vector<256x16xf32>
    %332 = vector.extract_strided_slice %284 {offsets = [2, 7, 0], sizes = [16, 16, 16], strides = [1, 1, 1]} : vector<18x32x16xf32> to vector<16x16x16xf32>
    %333 = vector.shape_cast %332 : vector<16x16x16xf32> to vector<256x16xf32>
    %334 = arith.truncf %333 : vector<256x16xf32> to vector<256x16xbf16>
    %335 = vector.extract_strided_slice %279 {offsets = [2, 0, 0, 0], sizes = [1, 1, 16, 16], strides = [1, 1, 1, 1]} : vector<3x3x16x16xf32> to vector<1x1x16x16xf32>
    %336 = vector.shape_cast %335 : vector<1x1x16x16xf32> to vector<16x16xf32>
    %337 = arith.truncf %336 : vector<16x16xf32> to vector<16x16xbf16>
    %cst_88 = arith.constant dense<0.000000e+00> : vector<256x16xf32>
    %338 = tpu.matmul %334, %337, %cst_88 {dimension_numbers = #tpu.dot_dimension_numbers<[1], [0], [0], [1], [0, 0, 1, 1], [], []>} : vector<256x16xbf16>, vector<16x16xbf16>, vector<256x16xf32> -> vector<256x16xf32>
    %339 = arith.addf %331, %338 : vector<256x16xf32>
    %340 = vector.extract_strided_slice %284 {offsets = [2, 8, 0], sizes = [16, 16, 16], strides = [1, 1, 1]} : vector<18x32x16xf32> to vector<16x16x16xf32>
    %341 = vector.shape_cast %340 : vector<16x16x16xf32> to vector<256x16xf32>
    %342 = arith.truncf %341 : vector<256x16xf32> to vector<256x16xbf16>
    %343 = vector.extract_strided_slice %279 {offsets = [2, 1, 0, 0], sizes = [1, 1, 16, 16], strides = [1, 1, 1, 1]} : vector<3x3x16x16xf32> to vector<1x1x16x16xf32>
    %344 = vector.shape_cast %343 : vector<1x1x16x16xf32> to vector<16x16xf32>
    %345 = arith.truncf %344 : vector<16x16xf32> to vector<16x16xbf16>
    %cst_89 = arith.constant dense<0.000000e+00> : vector<256x16xf32>
    %346 = tpu.matmul %342, %345, %cst_89 {dimension_numbers = #tpu.dot_dimension_numbers<[1], [0], [0], [1], [0, 0, 1, 1], [], []>} : vector<256x16xbf16>, vector<16x16xbf16>, vector<256x16xf32> -> vector<256x16xf32>
    %347 = arith.addf %339, %346 : vector<256x16xf32>
    %348 = vector.extract_strided_slice %284 {offsets = [2, 9, 0], sizes = [16, 16, 16], strides = [1, 1, 1]} : vector<18x32x16xf32> to vector<16x16x16xf32>
    %349 = vector.shape_cast %348 : vector<16x16x16xf32> to vector<256x16xf32>
    %350 = arith.truncf %349 : vector<256x16xf32> to vector<256x16xbf16>
    %351 = vector.extract_strided_slice %279 {offsets = [2, 2, 0, 0], sizes = [1, 1, 16, 16], strides = [1, 1, 1, 1]} : vector<3x3x16x16xf32> to vector<1x1x16x16xf32>
    %352 = vector.shape_cast %351 : vector<1x1x16x16xf32> to vector<16x16xf32>
    %353 = arith.truncf %352 : vector<16x16xf32> to vector<16x16xbf16>
    %cst_90 = arith.constant dense<0.000000e+00> : vector<256x16xf32>
    %354 = tpu.matmul %350, %353, %cst_90 {dimension_numbers = #tpu.dot_dimension_numbers<[1], [0], [0], [1], [0, 0, 1, 1], [], []>} : vector<256x16xbf16>, vector<16x16xbf16>, vector<256x16xf32> -> vector<256x16xf32>
    %355 = arith.addf %347, %354 : vector<256x16xf32>
    %cst_91 = arith.constant 0.000000e+00 : f32
    %356 = vector.broadcast %cst_91 : f32 to vector<256x16xf32>
    %357 = arith.maximumf %355, %356 : vector<256x16xf32>
    %c0_92 = arith.constant 0 : index
    %c0_93 = arith.constant 0 : index
    %358 = vector.load %arg17[%c0_92, %c0_93] : memref<3x16xf32, #tpu.memory_space<vmem>>, vector<3x16xf32>
    %359 = arith.truncf %358 : vector<3x16xf32> to vector<3x16xbf16>
    %360 = arith.truncf %357 : vector<256x16xf32> to vector<256x16xbf16>
    %cst_94 = arith.constant dense<0.000000e+00> : vector<3x256xf32>
    %361 = tpu.matmul %359, %360, %cst_94 {dimension_numbers = #tpu.dot_dimension_numbers<[1], [1], [0], [0], [0, 0, 1, 0], [], []>} : vector<3x16xbf16>, vector<256x16xbf16>, vector<3x256xf32> -> vector<3x256xf32>
    %c0_95 = arith.constant 0 : index
    %c0_96 = arith.constant 0 : index
    %362 = vector.load %arg18[%c0_95, %c0_96] : memref<3x1xf32, #tpu.memory_space<vmem>>, vector<3x1xf32>
    %363 = vector.broadcast %362 : vector<3x1xf32> to vector<3x256xf32>
    %364 = arith.addf %361, %363 : vector<3x256xf32>
    %c0_97 = arith.constant 0 : index
    %c0_98 = arith.constant 0 : index
    %c0_99 = arith.constant 0 : index
    %365 = vector.load %arg4[%c0_97, %c0_98, %c0_99] : memref<1x1x256xf32, #tpu.memory_space<vmem>>, vector<1x1x256xf32>
    %366 = vector.shape_cast %365 : vector<1x1x256xf32> to vector<1x256xf32>
    %367 = vector.broadcast %366 : vector<1x256xf32> to vector<3x256xf32>
    %368 = arith.mulf %364, %367 : vector<3x256xf32>
    %c0_100 = arith.constant 0 : index
    %c0_101 = arith.constant 0 : index
    %c0_102 = arith.constant 0 : index
    %369 = vector.load %arg3[%c0_100, %c0_101, %c0_102] : memref<1x3x256xf32, #tpu.memory_space<vmem>>, vector<1x3x256xf32>
    %370 = vector.shape_cast %369 : vector<1x3x256xf32> to vector<3x256xf32>
    %cst_103 = arith.constant 1.000000e+00 : f32
    %371 = vector.broadcast %cst_103 : f32 to vector<1x256xf32>
    %372 = arith.subf %371, %366 : vector<1x256xf32>
    %373 = vector.broadcast %372 : vector<1x256xf32> to vector<3x256xf32>
    %374 = arith.mulf %370, %373 : vector<3x256xf32>
    %375 = arith.addf %368, %374 : vector<3x256xf32>
    %376 = vector.shape_cast %375 : vector<3x256xf32> to vector<1x3x256xf32>
    %c0_104 = arith.constant 0 : index
    %c0_105 = arith.constant 0 : index
    %c0_106 = arith.constant 0 : index
    %377 = vector.load %arg19[%c0_104, %c0_105, %c0_106] : memref<1x3x256xf32, #tpu.memory_space<vmem>>, vector<1x3x256xf32>
    tpu.vector_store %arg19[%c0_104, %c0_105, %c0_106], %376 {strides = array<i32>} : memref<1x3x256xf32, #tpu.memory_space<vmem>>, vector<1x3x256xf32>,
    return
  }
  func.func @transform_0(%arg0: i32) -> (i32, i32, i32, i32) {
    %c0_i32 = arith.constant 0 : i32
    %c0_i32_0 = arith.constant 0 : i32
    %c0_i32_1 = arith.constant 0 : i32
    %c0_i32_2 = arith.constant 0 : i32
    return %arg0, %c0_i32, %c0_i32_0, %c0_i32_1 : i32, i32, i32, i32
  }
  func.func @transform_1(%arg0: i32) -> (i32, i32, i32, i32) {
    %c0_i32 = arith.constant 0 : i32
    %c0_i32_0 = arith.constant 0 : i32
    %c0_i32_1 = arith.constant 0 : i32
    %c0_i32_2 = arith.constant 0 : i32
    return %arg0, %c0_i32, %c0_i32_0, %c0_i32_1 : i32, i32, i32, i32
  }
  func.func @transform_2(%arg0: i32) -> (i32, i32, i32) {
    %c0_i32 = arith.constant 0 : i32
    %c0_i32_0 = arith.constant 0 : i32
    %c0_i32_1 = arith.constant 0 : i32
    return %arg0, %c0_i32, %c0_i32_0 : i32, i32, i32
  }
  func.func @transform_3(%arg0: i32) -> (i32, i32, i32) {
    %c0_i32 = arith.constant 0 : i32
    %c0_i32_0 = arith.constant 0 : i32
    %c0_i32_1 = arith.constant 0 : i32
    return %arg0, %c0_i32, %c0_i32_0 : i32, i32, i32
  }
  func.func @transform_4(%arg0: i32) -> (i32, i32, i32, i32) {
    %c0_i32 = arith.constant 0 : i32
    %c0_i32_0 = arith.constant 0 : i32
    %c0_i32_1 = arith.constant 0 : i32
    %c0_i32_2 = arith.constant 0 : i32
    %c0_i32_3 = arith.constant 0 : i32
    return %c0_i32, %c0_i32_0, %c0_i32_1, %c0_i32_2 : i32, i32, i32, i32
  }
  func.func @transform_5(%arg0: i32) -> (i32, i32) {
    %c0_i32 = arith.constant 0 : i32
    %c0_i32_0 = arith.constant 0 : i32
    %c0_i32_1 = arith.constant 0 : i32
    return %c0_i32, %c0_i32_0 : i32, i32
  }
  func.func @transform_6(%arg0: i32) -> (i32, i32, i32, i32) {
    %c0_i32 = arith.constant 0 : i32
    %c0_i32_0 = arith.constant 0 : i32
    %c0_i32_1 = arith.constant 0 : i32
    %c0_i32_2 = arith.constant 0 : i32
    %c0_i32_3 = arith.constant 0 : i32
    return %c0_i32, %c0_i32_0, %c0_i32_1, %c0_i32_2 : i32, i32, i32, i32
  }
  func.func @transform_7(%arg0: i32) -> (i32, i32) {
    %c0_i32 = arith.constant 0 : i32
    %c0_i32_0 = arith.constant 0 : i32
    %c0_i32_1 = arith.constant 0 : i32
    return %c0_i32, %c0_i32_0 : i32, i32
  }
  func.func @transform_8(%arg0: i32) -> (i32, i32) {
    %c0_i32 = arith.constant 0 : i32
    %c0_i32_0 = arith.constant 0 : i32
    %c0_i32_1 = arith.constant 0 : i32
    return %c0_i32, %c0_i32_0 : i32, i32
  }
  func.func @transform_9(%arg0: i32) -> (i32, i32) {
    %c0_i32 = arith.constant 0 : i32
    %c0_i32_0 = arith.constant 0 : i32
    %c0_i32_1 = arith.constant 0 : i32
    return %c0_i32, %c0_i32_0 : i32, i32
  }
  func.func @transform_10(%arg0: i32) -> (i32, i32, i32, i32) {
    %c0_i32 = arith.constant 0 : i32
    %c0_i32_0 = arith.constant 0 : i32
    %c0_i32_1 = arith.constant 0 : i32
    %c0_i32_2 = arith.constant 0 : i32
    %c0_i32_3 = arith.constant 0 : i32
    return %c0_i32, %c0_i32_0, %c0_i32_1, %c0_i32_2 : i32, i32, i32, i32
  }
  func.func @transform_11(%arg0: i32) -> (i32, i32) {
    %c0_i32 = arith.constant 0 : i32
    %c0_i32_0 = arith.constant 0 : i32
    %c0_i32_1 = arith.constant 0 : i32
    return %c0_i32, %c0_i32_0 : i32, i32
  }
  func.func @transform_12(%arg0: i32) -> (i32, i32) {
    %c0_i32 = arith.constant 0 : i32
    %c0_i32_0 = arith.constant 0 : i32
    %c0_i32_1 = arith.constant 0 : i32
    return %c0_i32, %c0_i32_0 : i32, i32
  }
  func.func @transform_13(%arg0: i32) -> (i32, i32) {
    %c0_i32 = arith.constant 0 : i32
    %c0_i32_0 = arith.constant 0 : i32
    %c0_i32_1 = arith.constant 0 : i32
    return %c0_i32, %c0_i32_0 : i32, i32
  }
  func.func @transform_14(%arg0: i32) -> (i32, i32) {
    %c0_i32 = arith.constant 0 : i32
    %c0_i32_0 = arith.constant 0 : i32
    %c0_i32_1 = arith.constant 0 : i32
    return %c0_i32, %c0_i32_0 : i32, i32
  }
  func.func @transform_15(%arg0: i32) -> (i32, i32, i32, i32) {
    %c0_i32 = arith.constant 0 : i32
    %c0_i32_0 = arith.constant 0 : i32
    %c0_i32_1 = arith.constant 0 : i32
    %c0_i32_2 = arith.constant 0 : i32
    %c0_i32_3 = arith.constant 0 : i32
    return %c0_i32, %c0_i32_0, %c0_i32_1, %c0_i32_2 : i32, i32, i32, i32
  }
  func.func @transform_16(%arg0: i32) -> (i32, i32) {
    %c0_i32 = arith.constant 0 : i32
    %c0_i32_0 = arith.constant 0 : i32
    %c0_i32_1 = arith.constant 0 : i32
    return %c0_i32, %c0_i32_0 : i32, i32
  }
  func.func @transform_17(%arg0: i32) -> (i32, i32) {
    %c0_i32 = arith.constant 0 : i32
    %c0_i32_0 = arith.constant 0 : i32
    %c0_i32_1 = arith.constant 0 : i32
    return %c0_i32, %c0_i32_0 : i32, i32
  }
  func.func @transform_18(%arg0: i32) -> (i32, i32, i32) {
    %c0_i32 = arith.constant 0 : i32
    %c0_i32_0 = arith.constant 0 : i32
    %c0_i32_1 = arith.constant 0 : i32
    return %arg0, %c0_i32, %c0_i32_0 : i32, i32, i32
  }
}

</mosaic_0001>

<bundles_post_ra>
// kernel: align_model_forward.1
= control target key start
LH: loop header
LB: loop body
LE: loop exit
PB: predicated region body
PF: predicated region fallthrough
CT: control target
= control target key end

     0   :  { %s8126_s27 = smov 0   ;;  %s12309_s0 = inlined_call_operand.vmem [shape: f32[2,16,16,3], index: 0, kind: input, shape index: {}]   ;;  %s12310_s1 = inlined_call_operand.vmem [shape: f32[2,16,16,2], index: 1, kind: input, shape index: {}]   ;;  %s12311_s2 = inlined_call_operand.vmem [shape: f32[2,3,256], index: 2, kind: input, shape index: {}]   ;;  %s12312_s3 = inlined_call_operand.vmem [shape: f32[2,1,256], index: 3, kind: input, shape index: {}]   ;;  %s12313_s4 = inlined_call_operand.vmem [shape: f32[3,3,3,16], index: 4, kind: input, shape index: {}]   ;;  %s12314_s5 = inlined_call_operand.vmem [shape: f32[1,16], index: 5, kind: input, shape index: {}]   ;;  %s12315_s6 = inlined_call_operand.vmem [shape: f32[3,3,16,16], index: 6, kind: input, shape index: {}]   ;;  %s12316_s7 = inlined_call_operand.vmem [shape: f32[1,16], index: 7, kind: input, shape index: {}]   ;;  %s12317_s8 = inlined_call_operand.vmem [shape: f32[16,128], index: 8, kind: input, shape index: {}]   ;;  %s12318_s9 = inlined_call_operand.vmem [shape: f32[1,128], index: 9, kind: input, shape index: {}]   ;;  %s12319_s10 = inlined_call_operand.vmem [shape: f32[3,3,2,16], index: 10, kind: input, shape index: {}]   ;;  %s12320_s11 = inlined_call_operand.vmem [shape: f32[1,16], index: 11, kind: input, shape index: {}]   ;;  %s12321_s12 = inlined_call_operand.vmem [shape: f32[256,16], index: 12, kind: input, shape index: {}]   ;;  %s12322_s13 = inlined_call_operand.vmem [shape: f32[32,16], index: 13, kind: input, shape index: {}]   ;;  %s12323_s14 = inlined_call_operand.vmem [shape: f32[1,16], index: 14, kind: input, shape index: {}]   ;;  %s12324_s15 = inlined_call_operand.vmem [shape: f32[3,3,16,16], index: 15, kind: input, shape index: {}]   ;;  %s12325_s16 = inlined_call_operand.vmem [shape: f32[3,16], index: 16, kind: input, shape index: {}]   ;;  %s12326_s17 = inlined_call_operand.vmem [shape: f32[3,1], index: 17, kind: input, shape index: {}]   ;;  %s12327_s18 = inlined_call_operand.vmem [shape: f32[2,3,256], index: 18, kind: output, shape index: {}]  }
   0x1   :  { %12463 = sst [smem:[#allocation47_spill]] %s12309_s0 }
   0x2   :  { %12464 = sst [smem:[#allocation48_spill]] %s12310_s1 }
   0x3   :  { %12465 = sst [smem:[#allocation49_spill]] %s12311_s2 }
   0x4 LB: > { %s7404_s28 = sadd.s32 4294967295, %s8025_s27   ;;  %p7408_p0 = scmp.ge.s32.totalorder %s8025_s27, 1  ;;  %s8025_s27 = sphi %s8126_s27, %s28_s27  }
   0x5   : > { %p541_p1 = scmp.lt.s32.totalorder %s8025_s27, 3 }
   0x7   : > { %p542_p2 = pnand %p7408_p0, %p541_p1 }
   0x9   : > { %545 = sbr.rel (%p542_p2) target bundleno = 3542 (0xdd6), region = 92 }
   0xe   : > { %v667_v0 = vld [vmem:[%s12313_s4 + $0x4] sm:$0x7]  ;;  %vm707_vm0 = vcmask 1040384   ;;  %vm884_vm1 = vcmask 1041408   ;;  %v8027_v2 = vmov 65535   ;;  %v8028_v9 = vmov 0.0  }
   0xf   : > { %v834_v1 = vpack.c.bf16 %v667_v0, %v667_v0  ;;  %v885_v3 = vsel %vm707_vm0, 4294967295, %v8027_v2  ;;  %v666_v4 = vld [vmem:[%s12313_s4] sm:$0x7]  ;;  %v668_v5 = vld [vmem:[%s12313_s4 + $0x8] sm:$0x7]  ;;  %v8146_v10 = vrot.slane %v8028_v9, 7 }
  0x10   : > { %v8144_v6 = vsel %vm884_vm1, %v885_v3, 0  ;;  %v817_v7 = vpack.c.bf16 %v666_v4, %v666_v4  ;;  %v1229_v8 = vpack.c.bf16 %v668_v5, %v668_v5  ;;  %p609_p3 = scmp.lt.s32.totalorder %s7404_s28, 1  ;;  %v669_v11 = vld [vmem:[%s12313_s4 + $0xc] sm:$0x7]  ;;  %v8152_v13 = vrot.slane %v8028_v9, 1  ;;  %s12470_s25 = sld [smem:[#allocation47_spill]] }
  0x11   : > { %12466 = vst [vmem:[#allocation2_spill] sm:$0xff] %v8146_v10  ;;  %v888_v12 = vand.u32 %v8144_v6, %v834_v1  ;;  %v1411_v16 = vpack.c.bf16 %v669_v11, %v669_v11  ;;  %v8160_v17 = vpack.c.bf16 %v8146_v10, %v8146_v10  ;;  %vm835_vm2 = vcmask 23552   ;;  %s12629_s21 = sld [smem:[#allocation48_spill]] }
  0x12   : > { %12467 = vst [vmem:[#allocation3_spill] sm:$0xff] %v8152_v13  ;;  %v1028_v14 = vand.u32 %v8144_v6, %v817_v7  ;;  %v1279_v15 = vand.u32 %v1229_v8, %v8144_v6  ;;  %s12873_s28 = smov (!%p609_p3, %s7404_s28), 1  ;;  %v8164_v18 = vpack.c.bf16 %v8152_v13, %v8152_v13  ;;  %v12328_v20 = vmov 0.0|0.0  }
  0x13   : > { %897 = vmatpush.bf16.msra.mxu0 %v888_v12  ;;  %12468 = vst [vmem:[#allocation4_spill] sm:$0xff] %v8160_v17  ;;  %s7992_s2 = sshll.u32 %s12873_s28, 8  ;;  %v1416_v19 = vand.u32 %v1411_v16, %v8144_v6  ;;  %vm1119_vm3 = vcmask 1046528   ;;  %vm2416_vm4 = vcmask 130048   ;;  %vm4073_vm5 = vcmask 15360   ;;  %s7415_s20 = sshll.u32 %s12873_s28, 1 }
  0x14   : > { %12469 = vst [vmem:[#allocation5_spill] sm:$0xff] %v8164_v18  ;;  %1037 = vmatpush.bf16.msra.mxu1 %v1028_v14  ;;  %1288 = vmatpush.bf16.msra.mxu2 %v1279_v15  ;;  %vm5544_vm6 = vcmask 261120   ;;  %s627_s23 = scalar_lea.vmem %s12312_s3, %s7415_s20  ;;  %vm7295_vm10 = vcmask 1043456  }
  0x15   : > { %7996 = vmatpush.bf16.msra.mxu3 %v1279_v15 }
  0x16   : > { %s8173_s26 = scalar_lea.vmem %s12470_s25, %s7992_s2  ;;  %898 = vmatmul.bf16.vlgmr.msra.gmra.mxu0 %v12328_v20 }
  0x17   : > { %v8177_v21 = vld [vmem:[%s8173_s26 + $0xe0] sm:$0xff]  ;;  %v8180_v22 = vld [vmem:[%s8173_s26 + $0xe8] sm:$0xff]  ;;  %7433 = vmatmul.msk.bf16.vlgmr.msra.gmra.mxu1 %vm835_vm2, %v8160_v17  ;;  %7449 = vmatmul.msk.bf16.vlgmr.msra.gmra.mxu2 %vm835_vm2, %v8164_v18  ;;  %v636_v41 = vld [vmem:[%s8173_s26 + $0x10] sm:$0xff]  ;;  %s9961_s22 = scalar_lea.vmem %s12629_s21, %s7992_s2 }
  0x18   : > { %v1178_v23 = vrot.slane %v8177_v21, 1  ;;  %v1179_v24 = vrot.slane %v8180_v22, 1  ;;  %v634_v27 = vld [vmem:[%s8173_s26] sm:$0xff]  ;;  %v635_v28 = vld [vmem:[%s8173_s26 + $0x8] sm:$0xff]  ;;  %v637_v42 = vld [vmem:[%s8173_s26 + $0x18] sm:$0xff]  ;;  %v714_v43 = vrot.slane %v636_v41, 7 }
  0x19   : > { %1425 = vmatpush.bf16.msrb.mxu3 %v1416_v19  ;;  %v710_v30 = vrot.slane %v634_v27, 7  ;;  %v712_v31 = vrot.slane %v635_v28, 7  ;;  %v1122_v32 = vrot.slane %v634_v27, 1  ;;  %v1123_v33 = vrot.slane %v635_v28, 1  ;;  %v638_v54 = vld [vmem:[%s8173_s26 + $0x20] sm:$0xff]  ;;  %v639_v55 = vld [vmem:[%s8173_s26 + $0x28] sm:$0xff] }
  0x1a   : > { %v1180_v25 = vsel %vm1119_vm3, %v1178_v23, %v1179_v24  ;;  %v1181_v26 = vsel %vm1119_vm3, %v1179_v24, %v8152_v13  ;;  %v8203_v38 = vpack.c.bf16 %v635_v28, %v634_v27  ;;  %v716_v44 = vrot.slane %v637_v42, 7  ;;  %v640_v3 = vld [vmem:[%s8173_s26 + $0x30] sm:$0xff]  ;;  %v641_v4 = vld [vmem:[%s8173_s26 + $0x38] sm:$0xff]  ;;  %v642_v24 = vld [vmem:[%s8173_s26 + $0x40] sm:$0xff] }
  0x1b   : > { %v8193_v29 = vpack.c.bf16 %v1181_v26, %v1180_v25  ;;  %v711_v34 = vsel %vm707_vm0, %v8146_v10, %v710_v30  ;;  %v713_v35 = vsel %vm707_vm0, %v710_v30, %v712_v31  ;;  %v1124_v36 = vsel %vm1119_vm3, %v1122_v32, %v1123_v33  ;;  %v643_v25 = vld [vmem:[%s8173_s26 + $0x48] sm:$0xff] }
  0x1c   : > { %v1125_v37 = vsel %vm1119_vm3, %v1123_v33, %v8152_v13  ;;  %v802_v39 = vpack.c.bf16 %v713_v35, %v711_v34  ;;  %v1126_v45 = vrot.slane %v636_v41, 1  ;;  %v1127_v46 = vrot.slane %v637_v42, 1 }
  0x1d   : > { %12471 = vst [vmem:[#allocation6_spill] sm:$0xff] %v8193_v29  ;;  %7464 = vmatmul.msk.bf16.vlgmr.msra.gmra.mxu3 %vm835_vm2, %v8193_v29  ;;  %v8205_v40 = vpack.c.bf16 %v1125_v37, %v1124_v36  ;;  %v715_v47 = vsel %vm707_vm0, %v8146_v10, %v714_v43  ;;  %v717_v48 = vsel %vm707_vm0, %v714_v43, %v716_v44  ;;  %v718_v56 = vrot.slane %v638_v54, 7 }
  0x1e   : > { %v1128_v49 = vsel %vm1119_vm3, %v1126_v45, %v1127_v46  ;;  %v1129_v50 = vsel %vm1119_vm3, %v1127_v46, %v8152_v13  ;;  %v8221_v51 = vpack.c.bf16 %v637_v42, %v636_v41  ;;  %v8223_v52 = vpack.c.bf16 %v717_v48, %v715_v47  ;;  %v645_v41 = vld [vmem:[%s8173_s26 + $0x58] sm:$0xff] }
  0x1f   : > { %v8225_v53 = vpack.c.bf16 %v1129_v50, %v1128_v49  ;;  %v720_v57 = vrot.slane %v639_v55, 7  ;;  %v1130_v58 = vrot.slane %v638_v54, 1  ;;  %v1131_v59 = vrot.slane %v639_v55, 1 }
  0x20   : > { %v719_v60 = vsel %vm707_vm0, %v8146_v10, %v718_v56  ;;  %v8243_v0 = vpack.c.bf16 %v639_v55, %v638_v54  ;;  %v722_v5 = vrot.slane %v640_v3, 7  ;;  %v724_v7 = vrot.slane %v641_v4, 7 }
  0x21   : > { %v721_v61 = vsel %vm707_vm0, %v718_v56, %v720_v57  ;;  %v1132_v62 = vsel %vm1119_vm3, %v1130_v58, %v1131_v59  ;;  %v1133_v63 = vsel %vm1119_vm3, %v1131_v59, %v8152_v13  ;;  %v1134_v8 = vrot.slane %v640_v3, 1  ;;  %v646_v56 = vld [vmem:[%s8173_s26 + $0x60] sm:$0xff]  ;;  %v647_v57 = vld [vmem:[%s8173_s26 + $0x68] sm:$0xff] }
  0x22   : > { %v8245_v1 = vpack.c.bf16 %v721_v61, %v719_v60  ;;  %v8247_v2 = vpack.c.bf16 %v1133_v63, %v1132_v62  ;;  %v1135_v9 = vrot.slane %v641_v4, 1  ;;  %v723_v11 = vsel %vm707_vm0, %v8146_v10, %v722_v5 }
  0x23   : > { %v725_v12 = vsel %vm707_vm0, %v722_v5, %v724_v7  ;;  %v8265_v16 = vpack.c.bf16 %v641_v4, %v640_v3  ;;  %v726_v26 = vrot.slane %v642_v24, 7  ;;  %v728_v27 = vrot.slane %v643_v25, 7 }
  0x24   : > { %v1136_v14 = vsel %vm1119_vm3, %v1134_v8, %v1135_v9  ;;  %v1137_v15 = vsel %vm1119_vm3, %v1135_v9, %v8152_v13  ;;  %v8267_v19 = vpack.c.bf16 %v725_v12, %v723_v11  ;;  %v1138_v28 = vrot.slane %v642_v24, 1  ;;  %v648_v9 = vld [vmem:[%s8173_s26 + $0x70] sm:$0xff]  ;;  %v649_v11 = vld [vmem:[%s8173_s26 + $0x78] sm:$0xff] }
  0x25   : > { %v8269_v23 = vpack.c.bf16 %v1137_v15, %v1136_v14  ;;  %v1139_v30 = vrot.slane %v643_v25, 1  ;;  %v727_v31 = vsel %vm707_vm0, %v8146_v10, %v726_v26  ;;  %v729_v32 = vsel %vm707_vm0, %v726_v26, %v728_v27 }
  0x26   : > { %7418 = vmatmul.msk.bf16.gmra.mxu0 %vm835_vm2, %v8203_v38  ;;  %v8287_v35 = vpack.c.bf16 %v643_v25, %v642_v24  ;;  %v8289_v36 = vpack.c.bf16 %v729_v32, %v727_v31  ;;  %v732_v43 = vrot.slane %v645_v41, 7  ;;  %v1143_v45 = vrot.slane %v645_v41, 1 }
  0x27   : > { %7434 = vmatmul.msk.bf16.gmra.mxu1 %vm835_vm2, %v802_v39  ;;  %7450 = vmatmul.msk.bf16.gmra.mxu2 %vm835_vm2, %v8205_v40  ;;  %v1140_v33 = vsel %vm1119_vm3, %v1138_v28, %v1139_v30  ;;  %v1141_v34 = vsel %vm1119_vm3, %v1139_v30, %v8152_v13  ;;  %v734_v58 = vrot.slane %v646_v56, 7  ;;  %v736_v59 = vrot.slane %v647_v57, 7 }
  0x28   : > { %v8291_v37 = vpack.c.bf16 %v1141_v34, %v1140_v33  ;;  %v1145_v49 = vsel %vm1119_vm3, %v1143_v45, %v8152_v13  ;;  %v1146_v60 = vrot.slane %v646_v56, 1  ;;  %v1147_v61 = vrot.slane %v647_v57, 1 }
  0x29   : > { %v735_v62 = vsel %vm707_vm0, %v8146_v10, %v734_v58  ;;  %v737_v63 = vsel %vm707_vm0, %v734_v58, %v736_v59  ;;  %v8331_v5 = vpack.c.bf16 %v647_v57, %v646_v56  ;;  %v738_v12 = vrot.slane %v648_v9, 7 }
  0x2a   : > { %v1148_v3 = vsel %vm1119_vm3, %v1146_v60, %v1147_v61  ;;  %v1149_v4 = vsel %vm1119_vm3, %v1147_v61, %v8152_v13  ;;  %v8333_v7 = vpack.c.bf16 %v737_v63, %v735_v62  ;;  %v740_v14 = vrot.slane %v649_v11, 7 }
  0x2b   : > { %v8335_v8 = vpack.c.bf16 %v1149_v4, %v1148_v3  ;;  %v1150_v15 = vrot.slane %v648_v9, 1  ;;  %v1151_v24 = vrot.slane %v649_v11, 1  ;;  %v739_v25 = vsel %vm707_vm0, %v8146_v10, %v738_v12 }
  0x2c   : > { %v741_v26 = vsel %vm707_vm0, %v738_v12, %v740_v14  ;;  %v8353_v30 = vpack.c.bf16 %v649_v11, %v648_v9 }
  0x2d   : > { %7465 = vmatmul.msk.bf16.vlgmr.msrb.gmra.mxu3 %vm835_vm2, %v802_v39  ;;  %v644_v39 = vld [vmem:[%s8173_s26 + $0x50] sm:$0xff]  ;;  %v1152_v27 = vsel %vm1119_vm3, %v1150_v15, %v1151_v24  ;;  %v1153_v28 = vsel %vm1119_vm3, %v1151_v24, %v8152_v13  ;;  %v8355_v32 = vpack.c.bf16 %v741_v26, %v739_v25  ;;  %v653_v26 = vld [vmem:[%s8173_s26 + $0x98] sm:$0xff] }
  0x2e   : > { %v730_v42 = vrot.slane %v644_v39, 7  ;;  %v1142_v44 = vrot.slane %v644_v39, 1  ;;  %v8309_v50 = vpack.c.bf16 %v645_v41, %v644_v39  ;;  %v8357_v33 = vpack.c.bf16 %v1153_v28, %v1152_v27  ;;  %v650_v41 = vld [vmem:[%s8173_s26 + $0x80] sm:$0xff]  ;;  %v652_v25 = vld [vmem:[%s8173_s26 + $0x90] sm:$0xff] }
  0x30   : > { %v731_v46 = vsel %vm707_vm0, %v8146_v10, %v730_v42  ;;  %v733_v47 = vsel %vm707_vm0, %v730_v42, %v732_v43  ;;  %v1144_v48 = vsel %vm1119_vm3, %v1142_v44, %v1143_v45  ;;  %v651_v42 = vld [vmem:[%s8173_s26 + $0x88] sm:$0xff] }
  0x31   : > { %v8311_v54 = vpack.c.bf16 %v733_v47, %v731_v46  ;;  %v8313_v55 = vpack.c.bf16 %v1145_v49, %v1144_v48  ;;  %v742_v47 = vrot.slane %v650_v41, 7  ;;  %v744_v48 = vrot.slane %v651_v42, 7 }
  0x32   : > { %v1154_v49 = vrot.slane %v650_v41, 1  ;;  %v1155_v56 = vrot.slane %v651_v42, 1  ;;  %v8377_v3 = vpack.c.bf16 %v651_v42, %v650_v41  ;;  %v748_v41 = vrot.slane %v653_v26, 7 }
  0x33   : > { %v743_v59 = vsel %vm707_vm0, %v8146_v10, %v742_v47  ;;  %v745_v60 = vsel %vm707_vm0, %v742_v47, %v744_v48  ;;  %v1158_v42 = vrot.slane %v652_v25, 1 }
  0x34   : > { %v1156_v61 = vsel %vm1119_vm3, %v1154_v49, %v1155_v56  ;;  %v1157_v62 = vsel %vm1119_vm3, %v1155_v56, %v8152_v13  ;;  %v8379_v11 = vpack.c.bf16 %v745_v60, %v743_v59  ;;  %v8403_v60 = vpack.c.bf16 %v653_v26, %v652_v25 }
  0x35   : > { %v8381_v12 = vpack.c.bf16 %v1157_v62, %v1156_v61 }
  0x36   : > { %7419 = vmatmul.msk.bf16.gmra.mxu0 %vm835_vm2, %v8221_v51 }
  0x37   : > { %7435 = vmatmul.msk.bf16.gmra.mxu1 %vm835_vm2, %v8223_v52  ;;  %7451 = vmatmul.msk.bf16.gmra.mxu2 %vm835_vm2, %v8225_v53 }
  0x3d   : > { %7466 = vmatmul.msk.bf16.gmra.mxu3 %vm835_vm2, %v8223_v52 }
  0x46   : > { %7420 = vmatmul.msk.bf16.gmra.mxu0 %vm835_vm2, %v8243_v0 }
  0x47   : > { %7436 = vmatmul.msk.bf16.gmra.mxu1 %vm835_vm2, %v8245_v1  ;;  %7452 = vmatmul.msk.bf16.gmra.mxu2 %vm835_vm2, %v8247_v2 }
  0x4d   : > { %7467 = vmatmul.msk.bf16.gmra.mxu3 %vm835_vm2, %v8245_v1 }
  0x56   : > { %7421 = vmatmul.msk.bf16.gmra.mxu0 %vm835_vm2, %v8265_v16 }
  0x57   : > { %7437 = vmatmul.msk.bf16.gmra.mxu1 %vm835_vm2, %v8267_v19  ;;  %7453 = vmatmul.msk.bf16.gmra.mxu2 %vm835_vm2, %v8269_v23 }
  0x5d   : > { %7468 = vmatmul.msk.bf16.gmra.mxu3 %vm835_vm2, %v8267_v19 }
  0x66   : > { %7422 = vmatmul.msk.bf16.gmra.mxu0 %vm835_vm2, %v8287_v35 }
  0x67   : > { %7438 = vmatmul.msk.bf16.gmra.mxu1 %vm835_vm2, %v8289_v36  ;;  %7454 = vmatmul.msk.bf16.gmra.mxu2 %vm835_vm2, %v8291_v37 }
  0x6d   : > { %7469 = vmatmul.msk.bf16.gmra.mxu3 %vm835_vm2, %v8289_v36 }
  0x76   : > { %7423 = vmatmul.msk.bf16.gmra.mxu0 %vm835_vm2, %v8309_v50 }
  0x77   : > { %7439 = vmatmul.msk.bf16.gmra.mxu1 %vm835_vm2, %v8311_v54  ;;  %7455 = vmatmul.msk.bf16.gmra.mxu2 %vm835_vm2, %v8313_v55 }
  0x7d   : > { %7470 = vmatmul.msk.bf16.gmra.mxu3 %vm835_vm2, %v8311_v54 }
  0x86   : > { %7424 = vmatmul.msk.bf16.gmra.mxu0 %vm835_vm2, %v8331_v5 }
  0x87   : > { %7440 = vmatmul.msk.bf16.gmra.mxu1 %vm835_vm2, %v8333_v7  ;;  %7456 = vmatmul.msk.bf16.gmra.mxu2 %vm835_vm2, %v8335_v8 }
  0x8d   : > { %7471 = vmatmul.msk.bf16.gmra.mxu3 %vm835_vm2, %v8333_v7 }
  0x93   : > { %v899_v31 = vpop.f32.mrf.mxu0 }
  0x94   : > { %v1039_v34 = vpop.f32.mrf.mxu1 }
  0x95   : > { %v1040_v39 = vadd.f32 %v1039_v34, %v899_v31  ;;  %v746_v34 = vrot.slane %v652_v25, 7 }
  0x96   : > { %7425 = vmatmul.msk.bf16.gmra.mxu0 %vm835_vm2, %v8353_v30 }
  0x97   : > { %7441 = vmatmul.msk.bf16.gmra.mxu1 %vm835_vm2, %v8355_v32  ;;  %7457 = vmatmul.msk.bf16.gmra.mxu2 %vm835_vm2, %v8357_v33  ;;  %v747_v47 = vsel %vm707_vm0, %v8146_v10, %v746_v34  ;;  %v749_v49 = vsel %vm707_vm0, %v746_v34, %v748_v41 }
  0x9a   : > { %v1290_v43 = vpop.f32.mrf.mxu2 }
  0x9b   : > { %v1370_v44 = vadd.f32 %v1290_v43, %v1040_v39  ;;  %v901_v45 = vpop.f32.mrf.mxu0  ;;  %v1159_v43 = vrot.slane %v653_v26, 1  ;;  %v654_v26 = vld [vmem:[%s8173_s26 + $0xa0] sm:$0xff] }
  0x9c   : > { %v1041_v46 = vpop.f32.mrf.mxu1 }
  0x9d   : > { %7472 = vmatmul.msk.bf16.gmra.mxu3 %vm835_vm2, %v8355_v32  ;;  %v1042_v57 = vadd.f32 %v1041_v46, %v901_v45  ;;  %v1160_v56 = vsel %vm1119_vm3, %v1158_v42, %v1159_v43 }
  0xa0   : > { %v8369_v58 = vpop.f32.mrf.mxu3 }
  0xa2   : > { %v1292_v63 = vpop.f32.mrf.mxu2 }
  0xa3   : > { %v1371_v4 = vadd.f32 %v1292_v63, %v1042_v57  ;;  %v904_v9 = vpop.f32.mrf.mxu0  ;;  %v1161_v57 = vsel %vm1119_vm3, %v1159_v43, %v8152_v13  ;;  %v8405_v63 = vpack.c.bf16 %v749_v49, %v747_v47  ;;  %v750_v43 = vrot.slane %v654_v26, 7 }
  0xa4   : > { %v1044_v14 = vpop.f32.mrf.mxu1 }
  0xa5   : > { %v1045_v15 = vadd.f32 %v1044_v14, %v904_v9  ;;  %v8407_v9 = vpack.c.bf16 %v1161_v57, %v1160_v56 }
  0xa6   : > { %7426 = vmatmul.msk.bf16.gmra.mxu0 %vm835_vm2, %v8377_v3 }
  0xa7   : > { %7442 = vmatmul.msk.bf16.gmra.mxu1 %vm835_vm2, %v8379_v11  ;;  %7458 = vmatmul.msk.bf16.gmra.mxu2 %vm835_vm2, %v8381_v12 }
  0xa8   : > { %v8385_v24 = vpop.f32.mrf.mxu3 }
  0xaa   : > { %v1295_v27 = vpop.f32.mrf.mxu2 }
  0xab   : > { %v1372_v28 = vadd.f32 %v1295_v27, %v1045_v15  ;;  %v906_v31 = vpop.f32.mrf.mxu0  ;;  %v670_v27 = vld [vmem:[%s12313_s4 + $0x10] sm:$0x7] }
  0xac   : > { %v1046_v39 = vpop.f32.mrf.mxu1  ;;  %v1540_v34 = vpack.c.bf16 %v670_v27, %v670_v27 }
  0xad   : > { %7473 = vmatmul.msk.bf16.gmra.mxu3 %vm835_vm2, %v8379_v11  ;;  %v1047_v45 = vadd.f32 %v1046_v39, %v906_v31  ;;  %v655_v31 = vld [vmem:[%s8173_s26 + $0xa8] sm:$0xff] }
  0xae   : > { %v752_v47 = vrot.slane %v655_v31, 7  ;;  %v1163_v49 = vrot.slane %v655_v31, 1 }
  0xb0   : > { %v1427_v46 = vpop.f32.mrf.mxu3 }
  0xb1   : > { %v8397_v48 = vadd.f32 %v1427_v46, %v1370_v44 }
  0xb2   : > { %v1297_v59 = vpop.f32.mrf.mxu2 }
  0xb3   : > { %v1373_v61 = vadd.f32 %v1297_v59, %v1047_v45  ;;  %v909_v62 = vpop.f32.mrf.mxu0  ;;  %v1545_v45 = vand.u32 %v1540_v34, %v8144_v6  ;;  %v751_v59 = vsel %vm707_vm0, %v8146_v10, %v750_v43  ;;  %v8433_v34 = vpack.c.bf16 %v655_v31, %v654_v26  ;;  %v656_v31 = vld [vmem:[%s8173_s26 + $0xb0] sm:$0xff] }
  0xb4   : > { %v1049_v44 = vpop.f32.mrf.mxu1 }
  0xb5   : > { %v1050_v14 = vadd.f32 %v1049_v44, %v909_v62  ;;  %1554 = vmatpush.bf16.msrb.mxu0 %v1545_v45  ;;  %v753_v44 = vsel %vm707_vm0, %v750_v43, %v752_v47  ;;  %12472 = vst [vmem:[#allocation7_spill] sm:$0xff] %v8433_v34  ;;  %v657_v47 = vld [vmem:[%s8173_s26 + $0xb8] sm:$0xff] }
  0xb6   : > { %7427 = vmatmul.msk.bf16.gmra.mxu0 %vm835_vm2, %v8403_v60  ;;  %v8435_v45 = vpack.c.bf16 %v753_v44, %v751_v59  ;;  %v754_v59 = vrot.slane %v656_v31, 7  ;;  %v8459_v17 = vpack.c.bf16 %v657_v47, %v656_v31 }
  0xb7   : > { %7443 = vmatmul.msk.bf16.gmra.mxu1 %vm835_vm2, %v8405_v63  ;;  %7459 = vmatmul.msk.bf16.gmra.mxu2 %vm835_vm2, %v8407_v9 }
  0xb8   : > { %v1429_v15 = vpop.f32.mrf.mxu3  ;;  %v755_v20 = vsel %vm707_vm0, %v8146_v10, %v754_v59  ;;  %12476 = vst [vmem:[#allocation11_spill] sm:$0xff] %v8459_v17 }
  0xb9   : > { %v8415_v25 = vadd.f32 %v1429_v15, %v1371_v4  ;;  %v1162_v4 = vrot.slane %v654_v26, 1  ;;  %v1165_v15 = vsel %vm1119_vm3, %v1163_v49, %v8152_v13 }
  0xba   : > { %v1300_v39 = vpop.f32.mrf.mxu2 }
  0xbb   : > { %v1374_v41 = vadd.f32 %v1300_v39, %v1050_v14  ;;  %v911_v42 = vpop.f32.mrf.mxu0  ;;  %v1164_v14 = vsel %vm1119_vm3, %v1162_v4, %v1163_v49 }
  0xbc   : > { %v1051_v46 = vpop.f32.mrf.mxu1 }
  0xbd   : > { %7474 = vmatmul.msk.bf16.gmra.mxu3 %vm835_vm2, %v8405_v63  ;;  %v1052_v56 = vadd.f32 %v1051_v46, %v911_v42  ;;  %v8437_v46 = vpack.c.bf16 %v1165_v15, %v1164_v14  ;;  %v756_v14 = vrot.slane %v657_v47, 7  ;;  %v1166_v15 = vrot.slane %v656_v31, 1 }
  0xbf   : > { %12473 = vst [vmem:[#allocation8_spill] sm:$0xff] %v8437_v46 }
  0xc0   : > { %v1432_v57 = vpop.f32.mrf.mxu3 }
  0xc1   : > { %v8427_v62 = vadd.f32 %v1432_v57, %v1372_v28 }
  0xc2   : > { %v1302_v27 = vpop.f32.mrf.mxu2 }
  0xc3   : > { %v1375_v39 = vadd.f32 %v1302_v27, %v1052_v56  ;;  %v914_v42 = vpop.f32.mrf.mxu0  ;;  %v1167_v27 = vrot.slane %v657_v47, 1  ;;  %v659_v47 = vld [vmem:[%s8173_s26 + $0xc8] sm:$0xff] }
  0xc4   : > { %v1054_v28 = vpop.f32.mrf.mxu1 }
  0xc5   : > { %v1055_v57 = vadd.f32 %v1054_v28, %v914_v42 }
  0xc6   : > { %7428 = vmatmul.msk.bf16.gmra.mxu0 %vm835_vm2, %v8433_v34 }
  0xc7   : > { %7444 = vmatmul.msk.bf16.gmra.mxu1 %vm835_vm2, %v8435_v45  ;;  %7460 = vmatmul.msk.bf16.gmra.mxu2 %vm835_vm2, %v8437_v46 }
  0xc8   : > { %v1434_v43 = vpop.f32.mrf.mxu3 }
  0xc9   : > { %v8445_v26 = vadd.f32 %v1434_v43, %v1373_v61  ;;  %v757_v43 = vsel %vm707_vm0, %v754_v59, %v756_v14 }
  0xca   : > { %v1305_v4 = vpop.f32.mrf.mxu2 }
  0xcb   : > { %12474 = vst [vmem:[#allocation9_spill] sm:$0xff] %v8445_v26  ;;  %v1376_v49 = vadd.f32 %v1305_v4, %v1055_v57  ;;  %v916_v56 = vpop.f32.mrf.mxu0  ;;  %v1168_v57 = vsel %vm1119_vm3, %v1166_v15, %v1167_v27  ;;  %v1169_v4 = vsel %vm1119_vm3, %v1167_v27, %v8152_v13 }
  0xcc   : > { %v1056_v44 = vpop.f32.mrf.mxu1  ;;  %v8463_v46 = vpack.c.bf16 %v1169_v4, %v1168_v57  ;;  %v1171_v4 = vrot.slane %v659_v47, 1 }
  0xcd   : > { %7475 = vmatmul.msk.bf16.gmra.mxu3 %vm835_vm2, %v8435_v45  ;;  %v1057_v42 = vadd.f32 %v1056_v44, %v916_v56  ;;  %v8461_v44 = vpack.c.bf16 %v757_v43, %v755_v20  ;;  %v760_v43 = vrot.slane %v659_v47, 7 }
  0xce   : > { %12477 = vst [vmem:[#allocation12_spill] sm:$0xff] %v8463_v46 }
  0xd0   : > { %v1437_v28 = vpop.f32.mrf.mxu3 }
  0xd1   : > { %v8453_v61 = vadd.f32 %v1437_v28, %v1374_v41 }
  0xd2   : > { %v1307_v18 = vpop.f32.mrf.mxu2 }
  0xd3   : > { %12475 = vst [vmem:[#allocation10_spill] sm:$0xff] %v8453_v61  ;;  %v1377_v29 = vadd.f32 %v1307_v18, %v1057_v42  ;;  %v919_v56 = vpop.f32.mrf.mxu0  ;;  %v658_v18 = vld [vmem:[%s8173_s26 + $0xc0] sm:$0xff] }
  0xd4   : > { %v1059_v41 = vpop.f32.mrf.mxu1  ;;  %v758_v27 = vrot.slane %v658_v18, 7  ;;  %v1170_v57 = vrot.slane %v658_v18, 1 }
  0xd5   : > { %v1060_v28 = vadd.f32 %v1059_v41, %v919_v56 }
  0xd6   : > { %7429 = vmatmul.msk.bf16.gmra.mxu0 %vm835_vm2, %v8459_v17 }
  0xd7   : > { %7445 = vmatmul.msk.bf16.gmra.mxu1 %vm835_vm2, %v8461_v44  ;;  %7461 = vmatmul.msk.bf16.gmra.mxu2 %vm835_vm2, %v8463_v46  ;;  %v759_v46 = vsel %vm707_vm0, %v8146_v10, %v758_v27 }
  0xd8   : > { %v1439_v59 = vpop.f32.mrf.mxu3 }
  0xd9   : > { %v8471_v31 = vadd.f32 %v1439_v59, %v1375_v39  ;;  %v761_v59 = vsel %vm707_vm0, %v758_v27, %v760_v43 }
  0xda   : > { %v1310_v20 = vpop.f32.mrf.mxu2 }
  0xdb   : > { %12478 = vst [vmem:[#allocation13_spill] sm:$0xff] %v8471_v31  ;;  %v1378_v14 = vadd.f32 %v1310_v20, %v1060_v28  ;;  %v921_v15 = vpop.f32.mrf.mxu0  ;;  %v1172_v28 = vsel %vm1119_vm3, %v1170_v57, %v1171_v4  ;;  %v1173_v20 = vsel %vm1119_vm3, %v1171_v4, %v8152_v13  ;;  %v8485_v31 = vpack.c.bf16 %v659_v47, %v658_v18  ;;  %v661_v47 = vld [vmem:[%s8173_s26 + $0xd8] sm:$0xff] }
  0xdc   : > { %v1061_v42 = vpop.f32.mrf.mxu1  ;;  %v8489_v61 = vpack.c.bf16 %v1173_v20, %v1172_v28  ;;  %v1175_v20 = vrot.slane %v661_v47, 1 }
  0xdd   : > { %7476 = vmatmul.msk.bf16.gmra.mxu3 %vm835_vm2, %v8461_v44  ;;  %v1062_v56 = vadd.f32 %v1061_v42, %v921_v15  ;;  %12480 = vst [vmem:[#allocation15_spill] sm:$0xff] %v8485_v31  ;;  %v8487_v42 = vpack.c.bf16 %v761_v59, %v759_v46  ;;  %v764_v59 = vrot.slane %v661_v47, 7 }
  0xde   : > { %12482 = vst [vmem:[#allocation17_spill] sm:$0xff] %v8489_v61 }
  0xdf   : > { %12481 = vst [vmem:[#allocation16_spill] sm:$0xff] %v8487_v42 }
  0xe0   : > { %v1442_v41 = vpop.f32.mrf.mxu3 }
  0xe1   : > { %v8479_v39 = vadd.f32 %v1442_v41, %v1376_v49 }
  0xe2   : > { %v1312_v17 = vpop.f32.mrf.mxu2 }
  0xe3   : > { %12479 = vst [vmem:[#allocation14_spill] sm:$0xff] %v8479_v39  ;;  %v1379_v34 = vadd.f32 %v1312_v17, %v1062_v56  ;;  %v924_v15 = vpop.f32.mrf.mxu0  ;;  %v660_v17 = vld [vmem:[%s8173_s26 + $0xd0] sm:$0xff] }
  0xe4   : > { %v1064_v49 = vpop.f32.mrf.mxu1  ;;  %v762_v4 = vrot.slane %v660_v17, 7  ;;  %v1174_v28 = vrot.slane %v660_v17, 1  ;;  %v8515_v39 = vpack.c.bf16 %v661_v47, %v660_v17 }
  0xe5   : > { %v1065_v41 = vadd.f32 %v1064_v49, %v924_v15  ;;  %v672_v49 = vld [vmem:[%s12313_s4 + $0x18] sm:$0x7] }
  0xe6   : > { %7430 = vmatmul.msk.bf16.gmra.mxu0 %vm835_vm2, %v8485_v31  ;;  %v1176_v31 = vsel %vm1119_vm3, %v1174_v28, %v1175_v20 }
  0xe7   : > { %7446 = vmatmul.msk.bf16.gmra.mxu1 %vm835_vm2, %v8487_v42  ;;  %7462 = vmatmul.msk.bf16.gmra.mxu2 %vm835_vm2, %v8489_v61  ;;  %v1803_v61 = vpack.c.bf16 %v672_v49, %v672_v49 }
  0xe8   : > { %v1444_v27 = vpop.f32.mrf.mxu3 }
  0xe9   : > { %v8497_v18 = vadd.f32 %v1444_v27, %v1377_v29  ;;  %v763_v27 = vsel %vm707_vm0, %v8146_v10, %v762_v4 }
  0xea   : > { %v1315_v46 = vpop.f32.mrf.mxu2 }
  0xeb   : > { %12483 = vst [vmem:[#allocation18_spill] sm:$0xff] %v8497_v18  ;;  %v1380_v43 = vadd.f32 %v1315_v46, %v1065_v41  ;;  %v926_v57 = vpop.f32.mrf.mxu0  ;;  %v765_v46 = vsel %vm707_vm0, %v762_v4, %v764_v59  ;;  %v1177_v18 = vsel %vm1119_vm3, %v1175_v20, %v8152_v13 }
  0xec   : > { %v1066_v56 = vpop.f32.mrf.mxu1 }
  0xed   : > { %7477 = vmatmul.msk.bf16.gmra.mxu3 %vm835_vm2, %v8487_v42  ;;  %v1067_v15 = vadd.f32 %v1066_v56, %v926_v57  ;;  %v1805_v57 = vand.u32 %v1803_v61, %v8144_v6  ;;  %v671_v42 = vld [vmem:[%s12313_s4 + $0x14] sm:$0x7] }
  0xee   : > { %v1675_v4 = vpack.c.bf16 %v671_v42, %v671_v42 }
  0xef   : > { %1814 = vmatpush.bf16.msrb.mxu2 %v1805_v57 }
  0xf0   : > { %v1447_v29 = vpop.f32.mrf.mxu3  ;;  %v1680_v20 = vand.u32 %v1675_v4, %v8144_v6 }
  0xf1   : > { %v8508_v41 = vadd.f32 %v1447_v29, %v1378_v14  ;;  %v8520_v14 = vpack.c.bf16 %v765_v46, %v763_v27  ;;  %v8522_v29 = vpack.c.bf16 %v1177_v18, %v1176_v31  ;;  %v768_v27 = vrot.slane %v8180_v22, 7 }
  0xf2   : > { %v1317_v56 = vpop.f32.mrf.mxu2  ;;  %1689 = vmatpush.bf16.msrb.mxu1 %v1680_v20 }
  0xf3   : > { %v1381_v26 = vadd.f32 %v1317_v56, %v1067_v15  ;;  %v929_v49 = vpop.f32.mrf.mxu0  ;;  %v766_v15 = vrot.slane %v8177_v21, 7 }
  0xf4   : > { %v1069_v59 = vpop.f32.mrf.mxu1 }
  0xf5   : > { %v1070_v28 = vadd.f32 %v1069_v59, %v929_v49  ;;  %v769_v49 = vsel %vm707_vm0, %v766_v15, %v768_v27  ;;  %v8544_v59 = vpack.c.bf16 %v8180_v22, %v8177_v21 }
  0xf6   : > { %7431 = vmatmul.msk.bf16.gmra.mxu0 %vm835_vm2, %v8515_v39 }
  0xf7   : > { %7447 = vmatmul.msk.bf16.gmra.mxu1 %vm835_vm2, %v8520_v14  ;;  %7463 = vmatmul.msk.bf16.gmra.mxu2 %vm835_vm2, %v8522_v29 }
  0xf8   : > { %v1449_v61 = vpop.f32.mrf.mxu3 }
  0xf9   : > { %v8531_v17 = vadd.f32 %v1449_v61, %v1379_v34  ;;  %v767_v34 = vsel %vm707_vm0, %v8146_v10, %v766_v15 }
  0xfa   : > { %v1320_v31 = vpop.f32.mrf.mxu2  ;;  %v8546_v61 = vpack.c.bf16 %v769_v49, %v767_v34 }
  0xfb   : > { %v1382_v18 = vadd.f32 %v1320_v31, %v1070_v28  ;;  %v931_v42 = vpop.f32.mrf.mxu0 }
  0xfc   : > { %v1071_v47 = vpop.f32.mrf.mxu1 }
  0xfd   : > { %7478 = vmatmul.msk.bf16.gmra.mxu3 %vm835_vm2, %v8520_v14  ;;  %v1072_v46 = vadd.f32 %v1071_v47, %v931_v42 }
 0x100   : > { %v1452_v57 = vpop.f32.mrf.mxu3 }
 0x101   : > { %v8537_v56 = vadd.f32 %v1452_v57, %v1380_v43  ;;  %v673_v43 = vld [vmem:[%s12313_s4 + $0x1c] sm:$0x7] }
 0x102   : > { %v1322_v4 = vpop.f32.mrf.mxu2  ;;  %v1928_v47 = vpack.c.bf16 %v673_v43, %v673_v43 }
 0x103   : > { %v1383_v28 = vadd.f32 %v1322_v4, %v1072_v46  ;;  %v934_v20 = vpop.f32.mrf.mxu0  ;;  %v8563_v4 = vld [vmem:[%s8173_s26 + $0xf0] sm:$0xff] }
 0x104   : > { %v1074_v31 = vpop.f32.mrf.mxu1  ;;  %v1930_v21 = vand.u32 %v1928_v47, %v8144_v6  ;;  %12484 = vst [vmem:[#allocation19_spill] sm:$0xff] %v8563_v4 }
 0x105   : > { %v1075_v42 = vadd.f32 %v1074_v31, %v934_v20  ;;  %v8566_v20 = vld [vmem:[%s8173_s26 + $0xf8] sm:$0xff]  ;;  %s12871_s26 = sld [smem:[#allocation49_spill]] }
 0x106   : > { %7432 = vmatmul.msk.bf16.gmra.mxu0 %vm835_vm2, %v8544_v59  ;;  %1939 = vmatpush.bf16.msra.mxu3 %v1930_v21  ;;  %12485 = vst [vmem:[#allocation20_spill] sm:$0xff] %v8566_v20 }
 0x107   : > { %7448 = vmatmul.msk.bf16.gmra.mxu1 %vm835_vm2, %v8546_v61  ;;  %7513 = vmatmul.msk.bf16.vlgmr.msrb.gmra.mxu2 %vm835_vm2, %v8223_v52  ;;  %v1404_v52 = vrot.slane %v8563_v4, 7 }
 0x108   : > { %v1454_v15 = vpop.f32.mrf.mxu3 }
 0x109   : > { %v8558_v22 = vadd.f32 %v1454_v15, %v1381_v26  ;;  %v1406_v26 = vrot.slane %v8566_v20, 7  ;;  %v1405_v13 = vsel %vm707_vm0, %v8146_v10, %v1404_v52 }
 0x10a   : > { %v1325_v27 = vpop.f32.mrf.mxu2 }
 0x10b   : > { %v1384_v46 = vadd.f32 %v1325_v27, %v1075_v42  ;;  %v936_v57 = vpop.f32.mrf.mxu0 }
 0x10c   : > { %v1076_v34 = vpop.f32.mrf.mxu1 }
 0x10d   : > { %7479 = vmatmul.msk.bf16.gmra.mxu3 %vm835_vm2, %v8546_v61  ;;  %v1077_v49 = vadd.f32 %v1076_v34, %v936_v57  ;;  %v1407_v57 = vsel %vm707_vm0, %v1404_v52, %v1406_v26 }
 0x110   : > { %v1457_v31 = vpop.f32.mrf.mxu3 }
 0x111   : > { %v8568_v43 = vadd.f32 %v1457_v31, %v1382_v18 }
 0x112   : > { %v1327_v47 = vpop.f32.mrf.mxu2 }
 0x113   : > { %v1385_v15 = vadd.f32 %v1327_v47, %v1077_v49  ;;  %v939_v42 = vpop.f32.mrf.mxu0  ;;  %v8583_v49 = vpack.c.bf16 %v1407_v57, %v1405_v13 }
 0x114   : > { %v1079_v21 = vpop.f32.mrf.mxu1 }
 0x115   : > { %v1080_v27 = vadd.f32 %v1079_v21, %v939_v42 }
 0x116   : > { %7481 = vmatmul.msk.bf16.vlgmr.msrb.gmra.mxu0 %vm835_vm2, %v8203_v38 }
 0x117   : > { %7497 = vmatmul.msk.bf16.vlgmr.msrb.gmra.mxu1 %vm835_vm2, %v8205_v40  ;;  %7514 = vmatmul.msk.bf16.gmra.mxu2 %vm835_vm2, %v8245_v1 }
 0x118   : > { %v1459_v34 = vpop.f32.mrf.mxu3 }
 0x119   : > { %v8581_v18 = vadd.f32 %v1459_v34, %v1383_v28 }
 0x11a   : > { %v1330_v31 = vpop.f32.mrf.mxu2 }
 0x11b   : > { %v1386_v47 = vadd.f32 %v1330_v31, %v1080_v27  ;;  %v941_v42 = vpop.f32.mrf.mxu0 }
 0x11c   : > { %v1081_v52 = vpop.f32.mrf.mxu1 }
 0x11d   : > { %7480 = vmatmul.msk.bf16.gmra.mxu3 %vm835_vm2, %v8583_v49  ;;  %v1082_v26 = vadd.f32 %v1081_v52, %v941_v42 }
 0x120   : > { %v1462_v38 = vpop.f32.mrf.mxu3 }
 0x121   : > { %v8587_v21 = vadd.f32 %v1462_v38, %v1384_v46 }
 0x122   : > { %v1332_v10 = vpop.f32.mrf.mxu2 }
 0x123   : > { %v1387_v40 = vadd.f32 %v1332_v10, %v1082_v26  ;;  %v944_v20 = vpop.f32.mrf.mxu0 }
 0x124   : > { %v1084_v4 = vpop.f32.mrf.mxu1 }
 0x125   : > { %v1085_v1 = vadd.f32 %v1084_v4, %v944_v20 }
 0x126   : > { %7482 = vmatmul.msk.bf16.gmra.mxu0 %vm835_vm2, %v8221_v51 }
 0x127   : > { %7498 = vmatmul.msk.bf16.gmra.mxu1 %vm835_vm2, %v8225_v53  ;;  %7515 = vmatmul.msk.bf16.gmra.mxu2 %vm835_vm2, %v8267_v19 }
 0x128   : > { %v1464_v13 = vpop.f32.mrf.mxu3 }
 0x129   : > { %v8595_v28 = vadd.f32 %v1464_v13, %v1385_v15 }
 0x12a   : > { %v1335_v27 = vpop.f32.mrf.mxu2 }
 0x12b   : > { %v1388_v46 = vadd.f32 %v1335_v27, %v1085_v1  ;;  %v946_v57 = vpop.f32.mrf.mxu0 }
 0x12c   : > { %v1086_v10 = vpop.f32.mrf.mxu1 }
 0x12d   : > { %7529 = vmatmul.msk.bf16.vlgmr.msra.gmra.mxu3 %vm835_vm2, %v8221_v51  ;;  %v1087_v4 = vadd.f32 %v1086_v10, %v946_v57 }
 0x130   : > { %v1467_v20 = vpop.f32.mrf.mxu3 }
 0x131   : > { %v8599_v34 = vadd.f32 %v1467_v20, %v1386_v47 }
 0x132   : > { %v1337_v31 = vpop.f32.mrf.mxu2 }
 0x133   : > { %v1389_v42 = vadd.f32 %v1337_v31, %v1087_v4  ;;  %v949_v52 = vpop.f32.mrf.mxu0 }
 0x134   : > { %v1089_v26 = vpop.f32.mrf.mxu1 }
 0x135   : > { %v1090_v38 = vadd.f32 %v1089_v26, %v949_v52 }
 0x136   : > { %7483 = vmatmul.msk.bf16.gmra.mxu0 %vm835_vm2, %v8243_v0 }
 0x137   : > { %7499 = vmatmul.msk.bf16.gmra.mxu1 %vm835_vm2, %v8247_v2  ;;  %7516 = vmatmul.msk.bf16.gmra.mxu2 %vm835_vm2, %v8289_v36 }
 0x138   : > { %v1469_v19 = vpop.f32.mrf.mxu3 }
 0x139   : > { %v8607_v51 = vadd.f32 %v1469_v19, %v1387_v40 }
 0x13a   : > { %v1340_v15 = vpop.f32.mrf.mxu2 }
 0x13b   : > { %v1390_v47 = vadd.f32 %v1340_v15, %v1090_v38  ;;  %v951_v1 = vpop.f32.mrf.mxu0 }
 0x13c   : > { %v1091_v13 = vpop.f32.mrf.mxu1 }
 0x13d   : > { %7530 = vmatmul.msk.bf16.gmra.mxu3 %vm835_vm2, %v8243_v0  ;;  %v1092_v27 = vadd.f32 %v1091_v13, %v951_v1 }
 0x140   : > { %v1472_v57 = vpop.f32.mrf.mxu3 }
 0x141   : > { %v8611_v10 = vadd.f32 %v1472_v57, %v1388_v46 }
 0x142   : > { %v1342_v4 = vpop.f32.mrf.mxu2 }
 0x143   : > { %v1391_v20 = vadd.f32 %v1342_v4, %v1092_v27  ;;  %v954_v31 = vpop.f32.mrf.mxu0 }
 0x144   : > { %v1094_v52 = vpop.f32.mrf.mxu1 }
 0x145   : > { %v1095_v26 = vadd.f32 %v1094_v52, %v954_v31 }
 0x146   : > { %7484 = vmatmul.msk.bf16.gmra.mxu0 %vm835_vm2, %v8265_v16 }
 0x147   : > { %7500 = vmatmul.msk.bf16.gmra.mxu1 %vm835_vm2, %v8269_v23  ;;  %7517 = vmatmul.msk.bf16.gmra.mxu2 %vm835_vm2, %v8311_v54 }
 0x148   : > { %v1474_v36 = vpop.f32.mrf.mxu3 }
 0x149   : > { %v8619_v0 = vadd.f32 %v1474_v36, %v1389_v42 }
 0x14a   : > { %v1345_v40 = vpop.f32.mrf.mxu2 }
 0x14b   : > { %v1392_v46 = vadd.f32 %v1345_v40, %v1095_v26  ;;  %v956_v38 = vpop.f32.mrf.mxu0 }
 0x14c   : > { %v1096_v19 = vpop.f32.mrf.mxu1 }
 0x14d   : > { %7531 = vmatmul.msk.bf16.gmra.mxu3 %vm835_vm2, %v8265_v16  ;;  %v1097_v15 = vadd.f32 %v1096_v19, %v956_v38 }
 0x150   : > { %v1477_v1 = vpop.f32.mrf.mxu3 }
 0x151   : > { %v8623_v13 = vadd.f32 %v1477_v1, %v1390_v47 }
 0x152   : > { %v1347_v27 = vpop.f32.mrf.mxu2 }
 0x153   : > { %v1393_v57 = vadd.f32 %v1347_v27, %v1097_v15  ;;  %v959_v4 = vpop.f32.mrf.mxu0 }
 0x154   : > { %v1099_v31 = vpop.f32.mrf.mxu1 }
 0x155   : > { %v1100_v52 = vadd.f32 %v1099_v31, %v959_v4 }
 0x156   : > { %7485 = vmatmul.msk.bf16.gmra.mxu0 %vm835_vm2, %v8287_v35 }
 0x157   : > { %7501 = vmatmul.msk.bf16.gmra.mxu1 %vm835_vm2, %v8291_v37  ;;  %7518 = vmatmul.msk.bf16.gmra.mxu2 %vm835_vm2, %v8333_v7 }
 0x158   : > { %v1479_v54 = vpop.f32.mrf.mxu3 }
 0x159   : > { %v8631_v16 = vadd.f32 %v1479_v54, %v1391_v20 }
 0x15a   : > { %v1350_v42 = vpop.f32.mrf.mxu2 }
 0x15b   : > { %v1394_v47 = vadd.f32 %v1350_v42, %v1100_v52  ;;  %v961_v26 = vpop.f32.mrf.mxu0 }
 0x15c   : > { %v1101_v36 = vpop.f32.mrf.mxu1 }
 0x15d   : > { %7532 = vmatmul.msk.bf16.gmra.mxu3 %vm835_vm2, %v8287_v35  ;;  %v1102_v40 = vadd.f32 %v1101_v36, %v961_v26 }
 0x160   : > { %v1482_v38 = vpop.f32.mrf.mxu3 }
 0x161   : > { %v8635_v19 = vadd.f32 %v1482_v38, %v1392_v46 }
 0x162   : > { %v1352_v15 = vpop.f32.mrf.mxu2 }
 0x163   : > { %v1395_v1 = vadd.f32 %v1352_v15, %v1102_v40  ;;  %v964_v27 = vpop.f32.mrf.mxu0 }
 0x164   : > { %v1104_v4 = vpop.f32.mrf.mxu1 }
 0x165   : > { %v1105_v31 = vadd.f32 %v1104_v4, %v964_v27 }
 0x166   : > { %7486 = vmatmul.msk.bf16.gmra.mxu0 %vm835_vm2, %v8309_v50 }
 0x167   : > { %7502 = vmatmul.msk.bf16.gmra.mxu1 %vm835_vm2, %v8313_v55  ;;  %7519 = vmatmul.msk.bf16.gmra.mxu2 %vm835_vm2, %v8355_v32 }
 0x168   : > { %v1484_v7 = vpop.f32.mrf.mxu3 }
 0x169   : > { %v8643_v35 = vadd.f32 %v1484_v7, %v1393_v57 }
 0x16a   : > { %v1355_v20 = vpop.f32.mrf.mxu2 }
 0x16b   : > { %v1396_v46 = vadd.f32 %v1355_v20, %v1105_v31  ;;  %v966_v52 = vpop.f32.mrf.mxu0 }
 0x16c   : > { %v1106_v54 = vpop.f32.mrf.mxu1 }
 0x16d   : > { %7533 = vmatmul.msk.bf16.gmra.mxu3 %vm835_vm2, %v8309_v50  ;;  %v1107_v42 = vadd.f32 %v1106_v54, %v966_v52 }
 0x170   : > { %v1487_v26 = vpop.f32.mrf.mxu3 }
 0x171   : > { %v8647_v36 = vadd.f32 %v1487_v26, %v1394_v47 }
 0x172   : > { %v1357_v40 = vpop.f32.mrf.mxu2 }
 0x173   : > { %v1397_v38 = vadd.f32 %v1357_v40, %v1107_v42  ;;  %v969_v15 = vpop.f32.mrf.mxu0 }
 0x174   : > { %v1109_v27 = vpop.f32.mrf.mxu1 }
 0x175   : > { %v1110_v4 = vadd.f32 %v1109_v27, %v969_v15 }
 0x176   : > { %7487 = vmatmul.msk.bf16.gmra.mxu0 %vm835_vm2, %v8331_v5 }
 0x177   : > { %7503 = vmatmul.msk.bf16.gmra.mxu1 %vm835_vm2, %v8335_v8  ;;  %7520 = vmatmul.msk.bf16.gmra.mxu2 %vm835_vm2, %v8379_v11 }
 0x178   : > { %v1489_v32 = vpop.f32.mrf.mxu3 }
 0x179   : > { %v8655_v50 = vadd.f32 %v1489_v32, %v1395_v1 }
 0x17a   : > { %v1360_v57 = vpop.f32.mrf.mxu2 }
 0x17b   : > { %v1398_v47 = vadd.f32 %v1360_v57, %v1110_v4  ;;  %v971_v31 = vpop.f32.mrf.mxu0 }
 0x17c   : > { %v1111_v7 = vpop.f32.mrf.mxu1 }
 0x17d   : > { %7534 = vmatmul.msk.bf16.gmra.mxu3 %vm835_vm2, %v8331_v5  ;;  %v1112_v20 = vadd.f32 %v1111_v7, %v971_v31 }
 0x180   : > { %v1492_v52 = vpop.f32.mrf.mxu3 }
 0x181   : > { %v8659_v54 = vadd.f32 %v1492_v52, %v1396_v46 }
 0x182   : > { %v1362_v42 = vpop.f32.mrf.mxu2 }
 0x183   : > { %v1399_v26 = vadd.f32 %v1362_v42, %v1112_v20  ;;  %v974_v40 = vpop.f32.mrf.mxu0 }
 0x184   : > { %v1114_v15 = vpop.f32.mrf.mxu1 }
 0x185   : > { %v1115_v27 = vadd.f32 %v1114_v15, %v974_v40 }
 0x186   : > { %7488 = vmatmul.msk.bf16.gmra.mxu0 %vm835_vm2, %v8353_v30 }
 0x187   : > { %7504 = vmatmul.msk.bf16.gmra.mxu1 %vm835_vm2, %v8357_v33  ;;  %7521 = vmatmul.msk.bf16.gmra.mxu2 %vm835_vm2, %v8405_v63 }
 0x188   : > { %v1494_v11 = vpop.f32.mrf.mxu3 }
 0x189   : > { %v8667_v5 = vadd.f32 %v1494_v11, %v1397_v38 }
 0x18a   : > { %v1816_v1 = vpop.f32.mrf.mxu2 }
 0x18b   : > { %v976_v46 = vpop.f32.mrf.mxu0 }
 0x18c   : > { %v1116_v4 = vpop.f32.mrf.mxu1 }
 0x18d   : > { %7535 = vmatmul.msk.bf16.gmra.mxu3 %vm835_vm2, %v8353_v30  ;;  %v1117_v32 = vadd.f32 %v1116_v4, %v976_v46  ;;  %v1400_v46 = vadd.f32 %v8369_v58, %v1115_v27 }
 0x190   : > { %v1497_v57 = vpop.f32.mrf.mxu3 }
 0x191   : > { %v8671_v31 = vadd.f32 %v1497_v57, %v1398_v47 }
 0x192   : > { %v1818_v7 = vpop.f32.mrf.mxu2 }
 0x193   : > { %v1556_v20 = vpop.f32.mrf.mxu0 }
 0x194   : > { %v1636_v52 = vadd.f32 %v1556_v20, %v8397_v48  ;;  %v1691_v42 = vpop.f32.mrf.mxu1 }
 0x196   : > { %v1771_v40 = vadd.f32 %v1691_v42, %v1636_v52  ;;  %7489 = vmatmul.msk.bf16.gmra.mxu0 %vm835_vm2, %v8377_v3 }
 0x197   : > { %7505 = vmatmul.msk.bf16.gmra.mxu1 %vm835_vm2, %v8381_v12  ;;  %7522 = vmatmul.msk.bf16.gmra.mxu2 %vm835_vm2, %v8435_v45 }
 0x198   : > { %v1499_v63 = vpop.f32.mrf.mxu3  ;;  %v1896_v38 = vadd.f32 %v1816_v1, %v1771_v40  ;;  %v1401_v40 = vadd.f32 %v8385_v24, %v1117_v32  ;;  %v12486_v24 = vld [vmem:[#allocation9_spill] sm:$0xff] }
 0x199   : > { %v8680_v30 = vadd.f32 %v1499_v63, %v1399_v26 }
 0x19a   : > { %v1821_v47 = vpop.f32.mrf.mxu2 }
 0x19b   : > { %v1558_v15 = vpop.f32.mrf.mxu0 }
 0x19c   : > { %v1637_v48 = vadd.f32 %v1558_v15, %v8415_v25  ;;  %v1693_v11 = vpop.f32.mrf.mxu1 }
 0x19d   : > { %7536 = vmatmul.msk.bf16.gmra.mxu3 %vm835_vm2, %v8377_v3 }
 0x19e   : > { %v1772_v4 = vadd.f32 %v1693_v11, %v1637_v48 }
 0x1a0   : > { %v1502_v57 = vpop.f32.mrf.mxu3  ;;  %v1897_v52 = vadd.f32 %v1818_v7, %v1772_v4 }
 0x1a1   : > { %v8686_v20 = vadd.f32 %v1502_v57, %v1400_v46 }
 0x1a2   : > { %v1823_v42 = vpop.f32.mrf.mxu2 }
 0x1a3   : > { %v1561_v45 = vpop.f32.mrf.mxu0 }
 0x1a4   : > { %v1638_v26 = vadd.f32 %v1561_v45, %v8427_v62  ;;  %v1696_v1 = vpop.f32.mrf.mxu1  ;;  %v12487_v45 = vld [vmem:[#allocation10_spill] sm:$0xff] }
 0x1a6   : > { %v1773_v63 = vadd.f32 %v1696_v1, %v1638_v26  ;;  %7490 = vmatmul.msk.bf16.gmra.mxu0 %vm835_vm2, %v8403_v60 }
 0x1a7   : > { %7506 = vmatmul.msk.bf16.gmra.mxu1 %vm835_vm2, %v8407_v9  ;;  %7523 = vmatmul.msk.bf16.gmra.mxu2 %vm835_vm2, %v8461_v44 }
 0x1a8   : > { %v1504_v3 = vpop.f32.mrf.mxu3  ;;  %v1898_v25 = vadd.f32 %v1821_v47, %v1773_v63  ;;  %v12488_v47 = vld [vmem:[#allocation7_spill] sm:$0xff]  ;;  %v12489_v63 = vld [vmem:[#allocation8_spill] sm:$0xff] }
 0x1a9   : > { %v8696_v58 = vadd.f32 %v1504_v3, %v1401_v40 }
 0x1aa   : > { %v1826_v27 = vpop.f32.mrf.mxu2 }
 0x1ab   : > { %v1563_v7 = vpop.f32.mrf.mxu0 }
 0x1ac   : > { %v1639_v62 = vadd.f32 %v1563_v7, %v12486_v24  ;;  %v1698_v32 = vpop.f32.mrf.mxu1 }
 0x1ad   : > { %7537 = vmatmul.msk.bf16.gmra.mxu3 %vm835_vm2, %v8403_v60  ;;  %v12490_v60 = vld [vmem:[#allocation16_spill] sm:$0xff] }
 0x1ae   : > { %v1774_v15 = vadd.f32 %v1698_v32, %v1639_v62 }
 0x1b0   : > { %v1941_v48 = vpop.f32.mrf.mxu3  ;;  %v1899_v46 = vadd.f32 %v1823_v42, %v1774_v15  ;;  %v674_v42 = vld [vmem:[%s12313_s4 + $0x20] sm:$0x7] }
 0x1b1   : > { %v8701_v11 = vadd.f32 %v1941_v48, %v1896_v38  ;;  %v2053_v7 = vpack.c.bf16 %v674_v42, %v674_v42  ;;  %v12492_v15 = vld [vmem:[#allocation13_spill] sm:$0xff] }
 0x1b2   : > { %v1828_v4 = vpop.f32.mrf.mxu2 }
 0x1b3   : > { %v1566_v57 = vpop.f32.mrf.mxu0  ;;  %v2055_v32 = vand.u32 %v2053_v7, %v8144_v6 }
 0x1b4   : > { %v1640_v44 = vadd.f32 %v1566_v57, %v12487_v45  ;;  %v1701_v26 = vpop.f32.mrf.mxu1 }
 0x1b5   : > { %2064 = vmatpush.bf16.msra.mxu0 %v2055_v32  ;;  %v12496_v32 = vld [vmem:[#allocation18_spill] sm:$0xff] }
 0x1b6   : > { %v1775_v1 = vadd.f32 %v1701_v26, %v1640_v44  ;;  %7491 = vmatmul.msk.bf16.gmra.mxu0 %vm835_vm2, %v12488_v47 }
 0x1b7   : > { %7507 = vmatmul.msk.bf16.gmra.mxu1 %vm835_vm2, %v12489_v63  ;;  %7524 = vmatmul.msk.bf16.gmra.mxu2 %vm835_vm2, %v12490_v60 }
 0x1b8   : > { %v1943_v40 = vpop.f32.mrf.mxu3  ;;  %v1900_v38 = vadd.f32 %v1826_v27, %v1775_v1 }
 0x1b9   : > { %v8710_v3 = vadd.f32 %v1943_v40, %v1897_v52  ;;  %v12493_v40 = vld [vmem:[#allocation14_spill] sm:$0xff] }
 0x1ba   : > { %v1831_v24 = vpop.f32.mrf.mxu2 }
 0x1bb   : > { %12491 = vst [vmem:[#allocation9_spill] sm:$0xff] %v8710_v3  ;;  %v1568_v62 = vpop.f32.mrf.mxu0  ;;  %v12494_v3 = vld [vmem:[#allocation11_spill] sm:$0xff] }
 0x1bc   : > { %v1641_v48 = vadd.f32 %v1568_v62, %v12492_v15  ;;  %v1703_v57 = vpop.f32.mrf.mxu1 }
 0x1bd   : > { %7538 = vmatmul.msk.bf16.gmra.mxu3 %vm835_vm2, %v12488_v47  ;;  %v12495_v47 = vld [vmem:[#allocation12_spill] sm:$0xff] }
 0x1be   : > { %v1776_v45 = vadd.f32 %v1703_v57, %v1641_v48 }
 0x1c0   : > { %v1946_v52 = vpop.f32.mrf.mxu3  ;;  %v1901_v27 = vadd.f32 %v1828_v4, %v1776_v45 }
 0x1c1   : > { %v8719_v44 = vadd.f32 %v1946_v52, %v1898_v25 }
 0x1c2   : > { %v1833_v26 = vpop.f32.mrf.mxu2 }
 0x1c3   : > { %v1571_v1 = vpop.f32.mrf.mxu0 }
 0x1c4   : > { %v1642_v60 = vadd.f32 %v1571_v1, %v12493_v40  ;;  %v1706_v42 = vpop.f32.mrf.mxu1 }
 0x1c6   : > { %v1777_v63 = vadd.f32 %v1706_v42, %v1642_v60  ;;  %7492 = vmatmul.msk.bf16.gmra.mxu0 %vm835_vm2, %v12494_v3 }
 0x1c7   : > { %7508 = vmatmul.msk.bf16.gmra.mxu1 %vm835_vm2, %v12495_v47  ;;  %7525 = vmatmul.msk.bf16.gmra.mxu2 %vm835_vm2, %v8520_v14 }
 0x1c8   : > { %v1948_v6 = vpop.f32.mrf.mxu3  ;;  %v1902_v25 = vadd.f32 %v1831_v24, %v1777_v63  ;;  %v12497_v24 = vld [vmem:[#allocation15_spill] sm:$0xff] }
 0x1c9   : > { %v8728_v7 = vadd.f32 %v1948_v6, %v1899_v46 }
 0x1ca   : > { %v1836_v4 = vpop.f32.mrf.mxu2 }
 0x1cb   : > { %v1573_v62 = vpop.f32.mrf.mxu0 }
 0x1cc   : > { %v1643_v15 = vadd.f32 %v1573_v62, %v12496_v32  ;;  %v1708_v48 = vpop.f32.mrf.mxu1 }
 0x1cd   : > { %7539 = vmatmul.msk.bf16.gmra.mxu3 %vm835_vm2, %v12494_v3  ;;  %v12498_v3 = vld [vmem:[#allocation17_spill] sm:$0xff] }
 0x1ce   : > { %v1778_v57 = vadd.f32 %v1708_v48, %v1643_v15 }
 0x1d0   : > { %v1951_v45 = vpop.f32.mrf.mxu3  ;;  %v1903_v1 = vadd.f32 %v1833_v26, %v1778_v57 }
 0x1d1   : > { %v8733_v52 = vadd.f32 %v1951_v45, %v1900_v38 }
 0x1d2   : > { %v8735_v40 = vpop.f32.mrf.mxu2 }
 0x1d3   : > { %v1576_v60 = vpop.f32.mrf.mxu0 }
 0x1d4   : > { %v1644_v14 = vadd.f32 %v1576_v60, %v8508_v41  ;;  %v1711_v46 = vpop.f32.mrf.mxu1 }
 0x1d6   : > { %v1779_v63 = vadd.f32 %v1711_v46, %v1644_v14  ;;  %7493 = vmatmul.msk.bf16.gmra.mxu0 %vm835_vm2, %v12497_v24 }
 0x1d7   : > { %7509 = vmatmul.msk.bf16.gmra.mxu1 %vm835_vm2, %v12498_v3  ;;  %7526 = vmatmul.msk.bf16.gmra.mxu2 %vm835_vm2, %v8546_v61 }
 0x1d8   : > { %v1953_v42 = vpop.f32.mrf.mxu3  ;;  %v1904_v26 = vadd.f32 %v1836_v4, %v1779_v63 }
 0x1d9   : > { %v8744_v38 = vadd.f32 %v1953_v42, %v1901_v27 }
 0x1da   : > { %v1841_v6 = vpop.f32.mrf.mxu2 }
 0x1db   : > { %v1578_v62 = vpop.f32.mrf.mxu0 }
 0x1dc   : > { %v8749_v41 = vadd.f32 %v1578_v62, %v8531_v17  ;;  %v8751_v32 = vpop.f32.mrf.mxu1 }
 0x1dd   : > { %7540 = vmatmul.msk.bf16.gmra.mxu3 %vm835_vm2, %v12497_v24 }
 0x1e0   : > { %v1956_v15 = vpop.f32.mrf.mxu3 }
 0x1e1   : > { %v8753_v48 = vadd.f32 %v1956_v15, %v1902_v25 }
 0x1e2   : > { %v8755_v57 = vpop.f32.mrf.mxu2 }
 0x1e3   : > { %12499 = vst [vmem:[#allocation10_spill] sm:$0xff] %v8755_v57  ;;  %v1581_v45 = vpop.f32.mrf.mxu0 }
 0x1e4   : > { %v1646_v61 = vadd.f32 %v1581_v45, %v8537_v56  ;;  %v1716_v27 = vpop.f32.mrf.mxu1 }
 0x1e6   : > { %v1781_v4 = vadd.f32 %v1716_v27, %v1646_v61  ;;  %7494 = vmatmul.msk.bf16.gmra.mxu0 %vm835_vm2, %v8515_v39 }
 0x1e7   : > { %7510 = vmatmul.msk.bf16.gmra.mxu1 %vm835_vm2, %v8522_v29  ;;  %7527 = vmatmul.msk.bf16.gmra.mxu2 %vm835_vm2, %v8583_v49 }
 0x1e8   : > { %v1958_v60 = vpop.f32.mrf.mxu3  ;;  %v1906_v25 = vadd.f32 %v1841_v6, %v1781_v4 }
 0x1e9   : > { %v8764_v17 = vadd.f32 %v1958_v60, %v1903_v1  ;;  %v12505_v60 = vld [vmem:[#allocation19_spill] sm:$0xff] }
 0x1ea   : > { %v1846_v14 = vpop.f32.mrf.mxu2 }
 0x1eb   : > { %v1583_v46 = vpop.f32.mrf.mxu0 }
 0x1ec   : > { %v8769_v56 = vadd.f32 %v1583_v46, %v8558_v22  ;;  %v8771_v63 = vpop.f32.mrf.mxu1  ;;  %v12502_v22 = vld [vmem:[#allocation4_spill] sm:$0xff]  ;;  %v1668_v46 = vrot.slane %v12505_v60, 1 }
 0x1ed   : > { %7541 = vmatmul.msk.bf16.gmra.mxu3 %vm835_vm2, %v8515_v39  ;;  %v12501_v39 = vld [vmem:[#allocation6_spill] sm:$0xff] }
 0x1f0   : > { %v1961_v24 = vpop.f32.mrf.mxu3 }
 0x1f1   : > { %v8773_v42 = vadd.f32 %v1961_v24, %v1904_v26  ;;  %v12506_v24 = vld [vmem:[#allocation20_spill] sm:$0xff] }
 0x1f2   : > { %v8775_v62 = vpop.f32.mrf.mxu2 }
 0x1f3   : > { %12500 = vst [vmem:[#allocation7_spill] sm:$0xff] %v8775_v62  ;;  %v1586_v15 = vpop.f32.mrf.mxu0 }
 0x1f4   : > { %v1648_v49 = vadd.f32 %v1586_v15, %v8568_v43  ;;  %v1721_v1 = vpop.f32.mrf.mxu1  ;;  %v1669_v15 = vrot.slane %v12506_v24, 1 }
 0x1f6   : > { %v1783_v6 = vadd.f32 %v1721_v1, %v1648_v49  ;;  %7495 = vmatmul.msk.bf16.gmra.mxu0 %vm835_vm2, %v8544_v59  ;;  %v1670_v62 = vsel %vm1119_vm3, %v1668_v46, %v1669_v15 }
 0x1f7   : > { %7511 = vmatmul.msk.bf16.gmra.mxu1 %vm835_vm2, %v12501_v39  ;;  %7528 = vmatmul.msk.bf16.gmra.mxu2 %vm835_vm2, %v12502_v22 }
 0x1f8   : > { %v8780_v45 = vpop.f32.mrf.mxu3  ;;  %v1908_v26 = vadd.f32 %v1846_v14, %v1783_v6  ;;  %v12507_v14 = vld [vmem:[#allocation3_spill] sm:$0xff] }
 0x1f9   : > { %v1671_v6 = vsel %vm1119_vm3, %v1669_v15, %v12507_v14 }
 0x1fa   : > { %v1851_v61 = vpop.f32.mrf.mxu2 }
 0x1fb   : > { %v1588_v27 = vpop.f32.mrf.mxu0 }
 0x1fc   : > { %v8789_v43 = vadd.f32 %v1588_v27, %v8581_v18  ;;  %v8791_v4 = vpop.f32.mrf.mxu1  ;;  %v8804_v27 = vpack.c.bf16 %v1671_v6, %v1670_v62 }
 0x1fd   : > { %7542 = vmatmul.msk.bf16.gmra.mxu3 %vm835_vm2, %v8544_v59  ;;  %12504 = vst [vmem:[#allocation13_spill] sm:$0xff] %v8791_v4  ;;  %v1539_v59 = vpack.c.bf16 %v12506_v24, %v12505_v60 }
 0x1fe   : > { %12503 = vst [vmem:[#allocation16_spill] sm:$0xff] %v8789_v43 }
 0x200   : > { %v1966_v49 = vpop.f32.mrf.mxu3 }
 0x201   : > { %v8795_v1 = vadd.f32 %v1966_v49, %v1906_v25 }
 0x202   : > { %v8802_v57 = vpop.f32.mrf.mxu2 }
 0x203   : > { %12508 = vst [vmem:[#allocation14_spill] sm:$0xff] %v8802_v57  ;;  %v1591_v18 = vpop.f32.mrf.mxu0 }
 0x204   : > { %v1650_v4 = vadd.f32 %v1591_v18, %v8587_v21  ;;  %v1726_v43 = vpop.f32.mrf.mxu1 }
 0x206   : > { %v1785_v39 = vadd.f32 %v1726_v43, %v1650_v4  ;;  %7496 = vmatmul.msk.bf16.gmra.mxu0 %vm835_vm2, %v1539_v59 }
 0x207   : > { %7512 = vmatmul.msk.bf16.gmra.mxu1 %vm835_vm2, %v8804_v27 }
 0x208   : > { %v8808_v25 = vpop.f32.mrf.mxu3  ;;  %v1910_v46 = vadd.f32 %v1851_v61, %v1785_v39 }
 0x20a   : > { %v1856_v15 = vpop.f32.mrf.mxu2 }
 0x20b   : > { %v1593_v49 = vpop.f32.mrf.mxu0 }
 0x20c   : > { %v8814_v60 = vadd.f32 %v1593_v49, %v8595_v28  ;;  %v8816_v62 = vpop.f32.mrf.mxu1  ;;  %v12511_v49 = vmov 0.0|0.0  }
 0x20d   : > { %7543 = vmatmul.msk.bf16.gmra.mxu3 %vm835_vm2, %v1539_v59  ;;  %12509 = vst [vmem:[#allocation11_spill] sm:$0xff] %v8816_v62 }
 0x210   : > { %v1971_v21 = vpop.f32.mrf.mxu3 }
 0x211   : > { %v8818_v24 = vadd.f32 %v1971_v21, %v1908_v26 }
 0x212   : > { %v8820_v43 = vpop.f32.mrf.mxu2 }
 0x213   : > { %12510 = vst [vmem:[#allocation12_spill] sm:$0xff] %v8820_v43  ;;  %v1596_v4 = vpop.f32.mrf.mxu0 }
 0x214   : > { %v1652_v6 = vadd.f32 %v1596_v4, %v8599_v34  ;;  %v1731_v18 = vpop.f32.mrf.mxu1 }
 0x216   : > { %v1787_v57 = vadd.f32 %v1731_v18, %v1652_v6  ;;  %7544 = vmatmul.msk.bf16.vlgmr.msra.gmra.mxu0 %vm835_vm2, %v8225_v53 }
 0x218   : > { %v8825_v39 = vpop.f32.mrf.mxu3  ;;  %v1912_v61 = vadd.f32 %v1856_v15, %v1787_v57 }
 0x21a   : > { %v1861_v28 = vpop.f32.mrf.mxu2 }
 0x21b   : > { %v1598_v59 = vpop.f32.mrf.mxu0 }
 0x21c   : > { %v8829_v26 = vadd.f32 %v1598_v59, %v8607_v51  ;;  %v8831_v21 = vpop.f32.mrf.mxu1 }
 0x21d   : > { %2015 = vmatmul.bf16.gmra.mxu3 %v12511_v49  ;;  %12513 = vst [vmem:[#allocation15_spill] sm:$0xff] %v8831_v21 }
 0x21e   : > { %12512 = vst [vmem:[#allocation18_spill] sm:$0xff] %v8829_v26 }
 0x220   : > { %v1976_v43 = vpop.f32.mrf.mxu3 }
 0x221   : > { %v8833_v62 = vadd.f32 %v1976_v43, %v1910_v46 }
 0x222   : > { %v8835_v34 = vpop.f32.mrf.mxu2 }
 0x223   : > { %12514 = vst [vmem:[#allocation17_spill] sm:$0xff] %v8835_v34  ;;  %v1601_v4 = vpop.f32.mrf.mxu0 }
 0x224   : > { %v1654_v53 = vadd.f32 %v1601_v4, %v8611_v10  ;;  %v1736_v6 = vpop.f32.mrf.mxu1 }
 0x226   : > { %v1789_v18 = vadd.f32 %v1736_v6, %v1654_v53  ;;  %7545 = vmatmul.msk.bf16.gmra.mxu0 %vm835_vm2, %v8247_v2 }
 0x228   : > { %v8840_v57 = vpop.f32.mrf.mxu3  ;;  %v1914_v15 = vadd.f32 %v1861_v28, %v1789_v18 }
 0x22a   : > { %v1866_v51 = vpop.f32.mrf.mxu2 }
 0x22b   : > { %v1603_v59 = vpop.f32.mrf.mxu0 }
 0x22c   : > { %v8843_v21 = vadd.f32 %v1603_v59, %v8619_v0  ;;  %v8845_v46 = vpop.f32.mrf.mxu1  ;;  %v2247_v0 = vld [vmem:[%s12315_s6 + $0x10] sm:$0xff] }
 0x230   : > { %v1981_v43 = vpop.f32.mrf.mxu3 }
 0x231   : > { %v8847_v34 = vadd.f32 %v1981_v43, %v1912_v61  ;;  %v2248_v61 = vld [vmem:[%s12315_s6 + $0x18] sm:$0xff] }
 0x232   : > { %v8849_v26 = vpop.f32.mrf.mxu2  ;;  %v2415_v18 = vpack.c.bf16 %v2248_v61, %v2247_v0 }
 0x233   : > { %12515 = vst [vmem:[#allocation19_spill] sm:$0xff] %v8849_v26  ;;  %v1606_v10 = vpop.f32.mrf.mxu0 }
 0x234   : > { %v1656_v4 = vadd.f32 %v1606_v10, %v8623_v13  ;;  %v1741_v53 = vpop.f32.mrf.mxu1  ;;  %2471 = vmatpush.bf16.msra.mxu1 %v2415_v18 }
 0x236   : > { %v1791_v2 = vadd.f32 %v1741_v53, %v1656_v4  ;;  %7546 = vmatmul.msk.bf16.gmra.mxu0 %vm835_vm2, %v8269_v23 }
 0x237   : > { %2472 = vmatmul.bf16.vlgmr.msra.gmra.mxu1 %v12511_v49 }
 0x238   : > { %v8854_v28 = vpop.f32.mrf.mxu3  ;;  %v1916_v6 = vadd.f32 %v1866_v51, %v1791_v2 }
 0x23a   : > { %v1871_v59 = vpop.f32.mrf.mxu2 }
 0x23b   : > { %v1608_v43 = vpop.f32.mrf.mxu0 }
 0x23c   : > { %v8863_v13 = vadd.f32 %v1608_v43, %v8631_v16  ;;  %v8865_v10 = vpop.f32.mrf.mxu1 }
 0x23d   : > { %12516 = vst [vmem:[#allocation20_spill] sm:$0xff] %v8865_v10 }
 0x240   : > { %v1986_v23 = vpop.f32.mrf.mxu3 }
 0x241   : > { %v8868_v51 = vadd.f32 %v1986_v23, %v1914_v15 }
 0x242   : > { %v8870_v4 = vpop.f32.mrf.mxu2 }
 0x243   : > { %12517 = vst [vmem:[#allocation21_spill] sm:$0xff] %v8870_v4  ;;  %v1611_v53 = vpop.f32.mrf.mxu0 }
 0x244   : > { %v1658_v2 = vadd.f32 %v1611_v53, %v8635_v19  ;;  %v1746_v26 = vpop.f32.mrf.mxu1 }
 0x246   : > { %v1793_v0 = vadd.f32 %v1746_v26, %v1658_v2  ;;  %7547 = vmatmul.msk.bf16.gmra.mxu0 %vm835_vm2, %v8291_v37 }
 0x248   : > { %v8875_v61 = vpop.f32.mrf.mxu3  ;;  %v1918_v16 = vadd.f32 %v1871_v59, %v1793_v0 }
 0x24a   : > { %v1876_v18 = vpop.f32.mrf.mxu2 }
 0x24b   : > { %v1613_v43 = vpop.f32.mrf.mxu0 }
 0x24c   : > { %v8878_v49 = vadd.f32 %v1613_v43, %v8643_v35  ;;  %v8880_v15 = vpop.f32.mrf.mxu1 }
 0x24d   : > { %12518 = vst [vmem:[#allocation22_spill] sm:$0xff] %v8880_v15 }
 0x250   : > { %v1991_v23 = vpop.f32.mrf.mxu3 }
 0x251   : > { %v8882_v4 = vadd.f32 %v1991_v23, %v1916_v6 }
 0x252   : > { %v8884_v19 = vpop.f32.mrf.mxu2 }
 0x253   : > { %v1616_v10 = vpop.f32.mrf.mxu0  ;;  %12519 = vst [vmem:[#allocation23_spill] sm:$0xff] %v8884_v19 }
 0x254   : > { %v1660_v26 = vadd.f32 %v1616_v10, %v8647_v36  ;;  %v1751_v53 = vpop.f32.mrf.mxu1  ;;  %v2245_v36 = vld [vmem:[%s12315_s6] sm:$0xff] }
 0x256   : > { %v1795_v37 = vadd.f32 %v1751_v53, %v1660_v26  ;;  %7548 = vmatmul.msk.bf16.gmra.mxu0 %vm835_vm2, %v8313_v55  ;;  %v2246_v55 = vld [vmem:[%s12315_s6 + $0x8] sm:$0xff]  ;;  %v2249_v53 = vld [vmem:[%s12315_s6 + $0x20] sm:$0xff] }
 0x258   : > { %v8889_v59 = vpop.f32.mrf.mxu3  ;;  %v1920_v2 = vadd.f32 %v1876_v18, %v1795_v37  ;;  %v2399_v18 = vpack.c.bf16 %v2246_v55, %v2245_v36  ;;  %v12521_v55 = vld [vmem:[#allocation5_spill] sm:$0xff] }
 0x25a   : > { %v1881_v6 = vpop.f32.mrf.mxu2  ;;  %2607 = vmatpush.bf16.msra.mxu2 %v2399_v18 }
 0x25b   : > { %v1618_v35 = vpop.f32.mrf.mxu0 }
 0x25c   : > { %v8892_v0 = vadd.f32 %v1618_v35, %v8655_v50  ;;  %v8894_v43 = vpop.f32.mrf.mxu1 }
 0x25d   : > { %7575 = vmatmul.msk.bf16.vlgmr.msra.gmra.mxu2 %vm2416_vm4, %v12502_v22 }
 0x260   : > { %v1996_v23 = vpop.f32.mrf.mxu3 }
 0x261   : > { %v8896_v15 = vadd.f32 %v1996_v23, %v1918_v16  ;;  %v2250_v16 = vld [vmem:[%s12315_s6 + $0x28] sm:$0xff] }
 0x262   : > { %v2794_v37 = vpack.c.bf16 %v2250_v16, %v2249_v53  ;;  %v8915_v36 = vpop.f32.mrf.mxu2 }
 0x263   : > { %v1621_v10 = vpop.f32.mrf.mxu0  ;;  %12520 = vst [vmem:[#allocation24_spill] sm:$0xff] %v8915_v36 }
 0x264   : > { %v1662_v26 = vadd.f32 %v1621_v10, %v8659_v54  ;;  %v1756_v50 = vpop.f32.mrf.mxu1  ;;  %2849 = vmatpush.bf16.msrb.mxu3 %v2794_v37 }
 0x266   : > { %v1797_v35 = vadd.f32 %v1756_v50, %v1662_v26  ;;  %7549 = vmatmul.msk.bf16.gmra.mxu0 %vm835_vm2, %v8335_v8 }
 0x267   : > { %7591 = vmatmul.msk.bf16.vlgmr.msrb.gmra.mxu3 %vm2416_vm4, %v12521_v55 }
 0x268   : > { %v8913_v23 = vpop.f32.mrf.mxu3  ;;  %v1922_v54 = vadd.f32 %v1881_v6, %v1797_v35 }
 0x26a   : > { %v1886_v53 = vpop.f32.mrf.mxu2 }
 0x26b   : > { %v1623_v10 = vpop.f32.mrf.mxu0 }
 0x26c   : > { %v8922_v18 = vadd.f32 %v1623_v10, %v8667_v5  ;;  %v8924_v26 = vpop.f32.mrf.mxu1 }
 0x26d   : > { %12522 = vst [vmem:[#allocation25_spill] sm:$0xff] %v8924_v26 }
 0x270   : > { %v2001_v8 = vpop.f32.mrf.mxu3 }
 0x271   : > { %v8926_v50 = vadd.f32 %v2001_v8, %v1920_v2 }
 0x272   : > { %v8933_v5 = vpop.f32.mrf.mxu2 }
 0x273   : > { %v1626_v16 = vpop.f32.mrf.mxu0  ;;  %12523 = vst [vmem:[#allocation26_spill] sm:$0xff] %v8933_v5 }
 0x274   : > { %v1664_v37 = vadd.f32 %v1626_v16, %v8671_v31  ;;  %v1761_v6 = vpop.f32.mrf.mxu1 }
 0x276   : > { %v1799_v35 = vadd.f32 %v1761_v6, %v1664_v37  ;;  %7550 = vmatmul.msk.bf16.gmra.mxu0 %vm835_vm2, %v8357_v33 }
 0x278   : > { %v8931_v22 = vpop.f32.mrf.mxu3  ;;  %v1924_v36 = vadd.f32 %v1886_v53, %v1799_v35 }
 0x27a   : > { %v1891_v6 = vpop.f32.mrf.mxu2 }
 0x27b   : > { %v1628_v19 = vpop.f32.mrf.mxu0 }
 0x27c   : > { %v8936_v10 = vadd.f32 %v1628_v19, %v8680_v30  ;;  %v8938_v2 = vpop.f32.mrf.mxu1 }
 0x27d   : > { %12525 = vst [vmem:[#allocation28_spill] sm:$0xff] %v8938_v2 }
 0x27e   : > { %12524 = vst [vmem:[#allocation27_spill] sm:$0xff] %v8936_v10 }
 0x280   : > { %v2006_v8 = vpop.f32.mrf.mxu3 }
 0x281   : > { %v8940_v26 = vadd.f32 %v2006_v8, %v1922_v54 }
 0x283   : > { %v1631_v31 = vpop.f32.mrf.mxu0 }
 0x284   : > { %v1666_v16 = vadd.f32 %v1631_v31, %v8686_v20  ;;  %v1766_v37 = vpop.f32.mrf.mxu1  ;;  %v8955_v20 = vld [vmem:[%s12314_s5] ss:$0 sm:$0xff] }
 0x286   : > { %v1801_v33 = vadd.f32 %v1766_v37, %v1666_v16  ;;  %7551 = vmatmul.msk.bf16.gmra.mxu0 %vm835_vm2, %v8381_v12  ;;  %v12529_v16 = vld [vmem:[#allocation9_spill] sm:$0xff] }
 0x288   : > { %v8945_v53 = vpop.f32.mrf.mxu3  ;;  %v1926_v35 = vadd.f32 %v1891_v6, %v1801_v33 }
 0x28b   : > { %v1633_v5 = vpop.f32.mrf.mxu0 }
 0x28c   : > { %v8948_v30 = vadd.f32 %v1633_v5, %v8696_v58 }
 0x28e   : > { %12526 = vst [vmem:[#allocation29_spill] sm:$0xff] %v8948_v30 }
 0x290   : > { %v2011_v19 = vpop.f32.mrf.mxu3 }
 0x291   : > { %v8950_v2 = vadd.f32 %v2011_v19, %v1924_v36 }
 0x293   : > { %12527 = vst [vmem:[#allocation30_spill] sm:$0xff] %v8950_v2  ;;  %v2066_v54 = vpop.f32.mrf.mxu0 }
 0x294   : > { %v2146_v8 = vadd.f32 %v2066_v54, %v8701_v11 }
 0x296   : > { %7552 = vmatmul.msk.bf16.gmra.mxu0 %vm835_vm2, %v8407_v9  ;;  %v2181_v12 = vadd.f32 %v8955_v20, %v2146_v8  ;;  %v12530_v8 = vld [vmem:[#allocation2_spill] sm:$0xff] }
 0x298   : > { %v8961_v31 = vpop.f32.mrf.mxu3  ;;  %v2213_v58 = vmax.f32 %v2181_v12, 0.0 }
 0x299   : > { %12528 = vst [vmem:[#allocation31_spill] sm:$0xff] %v8961_v31 }
 0x29a   : > { %v2294_v6 = vrot.slane %v2213_v58, 7  ;;  %v2689_v2 = vrot.slane %v2213_v58, 1 }
 0x29b   : > { %v2068_v5 = vpop.f32.mrf.mxu0 }
 0x29c   : > { %v2147_v36 = vadd.f32 %v2068_v5, %v12529_v16  ;;  %v2295_v31 = vsel %vm707_vm0, %v12530_v8, %v2294_v6 }
 0x29e   : > { %v2182_v37 = vadd.f32 %v8955_v20, %v2147_v36 }
 0x2a0   : > { %v2016_v33 = vpop.f32.mrf.mxu3  ;;  %v2214_v19 = vmax.f32 %v2182_v37, 0.0  ;;  %v12531_v37 = vld [vmem:[#allocation8_spill] sm:$0xff] }
 0x2a1   : > { %v8965_v30 = vadd.f32 %v2016_v33, %v1926_v35 }
 0x2a2   : > { %v2296_v11 = vrot.slane %v2214_v19, 7  ;;  %v2690_v54 = vrot.slane %v2214_v19, 1  ;;  %v8967_v10 = vpack.c.bf16 %v2214_v19, %v2213_v58 }
 0x2a3   : > { %v2071_v9 = vpop.f32.mrf.mxu0 }
 0x2a4   : > { %v2148_v12 = vadd.f32 %v2071_v9, %v8719_v44  ;;  %7560 = vmatmul.msk.bf16.gmra.mxu1 %vm2416_vm4, %v8967_v10  ;;  %v2297_v5 = vsel %vm707_vm0, %v2294_v6, %v2296_v11  ;;  %v2691_v16 = vsel %vm1119_vm3, %v2689_v2, %v2690_v54  ;;  %v2692_v35 = vsel %vm1119_vm3, %v2690_v54, %v12507_v14 }
 0x2a5   : > { %v8978_v36 = vpack.c.bf16 %v2297_v5, %v2295_v31  ;;  %v8980_v58 = vpack.c.bf16 %v2692_v35, %v2691_v16 }
 0x2a6   : > { %7553 = vmatmul.msk.bf16.gmra.mxu0 %vm835_vm2, %v12531_v37  ;;  %v2183_v33 = vadd.f32 %v8955_v20, %v2148_v12 }
 0x2a7   : > { %7576 = vmatmul.msk.bf16.gmra.mxu2 %vm2416_vm4, %v8978_v36  ;;  %7592 = vmatmul.msk.bf16.gmra.mxu3 %vm2416_vm4, %v8980_v58 }
 0x2a8   : > { %v2215_v44 = vmax.f32 %v2183_v33, 0.0 }
 0x2aa   : > { %v2298_v19 = vrot.slane %v2215_v44, 7  ;;  %v2693_v54 = vrot.slane %v2215_v44, 1 }
 0x2ab   : > { %v2073_v2 = vpop.f32.mrf.mxu0 }
 0x2ac   : > { %v2149_v6 = vadd.f32 %v2073_v2, %v8728_v7  ;;  %v2299_v35 = vsel %vm707_vm0, %v12530_v8, %v2298_v19 }
 0x2ae   : > { %v2184_v31 = vadd.f32 %v8955_v20, %v2149_v6 }
 0x2b0   : > { %v2216_v11 = vmax.f32 %v2184_v31, 0.0 }
 0x2b2   : > { %v2300_v9 = vrot.slane %v2216_v11, 7  ;;  %v2694_v5 = vrot.slane %v2216_v11, 1  ;;  %v8991_v16 = vpack.c.bf16 %v2216_v11, %v2215_v44 }
 0x2b3   : > { %v2076_v12 = vpop.f32.mrf.mxu0 }
 0x2b4   : > { %v2150_v37 = vadd.f32 %v2076_v12, %v8733_v52  ;;  %7561 = vmatmul.msk.bf16.gmra.mxu1 %vm2416_vm4, %v8991_v16  ;;  %v2301_v7 = vsel %vm707_vm0, %v2298_v19, %v2300_v9  ;;  %v2695_v33 = vsel %vm1119_vm3, %v2693_v54, %v2694_v5  ;;  %v2696_v2 = vsel %vm1119_vm3, %v2694_v5, %v12507_v14 }
 0x2b5   : > { %v9002_v6 = vpack.c.bf16 %v2301_v7, %v2299_v35  ;;  %v9004_v44 = vpack.c.bf16 %v2696_v2, %v2695_v33 }
 0x2b6   : > { %7554 = vmatmul.msk.bf16.gmra.mxu0 %vm835_vm2, %v12495_v47  ;;  %v2185_v31 = vadd.f32 %v8955_v20, %v2150_v37 }
 0x2b7   : > { %12532 = vst [vmem:[#allocation9_spill] sm:$0xff] %v9004_v44  ;;  %7577 = vmatmul.msk.bf16.gmra.mxu2 %vm2416_vm4, %v9002_v6  ;;  %7593 = vmatmul.msk.bf16.gmra.mxu3 %vm2416_vm4, %v9004_v44 }
 0x2b8   : > { %v2217_v52 = vmax.f32 %v2185_v31, 0.0 }
 0x2ba   : > { %v2302_v9 = vrot.slane %v2217_v52, 7  ;;  %v2697_v12 = vrot.slane %v2217_v52, 1 }
 0x2bb   : > { %v2078_v19 = vpop.f32.mrf.mxu0 }
 0x2bc   : > { %v2151_v11 = vadd.f32 %v2078_v19, %v8744_v38  ;;  %v2303_v33 = vsel %vm707_vm0, %v12530_v8, %v2302_v9 }
 0x2be   : > { %v2186_v54 = vadd.f32 %v8955_v20, %v2151_v11 }
 0x2c0   : > { %v2218_v5 = vmax.f32 %v2186_v54, 0.0 }
 0x2c2   : > { %v2304_v35 = vrot.slane %v2218_v5, 7  ;;  %v2698_v7 = vrot.slane %v2218_v5, 1  ;;  %v9015_v47 = vpack.c.bf16 %v2218_v5, %v2217_v52 }
 0x2c3   : > { %v2081_v37 = vpop.f32.mrf.mxu0 }
 0x2c4   : > { %v2152_v2 = vadd.f32 %v2081_v37, %v8753_v48  ;;  %7562 = vmatmul.msk.bf16.gmra.mxu1 %vm2416_vm4, %v9015_v47  ;;  %v2305_v38 = vsel %vm707_vm0, %v2302_v9, %v2304_v35  ;;  %v2699_v31 = vsel %vm1119_vm3, %v2697_v12, %v2698_v7  ;;  %v2700_v19 = vsel %vm1119_vm3, %v2698_v7, %v12507_v14 }
 0x2c5   : > { %v9026_v11 = vpack.c.bf16 %v2305_v38, %v2303_v33  ;;  %v9028_v52 = vpack.c.bf16 %v2700_v19, %v2699_v31 }
 0x2c6   : > { %7555 = vmatmul.msk.bf16.gmra.mxu0 %vm835_vm2, %v12498_v3  ;;  %v2187_v54 = vadd.f32 %v8955_v20, %v2152_v2  ;;  %v1780_v2 = vadd.f32 %v8751_v32, %v8749_v41 }
 0x2c7   : > { %12533 = vst [vmem:[#allocation8_spill] sm:$0xff] %v9028_v52  ;;  %7578 = vmatmul.msk.bf16.gmra.mxu2 %vm2416_vm4, %v9026_v11  ;;  %7594 = vmatmul.msk.bf16.gmra.mxu3 %vm2416_vm4, %v9028_v52 }
 0x2c8   : > { %v2219_v48 = vmax.f32 %v2187_v54, 0.0  ;;  %v1905_v32 = vadd.f32 %v8735_v40, %v1780_v2  ;;  %v9072_v40 = vpop.f32.mrf.mxu2 }
 0x2ca   : > { %v2306_v35 = vrot.slane %v2219_v48, 7  ;;  %v2701_v37 = vrot.slane %v2219_v48, 1 }
 0x2cb   : > { %v2083_v9 = vpop.f32.mrf.mxu0 }
 0x2cc   : > { %v2153_v5 = vadd.f32 %v2083_v9, %v8764_v17  ;;  %v2307_v19 = vsel %vm707_vm0, %v12530_v8, %v2306_v35 }
 0x2ce   : > { %v2188_v12 = vadd.f32 %v8955_v20, %v2153_v5 }
 0x2d0   : > { %v2220_v7 = vmax.f32 %v2188_v12, 0.0 }
 0x2d2   : > { %v2308_v33 = vrot.slane %v2220_v7, 7  ;;  %v2702_v38 = vrot.slane %v2220_v7, 1  ;;  %v9039_v3 = vpack.c.bf16 %v2220_v7, %v2219_v48 }
 0x2d3   : > { %v2086_v31 = vpop.f32.mrf.mxu0 }
 0x2d4   : > { %12534 = vst [vmem:[#allocation32_spill] sm:$0xff] %v9039_v3  ;;  %v2154_v54 = vadd.f32 %v2086_v31, %v8773_v42  ;;  %7563 = vmatmul.msk.bf16.gmra.mxu1 %vm2416_vm4, %v9039_v3  ;;  %v2309_v17 = vsel %vm707_vm0, %v2306_v35, %v2308_v33  ;;  %v2703_v9 = vsel %vm1119_vm3, %v2701_v37, %v2702_v38 }
 0x2d5   : > { %v2704_v48 = vsel %vm1119_vm3, %v2702_v38, %v12507_v14  ;;  %v9052_v5 = vpack.c.bf16 %v2309_v17, %v2307_v19  ;;  %v2030_v42 = vadd.f32 %v8780_v45, %v1905_v32 }
 0x2d6   : > { %v9054_v12 = vpack.c.bf16 %v2704_v48, %v2703_v9  ;;  %7556 = vmatmul.msk.bf16.gmra.mxu0 %vm835_vm2, %v8522_v29  ;;  %v2189_v41 = vadd.f32 %v8955_v20, %v2154_v54  ;;  %v9066_v29 = vpop.f32.mrf.mxu1  ;;  %v1782_v48 = vadd.f32 %v8771_v63, %v8769_v56  ;;  %v12538_v63 = vld [vmem:[#allocation6_spill] sm:$0xff] }
 0x2d7   : > { %7579 = vmatmul.msk.bf16.gmra.mxu2 %vm2416_vm4, %v9052_v5 }
 0x2d8   : > { %12535 = vst [vmem:[#allocation33_spill] sm:$0xff] %v9054_v12  ;;  %7595 = vmatmul.msk.bf16.gmra.mxu3 %vm2416_vm4, %v9054_v12  ;;  %v2221_v35 = vmax.f32 %v2189_v41, 0.0 }
 0x2da   : > { %v2310_v38 = vrot.slane %v2221_v35, 7  ;;  %v2705_v19 = vrot.slane %v2221_v35, 1 }
 0x2db   : > { %v2088_v7 = vpop.f32.mrf.mxu0 }
 0x2dc   : > { %v2155_v37 = vadd.f32 %v2088_v7, %v2030_v42  ;;  %v2311_v2 = vsel %vm707_vm0, %v12530_v8, %v2310_v38 }
 0x2de   : > { %v2190_v33 = vadd.f32 %v8955_v20, %v2155_v37 }
 0x2e0   : > { %v2222_v31 = vmax.f32 %v2190_v33, 0.0 }
 0x2e2   : > { %v2312_v54 = vrot.slane %v2222_v31, 7  ;;  %v2706_v17 = vrot.slane %v2222_v31, 1  ;;  %v9068_v9 = vpack.c.bf16 %v2222_v31, %v2221_v35 }
 0x2e3   : > { %v2091_v45 = vpop.f32.mrf.mxu0 }
 0x2e4   : > { %12536 = vst [vmem:[#allocation34_spill] sm:$0xff] %v9068_v9  ;;  %v2156_v41 = vadd.f32 %v2091_v45, %v8795_v1  ;;  %7564 = vmatmul.msk.bf16.gmra.mxu1 %vm2416_vm4, %v9068_v9  ;;  %v2313_v32 = vsel %vm707_vm0, %v2310_v38, %v2312_v54  ;;  %v2707_v42 = vsel %vm1119_vm3, %v2705_v19, %v2706_v17  ;;  %v12539_v1 = vld [vmem:[#allocation10_spill] sm:$0xff]  ;;  %v9095_v38 = vpop.f32.mrf.mxu3  ;;  %v2473_v19 = vpop.f32.mrf.mxu1 }
 0x2e5   : > { %v2708_v35 = vsel %vm1119_vm3, %v2706_v17, %v12507_v14  ;;  %v9083_v7 = vpack.c.bf16 %v2313_v32, %v2311_v2  ;;  %v1907_v33 = vadd.f32 %v12539_v1, %v1782_v48  ;;  %v2609_v45 = vpop.f32.mrf.mxu2  ;;  %v12540_v1 = vld [vmem:[#allocation16_spill] sm:$0xff] }
 0x2e6   : > { %v9085_v56 = vpack.c.bf16 %v2708_v35, %v2707_v42  ;;  %7557 = vmatmul.msk.bf16.gmra.mxu0 %vm835_vm2, %v12538_v63  ;;  %v2191_v37 = vadd.f32 %v8955_v20, %v2156_v41  ;;  %v2610_v32 = vadd.f32 %v2609_v45, %v2473_v19 }
 0x2e7   : > { %7580 = vmatmul.msk.bf16.gmra.mxu2 %vm2416_vm4, %v9083_v7  ;;  %v2032_v31 = vadd.f32 %v8808_v25, %v1907_v33  ;;  %v2251_v25 = vld [vmem:[%s12315_s6 + $0x30] sm:$0xff]  ;;  %v12541_v33 = vld [vmem:[#allocation13_spill] sm:$0xff] }
 0x2e8   : > { %12537 = vst [vmem:[#allocation35_spill] sm:$0xff] %v9085_v56  ;;  %7596 = vmatmul.msk.bf16.gmra.mxu3 %vm2416_vm4, %v9085_v56  ;;  %v2223_v54 = vmax.f32 %v2191_v37, 0.0  ;;  %v2252_v37 = vld [vmem:[%s12315_s6 + $0x38] sm:$0xff] }
 0x2e9   : > { %v2972_v45 = vpack.c.bf16 %v2252_v37, %v2251_v25 }
 0x2ea   : > { %v2314_v42 = vrot.slane %v2223_v54, 7  ;;  %v2709_v63 = vrot.slane %v2223_v54, 1 }
 0x2eb   : > { %v2093_v17 = vpop.f32.mrf.mxu0  ;;  %2983 = vmatpush.bf16.msrb.mxu0 %v2972_v45 }
 0x2ec   : > { %v2157_v2 = vadd.f32 %v2093_v17, %v2032_v31  ;;  %v2851_v9 = vpop.f32.mrf.mxu3  ;;  %v1784_v31 = vadd.f32 %v12541_v33, %v12540_v1  ;;  %v2315_v17 = vsel %vm707_vm0, %v12530_v8, %v2314_v42 }
 0x2ed   : > { %v9101_v48 = vadd.f32 %v2851_v9, %v2610_v32 }
 0x2ee   : > { %v2192_v41 = vadd.f32 %v8955_v20, %v2157_v2 }
 0x2f0   : > { %v2224_v35 = vmax.f32 %v2192_v41, 0.0 }
 0x2f2   : > { %v2316_v12 = vrot.slane %v2224_v35, 7  ;;  %v2710_v56 = vrot.slane %v2224_v35, 1  ;;  %v9099_v3 = vpack.c.bf16 %v2224_v35, %v2223_v54 }
 0x2f3   : > { %v2096_v19 = vpop.f32.mrf.mxu0 }
 0x2f4   : > { %v2158_v54 = vadd.f32 %v2096_v19, %v8818_v24  ;;  %7565 = vmatmul.msk.bf16.gmra.mxu1 %vm2416_vm4, %v9099_v3  ;;  %v2317_v9 = vsel %vm707_vm0, %v2314_v42, %v2316_v12  ;;  %v2711_v2 = vsel %vm1119_vm3, %v2709_v63, %v2710_v56  ;;  %v2712_v32 = vsel %vm1119_vm3, %v2710_v56, %v12507_v14  ;;  %v12543_v12 = vld [vmem:[#allocation7_spill] sm:$0xff] }
 0x2f5   : > { %v9120_v41 = vpack.c.bf16 %v2317_v9, %v2315_v17  ;;  %v9122_v35 = vpack.c.bf16 %v2712_v32, %v2711_v2  ;;  %v1909_v42 = vadd.f32 %v12543_v12, %v1784_v31  ;;  %v12544_v9 = vld [vmem:[#allocation11_spill] sm:$0xff] }
 0x2f6   : > { %7558 = vmatmul.msk.bf16.gmra.mxu0 %vm835_vm2, %v8804_v27  ;;  %v2193_v24 = vadd.f32 %v8955_v20, %v2158_v54  ;;  %v1786_v2 = vadd.f32 %v12544_v9, %v8814_v60 }
 0x2f7   : > { %12542 = vst [vmem:[#allocation6_spill] sm:$0xff] %v9122_v35  ;;  %7581 = vmatmul.msk.bf16.gmra.mxu2 %vm2416_vm4, %v9120_v41  ;;  %v2034_v56 = vadd.f32 %v8825_v39, %v1909_v42 }
 0x2f8   : > { %7597 = vmatmul.msk.bf16.gmra.mxu3 %vm2416_vm4, %v9122_v35  ;;  %v2225_v63 = vmax.f32 %v2193_v24, 0.0 }
 0x2fa   : > { %v2318_v33 = vrot.slane %v2225_v63, 7  ;;  %v2713_v27 = vrot.slane %v2225_v63, 1 }
 0x2fb   : > { %v2098_v25 = vpop.f32.mrf.mxu0 }
 0x2fc   : > { %v2159_v37 = vadd.f32 %v2098_v25, %v2034_v56  ;;  %v2319_v31 = vsel %vm707_vm0, %v12530_v8, %v2318_v33 }
 0x2fe   : > { %v2194_v1 = vadd.f32 %v8955_v20, %v2159_v37 }
 0x300   : > { %v2226_v19 = vmax.f32 %v2194_v1, 0.0 }
 0x302   : > { %v2320_v17 = vrot.slane %v2226_v19, 7  ;;  %v2714_v45 = vrot.slane %v2226_v19, 1  ;;  %v9134_v54 = vpack.c.bf16 %v2226_v19, %v2225_v63 }
 0x303   : > { %v2101_v32 = vpop.f32.mrf.mxu0 }
 0x304   : > { %v2160_v39 = vadd.f32 %v2101_v32, %v8833_v62  ;;  %7566 = vmatmul.msk.bf16.gmra.mxu1 %vm2416_vm4, %v9134_v54  ;;  %v2321_v24 = vsel %vm707_vm0, %v2318_v33, %v2320_v17  ;;  %v2715_v12 = vsel %vm1119_vm3, %v2713_v27, %v2714_v45  ;;  %v2716_v42 = vsel %vm1119_vm3, %v2714_v45, %v12507_v14  ;;  %v12546_v62 = vld [vmem:[#allocation14_spill] sm:$0xff] }
 0x305   : > { %v9147_v56 = vpack.c.bf16 %v2321_v24, %v2319_v31  ;;  %v9149_v63 = vpack.c.bf16 %v2716_v42, %v2715_v12  ;;  %v1911_v25 = vadd.f32 %v12546_v62, %v1786_v2  ;;  %v12548_v24 = vld [vmem:[#allocation18_spill] sm:$0xff]  ;;  %v12549_v12 = vld [vmem:[#allocation15_spill] sm:$0xff] }
 0x306   : > { %7559 = vmatmul.msk.bf16.gmra.mxu0 %vm835_vm2, %v12521_v55  ;;  %v2195_v60 = vadd.f32 %v8955_v20, %v2160_v39  ;;  %v1788_v42 = vadd.f32 %v12549_v12, %v12548_v24  ;;  %v9190_v12 = vpop.f32.mrf.mxu2 }
 0x307   : > { %12545 = vst [vmem:[#allocation10_spill] sm:$0xff] %v9149_v63  ;;  %7582 = vmatmul.msk.bf16.gmra.mxu2 %vm2416_vm4, %v9147_v56  ;;  %v2036_v37 = vadd.f32 %v8840_v57, %v1911_v25 }
 0x308   : > { %7598 = vmatmul.msk.bf16.gmra.mxu3 %vm2416_vm4, %v9149_v63  ;;  %v2227_v1 = vmax.f32 %v2195_v60, 0.0  ;;  %12553 = vst [vmem:[#allocation11_spill] sm:$0xff] %v9190_v12 }
 0x30a   : > { %v2322_v17 = vrot.slane %v2227_v1, 7  ;;  %v2717_v9 = vrot.slane %v2227_v1, 1 }
 0x30b   : > { %v2103_v33 = vpop.f32.mrf.mxu0 }
 0x30c   : > { %v2161_v19 = vadd.f32 %v2103_v33, %v2036_v37  ;;  %v2323_v2 = vsel %vm707_vm0, %v12530_v8, %v2322_v17 }
 0x30e   : > { %v2196_v27 = vadd.f32 %v8955_v20, %v2161_v19  ;;  %v9186_v19 = vpop.f32.mrf.mxu1 }
 0x30f   : > { %12552 = vst [vmem:[#allocation7_spill] sm:$0xff] %v9186_v19 }
 0x310   : > { %v2228_v45 = vmax.f32 %v2196_v27, 0.0 }
 0x312   : > { %v2324_v32 = vrot.slane %v2228_v45, 7  ;;  %v2718_v31 = vrot.slane %v2228_v45, 1  ;;  %v9161_v39 = vpack.c.bf16 %v2228_v45, %v2227_v1 }
 0x313   : > { %v2106_v55 = vpop.f32.mrf.mxu0 }
 0x314   : > { %12547 = vst [vmem:[#allocation16_spill] sm:$0xff] %v9161_v39  ;;  %v2162_v57 = vadd.f32 %v2106_v55, %v8847_v34  ;;  %7567 = vmatmul.msk.bf16.gmra.mxu1 %vm2416_vm4, %v9161_v39  ;;  %v2325_v60 = vsel %vm707_vm0, %v2322_v17, %v2324_v32  ;;  %v2719_v62 = vsel %vm1119_vm3, %v2717_v9, %v2718_v31  ;;  %v12551_v34 = vld [vmem:[#allocation12_spill] sm:$0xff] }
 0x315   : > { %v2720_v25 = vsel %vm1119_vm3, %v2718_v31, %v12507_v14  ;;  %v9174_v37 = vpack.c.bf16 %v2325_v60, %v2323_v2  ;;  %v1913_v55 = vadd.f32 %v12551_v34, %v1788_v42 }
 0x316   : > { %v9176_v1 = vpack.c.bf16 %v2720_v25, %v2719_v62  ;;  %7607 = vmatmul.msk.bf16.vlgmr.msrb.gmra.mxu0 %vm2416_vm4, %v8978_v36  ;;  %v2197_v33 = vadd.f32 %v8955_v20, %v2162_v57  ;;  %v9192_v57 = vpop.f32.mrf.mxu3 }
 0x317   : > { %7583 = vmatmul.msk.bf16.gmra.mxu2 %vm2416_vm4, %v9174_v37  ;;  %v2038_v27 = vadd.f32 %v8854_v28, %v1913_v55  ;;  %12554 = vst [vmem:[#allocation14_spill] sm:$0xff] %v9192_v57  ;;  %v1790_v28 = vadd.f32 %v8845_v46, %v8843_v21  ;;  %v12557_v46 = vld [vmem:[#allocation17_spill] sm:$0xff] }
 0x318   : > { %12550 = vst [vmem:[#allocation13_spill] sm:$0xff] %v9176_v1  ;;  %7599 = vmatmul.msk.bf16.gmra.mxu3 %vm2416_vm4, %v9176_v1  ;;  %v2229_v17 = vmax.f32 %v2197_v33, 0.0 }
 0x31a   : > { %v2326_v36 = vrot.slane %v2229_v17, 7  ;;  %v2721_v2 = vrot.slane %v2229_v17, 1 }
 0x31b   : > { %v2108_v45 = vpop.f32.mrf.mxu0 }
 0x31c   : > { %v2163_v9 = vadd.f32 %v2108_v45, %v2038_v27  ;;  %v2327_v33 = vsel %vm707_vm0, %v12530_v8, %v2326_v36 }
 0x31e   : > { %v2198_v32 = vadd.f32 %v8955_v20, %v2163_v9 }
 0x320   : > { %v2230_v31 = vmax.f32 %v2198_v32, 0.0 }
 0x321   : > { %v2478_v24 = vpop.f32.mrf.mxu1 }
 0x322   : > { %v2328_v60 = vrot.slane %v2230_v31, 7  ;;  %v2722_v62 = vrot.slane %v2230_v31, 1  ;;  %v9194_v42 = vpack.c.bf16 %v2230_v31, %v2229_v17 }
 0x323   : > { %v2111_v25 = vpop.f32.mrf.mxu0 }
 0x324   : > { %12555 = vst [vmem:[#allocation18_spill] sm:$0xff] %v9194_v42  ;;  %v2164_v34 = vadd.f32 %v2111_v25, %v8868_v51  ;;  %7568 = vmatmul.msk.bf16.gmra.mxu1 %vm2416_vm4, %v9194_v42  ;;  %v2329_v55 = vsel %vm707_vm0, %v2326_v36, %v2328_v60  ;;  %v2723_v27 = vsel %vm1119_vm3, %v2721_v2, %v2722_v62 }
 0x325   : > { %v2724_v17 = vsel %vm1119_vm3, %v2722_v62, %v12507_v14  ;;  %v9207_v45 = vpack.c.bf16 %v2329_v55, %v2327_v33  ;;  %v1915_v51 = vadd.f32 %v12557_v46, %v1790_v28 }
 0x326   : > { %v9209_v9 = vpack.c.bf16 %v2724_v17, %v2723_v27  ;;  %7608 = vmatmul.msk.bf16.gmra.mxu0 %vm2416_vm4, %v9002_v6  ;;  %v2199_v21 = vadd.f32 %v8955_v20, %v2164_v34 }
 0x327   : > { %7584 = vmatmul.msk.bf16.gmra.mxu2 %vm2416_vm4, %v9207_v45  ;;  %v2040_v36 = vadd.f32 %v8875_v61, %v1915_v51  ;;  %v12559_v61 = vld [vmem:[#allocation20_spill] sm:$0xff] }
 0x328   : > { %12556 = vst [vmem:[#allocation15_spill] sm:$0xff] %v9209_v9  ;;  %7600 = vmatmul.msk.bf16.gmra.mxu3 %vm2416_vm4, %v9209_v9  ;;  %v2231_v60 = vmax.f32 %v2199_v21, 0.0  ;;  %v1792_v21 = vadd.f32 %v12559_v61, %v8863_v13 }
 0x329   : > { %v2480_v32 = vpop.f32.mrf.mxu1 }
 0x32a   : > { %v2614_v31 = vpop.f32.mrf.mxu2  ;;  %v2856_v2 = vpop.f32.mrf.mxu3  ;;  %v2330_v27 = vrot.slane %v2231_v60, 7  ;;  %v2725_v42 = vrot.slane %v2231_v60, 1 }
 0x32b   : > { %v2615_v62 = vadd.f32 %v2614_v31, %v2478_v24  ;;  %v2113_v25 = vpop.f32.mrf.mxu0 }
 0x32c   : > { %v2165_v33 = vadd.f32 %v2113_v25, %v2040_v36  ;;  %v2331_v36 = vsel %vm707_vm0, %v12530_v8, %v2330_v27 }
 0x32d   : > { %v9220_v55 = vadd.f32 %v2856_v2, %v2615_v62 }
 0x32e   : > { %v2200_v34 = vadd.f32 %v8955_v20, %v2165_v33 }
 0x330   : > { %v2232_v17 = vmax.f32 %v2200_v34, 0.0 }
 0x331   : > { %v2483_v57 = vpop.f32.mrf.mxu1 }
 0x332   : > { %v2332_v9 = vrot.slane %v2232_v17, 7  ;;  %v2726_v12 = vrot.slane %v2232_v17, 1  ;;  %v2616_v28 = vpop.f32.mrf.mxu2  ;;  %v2858_v46 = vpop.f32.mrf.mxu3  ;;  %v9223_v19 = vpack.c.bf16 %v2232_v17, %v2231_v60  ;;  %v2253_v17 = vld [vmem:[%s12315_s6 + $0x40] sm:$0xff] }
 0x333   : > { %v2617_v24 = vadd.f32 %v2616_v28, %v2480_v32  ;;  %v2116_v51 = vpop.f32.mrf.mxu0  ;;  %v2254_v28 = vld [vmem:[%s12315_s6 + $0x48] sm:$0xff] }
 0x334   : > { %12558 = vst [vmem:[#allocation12_spill] sm:$0xff] %v9223_v19  ;;  %v2166_v31 = vadd.f32 %v2116_v51, %v8882_v4  ;;  %7569 = vmatmul.msk.bf16.gmra.mxu1 %vm2416_vm4, %v9223_v19  ;;  %v2333_v2 = vsel %vm707_vm0, %v2330_v27, %v2332_v9  ;;  %v2727_v62 = vsel %vm1119_vm3, %v2725_v42, %v2726_v12  ;;  %v12561_v42 = vld [vmem:[#allocation19_spill] sm:$0xff] }
 0x335   : > { %v2728_v60 = vsel %vm1119_vm3, %v2726_v12, %v12507_v14  ;;  %v9236_v25 = vadd.f32 %v2858_v46, %v2617_v24  ;;  %v9238_v13 = vpack.c.bf16 %v2333_v2, %v2331_v36  ;;  %v1917_v9 = vadd.f32 %v12561_v42, %v1792_v21 }
 0x336   : > { %v9240_v32 = vpack.c.bf16 %v2728_v60, %v2727_v62  ;;  %7609 = vmatmul.msk.bf16.gmra.mxu0 %vm2416_vm4, %v9026_v11  ;;  %v2201_v4 = vadd.f32 %v8955_v20, %v2166_v31  ;;  %v3098_v51 = vpack.c.bf16 %v2254_v28, %v2253_v17 }
 0x337   : > { %7585 = vmatmul.msk.bf16.gmra.mxu2 %vm2416_vm4, %v9238_v13  ;;  %v2042_v33 = vadd.f32 %v8889_v59, %v1917_v9 }
 0x338   : > { %12560 = vst [vmem:[#allocation17_spill] sm:$0xff] %v9240_v32  ;;  %7601 = vmatmul.msk.bf16.gmra.mxu3 %vm2416_vm4, %v9240_v32  ;;  %v2233_v46 = vmax.f32 %v2201_v4, 0.0  ;;  %3109 = vmatpush.bf16.msrb.mxu1 %v3098_v51 }
 0x339   : > { %v2485_v12 = vpop.f32.mrf.mxu1 }
 0x33a   : > { %v2619_v34 = vpop.f32.mrf.mxu2  ;;  %v2861_v27 = vpop.f32.mrf.mxu3  ;;  %v2334_v21 = vrot.slane %v2233_v46, 7  ;;  %v2729_v60 = vrot.slane %v2233_v46, 1 }
 0x33b   : > { %v2620_v61 = vadd.f32 %v2619_v34, %v2483_v57  ;;  %v2118_v24 = vpop.f32.mrf.mxu0  ;;  %v12563_v57 = vld [vmem:[#allocation22_spill] sm:$0xff] }
 0x33c   : > { %v2167_v36 = vadd.f32 %v2118_v24, %v2042_v33  ;;  %v1794_v4 = vadd.f32 %v12563_v57, %v8878_v49 }
 0x33d   : > { %v9257_v31 = vadd.f32 %v2861_v27, %v2620_v61  ;;  %v2335_v27 = vsel %vm707_vm0, %v12530_v8, %v2334_v21 }
 0x33e   : > { %v2202_v59 = vadd.f32 %v8955_v20, %v2167_v36 }
 0x340   : > { %v2234_v2 = vmax.f32 %v2202_v59, 0.0 }
 0x341   : > { %v2488_v62 = vpop.f32.mrf.mxu1 }
 0x342   : > { %v2336_v42 = vrot.slane %v2234_v2, 7  ;;  %v2730_v9 = vrot.slane %v2234_v2, 1  ;;  %v2621_v32 = vpop.f32.mrf.mxu2  ;;  %v2863_v19 = vpop.f32.mrf.mxu3  ;;  %v9260_v1 = vpack.c.bf16 %v2234_v2, %v2233_v46 }
 0x343   : > { %v2622_v34 = vadd.f32 %v2621_v32, %v2485_v12  ;;  %v2121_v33 = vpop.f32.mrf.mxu0  ;;  %v12565_v12 = vld [vmem:[#allocation21_spill] sm:$0xff] }
 0x344   : > { %12562 = vst [vmem:[#allocation20_spill] sm:$0xff] %v9260_v1  ;;  %v2168_v17 = vadd.f32 %v2121_v33, %v8896_v15  ;;  %7570 = vmatmul.msk.bf16.gmra.mxu1 %vm2416_vm4, %v9260_v1  ;;  %v2337_v28 = vsel %vm707_vm0, %v2334_v21, %v2336_v42  ;;  %v2731_v61 = vsel %vm1119_vm3, %v2729_v60, %v2730_v9 }
 0x345   : > { %v2732_v46 = vsel %vm1119_vm3, %v2730_v9, %v12507_v14  ;;  %v9273_v24 = vadd.f32 %v2863_v19, %v2622_v34  ;;  %v9275_v49 = vpack.c.bf16 %v2337_v28, %v2335_v27  ;;  %v1919_v51 = vadd.f32 %v12565_v12, %v1794_v4 }
 0x346   : > { %v9277_v32 = vpack.c.bf16 %v2732_v46, %v2731_v61  ;;  %7610 = vmatmul.msk.bf16.gmra.mxu0 %vm2416_vm4, %v9052_v5  ;;  %v2203_v15 = vadd.f32 %v8955_v20, %v2168_v17 }
 0x347   : > { %7586 = vmatmul.msk.bf16.gmra.mxu2 %vm2416_vm4, %v9275_v49  ;;  %v2044_v19 = vadd.f32 %v8913_v23, %v1919_v51  ;;  %v1796_v23 = vadd.f32 %v8894_v43, %v8892_v0 }
 0x348   : > { %12564 = vst [vmem:[#allocation19_spill] sm:$0xff] %v9277_v32  ;;  %7602 = vmatmul.msk.bf16.gmra.mxu3 %vm2416_vm4, %v9277_v32  ;;  %v2235_v2 = vmax.f32 %v2203_v15, 0.0 }
 0x349   : > { %v2490_v36 = vpop.f32.mrf.mxu1 }
 0x34a   : > { %v2624_v59 = vpop.f32.mrf.mxu2  ;;  %v2866_v21 = vpop.f32.mrf.mxu3  ;;  %v2338_v33 = vrot.slane %v2235_v2, 7  ;;  %v2733_v28 = vrot.slane %v2235_v2, 1 }
 0x34b   : > { %v2625_v60 = vadd.f32 %v2624_v59, %v2488_v62  ;;  %v2123_v42 = vpop.f32.mrf.mxu0 }
 0x34c   : > { %v2169_v9 = vadd.f32 %v2123_v42, %v2044_v19  ;;  %v2339_v51 = vsel %vm707_vm0, %v12530_v8, %v2338_v33 }
 0x34d   : > { %v9288_v57 = vadd.f32 %v2866_v21, %v2625_v60 }
 0x34e   : > { %v2204_v34 = vadd.f32 %v8955_v20, %v2169_v9 }
 0x350   : > { %v2236_v27 = vmax.f32 %v2204_v34, 0.0 }
 0x351   : > { %v2493_v17 = vpop.f32.mrf.mxu1 }
 0x352   : > { %v2340_v61 = vrot.slane %v2236_v27, 7  ;;  %v2734_v46 = vrot.slane %v2236_v27, 1  ;;  %v2626_v4 = vpop.f32.mrf.mxu2  ;;  %v2868_v12 = vpop.f32.mrf.mxu3  ;;  %v9291_v32 = vpack.c.bf16 %v2236_v27, %v2235_v2 }
 0x353   : > { %v2627_v62 = vadd.f32 %v2626_v4, %v2490_v36  ;;  %v2126_v15 = vpop.f32.mrf.mxu0  ;;  %v12568_v36 = vld [vmem:[#allocation23_spill] sm:$0xff] }
 0x354   : > { %12566 = vst [vmem:[#allocation22_spill] sm:$0xff] %v9291_v32  ;;  %v2170_v19 = vadd.f32 %v2126_v15, %v8926_v50  ;;  %7571 = vmatmul.msk.bf16.gmra.mxu1 %vm2416_vm4, %v9291_v32  ;;  %v2341_v59 = vsel %vm707_vm0, %v2338_v33, %v2340_v61  ;;  %v2735_v21 = vsel %vm1119_vm3, %v2733_v28, %v2734_v46 }
 0x355   : > { %v2736_v2 = vsel %vm1119_vm3, %v2734_v46, %v12507_v14  ;;  %v9304_v60 = vadd.f32 %v2868_v12, %v2627_v62  ;;  %v9306_v0 = vpack.c.bf16 %v2341_v59, %v2339_v51  ;;  %v1921_v42 = vadd.f32 %v12568_v36, %v1796_v23 }
 0x356   : > { %v9308_v43 = vpack.c.bf16 %v2736_v2, %v2735_v21  ;;  %7611 = vmatmul.msk.bf16.gmra.mxu0 %vm2416_vm4, %v9083_v7  ;;  %v2205_v50 = vadd.f32 %v8955_v20, %v2170_v19 }
 0x357   : > { %7587 = vmatmul.msk.bf16.gmra.mxu2 %vm2416_vm4, %v9306_v0  ;;  %v2046_v34 = vadd.f32 %v8931_v22, %v1921_v42  ;;  %v12570_v22 = vld [vmem:[#allocation25_spill] sm:$0xff] }
 0x358   : > { %12567 = vst [vmem:[#allocation21_spill] sm:$0xff] %v9308_v43  ;;  %7603 = vmatmul.msk.bf16.gmra.mxu3 %vm2416_vm4, %v9308_v43  ;;  %v2237_v28 = vmax.f32 %v2205_v50, 0.0  ;;  %v1798_v50 = vadd.f32 %v12570_v22, %v8922_v18 }
 0x359   : > { %v2495_v9 = vpop.f32.mrf.mxu1 }
 0x35a   : > { %v2629_v33 = vpop.f32.mrf.mxu2  ;;  %v2342_v15 = vrot.slane %v2237_v28, 7  ;;  %v2737_v59 = vrot.slane %v2237_v28, 1 }
 0x35b   : > { %v2871_v27 = vpop.f32.mrf.mxu3  ;;  %v2630_v61 = vadd.f32 %v2629_v33, %v2493_v17  ;;  %v2128_v46 = vpop.f32.mrf.mxu0 }
 0x35c   : > { %v2171_v4 = vadd.f32 %v2128_v46, %v2046_v34  ;;  %v2343_v34 = vsel %vm707_vm0, %v12530_v8, %v2342_v15 }
 0x35d   : > { %v9319_v12 = vadd.f32 %v2871_v27, %v2630_v61 }
 0x35e   : > { %v2206_v62 = vadd.f32 %v8955_v20, %v2171_v4  ;;  %v12572_v4 = vld [vmem:[#allocation24_spill] sm:$0xff] }
 0x360   : > { %v2238_v51 = vmax.f32 %v2206_v62, 0.0  ;;  %v1923_v62 = vadd.f32 %v12572_v4, %v1798_v50 }
 0x361   : > { %v2498_v19 = vpop.f32.mrf.mxu1 }
 0x362   : > { %v2344_v21 = vrot.slane %v2238_v51, 7  ;;  %v2738_v2 = vrot.slane %v2238_v51, 1  ;;  %v2631_v23 = vpop.f32.mrf.mxu2  ;;  %v9322_v43 = vpack.c.bf16 %v2238_v51, %v2237_v28  ;;  %v2048_v51 = vadd.f32 %v8945_v53, %v1923_v62  ;;  %v12574_v53 = vld [vmem:[#allocation27_spill] sm:$0xff]  ;;  %v12575_v62 = vld [vmem:[#allocation28_spill] sm:$0xff] }
 0x363   : > { %v2873_v36 = vpop.f32.mrf.mxu3  ;;  %v2632_v17 = vadd.f32 %v2631_v23, %v2495_v9  ;;  %v2131_v42 = vpop.f32.mrf.mxu0 }
 0x364   : > { %12569 = vst [vmem:[#allocation23_spill] sm:$0xff] %v9322_v43  ;;  %v2172_v33 = vadd.f32 %v2131_v42, %v8940_v26  ;;  %7572 = vmatmul.msk.bf16.gmra.mxu1 %vm2416_vm4, %v9322_v43  ;;  %v2345_v27 = vsel %vm707_vm0, %v2342_v15, %v2344_v21  ;;  %v2739_v61 = vsel %vm1119_vm3, %v2737_v59, %v2738_v2 }
 0x365   : > { %v2740_v28 = vsel %vm1119_vm3, %v2738_v2, %v12507_v14  ;;  %v9335_v46 = vadd.f32 %v2873_v36, %v2632_v17  ;;  %v9337_v18 = vpack.c.bf16 %v2345_v27, %v2343_v34 }
 0x366   : > { %v9339_v9 = vpack.c.bf16 %v2740_v28, %v2739_v61  ;;  %7612 = vmatmul.msk.bf16.gmra.mxu0 %vm2416_vm4, %v9120_v41  ;;  %v2207_v26 = vadd.f32 %v8955_v20, %v2172_v33 }
 0x367   : > { %7588 = vmatmul.msk.bf16.gmra.mxu2 %vm2416_vm4, %v9337_v18 }
 0x368   : > { %12571 = vst [vmem:[#allocation25_spill] sm:$0xff] %v9339_v9  ;;  %7604 = vmatmul.msk.bf16.gmra.mxu3 %vm2416_vm4, %v9339_v9  ;;  %v2239_v2 = vmax.f32 %v2207_v26, 0.0  ;;  %v1800_v26 = vadd.f32 %v12575_v62, %v12574_v53 }
 0x369   : > { %v2500_v15 = vpop.f32.mrf.mxu1 }
 0x36a   : > { %v2634_v59 = vpop.f32.mrf.mxu2  ;;  %v2346_v34 = vrot.slane %v2239_v2, 7  ;;  %v2741_v61 = vrot.slane %v2239_v2, 1 }
 0x36b   : > { %v2876_v21 = vpop.f32.mrf.mxu3  ;;  %v2635_v23 = vadd.f32 %v2634_v59, %v2498_v19  ;;  %v2133_v36 = vpop.f32.mrf.mxu0 }
 0x36c   : > { %v2173_v22 = vadd.f32 %v2133_v36, %v2048_v51  ;;  %v2347_v51 = vsel %vm707_vm0, %v12530_v8, %v2346_v34  ;;  %v12576_v36 = vld [vmem:[#allocation30_spill] sm:$0xff] }
 0x36d   : > { %v9350_v17 = vadd.f32 %v2876_v21, %v2635_v23  ;;  %v2255_v21 = vld [vmem:[%s12315_s6 + $0x50] sm:$0xff]  ;;  %v2256_v23 = vld [vmem:[%s12315_s6 + $0x58] sm:$0xff] }
 0x36e   : > { %v2208_v42 = vadd.f32 %v8955_v20, %v2173_v22 }
 0x370   : > { %v2240_v33 = vmax.f32 %v2208_v42, 0.0 }
 0x371   : > { %v2503_v27 = vpop.f32.mrf.mxu1 }
 0x372   : > { %v2348_v28 = vrot.slane %v2240_v33, 7  ;;  %v2742_v9 = vrot.slane %v2240_v33, 1  ;;  %v2636_v50 = vpop.f32.mrf.mxu2  ;;  %v9353_v43 = vpack.c.bf16 %v2240_v33, %v2239_v2  ;;  %v2257_v2 = vld [vmem:[%s12315_s6 + $0x60] sm:$0xff] }
 0x373   : > { %v2878_v4 = vpop.f32.mrf.mxu3  ;;  %v2637_v19 = vadd.f32 %v2636_v50, %v2500_v15  ;;  %v2136_v59 = vpop.f32.mrf.mxu0  ;;  %v2258_v50 = vld [vmem:[%s12315_s6 + $0x68] sm:$0xff] }
 0x374   : > { %12573 = vst [vmem:[#allocation24_spill] sm:$0xff] %v9353_v43  ;;  %v2174_v22 = vadd.f32 %v2136_v59, %v12576_v36  ;;  %7573 = vmatmul.msk.bf16.gmra.mxu1 %vm2416_vm4, %v9353_v43  ;;  %v2349_v15 = vsel %vm707_vm0, %v2346_v34, %v2348_v28  ;;  %v2743_v42 = vsel %vm1119_vm3, %v2741_v61, %v2742_v9 }
 0x375   : > { %v2744_v33 = vsel %vm1119_vm3, %v2742_v9, %v12507_v14  ;;  %v9378_v53 = vadd.f32 %v2878_v4, %v2637_v19  ;;  %v9380_v62 = vpack.c.bf16 %v2349_v15, %v2347_v51  ;;  %v3230_v59 = vpack.c.bf16 %v2256_v23, %v2255_v21  ;;  %v12578_v9 = vld [vmem:[#allocation26_spill] sm:$0xff]  ;;  %v12579_v19 = vld [vmem:[#allocation31_spill] sm:$0xff] }
 0x376   : > { %v9382_v32 = vpack.c.bf16 %v2744_v33, %v2743_v42  ;;  %7613 = vmatmul.msk.bf16.gmra.mxu0 %vm2416_vm4, %v9147_v56  ;;  %v3355_v34 = vpack.c.bf16 %v2258_v50, %v2257_v2  ;;  %v2209_v61 = vadd.f32 %v8955_v20, %v2174_v22  ;;  %v1925_v28 = vadd.f32 %v12578_v9, %v1800_v26 }
 0x377   : > { %7589 = vmatmul.msk.bf16.gmra.mxu2 %vm2416_vm4, %v9380_v62 }
 0x378   : > { %12577 = vst [vmem:[#allocation27_spill] sm:$0xff] %v9382_v32  ;;  %7605 = vmatmul.msk.bf16.gmra.mxu3 %vm2416_vm4, %v9382_v32  ;;  %3241 = vmatpush.bf16.msrb.mxu2 %v3230_v59  ;;  %v2050_v51 = vadd.f32 %v12579_v19, %v1925_v28  ;;  %v2241_v36 = vmax.f32 %v2209_v61, 0.0  ;;  %v12580_v28 = vld [vmem:[#allocation29_spill] sm:$0xff] }
 0x379   : > { %3363 = vmatpush.bf16.msra.mxu3 %v3355_v34  ;;  %v2505_v4 = vpop.f32.mrf.mxu1  ;;  %v1802_v61 = vadd.f32 %v9066_v29, %v12580_v28 }
 0x37a   : > { %v2639_v21 = vpop.f32.mrf.mxu2  ;;  %v2350_v50 = vrot.slane %v2241_v36, 7  ;;  %v2745_v1 = vrot.slane %v2241_v36, 1 }
 0x37b   : > { %v2881_v23 = vpop.f32.mrf.mxu3  ;;  %v2640_v15 = vadd.f32 %v2639_v21, %v2503_v27  ;;  %v2138_v2 = vpop.f32.mrf.mxu0 }
 0x37c   : > { %v2175_v42 = vadd.f32 %v2138_v2, %v2050_v51  ;;  %v2351_v51 = vsel %vm707_vm0, %v12530_v8, %v2350_v50 }
 0x37d   : > { %v9393_v22 = vadd.f32 %v2881_v23, %v2640_v15 }
 0x37e   : > { %v2210_v33 = vadd.f32 %v8955_v20, %v2175_v42 }
 0x380   : > { %v2242_v43 = vmax.f32 %v2210_v33, 0.0 }
 0x381   : > { %v2508_v32 = vpop.f32.mrf.mxu1 }
 0x382   : > { %v2352_v26 = vrot.slane %v2242_v43, 7  ;;  %v2746_v59 = vrot.slane %v2242_v43, 1  ;;  %v2641_v34 = vpop.f32.mrf.mxu2  ;;  %v9396_v39 = vpack.c.bf16 %v2242_v43, %v2241_v36 }
 0x383   : > { %v2883_v9 = vpop.f32.mrf.mxu3  ;;  %v2642_v27 = vadd.f32 %v2641_v34, %v2505_v4  ;;  %v2141_v19 = vpop.f32.mrf.mxu0 }
 0x384   : > { %v2176_v21 = vadd.f32 %v2141_v19, %v8965_v30  ;;  %7574 = vmatmul.msk.bf16.gmra.mxu1 %vm2416_vm4, %v9396_v39  ;;  %v2353_v23 = vsel %vm707_vm0, %v2350_v50, %v2352_v26  ;;  %v2747_v15 = vsel %vm1119_vm3, %v2745_v1, %v2746_v59  ;;  %v2748_v43 = vsel %vm1119_vm3, %v2746_v59, %v12507_v14 }
 0x385   : > { %v9409_v36 = vadd.f32 %v2883_v9, %v2642_v27  ;;  %v9411_v29 = vpack.c.bf16 %v2353_v23, %v2351_v51  ;;  %v9413_v4 = vpack.c.bf16 %v2748_v43, %v2747_v15  ;;  %v1927_v1 = vadd.f32 %v9072_v40, %v1802_v61 }
 0x386   : > { %7614 = vmatmul.msk.bf16.gmra.mxu0 %vm2416_vm4, %v9174_v37  ;;  %v2211_v30 = vadd.f32 %v8955_v20, %v2176_v21 }
 0x387   : > { %12581 = vst [vmem:[#allocation28_spill] sm:$0xff] %v9413_v4  ;;  %7590 = vmatmul.msk.bf16.gmra.mxu2 %vm2416_vm4, %v9411_v29  ;;  %v2052_v42 = vadd.f32 %v9095_v38, %v1927_v1 }
 0x388   : > { %7606 = vmatmul.msk.bf16.gmra.mxu3 %vm2416_vm4, %v9413_v4  ;;  %v2243_v26 = vmax.f32 %v2211_v30, 0.0 }
 0x389   : > { %v2510_v2 = vpop.f32.mrf.mxu1 }
 0x38a   : > { %v2644_v33 = vpop.f32.mrf.mxu2  ;;  %v2965_v19 = vrot.slane %v2243_v26, 7  ;;  %v3223_v23 = vrot.slane %v2243_v26, 1 }
 0x38b   : > { %v2886_v50 = vpop.f32.mrf.mxu3  ;;  %v2645_v59 = vadd.f32 %v2644_v33, %v2508_v32  ;;  %v2143_v34 = vpop.f32.mrf.mxu0 }
 0x38c   : > { %v2177_v9 = vadd.f32 %v2143_v34, %v2052_v42  ;;  %v2966_v32 = vsel %vm707_vm0, %v12530_v8, %v2965_v19 }
 0x38d   : > { %v9424_v28 = vadd.f32 %v2886_v50, %v2645_v59 }
 0x38e   : > { %v2212_v27 = vadd.f32 %v8955_v20, %v2177_v9 }
 0x390   : > { %v2244_v51 = vmax.f32 %v2212_v27, 0.0 }
 0x391   : > { %v2513_v21 = vpop.f32.mrf.mxu1 }
 0x392   : > { %v2967_v15 = vrot.slane %v2244_v51, 7  ;;  %v3224_v43 = vrot.slane %v2244_v51, 1  ;;  %v2646_v40 = vpop.f32.mrf.mxu2  ;;  %v9427_v4 = vpack.c.bf16 %v2244_v51, %v2243_v26 }
 0x393   : > { %v2888_v61 = vpop.f32.mrf.mxu3  ;;  %v2647_v38 = vadd.f32 %v2646_v40, %v2510_v2  ;;  %v2985_v1 = vpop.f32.mrf.mxu0 }
 0x394   : > { %v9432_v30 = vadd.f32 %v2985_v1, %v9101_v48  ;;  %7623 = vmatmul.msk.bf16.vlgmr.msrb.gmra.mxu1 %vm2416_vm4, %v8967_v10  ;;  %v2968_v20 = vsel %vm707_vm0, %v2965_v19, %v2967_v15  ;;  %v3225_v42 = vsel %vm1119_vm3, %v3223_v23, %v3224_v43  ;;  %v3226_v33 = vsel %vm1119_vm3, %v3224_v43, %v12507_v14 }
 0x395   : > { %v9440_v50 = vadd.f32 %v2888_v61, %v2647_v38  ;;  %v9442_v2 = vpack.c.bf16 %v2968_v20, %v2966_v32  ;;  %v9444_v26 = vpack.c.bf16 %v3226_v33, %v3225_v42 }
 0x396   : > { %7615 = vmatmul.msk.bf16.gmra.mxu0 %vm2416_vm4, %v9207_v45 }
 0x397   : > { %12582 = vst [vmem:[#allocation30_spill] sm:$0xff] %v9444_v26  ;;  %7639 = vmatmul.msk.bf16.vlgmr.msrb.gmra.mxu2 %vm2416_vm4, %v8980_v58 }
 0x398   : > { %7655 = vmatmul.msk.bf16.vlgmr.msra.gmra.mxu3 %vm2416_vm4, %v9002_v6 }
 0x399   : > { %v2515_v10 = vpop.f32.mrf.mxu1 }
 0x39a   : > { %v2649_v48 = vpop.f32.mrf.mxu2 }
 0x39b   : > { %v2891_v59 = vpop.f32.mrf.mxu3  ;;  %v2650_v34 = vadd.f32 %v2649_v48, %v2513_v21  ;;  %v9452_v9 = vpop.f32.mrf.mxu0 }
 0x39d   : > { %v9454_v27 = vadd.f32 %v2891_v59, %v2650_v34 }
 0x3a1   : > { %v2518_v19 = vpop.f32.mrf.mxu1 }
 0x3a2   : > { %v2651_v51 = vpop.f32.mrf.mxu2 }
 0x3a3   : > { %v2893_v23 = vpop.f32.mrf.mxu3  ;;  %v2652_v15 = vadd.f32 %v2651_v51, %v2515_v10  ;;  %v2990_v43 = vpop.f32.mrf.mxu0 }
 0x3a4   : > { %v9457_v40 = vadd.f32 %v2990_v43, %v9220_v55  ;;  %7624 = vmatmul.msk.bf16.gmra.mxu1 %vm2416_vm4, %v8991_v16 }
 0x3a5   : > { %v9461_v58 = vadd.f32 %v2893_v23, %v2652_v15 }
 0x3a6   : > { %7616 = vmatmul.msk.bf16.gmra.mxu0 %vm2416_vm4, %v9238_v13 }
 0x3a7   : > { %7640 = vmatmul.msk.bf16.gmra.mxu2 %vm2416_vm4, %v9004_v44 }
 0x3a8   : > { %7656 = vmatmul.msk.bf16.gmra.mxu3 %vm2416_vm4, %v9026_v11 }
 0x3a9   : > { %v2520_v6 = vpop.f32.mrf.mxu1 }
 0x3aa   : > { %v2654_v21 = vpop.f32.mrf.mxu2 }
 0x3ab   : > { %v2896_v61 = vpop.f32.mrf.mxu3  ;;  %v2655_v38 = vadd.f32 %v2654_v21, %v2518_v19  ;;  %v2992_v55 = vpop.f32.mrf.mxu0 }
 0x3ac   : > { %v9470_v1 = vadd.f32 %v2992_v55, %v9236_v25 }
 0x3ad   : > { %v9472_v32 = vadd.f32 %v2896_v61, %v2655_v38 }
 0x3b1   : > { %v2523_v20 = vpop.f32.mrf.mxu1 }
 0x3b2   : > { %v2656_v42 = vpop.f32.mrf.mxu2 }
 0x3b3   : > { %v2898_v33 = vpop.f32.mrf.mxu3  ;;  %v2657_v10 = vadd.f32 %v2656_v42, %v2520_v6  ;;  %v2995_v48 = vpop.f32.mrf.mxu0  ;;  %v12583_v42 = vld [vmem:[#allocation32_spill] sm:$0xff] }
 0x3b4   : > { %v9475_v59 = vadd.f32 %v2995_v48, %v9257_v31  ;;  %7625 = vmatmul.msk.bf16.gmra.mxu1 %vm2416_vm4, %v9015_v47 }
 0x3b5   : > { %v9479_v11 = vadd.f32 %v2898_v33, %v2657_v10 }
 0x3b6   : > { %7617 = vmatmul.msk.bf16.gmra.mxu0 %vm2416_vm4, %v9275_v49 }
 0x3b7   : > { %7641 = vmatmul.msk.bf16.gmra.mxu2 %vm2416_vm4, %v9028_v52 }
 0x3b8   : > { %7657 = vmatmul.msk.bf16.gmra.mxu3 %vm2416_vm4, %v9052_v5 }
 0x3b9   : > { %v2525_v25 = vpop.f32.mrf.mxu1 }
 0x3ba   : > { %v2659_v34 = vpop.f32.mrf.mxu2 }
 0x3bb   : > { %v2901_v19 = vpop.f32.mrf.mxu3  ;;  %v2660_v51 = vadd.f32 %v2659_v34, %v2523_v20  ;;  %v2997_v31 = vpop.f32.mrf.mxu0 }
 0x3bc   : > { %v9488_v23 = vadd.f32 %v2997_v31, %v9273_v24  ;;  %v12584_v24 = vld [vmem:[#allocation33_spill] sm:$0xff] }
 0x3bd   : > { %v9490_v15 = vadd.f32 %v2901_v19, %v2660_v51 }
 0x3c1   : > { %v2528_v43 = vpop.f32.mrf.mxu1 }
 0x3c2   : > { %v2661_v6 = vpop.f32.mrf.mxu2 }
 0x3c3   : > { %v2903_v21 = vpop.f32.mrf.mxu3  ;;  %v2662_v61 = vadd.f32 %v2661_v6, %v2525_v25  ;;  %v3000_v38 = vpop.f32.mrf.mxu0 }
 0x3c4   : > { %v9493_v55 = vadd.f32 %v3000_v38, %v9288_v57  ;;  %7626 = vmatmul.msk.bf16.gmra.mxu1 %vm2416_vm4, %v12583_v42  ;;  %v12585_v38 = vld [vmem:[#allocation34_spill] sm:$0xff] }
 0x3c5   : > { %v9497_v5 = vadd.f32 %v2903_v21, %v2662_v61 }
 0x3c6   : > { %7618 = vmatmul.msk.bf16.gmra.mxu0 %vm2416_vm4, %v9306_v0 }
 0x3c7   : > { %7642 = vmatmul.msk.bf16.gmra.mxu2 %vm2416_vm4, %v12584_v24 }
 0x3c8   : > { %7658 = vmatmul.msk.bf16.gmra.mxu3 %vm2416_vm4, %v9083_v7 }
 0x3c9   : > { %v2530_v20 = vpop.f32.mrf.mxu1 }
 0x3ca   : > { %v2664_v33 = vpop.f32.mrf.mxu2 }
 0x3cb   : > { %v2906_v10 = vpop.f32.mrf.mxu3  ;;  %v2665_v48 = vadd.f32 %v2664_v33, %v2528_v43  ;;  %v3002_v57 = vpop.f32.mrf.mxu0 }
 0x3cc   : > { %v9506_v25 = vadd.f32 %v3002_v57, %v9304_v60  ;;  %v12586_v60 = vld [vmem:[#allocation35_spill] sm:$0xff] }
 0x3cd   : > { %v9508_v34 = vadd.f32 %v2906_v10, %v2665_v48 }
 0x3d1   : > { %v2533_v19 = vpop.f32.mrf.mxu1 }
 0x3d2   : > { %v2666_v51 = vpop.f32.mrf.mxu2 }
 0x3d3   : > { %v2908_v31 = vpop.f32.mrf.mxu3  ;;  %v2667_v6 = vadd.f32 %v2666_v51, %v2530_v20  ;;  %v3005_v21 = vpop.f32.mrf.mxu0 }
 0x3d4   : > { %v9511_v61 = vadd.f32 %v3005_v21, %v9319_v12  ;;  %7627 = vmatmul.msk.bf16.gmra.mxu1 %vm2416_vm4, %v12585_v38 }
 0x3d5   : > { %v9515_v7 = vadd.f32 %v2908_v31, %v2667_v6 }
 0x3d6   : > { %7619 = vmatmul.msk.bf16.gmra.mxu0 %vm2416_vm4, %v9337_v18 }
 0x3d7   : > { %7643 = vmatmul.msk.bf16.gmra.mxu2 %vm2416_vm4, %v12586_v60  ;;  %v12587_v60 = vld [vmem:[#allocation16_spill] sm:$0xff] }
 0x3d8   : > { %7659 = vmatmul.msk.bf16.gmra.mxu3 %vm2416_vm4, %v9120_v41 }
 0x3d9   : > { %v2535_v43 = vpop.f32.mrf.mxu1 }
 0x3da   : > { %v2669_v20 = vpop.f32.mrf.mxu2 }
 0x3db   : > { %v2911_v33 = vpop.f32.mrf.mxu3  ;;  %v2670_v10 = vadd.f32 %v2669_v20, %v2533_v19  ;;  %v3007_v12 = vpop.f32.mrf.mxu0 }
 0x3dc   : > { %v9524_v48 = vadd.f32 %v3007_v12, %v9335_v46 }
 0x3dd   : > { %v9526_v57 = vadd.f32 %v2911_v33, %v2670_v10 }
 0x3e1   : > { %v2538_v51 = vpop.f32.mrf.mxu1 }
 0x3e2   : > { %v2671_v31 = vpop.f32.mrf.mxu2 }
 0x3e3   : > { %v2913_v6 = vpop.f32.mrf.mxu3  ;;  %v2672_v21 = vadd.f32 %v2671_v31, %v2535_v43  ;;  %v3010_v14 = vpop.f32.mrf.mxu0 }
 0x3e4   : > { %v9529_v8 = vadd.f32 %v3010_v14, %v9350_v17  ;;  %7628 = vmatmul.msk.bf16.gmra.mxu1 %vm2416_vm4, %v9099_v3 }
 0x3e5   : > { %v9533_v41 = vadd.f32 %v2913_v6, %v2672_v21  ;;  %v2259_v6 = vld [vmem:[%s12315_s6 + $0x70] sm:$0xff] }
 0x3e6   : > { %7620 = vmatmul.msk.bf16.gmra.mxu0 %vm2416_vm4, %v9380_v62 }
 0x3e7   : > { %7644 = vmatmul.msk.bf16.gmra.mxu2 %vm2416_vm4, %v9122_v35 }
 0x3e8   : > { %7660 = vmatmul.msk.bf16.gmra.mxu3 %vm2416_vm4, %v9147_v56  ;;  %v2260_v56 = vld [vmem:[%s12315_s6 + $0x78] sm:$0xff] }
 0x3e9   : > { %v2540_v46 = vpop.f32.mrf.mxu1 }
 0x3ea   : > { %v2674_v19 = vpop.f32.mrf.mxu2 }
 0x3eb   : > { %v2916_v43 = vpop.f32.mrf.mxu3  ;;  %v2675_v20 = vadd.f32 %v2674_v19, %v2538_v51  ;;  %v3012_v14 = vpop.f32.mrf.mxu0  ;;  %v3477_v51 = vpack.c.bf16 %v2260_v56, %v2259_v6 }
 0x3ec   : > { %v9542_v17 = vadd.f32 %v3012_v14, %v9378_v53 }
 0x3ed   : > { %v9544_v33 = vadd.f32 %v2916_v43, %v2675_v20  ;;  %3485 = vmatpush.bf16.msra.mxu0 %v3477_v51 }
 0x3f1   : > { %v2543_v10 = vpop.f32.mrf.mxu1 }
 0x3f2   : > { %v2676_v12 = vpop.f32.mrf.mxu2 }
 0x3f3   : > { %v2918_v31 = vpop.f32.mrf.mxu3  ;;  %v2677_v21 = vadd.f32 %v2676_v12, %v2540_v46  ;;  %v3015_v35 = vpop.f32.mrf.mxu0 }
 0x3f4   : > { %v9553_v19 = vadd.f32 %v3015_v35, %v9393_v22  ;;  %7629 = vmatmul.msk.bf16.gmra.mxu1 %vm2416_vm4, %v9134_v54 }
 0x3f5   : > { %v9557_v53 = vadd.f32 %v2918_v31, %v2677_v21 }
 0x3f6   : > { %7621 = vmatmul.msk.bf16.gmra.mxu0 %vm2416_vm4, %v9411_v29 }
 0x3f7   : > { %7645 = vmatmul.msk.bf16.gmra.mxu2 %vm2416_vm4, %v9149_v63 }
 0x3f8   : > { %7661 = vmatmul.msk.bf16.gmra.mxu3 %vm2416_vm4, %v9174_v37 }
 0x3f9   : > { %v2545_v46 = vpop.f32.mrf.mxu1 }
 0x3fa   : > { %v2679_v43 = vpop.f32.mrf.mxu2 }
 0x3fb   : > { %v2921_v20 = vpop.f32.mrf.mxu3  ;;  %v2680_v35 = vadd.f32 %v2679_v43, %v2543_v10  ;;  %v3017_v22 = vpop.f32.mrf.mxu0 }
 0x3fc   : > { %v9566_v14 = vadd.f32 %v3017_v22, %v9409_v36  ;;  %v12588_v36 = vld [vmem:[#allocation13_spill] sm:$0xff] }
 0x3fd   : > { %v9568_v12 = vadd.f32 %v2921_v20, %v2680_v35 }
 0x401   : > { %v2548_v31 = vpop.f32.mrf.mxu1 }
 0x402   : > { %v2681_v6 = vpop.f32.mrf.mxu2 }
 0x403   : > { %v2923_v56 = vpop.f32.mrf.mxu3  ;;  %v2682_v21 = vadd.f32 %v2681_v6, %v2545_v46  ;;  %v3020_v51 = vpop.f32.mrf.mxu0 }
 0x404   : > { %v9571_v63 = vadd.f32 %v3020_v51, %v9424_v28  ;;  %7630 = vmatmul.msk.bf16.gmra.mxu1 %vm2416_vm4, %v12587_v60 }
 0x405   : > { %v9575_v37 = vadd.f32 %v2923_v56, %v2682_v21  ;;  %v12589_v56 = vld [vmem:[#allocation7_spill] sm:$0xff] }
 0x406   : > { %7622 = vmatmul.msk.bf16.gmra.mxu0 %vm2416_vm4, %v9442_v2  ;;  %v12590_v21 = vld [vmem:[#allocation11_spill] sm:$0xff] }
 0x407   : > { %7646 = vmatmul.msk.bf16.gmra.mxu2 %vm2416_vm4, %v12588_v36  ;;  %v2612_v51 = vadd.f32 %v12590_v21, %v12589_v56 }
 0x408   : > { %7662 = vmatmul.msk.bf16.gmra.mxu3 %vm2416_vm4, %v9207_v45 }
 0x409   : > { %v2550_v10 = vpop.f32.mrf.mxu1 }
 0x40a   : > { %v2684_v46 = vpop.f32.mrf.mxu2 }
 0x40b   : > { %v2926_v43 = vpop.f32.mrf.mxu3  ;;  %v2685_v20 = vadd.f32 %v2684_v46, %v2548_v31  ;;  %v3022_v28 = vpop.f32.mrf.mxu0  ;;  %v12591_v31 = vld [vmem:[#allocation18_spill] sm:$0xff] }
 0x40c   : > { %v9584_v35 = vadd.f32 %v3022_v28, %v9440_v50  ;;  %v12592_v46 = vld [vmem:[#allocation14_spill] sm:$0xff] }
 0x40d   : > { %v9586_v22 = vadd.f32 %v2926_v43, %v2685_v20  ;;  %v2932_v43 = vadd.f32 %v12592_v46, %v2612_v51  ;;  %v12593_v20 = vld [vmem:[#allocation15_spill] sm:$0xff] }
 0x411   : > { %v3111_v6 = vpop.f32.mrf.mxu1 }
 0x412   : > { %v3191_v24 = vadd.f32 %v3111_v6, %v9432_v30  ;;  %v2686_v36 = vpop.f32.mrf.mxu2  ;;  %v3066_v30 = vadd.f32 %v9452_v9, %v2932_v43  ;;  %v12594_v43 = vld [vmem:[#allocation12_spill] sm:$0xff] }
 0x413   : > { %v2928_v52 = vpop.f32.mrf.mxu3  ;;  %v2687_v44 = vadd.f32 %v2686_v36, %v2550_v10  ;;  %v3025_v45 = vpop.f32.mrf.mxu0 }
 0x414   : > { %v9592_v26 = vadd.f32 %v3025_v45, %v9454_v27  ;;  %7631 = vmatmul.msk.bf16.gmra.mxu1 %vm2416_vm4, %v12591_v31 }
 0x415   : > { %v9596_v50 = vadd.f32 %v2928_v52, %v2687_v44 }
 0x416   : > { %7671 = vmatmul.msk.bf16.vlgmr.msra.gmra.mxu0 %vm2416_vm4, %v8991_v16 }
 0x417   : > { %7647 = vmatmul.msk.bf16.gmra.mxu2 %vm2416_vm4, %v12593_v20 }
 0x418   : > { %7663 = vmatmul.msk.bf16.gmra.mxu3 %vm2416_vm4, %v9238_v13 }
 0x419   : > { %v3113_v27 = vpop.f32.mrf.mxu1 }
 0x41a   : > { %v3192_v36 = vadd.f32 %v3113_v27, %v3066_v30  ;;  %v3243_v10 = vpop.f32.mrf.mxu2 }
 0x41b   : > { %v3365_v28 = vpop.f32.mrf.mxu3  ;;  %v3323_v6 = vadd.f32 %v3243_v10, %v3191_v24  ;;  %v3027_v44 = vpop.f32.mrf.mxu0 }
 0x41c   : > { %v9607_v52 = vadd.f32 %v3027_v44, %v9461_v58  ;;  %v12595_v58 = vld [vmem:[#allocation17_spill] sm:$0xff] }
 0x41d   : > { %v9609_v56 = vadd.f32 %v3365_v28, %v3323_v6 }
 0x421   : > { %v3116_v16 = vpop.f32.mrf.mxu1 }
 0x422   : > { %v3193_v21 = vadd.f32 %v3116_v16, %v9457_v40  ;;  %v3245_v51 = vpop.f32.mrf.mxu2 }
 0x423   : > { %v3367_v45 = vpop.f32.mrf.mxu3  ;;  %v3324_v46 = vadd.f32 %v3245_v51, %v3192_v36  ;;  %v3030_v13 = vpop.f32.mrf.mxu0 }
 0x424   : > { %v9613_v9 = vadd.f32 %v3030_v13, %v9472_v32  ;;  %7632 = vmatmul.msk.bf16.gmra.mxu1 %vm2416_vm4, %v12594_v43 }
 0x425   : > { %v9617_v24 = vadd.f32 %v3367_v45, %v3324_v46 }
 0x426   : > { %7672 = vmatmul.msk.bf16.gmra.mxu0 %vm2416_vm4, %v9015_v47 }
 0x427   : > { %7648 = vmatmul.msk.bf16.gmra.mxu2 %vm2416_vm4, %v12595_v58 }
 0x428   : > { %7664 = vmatmul.msk.bf16.gmra.mxu3 %vm2416_vm4, %v9275_v49 }
 0x429   : > { %v3118_v40 = vpop.f32.mrf.mxu1 }
 0x42a   : > { %v3194_v30 = vadd.f32 %v3118_v40, %v9470_v1  ;;  %v3248_v27 = vpop.f32.mrf.mxu2  ;;  %v12596_v1 = vld [vmem:[#allocation20_spill] sm:$0xff]  ;;  %v12597_v40 = vld [vmem:[#allocation19_spill] sm:$0xff] }
 0x42b   : > { %v3370_v32 = vpop.f32.mrf.mxu3  ;;  %v3325_v36 = vadd.f32 %v3248_v27, %v3193_v21  ;;  %v3032_v10 = vpop.f32.mrf.mxu0 }
 0x42c   : > { %v9627_v28 = vadd.f32 %v3032_v10, %v9479_v11  ;;  %v2261_v11 = vld [vmem:[%s12315_s6 + $0x80] sm:$0xff] }
 0x42d   : > { %v9629_v6 = vadd.f32 %v3370_v32, %v3325_v36 }
 0x431   : > { %v3121_v44 = vpop.f32.mrf.mxu1 }
 0x432   : > { %v3195_v47 = vadd.f32 %v3121_v44, %v9475_v59  ;;  %v3250_v16 = vpop.f32.mrf.mxu2  ;;  %v2262_v59 = vld [vmem:[%s12315_s6 + $0x88] sm:$0xff] }
 0x433   : > { %v3372_v51 = vpop.f32.mrf.mxu3  ;;  %v3326_v45 = vadd.f32 %v3250_v16, %v3194_v30  ;;  %v3035_v46 = vpop.f32.mrf.mxu0  ;;  %v3599_v13 = vpack.c.bf16 %v2262_v59, %v2261_v11 }
 0x434   : > { %v9633_v49 = vadd.f32 %v3035_v46, %v9490_v15  ;;  %7633 = vmatmul.msk.bf16.gmra.mxu1 %vm2416_vm4, %v12596_v1 }
 0x435   : > { %v9637_v21 = vadd.f32 %v3372_v51, %v3326_v45  ;;  %3607 = vmatpush.bf16.msra.mxu1 %v3599_v13 }
 0x436   : > { %7673 = vmatmul.msk.bf16.gmra.mxu0 %vm2416_vm4, %v12583_v42 }
 0x437   : > { %7649 = vmatmul.msk.bf16.gmra.mxu2 %vm2416_vm4, %v12597_v40 }
 0x438   : > { %7665 = vmatmul.msk.bf16.gmra.mxu3 %vm2416_vm4, %v9306_v0 }
 0x439   : > { %v3123_v15 = vpop.f32.mrf.mxu1 }
 0x43a   : > { %v3196_v30 = vadd.f32 %v3123_v15, %v9488_v23  ;;  %v3253_v27 = vpop.f32.mrf.mxu2  ;;  %v12598_v23 = vld [vmem:[#allocation22_spill] sm:$0xff] }
 0x43b   : > { %v3375_v32 = vpop.f32.mrf.mxu3  ;;  %v3327_v36 = vadd.f32 %v3253_v27, %v3195_v47  ;;  %v3037_v10 = vpop.f32.mrf.mxu0 }
 0x43c   : > { %v9653_v44 = vadd.f32 %v3037_v10, %v9497_v5  ;;  %v12599_v5 = vld [vmem:[#allocation21_spill] sm:$0xff] }
 0x43d   : > { %v9655_v16 = vadd.f32 %v3375_v32, %v3327_v36 }
 0x441   : > { %v3126_v42 = vpop.f32.mrf.mxu1 }
 0x442   : > { %v3197_v51 = vadd.f32 %v3126_v42, %v9493_v55  ;;  %v3255_v45 = vpop.f32.mrf.mxu2 }
 0x443   : > { %v3377_v46 = vpop.f32.mrf.mxu3  ;;  %v3328_v11 = vadd.f32 %v3255_v45, %v3196_v30  ;;  %v3040_v0 = vpop.f32.mrf.mxu0 }
 0x444   : > { %v9659_v59 = vadd.f32 %v3040_v0, %v9508_v34  ;;  %7634 = vmatmul.msk.bf16.gmra.mxu1 %vm2416_vm4, %v12598_v23 }
 0x445   : > { %v9663_v47 = vadd.f32 %v3377_v46, %v3328_v11 }
 0x446   : > { %7674 = vmatmul.msk.bf16.gmra.mxu0 %vm2416_vm4, %v12585_v38 }
 0x447   : > { %7650 = vmatmul.msk.bf16.gmra.mxu2 %vm2416_vm4, %v12599_v5 }
 0x448   : > { %7666 = vmatmul.msk.bf16.gmra.mxu3 %vm2416_vm4, %v9337_v18 }
 0x449   : > { %v3128_v55 = vpop.f32.mrf.mxu1 }
 0x44a   : > { %v3198_v13 = vadd.f32 %v3128_v55, %v9506_v25  ;;  %v3258_v15 = vpop.f32.mrf.mxu2  ;;  %v12600_v25 = vld [vmem:[#allocation23_spill] sm:$0xff] }
 0x44b   : > { %v3380_v34 = vpop.f32.mrf.mxu3  ;;  %v3329_v30 = vadd.f32 %v3258_v15, %v3197_v51  ;;  %v3042_v27 = vpop.f32.mrf.mxu0 }
 0x44c   : > { %v9673_v32 = vadd.f32 %v3042_v27, %v9515_v7  ;;  %v12601_v7 = vld [vmem:[#allocation25_spill] sm:$0xff] }
 0x44d   : > { %v9675_v36 = vadd.f32 %v3380_v34, %v3329_v30 }
 0x451   : > { %v3131_v10 = vpop.f32.mrf.mxu1 }
 0x452   : > { %v3199_v38 = vadd.f32 %v3131_v10, %v9511_v61  ;;  %v3260_v42 = vpop.f32.mrf.mxu2 }
 0x453   : > { %v3382_v45 = vpop.f32.mrf.mxu3  ;;  %v3330_v46 = vadd.f32 %v3260_v42, %v3198_v13  ;;  %v3045_v11 = vpop.f32.mrf.mxu0 }
 0x454   : > { %v9679_v18 = vadd.f32 %v3045_v11, %v9526_v57  ;;  %7635 = vmatmul.msk.bf16.gmra.mxu1 %vm2416_vm4, %v12600_v25 }
 0x455   : > { %v9683_v51 = vadd.f32 %v3382_v45, %v3330_v46  ;;  %v12602_v45 = vld [vmem:[#allocation24_spill] sm:$0xff] }
 0x456   : > { %7675 = vmatmul.msk.bf16.gmra.mxu0 %vm2416_vm4, %v9099_v3 }
 0x457   : > { %7651 = vmatmul.msk.bf16.gmra.mxu2 %vm2416_vm4, %v12601_v7 }
 0x458   : > { %7667 = vmatmul.msk.bf16.gmra.mxu3 %vm2416_vm4, %v9380_v62 }
 0x459   : > { %v3133_v61 = vpop.f32.mrf.mxu1 }
 0x45a   : > { %v9692_v0 = vadd.f32 %v3133_v61, %v9524_v48  ;;  %v3263_v57 = vpop.f32.mrf.mxu2 }
 0x45b   : > { %v3385_v55 = vpop.f32.mrf.mxu3  ;;  %v3331_v13 = vadd.f32 %v3263_v57, %v3199_v38  ;;  %v3047_v15 = vpop.f32.mrf.mxu0 }
 0x45c   : > { %v9695_v34 = vadd.f32 %v3047_v15, %v9533_v41  ;;  %v12603_v41 = vld [vmem:[#allocation27_spill] sm:$0xff] }
 0x45d   : > { %v9697_v30 = vadd.f32 %v3385_v55, %v3331_v13 }
 0x461   : > { %v3136_v3 = vpop.f32.mrf.mxu1 }
 0x462   : > { %v3201_v27 = vadd.f32 %v3136_v3, %v9529_v8  ;;  %v9700_v10 = vpop.f32.mrf.mxu2 }
 0x463   : > { %v9702_v42 = vpop.f32.mrf.mxu3  ;;  %v3050_v62 = vpop.f32.mrf.mxu0 }
 0x464   : > { %v9705_v48 = vadd.f32 %v3050_v62, %v9544_v33  ;;  %7636 = vmatmul.msk.bf16.gmra.mxu1 %vm2416_vm4, %v12602_v45 }
 0x466   : > { %7676 = vmatmul.msk.bf16.gmra.mxu0 %vm2416_vm4, %v9134_v54 }
 0x467   : > { %7652 = vmatmul.msk.bf16.gmra.mxu2 %vm2416_vm4, %v12603_v41 }
 0x468   : > { %7668 = vmatmul.msk.bf16.gmra.mxu3 %vm2416_vm4, %v9411_v29 }
 0x469   : > { %v3138_v8 = vpop.f32.mrf.mxu1 }
 0x46a   : > { %v9716_v38 = vadd.f32 %v3138_v8, %v9542_v17  ;;  %v3268_v46 = vpop.f32.mrf.mxu2 }
 0x46b   : > { %v3390_v11 = vpop.f32.mrf.mxu3  ;;  %v3333_v33 = vadd.f32 %v3268_v46, %v3201_v27  ;;  %v3052_v61 = vpop.f32.mrf.mxu0 }
 0x46c   : > { %v9719_v57 = vadd.f32 %v3052_v61, %v9557_v53  ;;  %v12604_v53 = vld [vmem:[#allocation28_spill] sm:$0xff] }
 0x46d   : > { %v9721_v55 = vadd.f32 %v3390_v11, %v3333_v33 }
 0x471   : > { %v3141_v54 = vpop.f32.mrf.mxu1 }
 0x472   : > { %v3203_v13 = vadd.f32 %v3141_v54, %v9553_v19  ;;  %v9724_v15 = vpop.f32.mrf.mxu2 }
 0x473   : > { %v9726_v3 = vpop.f32.mrf.mxu3  ;;  %v3055_v29 = vpop.f32.mrf.mxu0 }
 0x474   : > { %v9729_v17 = vadd.f32 %v3055_v29, %v9568_v12  ;;  %7637 = vmatmul.msk.bf16.gmra.mxu1 %vm2416_vm4, %v9396_v39 }
 0x476   : > { %7677 = vmatmul.msk.bf16.gmra.mxu0 %vm2416_vm4, %v12587_v60 }
 0x477   : > { %7653 = vmatmul.msk.bf16.gmra.mxu2 %vm2416_vm4, %v12604_v53 }
 0x478   : > { %7669 = vmatmul.msk.bf16.gmra.mxu3 %vm2416_vm4, %v9442_v2 }
 0x479   : > { %v3143_v19 = vpop.f32.mrf.mxu1 }
 0x47a   : > { %v9740_v27 = vadd.f32 %v3143_v19, %v9566_v14  ;;  %v3273_v62 = vpop.f32.mrf.mxu2 }
 0x47b   : > { %v3395_v8 = vpop.f32.mrf.mxu3  ;;  %v3335_v12 = vadd.f32 %v3273_v62, %v3203_v13  ;;  %v3057_v46 = vpop.f32.mrf.mxu0  ;;  %v12607_v13 = vld [vmem:[#allocation4_spill] sm:$0xff] }
 0x47c   : > { %v9743_v11 = vadd.f32 %v3057_v46, %v9575_v37  ;;  %v12606_v37 = vld [vmem:[#allocation30_spill] sm:$0xff] }
 0x47d   : > { %v9745_v33 = vadd.f32 %v3395_v8, %v3335_v12 }
 0x481   : > { %v3146_v60 = vpop.f32.mrf.mxu1 }
 0x482   : > { %v3205_v61 = vadd.f32 %v3146_v60, %v9571_v63  ;;  %v9748_v54 = vpop.f32.mrf.mxu2 }
 0x483   : > { %v9750_v29 = vpop.f32.mrf.mxu3  ;;  %v3060_v2 = vpop.f32.mrf.mxu0 }
 0x484   : > { %12605 = vst [vmem:[#allocation26_spill] sm:$0xff] %v9750_v29  ;;  %v9753_v14 = vadd.f32 %v3060_v2, %v9586_v22  ;;  %7638 = vmatmul.msk.bf16.gmra.mxu1 %vm2416_vm4, %v9427_v4 }
 0x486   : > { %7678 = vmatmul.msk.bf16.gmra.mxu0 %vm2416_vm4, %v12591_v31 }
 0x487   : > { %7654 = vmatmul.msk.bf16.gmra.mxu2 %vm2416_vm4, %v12606_v37 }
 0x488   : > { %7670 = vmatmul.msk.bf16.gmra.mxu3 %vm2416_vm4, %v12607_v13 }
 0x489   : > { %v3148_v63 = vpop.f32.mrf.mxu1 }
 0x48a   : > { %v9764_v19 = vadd.f32 %v3148_v63, %v9584_v35  ;;  %v3278_v62 = vpop.f32.mrf.mxu2  ;;  %v12609_v63 = vld [vmem:[#allocation9_spill] sm:$0xff] }
 0x48b   : > { %v3400_v8 = vpop.f32.mrf.mxu3  ;;  %v3337_v22 = vadd.f32 %v3278_v62, %v3205_v61  ;;  %v3062_v12 = vpop.f32.mrf.mxu0 }
 0x48c   : > { %v9767_v46 = vadd.f32 %v3062_v12, %v9596_v50 }
 0x48d   : > { %v9769_v60 = vadd.f32 %v3400_v8, %v3337_v22 }
 0x491   : > { %v3151_v31 = vpop.f32.mrf.mxu1 }
 0x492   : > { %v3207_v2 = vadd.f32 %v3151_v31, %v9592_v26  ;;  %v9772_v29 = vpop.f32.mrf.mxu2 }
 0x493   : > { %v9774_v37 = vpop.f32.mrf.mxu3  ;;  %v3487_v13 = vpop.f32.mrf.mxu0 }
 0x494   : > { %12608 = vst [vmem:[#allocation31_spill] sm:$0xff] %v9774_v37  ;;  %v9777_v35 = vadd.f32 %v3487_v13, %v9609_v56  ;;  %7686 = vmatmul.msk.bf16.vlgmr.msra.gmra.mxu1 %vm2416_vm4, %v12609_v63 }
 0x496   : > { %7679 = vmatmul.msk.bf16.gmra.mxu0 %vm2416_vm4, %v12594_v43 }
 0x499   : > { %v3153_v50 = vpop.f32.mrf.mxu1 }
 0x49a   : > { %v9784_v61 = vadd.f32 %v3153_v50, %v9607_v52  ;;  %v3283_v62 = vpop.f32.mrf.mxu2  ;;  %v12611_v50 = vld [vmem:[#allocation8_spill] sm:$0xff] }
 0x49b   : > { %v3405_v26 = vpop.f32.mrf.mxu3  ;;  %v3339_v8 = vadd.f32 %v3283_v62, %v3207_v2  ;;  %v3489_v22 = vpop.f32.mrf.mxu0 }
 0x49c   : > { %v9787_v12 = vadd.f32 %v3489_v22, %v9617_v24 }
 0x49d   : > { %v9789_v31 = vadd.f32 %v3405_v26, %v3339_v8 }
 0x4a1   : > { %v3156_v56 = vpop.f32.mrf.mxu1 }
 0x4a2   : > { %v3209_v13 = vadd.f32 %v3156_v56, %v9613_v9  ;;  %v9792_v63 = vpop.f32.mrf.mxu2 }
 0x4a3   : > { %v9794_v37 = vpop.f32.mrf.mxu3  ;;  %v3492_v43 = vpop.f32.mrf.mxu0 }
 0x4a4   : > { %12610 = vst [vmem:[#allocation29_spill] sm:$0xff] %v9794_v37  ;;  %v9797_v52 = vadd.f32 %v3492_v43, %v9629_v6  ;;  %7687 = vmatmul.msk.bf16.gmra.mxu1 %vm2416_vm4, %v12611_v50 }
 0x4a6   : > { %7680 = vmatmul.msk.bf16.gmra.mxu0 %vm2416_vm4, %v12596_v1 }
 0x4a9   : > { %v3158_v24 = vpop.f32.mrf.mxu1 }
 0x4aa   : > { %v9804_v2 = vadd.f32 %v3158_v24, %v9627_v28  ;;  %v3288_v62 = vpop.f32.mrf.mxu2  ;;  %v12613_v24 = vld [vmem:[#allocation33_spill] sm:$0xff] }
 0x4ab   : > { %v3410_v9 = vpop.f32.mrf.mxu3  ;;  %v3341_v26 = vadd.f32 %v3288_v62, %v3209_v13  ;;  %v3494_v8 = vpop.f32.mrf.mxu0 }
 0x4ac   : > { %v9807_v22 = vadd.f32 %v3494_v8, %v9637_v21 }
 0x4ad   : > { %v9809_v56 = vadd.f32 %v3410_v9, %v3341_v26 }
 0x4b1   : > { %v3161_v6 = vpop.f32.mrf.mxu1 }
 0x4b2   : > { %v3211_v43 = vadd.f32 %v3161_v6, %v9633_v49  ;;  %v9812_v50 = vpop.f32.mrf.mxu2 }
 0x4b3   : > { %v9814_v37 = vpop.f32.mrf.mxu3  ;;  %v3497_v1 = vpop.f32.mrf.mxu0 }
 0x4b4   : > { %12612 = vst [vmem:[#allocation32_spill] sm:$0xff] %v9814_v37  ;;  %v9817_v28 = vadd.f32 %v3497_v1, %v9655_v16  ;;  %7688 = vmatmul.msk.bf16.gmra.mxu1 %vm2416_vm4, %v12613_v24 }
 0x4b6   : > { %7681 = vmatmul.msk.bf16.gmra.mxu0 %vm2416_vm4, %v12598_v23 }
 0x4b9   : > { %v3163_v21 = vpop.f32.mrf.mxu1 }
 0x4ba   : > { %v9824_v13 = vadd.f32 %v3163_v21, %v9653_v44  ;;  %v3293_v62 = vpop.f32.mrf.mxu2  ;;  %v12615_v21 = vld [vmem:[#allocation35_spill] sm:$0xff] }
 0x4bb   : > { %v3415_v49 = vpop.f32.mrf.mxu3  ;;  %v3343_v9 = vadd.f32 %v3293_v62, %v3211_v43  ;;  %v3499_v26 = vpop.f32.mrf.mxu0 }
 0x4bc   : > { %v9827_v8 = vadd.f32 %v3499_v26, %v9663_v47 }
 0x4bd   : > { %v9829_v6 = vadd.f32 %v3415_v49, %v3343_v9 }
 0x4c1   : > { %v3166_v16 = vpop.f32.mrf.mxu1 }
 0x4c2   : > { %v3213_v1 = vadd.f32 %v3166_v16, %v9659_v59  ;;  %v9832_v24 = vpop.f32.mrf.mxu2 }
 0x4c3   : > { %v9834_v37 = vpop.f32.mrf.mxu3  ;;  %v3502_v23 = vpop.f32.mrf.mxu0 }
 0x4c4   : > { %12614 = vst [vmem:[#allocation34_spill] sm:$0xff] %v9834_v37  ;;  %v9837_v44 = vadd.f32 %v3502_v23, %v9675_v36  ;;  %7689 = vmatmul.msk.bf16.gmra.mxu1 %vm2416_vm4, %v12615_v21 }
 0x4c6   : > { %7682 = vmatmul.msk.bf16.gmra.mxu0 %vm2416_vm4, %v12600_v25 }
 0x4c9   : > { %v3168_v47 = vpop.f32.mrf.mxu1 }
 0x4ca   : > { %v9844_v43 = vadd.f32 %v3168_v47, %v9673_v32  ;;  %v3298_v62 = vpop.f32.mrf.mxu2  ;;  %v12617_v47 = vld [vmem:[#allocation6_spill] sm:$0xff] }
 0x4cb   : > { %v3420_v59 = vpop.f32.mrf.mxu3  ;;  %v3345_v49 = vadd.f32 %v3298_v62, %v3213_v1  ;;  %v3504_v9 = vpop.f32.mrf.mxu0 }
 0x4cc   : > { %v9847_v26 = vadd.f32 %v3504_v9, %v9683_v51 }
 0x4cd   : > { %v9849_v16 = vadd.f32 %v3420_v59, %v3345_v49 }
 0x4d1   : > { %v3171_v36 = vpop.f32.mrf.mxu1 }
 0x4d2   : > { %v3215_v23 = vadd.f32 %v3171_v36, %v9679_v18  ;;  %v9852_v21 = vpop.f32.mrf.mxu2 }
 0x4d3   : > { %v9854_v37 = vpop.f32.mrf.mxu3  ;;  %v3507_v25 = vpop.f32.mrf.mxu0 }
 0x4d4   : > { %12616 = vst [vmem:[#allocation16_spill] sm:$0xff] %v9854_v37  ;;  %v9857_v32 = vadd.f32 %v3507_v25, %v9697_v30  ;;  %7690 = vmatmul.msk.bf16.gmra.mxu1 %vm2416_vm4, %v12617_v47 }
 0x4d6   : > { %7683 = vmatmul.msk.bf16.gmra.mxu0 %vm2416_vm4, %v12602_v45 }
 0x4d9   : > { %v3173_v51 = vpop.f32.mrf.mxu1 }
 0x4da   : > { %v9864_v1 = vadd.f32 %v3173_v51, %v9695_v34  ;;  %v3303_v62 = vpop.f32.mrf.mxu2  ;;  %v12620_v34 = vld [vmem:[#allocation10_spill] sm:$0xff] }
 0x4db   : > { %v3425_v18 = vpop.f32.mrf.mxu3  ;;  %v3347_v59 = vadd.f32 %v3303_v62, %v3215_v23  ;;  %v9866_v49 = vpop.f32.mrf.mxu0 }
 0x4dd   : > { %v9868_v9 = vadd.f32 %v3425_v18, %v3347_v59 }
 0x4e1   : > { %v3176_v36 = vpop.f32.mrf.mxu1 }
 0x4e2   : > { %v3217_v30 = vadd.f32 %v3176_v36, %v9705_v48  ;;  %v9871_v25 = vpop.f32.mrf.mxu2 }
 0x4e3   : > { %12618 = vst [vmem:[#allocation7_spill] sm:$0xff] %v9871_v25  ;;  %v9873_v47 = vpop.f32.mrf.mxu3  ;;  %v3512_v37 = vpop.f32.mrf.mxu0 }
 0x4e4   : > { %12619 = vst [vmem:[#allocation11_spill] sm:$0xff] %v9873_v47  ;;  %v9876_v45 = vadd.f32 %v3512_v37, %v9721_v55  ;;  %7691 = vmatmul.msk.bf16.gmra.mxu1 %vm2416_vm4, %v12620_v34 }
 0x4e6   : > { %7684 = vmatmul.msk.bf16.gmra.mxu0 %vm2416_vm4, %v9396_v39 }
 0x4e9   : > { %v3178_v23 = vpop.f32.mrf.mxu1 }
 0x4ea   : > { %v9883_v51 = vadd.f32 %v3178_v23, %v9719_v57  ;;  %v3308_v62 = vpop.f32.mrf.mxu2  ;;  %v12623_v57 = vld [vmem:[#allocation13_spill] sm:$0xff] }
 0x4eb   : > { %v3430_v48 = vpop.f32.mrf.mxu3  ;;  %v3349_v18 = vadd.f32 %v3308_v62, %v3217_v30  ;;  %v9885_v59 = vpop.f32.mrf.mxu0 }
 0x4ed   : > { %v9887_v36 = vadd.f32 %v3430_v48, %v3349_v18 }
 0x4f1   : > { %v3181_v47 = vpop.f32.mrf.mxu1 }
 0x4f2   : > { %v3219_v55 = vadd.f32 %v3181_v47, %v9729_v17  ;;  %v9890_v37 = vpop.f32.mrf.mxu2 }
 0x4f3   : > { %12621 = vst [vmem:[#allocation18_spill] sm:$0xff] %v9890_v37  ;;  %v9892_v34 = vpop.f32.mrf.mxu3  ;;  %v3517_v25 = vpop.f32.mrf.mxu0 }
 0x4f4   : > { %12622 = vst [vmem:[#allocation14_spill] sm:$0xff] %v9892_v34  ;;  %v9895_v39 = vadd.f32 %v3517_v25, %v9745_v33  ;;  %7692 = vmatmul.msk.bf16.gmra.mxu1 %vm2416_vm4, %v12623_v57 }
 0x4f6   : > { %7685 = vmatmul.msk.bf16.gmra.mxu0 %vm2416_vm4, %v9427_v4 }
 0x4f9   : > { %v3183_v30 = vpop.f32.mrf.mxu1 }
 0x4fa   : > { %v9902_v23 = vadd.f32 %v3183_v30, %v9743_v11  ;;  %v3313_v62 = vpop.f32.mrf.mxu2  ;;  %v12626_v11 = vmov 0.0|0.0  }
 0x4fb   : > { %v3435_v17 = vpop.f32.mrf.mxu3  ;;  %v3351_v47 = vadd.f32 %v3313_v62, %v3219_v55  ;;  %v9904_v48 = vpop.f32.mrf.mxu0 }
 0x4fd   : > { %v9906_v18 = vadd.f32 %v3435_v17, %v3351_v47 }
 0x501   : > { %v3186_v34 = vpop.f32.mrf.mxu1 }
 0x502   : > { %v3221_v33 = vadd.f32 %v3186_v34, %v9753_v14  ;;  %v9909_v25 = vpop.f32.mrf.mxu2 }
 0x503   : > { %12624 = vst [vmem:[#allocation15_spill] sm:$0xff] %v9909_v25  ;;  %v9911_v57 = vpop.f32.mrf.mxu3  ;;  %v3522_v37 = vpop.f32.mrf.mxu0 }
 0x504   : > { %12625 = vst [vmem:[#allocation12_spill] sm:$0xff] %v9911_v57  ;;  %v9914_v4 = vadd.f32 %v3522_v37, %v9769_v60  ;;  %7693 = vmatmul.msk.bf16.gmra.mxu1 %vm2416_vm4, %v12593_v20  ;;  %v9930_v20 = vld [vmem:[%s12316_s7] ss:$0 sm:$0xff] }
 0x506   : > { %3561 = vmatmul.bf16.gmra.mxu0 %v12626_v11 }
 0x509   : > { %v3188_v55 = vpop.f32.mrf.mxu1 }
 0x50a   : > { %v9920_v30 = vadd.f32 %v3188_v55, %v9767_v46  ;;  %v3318_v62 = vpop.f32.mrf.mxu2  ;;  %v3912_v46 = vld [vmem:[%s12319_s10 + $0x2] sm:$0x3] }
 0x50b   : > { %v3440_v17 = vpop.f32.mrf.mxu3  ;;  %v3353_v14 = vadd.f32 %v3318_v62, %v3221_v33  ;;  %v9922_v34 = vpop.f32.mrf.mxu0  ;;  %v4072_v33 = vpack.c.bf16 %v3912_v46, %v3912_v46 }
 0x50c   : > { %12627 = vst [vmem:[#allocation17_spill] sm:$0xff] %v9920_v30 }
 0x50d   : > { %v9924_v47 = vadd.f32 %v3440_v17, %v3353_v14  ;;  %v4122_v55 = vsel %vm707_vm0, %v4072_v33, 0 }
 0x50e   : > { %4131 = vmatpush.bf16.msrb.mxu3 %v4122_v55 }
 0x50f   : > { %12628 = vst [vmem:[#allocation20_spill] sm:$0xff] %v9924_v47 }
 0x511   : > { %v3609_v57 = vpop.f32.mrf.mxu1  ;;  %4132 = vmatmul.bf16.vlgmr.msrb.gmra.mxu3 %v12626_v11  ;;  %v10020_v11 = vld [vmem:[%s9961_s22 + $0x28] sm:$0xff] }
 0x512   : > { %v3689_v60 = vadd.f32 %v3609_v57, %v9777_v35 }
 0x513   : > { %v3527_v37 = vpop.f32.mrf.mxu0 }
 0x514   : > { %v9933_v25 = vadd.f32 %v3527_v37, %v9789_v31  ;;  %7694 = vmatmul.msk.bf16.gmra.mxu1 %vm2416_vm4, %v12595_v58  ;;  %v3724_v35 = vadd.f32 %v9930_v20, %v3689_v60 }
 0x516   : > { %v3756_v31 = vmax.f32 %v3724_v35, 0.0 }
 0x518   : > { %v3788_v37 = vsel %vm2416_vm4, %v3756_v31, 0.0 }
 0x519   : > { %v3611_v57 = vpop.f32.mrf.mxu1 }
 0x51a   : > { %v3690_v62 = vadd.f32 %v3611_v57, %v9787_v12  ;;  %v9968_v57 = vld [vmem:[%s9961_s22 + $0x8] sm:$0xff] }
 0x51b   : > { %v9943_v17 = vpop.f32.mrf.mxu0 }
 0x51c   : > { %v3725_v58 = vadd.f32 %v9930_v20, %v3690_v62 }
 0x51e   : > { %v3757_v14 = vmax.f32 %v3725_v58, 0.0 }
 0x520   : > { %v3789_v46 = vsel %vm2416_vm4, %v3757_v14, 0.0 }
 0x521   : > { %v3790_v33 = vadd.f32 %v3789_v46, %v3788_v37  ;;  %v3614_v30 = vpop.f32.mrf.mxu1 }
 0x522   : > { %v3691_v60 = vadd.f32 %v3614_v30, %v9797_v52  ;;  %v9965_v30 = vld [vmem:[%s9961_s22] sm:$0xff] }
 0x523   : > { %v3532_v55 = vpop.f32.mrf.mxu0 }
 0x524   : > { %v3726_v47 = vadd.f32 %v9930_v20, %v3691_v60  ;;  %v9952_v12 = vadd.f32 %v3532_v55, %v9809_v56  ;;  %7695 = vmatmul.msk.bf16.gmra.mxu1 %vm2416_vm4, %v12597_v40  ;;  %v9972_v40 = vpack.c.bf16 %v9968_v57, %v9965_v30  ;;  %v12405_v60 = vrot.slane %v9965_v30, 7 }
 0x525   : > { %v3953_v55 = vrot.slane %v9968_v57, 7 }
 0x526   : > { %v3758_v35 = vmax.f32 %v3726_v47, 0.0  ;;  %7703 = vmatmul.msk.bf16.gmra.mxu3 %vm4073_vm5, %v9972_v40 }
 0x528   : > { %v3791_v52 = vsel %vm2416_vm4, %v3758_v35, 0.0 }
 0x529   : > { %v3792_v56 = vadd.f32 %v3791_v52, %v3790_v33  ;;  %v3616_v62 = vpop.f32.mrf.mxu1  ;;  %v9987_v52 = vsel %vm707_vm0, %v12405_v60, %v3953_v55 }
 0x52a   : > { %v3692_v31 = vadd.f32 %v3616_v62, %v9807_v22 }
 0x52b   : > { %v9975_v58 = vpop.f32.mrf.mxu0 }
 0x52c   : > { %v3727_v47 = vadd.f32 %v9930_v20, %v3692_v31 }
 0x52e   : > { %v3759_v14 = vmax.f32 %v3727_v47, 0.0 }
 0x530   : > { %v3793_v37 = vsel %vm2416_vm4, %v3759_v14, 0.0  ;;  %v9997_v14 = vld [vmem:[%s9961_s22 + $0x10] sm:$0xff] }
 0x531   : > { %v3794_v46 = vadd.f32 %v3793_v37, %v3792_v56  ;;  %v3619_v33 = vpop.f32.mrf.mxu1 }
 0x532   : > { %v3693_v22 = vadd.f32 %v3619_v33, %v9817_v28  ;;  %v10000_v28 = vld [vmem:[%s9961_s22 + $0x18] sm:$0xff] }
 0x533   : > { %v3537_v35 = vpop.f32.mrf.mxu0  ;;  %v10004_v55 = vpack.c.bf16 %v10000_v28, %v9997_v14 }
 0x534   : > { %v3728_v62 = vadd.f32 %v9930_v20, %v3693_v22  ;;  %v9991_v31 = vadd.f32 %v3537_v35, %v9829_v6  ;;  %7696 = vmatmul.msk.bf16.gmra.mxu1 %vm2416_vm4, %v12599_v5 }
 0x536   : > { %v3760_v56 = vmax.f32 %v3728_v62, 0.0  ;;  %7704 = vmatmul.msk.bf16.gmra.mxu3 %vm4073_vm5, %v10004_v55 }
 0x538   : > { %v3795_v47 = vsel %vm2416_vm4, %v3760_v56, 0.0 }
 0x539   : > { %v3796_v37 = vadd.f32 %v3795_v47, %v3794_v46  ;;  %v3621_v33 = vpop.f32.mrf.mxu1 }
 0x53a   : > { %v3694_v6 = vadd.f32 %v3621_v33, %v9827_v8  ;;  %v10017_v33 = vld [vmem:[%s9961_s22 + $0x20] sm:$0xff] }
 0x53c   : > { %v3729_v5 = vadd.f32 %v9930_v20, %v3694_v6 }
 0x53e   : > { %v3761_v22 = vmax.f32 %v3729_v5, 0.0 }
 0x540   : > { %v3797_v35 = vsel %vm2416_vm4, %v3761_v22, 0.0 }
 0x541   : > { %v3798_v62 = vadd.f32 %v3797_v35, %v3796_v37  ;;  %v3624_v56 = vpop.f32.mrf.mxu1  ;;  %v10024_v37 = vpack.c.bf16 %v10020_v11, %v10017_v33 }
 0x542   : > { %v3695_v46 = vadd.f32 %v3624_v56, %v9837_v44 }
 0x544   : > { %v3730_v47 = vadd.f32 %v9930_v20, %v3695_v46  ;;  %7697 = vmatmul.msk.bf16.gmra.mxu1 %vm2416_vm4, %v12601_v7 }
 0x546   : > { %v3762_v60 = vmax.f32 %v3730_v47, 0.0  ;;  %7705 = vmatmul.msk.bf16.gmra.mxu3 %vm4073_vm5, %v10024_v37 }
 0x548   : > { %v3799_v8 = vsel %vm2416_vm4, %v3762_v60, 0.0 }
 0x549   : > { %v3800_v6 = vadd.f32 %v3799_v8, %v3798_v62  ;;  %v3626_v5 = vpop.f32.mrf.mxu1  ;;  %v3332_v62 = vadd.f32 %v9700_v10, %v9692_v0 }
 0x54a   : > { %v3696_v44 = vadd.f32 %v3626_v5, %v9847_v26 }
 0x54b   : > { %v3454_v26 = vadd.f32 %v9702_v42, %v3332_v62 }
 0x54c   : > { %v3731_v7 = vadd.f32 %v9930_v20, %v3696_v44 }
 0x54d   : > { %v3576_v5 = vadd.f32 %v9866_v49, %v3454_v26 }
 0x54e   : > { %v3763_v60 = vmax.f32 %v3731_v7, 0.0  ;;  %v10041_v7 = vld [vmem:[%s9961_s22 + $0x30] sm:$0xff] }
 0x550   : > { %v3801_v22 = vsel %vm2416_vm4, %v3763_v60, 0.0 }
 0x551   : > { %v3802_v35 = vadd.f32 %v3801_v22, %v3800_v6  ;;  %v3629_v56 = vpop.f32.mrf.mxu1  ;;  %v10044_v6 = vld [vmem:[%s9961_s22 + $0x38] sm:$0xff] }
 0x552   : > { %v3697_v46 = vadd.f32 %v3629_v56, %v9857_v32  ;;  %v10048_v10 = vpack.c.bf16 %v10044_v6, %v10041_v7 }
 0x554   : > { %v3732_v47 = vadd.f32 %v9930_v20, %v3697_v46  ;;  %7698 = vmatmul.msk.bf16.gmra.mxu1 %vm2416_vm4, %v12603_v41 }
 0x556   : > { %v3764_v8 = vmax.f32 %v3732_v47, 0.0  ;;  %7706 = vmatmul.msk.bf16.gmra.mxu3 %vm4073_vm5, %v10048_v10 }
 0x558   : > { %v3803_v44 = vsel %vm2416_vm4, %v3764_v8, 0.0 }
 0x559   : > { %v3804_v60 = vadd.f32 %v3803_v44, %v3802_v35  ;;  %v3631_v0 = vpop.f32.mrf.mxu1  ;;  %v3334_v35 = vadd.f32 %v9724_v15, %v9716_v38  ;;  %v10064_v44 = vld [vmem:[%s9961_s22 + $0x40] sm:$0xff] }
 0x55a   : > { %v3698_v32 = vadd.f32 %v3631_v0, %v3576_v5 }
 0x55b   : > { %v3456_v47 = vadd.f32 %v9726_v3, %v3334_v35  ;;  %v12631_v35 = vld [vmem:[#allocation26_spill] sm:$0xff] }
 0x55c   : > { %v3733_v42 = vadd.f32 %v9930_v20, %v3698_v32 }
 0x55d   : > { %v3578_v8 = vadd.f32 %v9885_v59, %v3456_v47 }
 0x55e   : > { %v3765_v41 = vmax.f32 %v3733_v42, 0.0 }
 0x560   : > { %v3805_v49 = vsel %vm2416_vm4, %v3765_v41, 0.0  ;;  %v3336_v41 = vadd.f32 %v9748_v54, %v9740_v27 }
 0x561   : > { %v3806_v22 = vadd.f32 %v3805_v49, %v3804_v60  ;;  %v3634_v56 = vpop.f32.mrf.mxu1  ;;  %v10067_v60 = vld [vmem:[%s9961_s22 + $0x48] sm:$0xff] }
 0x562   : > { %v3699_v62 = vadd.f32 %v3634_v56, %v9876_v45  ;;  %v10071_v15 = vpack.c.bf16 %v10067_v60, %v10064_v44  ;;  %v12630_v56 = vld [vmem:[#allocation30_spill] sm:$0xff] }
 0x564   : > { %v3734_v46 = vadd.f32 %v9930_v20, %v3699_v62  ;;  %7699 = vmatmul.msk.bf16.gmra.mxu1 %vm2416_vm4, %v12604_v53  ;;  %v3458_v62 = vadd.f32 %v12631_v35, %v3336_v41  ;;  %v12633_v41 = vld [vmem:[#allocation5_spill] sm:$0xff] }
 0x566   : > { %v3766_v26 = vmax.f32 %v3734_v46, 0.0  ;;  %7707 = vmatmul.msk.bf16.gmra.mxu3 %vm4073_vm5, %v10071_v15  ;;  %v3580_v47 = vadd.f32 %v9904_v48, %v3458_v62 }
 0x568   : > { %v3807_v5 = vsel %vm2416_vm4, %v3766_v26, 0.0 }
 0x569   : > { %v3808_v0 = vadd.f32 %v3807_v5, %v3806_v22  ;;  %v3636_v38 = vpop.f32.mrf.mxu1  ;;  %v10090_v5 = vld [vmem:[%s9961_s22 + $0x58] sm:$0xff] }
 0x56a   : > { %v3700_v45 = vadd.f32 %v3636_v38, %v3578_v8  ;;  %v10087_v8 = vld [vmem:[%s9961_s22 + $0x50] sm:$0xff] }
 0x56b   : > { %v10094_v54 = vpack.c.bf16 %v10090_v5, %v10087_v8 }
 0x56c   : > { %v3735_v3 = vadd.f32 %v9930_v20, %v3700_v45 }
 0x56d   : > { %12632 = vst [vmem:[#allocation19_spill] sm:$0xff] %v10094_v54 }
 0x56e   : > { %v3767_v53 = vmax.f32 %v3735_v3, 0.0 }
 0x570   : > { %v3809_v59 = vsel %vm2416_vm4, %v3767_v53, 0.0 }
 0x571   : > { %v3810_v32 = vadd.f32 %v3809_v59, %v3808_v0  ;;  %v3639_v42 = vpop.f32.mrf.mxu1  ;;  %v3338_v59 = vadd.f32 %v9772_v29, %v9764_v19 }
 0x572   : > { %v3701_v49 = vadd.f32 %v3639_v42, %v9895_v39 }
 0x574   : > { %v3736_v22 = vadd.f32 %v9930_v20, %v3701_v49  ;;  %7700 = vmatmul.msk.bf16.gmra.mxu1 %vm2416_vm4, %v12630_v56  ;;  %v12634_v49 = vld [vmem:[#allocation31_spill] sm:$0xff] }
 0x576   : > { %v3768_v46 = vmax.f32 %v3736_v22, 0.0  ;;  %7708 = vmatmul.msk.bf16.gmra.mxu3 %vm4073_vm5, %v10094_v54  ;;  %v3460_v22 = vadd.f32 %v12634_v49, %v3338_v59 }
 0x578   : > { %v3811_v26 = vsel %vm2416_vm4, %v3768_v46, 0.0  ;;  %v3582_v35 = vadd.f32 %v9922_v34, %v3460_v22  ;;  %v10110_v46 = vld [vmem:[%s9961_s22 + $0x60] sm:$0xff] }
 0x579   : > { %v3812_v0 = vadd.f32 %v3811_v26, %v3810_v32  ;;  %v3641_v27 = vpop.f32.mrf.mxu1 }
 0x57a   : > { %v3702_v39 = vadd.f32 %v3641_v27, %v3580_v47  ;;  %v10113_v47 = vld [vmem:[%s9961_s22 + $0x68] sm:$0xff] }
 0x57b   : > { %v10117_v19 = vpack.c.bf16 %v10113_v47, %v10110_v46 }
 0x57c   : > { %v3737_v48 = vadd.f32 %v9930_v20, %v3702_v39 }
 0x57d   : > { %12635 = vst [vmem:[#allocation22_spill] sm:$0xff] %v10117_v19 }
 0x57e   : > { %v3769_v38 = vmax.f32 %v3737_v48, 0.0 }
 0x580   : > { %v3813_v45 = vsel %vm2416_vm4, %v3769_v38, 0.0  ;;  %v3340_v38 = vadd.f32 %v9792_v63, %v9784_v61 }
 0x581   : > { %v3814_v3 = vadd.f32 %v3813_v45, %v3812_v0  ;;  %v3644_v53 = vpop.f32.mrf.mxu1 }
 0x582   : > { %v3703_v32 = vadd.f32 %v3644_v53, %v9914_v4  ;;  %v12636_v53 = vld [vmem:[#allocation29_spill] sm:$0xff] }
 0x583   : > { %v3462_v59 = vadd.f32 %v12636_v53, %v3340_v38 }
 0x584   : > { %v3738_v42 = vadd.f32 %v9930_v20, %v3703_v32  ;;  %7701 = vmatmul.msk.bf16.gmra.mxu1 %vm2416_vm4, %v12633_v41  ;;  %v10128_v32 = vpop.f32.mrf.mxu3 }
 0x585   : > { %v3584_v49 = vadd.f32 %v9943_v17, %v3462_v59 }
 0x586   : > { %v3770_v56 = vmax.f32 %v3738_v42, 0.0  ;;  %7709 = vmatmul.msk.bf16.gmra.mxu3 %vm4073_vm5, %v10117_v19 }
 0x588   : > { %v3815_v62 = vsel %vm2416_vm4, %v3770_v56, 0.0  ;;  %v10133_v56 = vld [vmem:[%s9961_s22 + $0x70] sm:$0xff] }
 0x589   : > { %v3816_v26 = vadd.f32 %v3815_v62, %v3814_v3  ;;  %v3646_v29 = vpop.f32.mrf.mxu1 }
 0x58a   : > { %v3704_v4 = vadd.f32 %v3646_v29, %v3582_v35  ;;  %v10136_v35 = vld [vmem:[%s9961_s22 + $0x78] sm:$0xff] }
 0x58b   : > { %v10140_v61 = vpack.c.bf16 %v10136_v35, %v10133_v56 }
 0x58c   : > { %v3739_v34 = vadd.f32 %v9930_v20, %v3704_v4 }
 0x58d   : > { %12637 = vst [vmem:[#allocation21_spill] sm:$0xff] %v10140_v61 }
 0x58e   : > { %v3771_v0 = vmax.f32 %v3739_v34, 0.0  ;;  %v3539_v34 = vpop.f32.mrf.mxu0 }
 0x590   : > { %v3817_v27 = vsel %vm2416_vm4, %v3771_v0, 0.0 }
 0x591   : > { %v3818_v39 = vadd.f32 %v3817_v27, %v3816_v26  ;;  %v3649_v48 = vpop.f32.mrf.mxu1 }
 0x592   : > { %v3705_v45 = vadd.f32 %v3649_v48, %v9933_v25 }
 0x594   : > { %v3740_v3 = vadd.f32 %v9930_v20, %v3705_v45  ;;  %v10145_v29 = vpop.f32.mrf.mxu3  ;;  %v12638_v45 = vld [vmem:[#allocation32_spill] sm:$0xff] }
 0x596   : > { %v3772_v42 = vmax.f32 %v3740_v3, 0.0  ;;  %7710 = vmatmul.msk.bf16.gmra.mxu3 %vm4073_vm5, %v10140_v61 }
 0x598   : > { %v3819_v22 = vsel %vm2416_vm4, %v3772_v42, 0.0 }
 0x599   : > { %v3820_v62 = vadd.f32 %v3819_v22, %v3818_v39  ;;  %v3651_v26 = vpop.f32.mrf.mxu1  ;;  %v3342_v39 = vadd.f32 %v9812_v50, %v9804_v2  ;;  %v10158_v22 = vld [vmem:[%s9961_s22 + $0x80] sm:$0xff] }
 0x59a   : > { %v3706_v63 = vadd.f32 %v3651_v26, %v3584_v49 }
 0x59b   : > { %v3464_v3 = vadd.f32 %v12638_v45, %v3342_v39  ;;  %v3344_v39 = vadd.f32 %v9832_v24, %v9824_v13 }
 0x59c   : > { %v3741_v25 = vadd.f32 %v9930_v20, %v3706_v63  ;;  %v10153_v59 = vpop.f32.mrf.mxu3 }
 0x59d   : > { %v3586_v42 = vadd.f32 %v9975_v58, %v3464_v3  ;;  %v12641_v3 = vld [vmem:[#allocation34_spill] sm:$0xff] }
 0x59e   : > { %v3773_v17 = vmax.f32 %v3741_v25, 0.0 }
 0x5a0   : > { %v3821_v4 = vsel %vm2416_vm4, %v3773_v17, 0.0 }
 0x5a1   : > { %v3822_v0 = vadd.f32 %v3821_v4, %v3820_v62  ;;  %v3654_v27 = vpop.f32.mrf.mxu1  ;;  %v10161_v62 = vld [vmem:[%s9961_s22 + $0x88] sm:$0xff] }
 0x5a2   : > { %v3707_v48 = vadd.f32 %v3654_v27, %v9952_v12  ;;  %v10165_v2 = vpack.c.bf16 %v10161_v62, %v10158_v22  ;;  %v3542_v12 = vpop.f32.mrf.mxu0 }
 0x5a4   : > { %v3742_v38 = vadd.f32 %v9930_v20, %v3707_v48  ;;  %12639 = vst [vmem:[#allocation23_spill] sm:$0xff] %v10165_v2 }
 0x5a6   : > { %v3774_v53 = vmax.f32 %v3742_v38, 0.0  ;;  %7711 = vmatmul.msk.bf16.gmra.mxu3 %vm4073_vm5, %v10165_v2 }
 0x5a8   : > { %v3823_v49 = vsel %vm2416_vm4, %v3774_v53, 0.0  ;;  %v3466_v53 = vadd.f32 %v12641_v3, %v3344_v39 }
 0x5a9   : > { %v3824_v26 = vadd.f32 %v3823_v49, %v3822_v0  ;;  %v3656_v63 = vpop.f32.mrf.mxu1  ;;  %v10170_v17 = vpop.f32.mrf.mxu3 }
 0x5aa   : > { %v3708_v50 = vadd.f32 %v3656_v63, %v3586_v42  ;;  %12640 = vst [vmem:[#allocation25_spill] sm:$0xff] %v10170_v17  ;;  %v3544_v45 = vpop.f32.mrf.mxu0  ;;  %v3588_v63 = vadd.f32 %v3539_v34, %v3466_v53  ;;  %v3346_v53 = vadd.f32 %v9852_v21, %v9844_v43  ;;  %v10206_v17 = vld [vmem:[%s9961_s22 + $0xa0] sm:$0xff]  ;;  %v3860_v21 = vld [vmem:[%s12317_s8 + $0x8] sm:$0xff] }
 0x5ab   : > { %v3859_v43 = vld [vmem:[%s12317_s8] sm:$0xff] }
 0x5ac   : > { %v3743_v58 = vadd.f32 %v9930_v20, %v3708_v50 }
 0x5ae   : > { %v3775_v25 = vmax.f32 %v3743_v58, 0.0  ;;  %v10182_v58 = vld [vmem:[%s9961_s22 + $0x90] sm:$0xff] }
 0x5b0   : > { %v3825_v4 = vsel %vm2416_vm4, %v3775_v25, 0.0 }
 0x5b1   : > { %v3826_v0 = vadd.f32 %v3825_v4, %v3824_v26  ;;  %v3659_v27 = vpop.f32.mrf.mxu1  ;;  %v10178_v49 = vpop.f32.mrf.mxu3  ;;  %v10185_v26 = vld [vmem:[%s9961_s22 + $0x98] sm:$0xff] }
 0x5b2   : > { %v3709_v48 = vadd.f32 %v3659_v27, %v9991_v31  ;;  %12642 = vst [vmem:[#allocation24_spill] sm:$0xff] %v10178_v49  ;;  %v10189_v13 = vpack.c.bf16 %v10185_v26, %v10182_v58  ;;  %v3547_v39 = vpop.f32.mrf.mxu0 }
 0x5b4   : > { %v3744_v38 = vadd.f32 %v9930_v20, %v3709_v48  ;;  %12643 = vst [vmem:[#allocation27_spill] sm:$0xff] %v10189_v13  ;;  %v3589_v48 = vadd.f32 %v3542_v12, %v9849_v16  ;;  %v10209_v16 = vld [vmem:[%s9961_s22 + $0xa8] sm:$0xff] }
 0x5b6   : > { %v3776_v42 = vmax.f32 %v3744_v38, 0.0  ;;  %7712 = vmatmul.msk.bf16.gmra.mxu3 %vm4073_vm5, %v10189_v13 }
 0x5b8   : > { %v3827_v50 = vsel %vm2416_vm4, %v3776_v42, 0.0 }
 0x5b9   : > { %v3828_v25 = vadd.f32 %v3827_v50, %v3826_v0  ;;  %v3661_v4 = vpop.f32.mrf.mxu1  ;;  %v10194_v27 = vpop.f32.mrf.mxu3  ;;  %v12645_v50 = vld [vmem:[#allocation16_spill] sm:$0xff] }
 0x5ba   : > { %v3710_v24 = vadd.f32 %v3661_v4, %v3588_v63  ;;  %12644 = vst [vmem:[#allocation28_spill] sm:$0xff] %v10194_v27  ;;  %v3468_v4 = vadd.f32 %v12645_v50, %v3346_v53  ;;  %v3549_v12 = vpop.f32.mrf.mxu0  ;;  %v3591_v53 = vadd.f32 %v3547_v39, %v9868_v9  ;;  %v10236_v9 = vld [vmem:[%s9961_s22 + $0xb0] sm:$0xff]  ;;  %v10239_v39 = vld [vmem:[%s9961_s22 + $0xb8] sm:$0xff] }
 0x5bc   : > { %v3745_v31 = vadd.f32 %v9930_v20, %v3710_v24  ;;  %v3590_v49 = vadd.f32 %v3544_v45, %v3468_v4  ;;  %v10219_v45 = vpack.c.bf16 %v10209_v16, %v10206_v17 }
 0x5be   : > { %v3777_v34 = vmax.f32 %v3745_v31, 0.0 }
 0x5c0   : > { %v3829_v0 = vsel %vm2416_vm4, %v3777_v34, 0.0 }
 0x5c1   : > { %v3830_v38 = vadd.f32 %v3829_v0, %v3828_v25  ;;  %v3664_v3 = vpop.f32.mrf.mxu1  ;;  %v10202_v31 = vpop.f32.mrf.mxu3  ;;  %v3861_v0 = vpack.c.bf16 %v3860_v21, %v3859_v43  ;;  %v12649_v21 = vld [vmem:[#allocation11_spill] sm:$0xff] }
 0x5c2   : > { %v3711_v42 = vadd.f32 %v3664_v3, %v3589_v48  ;;  %12646 = vst [vmem:[#allocation9_spill] sm:$0xff] %v10202_v31 }
 0x5c3   : > { %3873 = vmatpush.bf16.msra.mxu2 %v3861_v0 }
 0x5c4   : > { %v3746_v63 = vadd.f32 %v9930_v20, %v3711_v42 }
 0x5c6   : > { %v3778_v24 = vmax.f32 %v3746_v63, 0.0  ;;  %7713 = vmatmul.msk.bf16.gmra.mxu3 %vm4073_vm5, %v10219_v45 }
 0x5c8   : > { %v3831_v27 = vsel %vm2416_vm4, %v3778_v24, 0.0 }
 0x5c9   : > { %v3832_v25 = vadd.f32 %v3831_v27, %v3830_v38  ;;  %v3666_v34 = vpop.f32.mrf.mxu1  ;;  %v10224_v3 = vpop.f32.mrf.mxu3 }
 0x5ca   : > { %v3712_v48 = vadd.f32 %v3666_v34, %v3590_v49  ;;  %12647 = vst [vmem:[#allocation8_spill] sm:$0xff] %v10224_v3  ;;  %v12648_v49 = vld [vmem:[#allocation7_spill] sm:$0xff]  ;;  %v3552_v34 = vpop.f32.mrf.mxu0 }
 0x5cb   : > { %v3348_v4 = vadd.f32 %v12648_v49, %v9864_v1  ;;  %v10243_v1 = vpack.c.bf16 %v10239_v39, %v10236_v9 }
 0x5cc   : > { %v3747_v27 = vadd.f32 %v9930_v20, %v3712_v48 }
 0x5cd   : > { %v3470_v48 = vadd.f32 %v12649_v21, %v3348_v4  ;;  %12651 = vst [vmem:[#allocation35_spill] sm:$0xff] %v10243_v1  ;;  %v3593_v4 = vadd.f32 %v3552_v34, %v9887_v36  ;;  %v10260_v36 = vld [vmem:[%s9961_s22 + $0xc0] sm:$0xff]  ;;  %v10263_v34 = vld [vmem:[%s9961_s22 + $0xc8] sm:$0xff] }
 0x5ce   : > { %v3779_v38 = vmax.f32 %v3747_v27, 0.0 }
 0x5cf   : > { %v3592_v31 = vadd.f32 %v3549_v12, %v3470_v48 }
 0x5d0   : > { %v3833_v42 = vsel %vm2416_vm4, %v3779_v38, 0.0 }
 0x5d1   : > { %v3834_v63 = vadd.f32 %v3833_v42, %v3832_v25  ;;  %v3669_v50 = vpop.f32.mrf.mxu1  ;;  %v10232_v27 = vpop.f32.mrf.mxu3 }
 0x5d2   : > { %v3713_v24 = vadd.f32 %v3669_v50, %v3591_v53  ;;  %12650 = vst [vmem:[#allocation33_spill] sm:$0xff] %v10232_v27  ;;  %v3554_v50 = vpop.f32.mrf.mxu0 }
 0x5d4   : > { %v3748_v43 = vadd.f32 %v9930_v20, %v3713_v24 }
 0x5d6   : > { %v3780_v0 = vmax.f32 %v3748_v43, 0.0  ;;  %7714 = vmatmul.msk.bf16.gmra.mxu3 %vm4073_vm5, %v10243_v1  ;;  %v12653_v43 = vld [vmem:[#allocation18_spill] sm:$0xff] }
 0x5d8   : > { %v3835_v3 = vsel %vm2416_vm4, %v3780_v0, 0.0  ;;  %v12654_v0 = vld [vmem:[#allocation14_spill] sm:$0xff] }
 0x5d9   : > { %v3836_v25 = vadd.f32 %v3835_v3, %v3834_v63  ;;  %v3671_v38 = vpop.f32.mrf.mxu1  ;;  %v10248_v49 = vpop.f32.mrf.mxu3 }
 0x5da   : > { %v3714_v53 = vadd.f32 %v3671_v38, %v3592_v31  ;;  %12652 = vst [vmem:[#allocation6_spill] sm:$0xff] %v10248_v49  ;;  %v3350_v31 = vadd.f32 %v12653_v43, %v9883_v51  ;;  %v10267_v51 = vpack.c.bf16 %v10263_v34, %v10260_v36 }
 0x5dc   : > { %v3749_v42 = vadd.f32 %v9930_v20, %v3714_v53  ;;  %v3472_v38 = vadd.f32 %v12654_v0, %v3350_v31  ;;  %12656 = vst [vmem:[#allocation13_spill] sm:$0xff] %v10267_v51 }
 0x5de   : > { %v3781_v12 = vmax.f32 %v3749_v42, 0.0  ;;  %v3557_v42 = vpop.f32.mrf.mxu0  ;;  %v3594_v1 = vadd.f32 %v3554_v50, %v3472_v38 }
 0x5df   : > { %v3595_v43 = vadd.f32 %v3557_v42, %v9906_v18  ;;  %v10284_v18 = vld [vmem:[%s9961_s22 + $0xd0] sm:$0xff]  ;;  %v10287_v42 = vld [vmem:[%s9961_s22 + $0xd8] sm:$0xff] }
 0x5e0   : > { %v3837_v3 = vsel %vm2416_vm4, %v3781_v12, 0.0 }
 0x5e1   : > { %v3838_v63 = vadd.f32 %v3837_v3, %v3836_v25  ;;  %v3674_v24 = vpop.f32.mrf.mxu1  ;;  %v10256_v27 = vpop.f32.mrf.mxu3 }
 0x5e2   : > { %v3715_v21 = vadd.f32 %v3674_v24, %v3593_v4  ;;  %12655 = vst [vmem:[#allocation10_spill] sm:$0xff] %v10256_v27 }
 0x5e4   : > { %v3750_v48 = vadd.f32 %v9930_v20, %v3715_v21 }
 0x5e6   : > { %v3782_v53 = vmax.f32 %v3750_v48, 0.0  ;;  %7715 = vmatmul.msk.bf16.gmra.mxu3 %vm4073_vm5, %v10267_v51  ;;  %v12658_v48 = vld [vmem:[#allocation15_spill] sm:$0xff] }
 0x5e8   : > { %v3839_v49 = vsel %vm2416_vm4, %v3782_v53, 0.0  ;;  %v12659_v53 = vld [vmem:[#allocation12_spill] sm:$0xff] }
 0x5e9   : > { %v3840_v25 = vadd.f32 %v3839_v49, %v3838_v63  ;;  %v3676_v12 = vpop.f32.mrf.mxu1  ;;  %v10272_v24 = vpop.f32.mrf.mxu3 }
 0x5ea   : > { %v3716_v4 = vadd.f32 %v3676_v12, %v3594_v1  ;;  %12657 = vst [vmem:[#allocation30_spill] sm:$0xff] %v10272_v24  ;;  %v3559_v63 = vpop.f32.mrf.mxu0  ;;  %v3352_v1 = vadd.f32 %v12658_v48, %v9902_v23  ;;  %v10291_v23 = vpack.c.bf16 %v10287_v42, %v10284_v18 }
 0x5ec   : > { %v3751_v3 = vadd.f32 %v9930_v20, %v3716_v4  ;;  %v3474_v12 = vadd.f32 %v12659_v53, %v3352_v1  ;;  %12661 = vst [vmem:[#allocation31_spill] sm:$0xff] %v10291_v23  ;;  %v3320_v1 = vpop.f32.mrf.mxu2 }
 0x5ee   : > { %v3783_v50 = vmax.f32 %v3751_v3, 0.0  ;;  %v3596_v27 = vadd.f32 %v3559_v63, %v3474_v12  ;;  %v12664_v12 = vld [vmem:[#allocation17_spill] sm:$0xff] }
 0x5f0   : > { %v3841_v49 = vsel %vm2416_vm4, %v3783_v50, 0.0 }
 0x5f1   : > { %v3842_v31 = vadd.f32 %v3841_v49, %v3840_v25  ;;  %v3679_v21 = vpop.f32.mrf.mxu1  ;;  %v10280_v3 = vpop.f32.mrf.mxu3 }
 0x5f2   : > { %v3717_v0 = vadd.f32 %v3679_v21, %v3595_v43  ;;  %12660 = vst [vmem:[#allocation26_spill] sm:$0xff] %v10280_v3  ;;  %v3562_v49 = vpop.f32.mrf.mxu0 }
 0x5f4   : > { %v3752_v38 = vadd.f32 %v9930_v20, %v3717_v0  ;;  %v12663_v0 = vld [vmem:[#allocation20_spill] sm:$0xff] }
 0x5f6   : > { %v3784_v4 = vmax.f32 %v3752_v38, 0.0  ;;  %7716 = vmatmul.msk.bf16.gmra.mxu3 %vm4073_vm5, %v10291_v23 }
 0x5f8   : > { %v3843_v24 = vsel %vm2416_vm4, %v3784_v4, 0.0  ;;  %v3354_v4 = vadd.f32 %v3320_v1, %v12664_v12 }
 0x5f9   : > { %v3844_v25 = vadd.f32 %v3843_v24, %v3842_v31  ;;  %v3681_v50 = vpop.f32.mrf.mxu1  ;;  %v10296_v48 = vpop.f32.mrf.mxu3  ;;  %v3597_v24 = vadd.f32 %v3562_v49, %v12663_v0 }
 0x5fa   : > { %v3718_v43 = vadd.f32 %v3681_v50, %v3596_v27  ;;  %12662 = vst [vmem:[#allocation29_spill] sm:$0xff] %v10296_v48  ;;  %v3911_v50 = vld [vmem:[%s12319_s10] sm:$0x3]  ;;  %v3564_v48 = vpop.f32.mrf.mxu0  ;;  %v3476_v49 = vadd.f32 %v10128_v32, %v3354_v4 }
 0x5fb   : > { %v4056_v23 = vpack.c.bf16 %v3911_v50, %v3911_v50  ;;  %v12668_v50 = vrot.slane %v9965_v30, 7 }
 0x5fc   : > { %v3753_v63 = vadd.f32 %v9930_v20, %v3718_v43  ;;  %v10306_v43 = vld [vmem:[%s9961_s22 + $0xe0] sm:$0xff] }
 0x5fd   : > { %v4261_v0 = vsel %vm707_vm0, %v4056_v23, 0 }
 0x5fe   : > { %v3785_v21 = vmax.f32 %v3753_v63, 0.0  ;;  %v10309_v63 = vld [vmem:[%s9961_s22 + $0xe8] sm:$0xff]  ;;  %4270 = vmatpush.bf16.msrb.mxu2 %v4261_v0 }
 0x5ff   : > { %v10316_v1 = vpack.c.bf16 %v10309_v63, %v10306_v43 }
 0x600   : > { %v3845_v31 = vsel %vm2416_vm4, %v3785_v21, 0.0 }
 0x601   : > { %v3846_v38 = vadd.f32 %v3845_v31, %v3844_v25  ;;  %v3684_v53 = vpop.f32.mrf.mxu1  ;;  %v10312_v25 = vpop.f32.mrf.mxu3  ;;  %12666 = vst [vmem:[#allocation34_spill] sm:$0xff] %v10316_v1 }
 0x602   : > { %v3719_v27 = vadd.f32 %v3684_v53, %v3597_v24  ;;  %12665 = vst [vmem:[#allocation32_spill] sm:$0xff] %v10312_v25  ;;  %v3598_v24 = vadd.f32 %v3564_v48, %v3476_v49  ;;  %v12669_v25 = vld [vmem:[#allocation2_spill] sm:$0xff] }
 0x603   : > { %v3952_v23 = vsel %vm707_vm0, %v12669_v25, %v12668_v50 }
 0x604   : > { %v3754_v3 = vadd.f32 %v9930_v20, %v3719_v27  ;;  %v4041_v0 = vpack.c.bf16 %v9987_v52, %v3952_v23 }
 0x606   : > { %v3786_v21 = vmax.f32 %v3754_v3, 0.0  ;;  %7717 = vmatmul.msk.bf16.gmra.mxu3 %vm4073_vm5, %v10316_v1 }
 0x608   : > { %v3847_v31 = vsel %vm2416_vm4, %v3786_v21, 0.0 }
 0x609   : > { %v3848_v53 = vadd.f32 %v3847_v31, %v3846_v38  ;;  %v3686_v12 = vpop.f32.mrf.mxu1  ;;  %v10323_v4 = vpop.f32.mrf.mxu3  ;;  %v3915_v38 = vld [vmem:[%s12319_s10 + $0x8] sm:$0x3] }
 0x60a   : > { %v3720_v27 = vadd.f32 %v3686_v12, %v3598_v24  ;;  %12667 = vst [vmem:[#allocation16_spill] sm:$0xff] %v10323_v4  ;;  %v4767_v24 = vpack.c.bf16 %v3915_v38, %v3915_v38  ;;  %v3914_v12 = vld [vmem:[%s12319_s10 + $0x6] sm:$0x3] }
 0x60c   : > { %v3755_v32 = vadd.f32 %v9930_v20, %v3720_v27  ;;  %v3913_v20 = vld [vmem:[%s12319_s10 + $0x4] sm:$0x3] }
 0x60d   : > { %v4457_v31 = vpack.c.bf16 %v3913_v20, %v3913_v20  ;;  %v4353_v20 = vrot.slane %v9968_v57, 1 }
 0x60e   : > { %v3787_v3 = vmax.f32 %v3755_v32, 0.0  ;;  %v4638_v32 = vpack.c.bf16 %v3914_v12, %v3914_v12 }
 0x60f   : > { %v4506_v50 = vsel %vm707_vm0, %v4457_v31, 0 }
 0x610   : > { %v3849_v48 = vsel %vm2416_vm4, %v3787_v3, 0.0  ;;  %v4772_v3 = vsel %vm707_vm0, %v4767_v24, 0  ;;  %4515 = vmatpush.bf16.msrb.mxu0 %v4506_v50  ;;  %v4643_v4 = vsel %vm707_vm0, %v4638_v32, 0  ;;  %v3955_v24 = vrot.slane %v9997_v14, 7 }
 0x611   : > { %v3850_v49 = vadd.f32 %v3849_v48, %v3848_v53  ;;  %v10340_v53 = vpop.f32.mrf.mxu3  ;;  %4781 = vmatpush.bf16.msra.mxu3 %v4772_v3  ;;  %4652 = vmatpush.bf16.msrb.mxu1 %v4643_v4  ;;  %v3957_v4 = vrot.slane %v10000_v28, 7 }
 0x613   : > { %v3851_v21 = vrot.slane %v3850_v49, 4  ;;  %7734 = vmatmul.msk.bf16.vlgmr.msrb.gmra.mxu0 %vm4073_vm5, %v12633_v41  ;;  %v3958_v3 = vsel %vm707_vm0, %v3955_v24, %v3957_v4 }
 0x614   : > { %7750 = vmatmul.msk.bf16.vlgmr.msrb.gmra.mxu1 %vm4073_vm5, %v4041_v0 }
 0x615   : > { %v3852_v27 = vadd.f32 %v3851_v21, %v3850_v49  ;;  %v4352_v21 = vrot.slane %v9965_v30, 1  ;;  %v3956_v30 = vsel %vm707_vm0, %v12669_v25, %v3955_v24  ;;  %v12671_v24 = vld [vmem:[#allocation4_spill] sm:$0xff] }
 0x616   : > { %7766 = vmatmul.msk.bf16.vlgmr.msra.gmra.mxu3 %vm4073_vm5, %v9972_v40  ;;  %v12670_v40 = vld [vmem:[#allocation3_spill] sm:$0xff]  ;;  %v10365_v57 = vpack.c.bf16 %v3958_v3, %v3956_v30  ;;  %v4360_v3 = vrot.slane %v10017_v33, 1 }
 0x617   : > { %v3853_v48 = vrot.slane %v3852_v27, 2  ;;  %v4355_v32 = vsel %vm1119_vm3, %v4353_v20, %v12670_v40 }
 0x619   : > { %v3854_v52 = vadd.f32 %v3853_v48, %v3852_v27  ;;  %v10351_v38 = vpop.f32.mrf.mxu3  ;;  %v4354_v27 = vsel %vm1119_vm3, %v4352_v21, %v4353_v20  ;;  %v3959_v21 = vrot.slane %v10017_v33, 7  ;;  %v3961_v20 = vrot.slane %v10020_v11, 7 }
 0x61a   : > { %v10363_v50 = vpack.c.bf16 %v4355_v32, %v4354_v27 }
 0x61b   : > { %v3855_v23 = vrot.slane %v3854_v52, 1  ;;  %v3962_v27 = vsel %vm707_vm0, %v3959_v21, %v3961_v20 }
 0x61d   : > { %v3856_v49 = vadd.f32 %v3855_v23, %v3854_v52  ;;  %v4356_v23 = vrot.slane %v9997_v14, 1 }
 0x61f   : > { %v3857_v31 = vmul.f32 0.00390625, %v3856_v49  ;;  %v4357_v49 = vrot.slane %v10000_v28, 1 }
 0x621   : > { %v3858_v12 = vpack.c.bf16 %v3857_v31, %v3857_v31  ;;  %v10367_v48 = vpop.f32.mrf.mxu3  ;;  %v4358_v4 = vsel %vm1119_vm3, %v4356_v23, %v4357_v49  ;;  %v4359_v31 = vsel %vm1119_vm3, %v4357_v49, %v12670_v40  ;;  %v4361_v23 = vrot.slane %v10020_v11, 1 }
 0x622   : > { %v10389_v14 = vpack.c.bf16 %v4359_v31, %v4358_v4  ;;  %v3963_v49 = vrot.slane %v10041_v7, 7 }
 0x623   : > { %7702 = vmatmul.msk.bf16.vlgmr.msra.gmra.mxu2 %vm2416_vm4, %v3858_v12  ;;  %7735 = vmatmul.msk.bf16.gmra.mxu0 %vm4073_vm5, %v10363_v50  ;;  %v3960_v12 = vsel %vm707_vm0, %v12669_v25, %v3959_v21  ;;  %v3965_v21 = vrot.slane %v10044_v6, 7  ;;  %v4362_v20 = vsel %vm1119_vm3, %v4360_v3, %v4361_v23  ;;  %v4363_v4 = vsel %vm1119_vm3, %v4361_v23, %v12670_v40 }
 0x624   : > { %7751 = vmatmul.msk.bf16.gmra.mxu1 %vm4073_vm5, %v10365_v57  ;;  %v10391_v28 = vpack.c.bf16 %v3962_v27, %v3960_v12  ;;  %v3964_v31 = vsel %vm707_vm0, %v12669_v25, %v3963_v49  ;;  %v10414_v27 = vpack.c.bf16 %v4363_v4, %v4362_v20  ;;  %v4364_v3 = vrot.slane %v10041_v7, 1 }
 0x625   : > { %v3966_v12 = vsel %vm707_vm0, %v3963_v49, %v3965_v21  ;;  %v4365_v23 = vrot.slane %v10044_v6, 1  ;;  %v3967_v49 = vrot.slane %v10064_v44, 7  ;;  %v3969_v21 = vrot.slane %v10067_v60, 7 }
 0x626   : > { %7767 = vmatmul.msk.bf16.gmra.mxu3 %vm4073_vm5, %v10004_v55  ;;  %v10416_v33 = vpack.c.bf16 %v3966_v12, %v3964_v31 }
 0x627   : > { %v4366_v20 = vsel %vm1119_vm3, %v4364_v3, %v4365_v23  ;;  %v4367_v4 = vsel %vm1119_vm3, %v4365_v23, %v12670_v40  ;;  %v3968_v31 = vsel %vm707_vm0, %v12669_v25, %v3967_v49  ;;  %v3970_v12 = vsel %vm707_vm0, %v3967_v49, %v3969_v21 }
 0x628   : > { %v10440_v7 = vpack.c.bf16 %v4367_v4, %v4366_v20  ;;  %v10442_v6 = vpack.c.bf16 %v3970_v12, %v3968_v31  ;;  %v4368_v23 = vrot.slane %v10064_v44, 1  ;;  %v4369_v49 = vrot.slane %v10067_v60, 1 }
 0x629   : > { %v10375_v52 = vpop.f32.mrf.mxu3  ;;  %v3971_v21 = vrot.slane %v10087_v8, 7  ;;  %v3973_v20 = vrot.slane %v10090_v5, 7 }
 0x62a   : > { %v4370_v4 = vsel %vm1119_vm3, %v4368_v23, %v4369_v49  ;;  %v4371_v31 = vsel %vm1119_vm3, %v4369_v49, %v12670_v40  ;;  %v4372_v49 = vrot.slane %v10087_v8, 1 }
 0x62b   : > { %v3972_v12 = vsel %vm707_vm0, %v12669_v25, %v3971_v21  ;;  %v3974_v41 = vsel %vm707_vm0, %v3971_v21, %v3973_v20  ;;  %v10466_v44 = vpack.c.bf16 %v4371_v31, %v4370_v4  ;;  %v4373_v21 = vrot.slane %v10090_v5, 1 }
 0x62c   : > { %v10468_v60 = vpack.c.bf16 %v3974_v41, %v3972_v12  ;;  %v3975_v41 = vrot.slane %v10110_v46, 7  ;;  %v3977_v20 = vrot.slane %v10113_v47, 7 }
 0x62d   : > { %v4374_v4 = vsel %vm1119_vm3, %v4372_v49, %v4373_v21  ;;  %v4375_v31 = vsel %vm1119_vm3, %v4373_v21, %v12670_v40  ;;  %v4376_v21 = vrot.slane %v10110_v46, 1 }
 0x62e   : > { %12676 = vst [vmem:[#allocation15_spill] sm:$0xff] %v10468_v60  ;;  %v3976_v12 = vsel %vm707_vm0, %v12669_v25, %v3975_v41  ;;  %v10492_v8 = vpack.c.bf16 %v4375_v31, %v4374_v4 }
 0x630   : > { %12679 = vst [vmem:[#allocation17_spill] sm:$0xff] %v10492_v8 }
 0x631   : > { %v10393_v32 = vpop.f32.mrf.mxu3 }
 0x633   : > { %7718 = vmatmul.msk.bf16.vlgmr.msrb.gmra.mxu2 %vm4073_vm5, %v12671_v24  ;;  %7736 = vmatmul.msk.bf16.gmra.mxu0 %vm4073_vm5, %v10389_v14 }
 0x634   : > { %7752 = vmatmul.msk.bf16.gmra.mxu1 %vm4073_vm5, %v10391_v28 }
 0x636   : > { %7768 = vmatmul.msk.bf16.gmra.mxu3 %vm4073_vm5, %v10024_v37 }
 0x639   : > { %v10401_v30 = vpop.f32.mrf.mxu3 }
 0x641   : > { %v10418_v11 = vpop.f32.mrf.mxu3 }
 0x642   : > { %12672 = vst [vmem:[#allocation7_spill] sm:$0xff] %v10418_v11 }
 0x643   : > { %7719 = vmatmul.msk.bf16.gmra.mxu2 %vm4073_vm5, %v4041_v0  ;;  %7737 = vmatmul.msk.bf16.gmra.mxu0 %vm4073_vm5, %v10414_v27 }
 0x644   : > { %7753 = vmatmul.msk.bf16.gmra.mxu1 %vm4073_vm5, %v10416_v33 }
 0x646   : > { %7769 = vmatmul.msk.bf16.gmra.mxu3 %vm4073_vm5, %v10048_v10 }
 0x649   : > { %v10426_v0 = vpop.f32.mrf.mxu3 }
 0x64a   : > { %12673 = vst [vmem:[#allocation11_spill] sm:$0xff] %v10426_v0 }
 0x651   : > { %v10444_v24 = vpop.f32.mrf.mxu3 }
 0x652   : > { %12674 = vst [vmem:[#allocation18_spill] sm:$0xff] %v10444_v24 }
 0x653   : > { %7720 = vmatmul.msk.bf16.gmra.mxu2 %vm4073_vm5, %v10365_v57  ;;  %7738 = vmatmul.msk.bf16.gmra.mxu0 %vm4073_vm5, %v10440_v7 }
 0x654   : > { %7754 = vmatmul.msk.bf16.gmra.mxu1 %vm4073_vm5, %v10442_v6 }
 0x656   : > { %7770 = vmatmul.msk.bf16.gmra.mxu3 %vm4073_vm5, %v10071_v15 }
 0x659   : > { %v10452_v3 = vpop.f32.mrf.mxu3 }
 0x65a   : > { %12675 = vst [vmem:[#allocation14_spill] sm:$0xff] %v10452_v3 }
 0x661   : > { %v10470_v3 = vpop.f32.mrf.mxu3 }
 0x662   : > { %12677 = vst [vmem:[#allocation12_spill] sm:$0xff] %v10470_v3 }
 0x663   : > { %7721 = vmatmul.msk.bf16.gmra.mxu2 %vm4073_vm5, %v10391_v28  ;;  %7739 = vmatmul.msk.bf16.gmra.mxu0 %vm4073_vm5, %v10466_v44 }
 0x664   : > { %7755 = vmatmul.msk.bf16.gmra.mxu1 %vm4073_vm5, %v10468_v60 }
 0x666   : > { %7771 = vmatmul.msk.bf16.gmra.mxu3 %vm4073_vm5, %v10094_v54 }
 0x669   : > { %v10478_v23 = vpop.f32.mrf.mxu3 }
 0x66a   : > { %12678 = vst [vmem:[#allocation20_spill] sm:$0xff] %v10478_v23  ;;  %v3978_v23 = vsel %vm707_vm0, %v3975_v41, %v3977_v20  ;;  %v3979_v41 = vrot.slane %v10133_v56, 7  ;;  %v3981_v20 = vrot.slane %v10136_v35, 7 }
 0x66b   : > { %v10494_v5 = vpack.c.bf16 %v3978_v23, %v3976_v12  ;;  %v4377_v23 = vrot.slane %v10113_v47, 1 }
 0x66d   : > { %12680 = vst [vmem:[#allocation2_spill] sm:$0xff] %v10494_v5  ;;  %v4378_v31 = vsel %vm1119_vm3, %v4376_v21, %v4377_v23  ;;  %v4379_v12 = vsel %vm1119_vm3, %v4377_v23, %v12670_v40  ;;  %v4380_v21 = vrot.slane %v10133_v56, 1  ;;  %v4381_v23 = vrot.slane %v10136_v35, 1 }
 0x671   : > { %v10496_v3 = vpop.f32.mrf.mxu3 }
 0x672   : > { %12681 = vst [vmem:[#allocation3_spill] sm:$0xff] %v10496_v3  ;;  %v3982_v3 = vsel %vm707_vm0, %v3979_v41, %v3981_v20  ;;  %v3985_v20 = vrot.slane %v10161_v62, 7 }
 0x673   : > { %7722 = vmatmul.msk.bf16.gmra.mxu2 %vm4073_vm5, %v10416_v33  ;;  %7740 = vmatmul.msk.bf16.gmra.mxu0 %vm4073_vm5, %v10492_v8 }
 0x674   : > { %7756 = vmatmul.msk.bf16.gmra.mxu1 %vm4073_vm5, %v10494_v5 }
 0x676   : > { %7772 = vmatmul.msk.bf16.gmra.mxu3 %vm4073_vm5, %v10117_v19  ;;  %v10520_v19 = vpack.c.bf16 %v4379_v12, %v4378_v31  ;;  %v4382_v12 = vsel %vm1119_vm3, %v4380_v21, %v4381_v23 }
 0x678   : > { %12684 = vst [vmem:[#allocation38_spill] sm:$0xff] %v10520_v19 }
 0x679   : > { %v10504_v49 = vpop.f32.mrf.mxu3 }
 0x67a   : > { %12682 = vst [vmem:[#allocation36_spill] sm:$0xff] %v10504_v49  ;;  %v3980_v49 = vsel %vm707_vm0, %v12669_v25, %v3979_v41  ;;  %v3983_v41 = vrot.slane %v10158_v22, 7 }
 0x67b   : > { %v10522_v46 = vpack.c.bf16 %v3982_v3, %v3980_v49 }
 0x67c   : > { %v3984_v56 = vsel %vm707_vm0, %v12669_v25, %v3983_v41  ;;  %v3986_v35 = vsel %vm707_vm0, %v3983_v41, %v3985_v20 }
 0x67d   : > { %12685 = vst [vmem:[#allocation39_spill] sm:$0xff] %v10522_v46 }
 0x681   : > { %v10512_v4 = vpop.f32.mrf.mxu3 }
 0x682   : > { %12683 = vst [vmem:[#allocation37_spill] sm:$0xff] %v10512_v4 }
 0x683   : > { %7723 = vmatmul.msk.bf16.gmra.mxu2 %vm4073_vm5, %v10442_v6  ;;  %7741 = vmatmul.msk.bf16.gmra.mxu0 %vm4073_vm5, %v10520_v19 }
 0x684   : > { %7757 = vmatmul.msk.bf16.gmra.mxu1 %vm4073_vm5, %v10522_v46 }
 0x686   : > { %7773 = vmatmul.msk.bf16.gmra.mxu3 %vm4073_vm5, %v10140_v61 }
 0x689   : > { %v10530_v47 = vpop.f32.mrf.mxu3 }
 0x68a   : > { %12686 = vst [vmem:[#allocation40_spill] sm:$0xff] %v10530_v47  ;;  %v4383_v47 = vsel %vm1119_vm3, %v4381_v23, %v12670_v40 }
 0x68b   : > { %v10545_v4 = vpack.c.bf16 %v4383_v47, %v4382_v12  ;;  %v4384_v47 = vrot.slane %v10158_v22, 1  ;;  %v4385_v12 = vrot.slane %v10161_v62, 1 }
 0x68d   : > { %12688 = vst [vmem:[#allocation42_spill] sm:$0xff] %v10545_v4  ;;  %v4386_v24 = vsel %vm1119_vm3, %v4384_v47, %v4385_v12  ;;  %v4387_v19 = vsel %vm1119_vm3, %v4385_v12, %v12670_v40 }
 0x68e   : > { %v10569_v22 = vpack.c.bf16 %v4387_v19, %v4386_v24  ;;  %v4388_v19 = vrot.slane %v10182_v58, 1  ;;  %v4389_v24 = vrot.slane %v10185_v26, 1 }
 0x690   : > { %v4517_v49 = vpop.f32.mrf.mxu0  ;;  %12690 = vst [vmem:[#allocation44_spill] sm:$0xff] %v10569_v22 }
 0x691   : > { %v10536_v3 = vpop.f32.mrf.mxu3  ;;  %v4654_v31 = vpop.f32.mrf.mxu1 }
 0x692   : > { %12687 = vst [vmem:[#allocation41_spill] sm:$0xff] %v10536_v3  ;;  %v10552_v3 = vpack.c.bf16 %v3986_v35, %v3984_v56  ;;  %v3987_v56 = vrot.slane %v10182_v58, 7  ;;  %v3989_v35 = vrot.slane %v10185_v26, 7  ;;  %v4391_v58 = vsel %vm1119_vm3, %v4389_v24, %v12670_v40 }
 0x693   : > { %7724 = vmatmul.msk.bf16.gmra.mxu2 %vm4073_vm5, %v10468_v60  ;;  %7742 = vmatmul.msk.bf16.gmra.mxu0 %vm4073_vm5, %v10545_v4  ;;  %v4390_v60 = vsel %vm1119_vm3, %v4388_v19, %v4389_v24 }
 0x694   : > { %7758 = vmatmul.msk.bf16.gmra.mxu1 %vm4073_vm5, %v10552_v3  ;;  %v3988_v62 = vsel %vm707_vm0, %v12669_v25, %v3987_v56  ;;  %v10596_v26 = vpack.c.bf16 %v4391_v58, %v4390_v60 }
 0x696   : > { %7774 = vmatmul.msk.bf16.gmra.mxu3 %vm4073_vm5, %v10165_v2 }
 0x698   : > { %v4519_v21 = vpop.f32.mrf.mxu0 }
 0x699   : > { %v4783_v61 = vpop.f32.mrf.mxu3  ;;  %v4656_v23 = vpop.f32.mrf.mxu1 }
 0x6a0   : > { %v4522_v20 = vpop.f32.mrf.mxu0 }
 0x6a1   : > { %v4785_v41 = vpop.f32.mrf.mxu3  ;;  %v4659_v4 = vpop.f32.mrf.mxu1 }
 0x6a3   : > { %7725 = vmatmul.msk.bf16.gmra.mxu2 %vm4073_vm5, %v10494_v5  ;;  %7743 = vmatmul.msk.bf16.gmra.mxu0 %vm4073_vm5, %v10569_v22 }
 0x6a6   : > { %v10560_v2 = vpop.f32.mrf.mxu2  ;;  %7775 = vmatmul.msk.bf16.gmra.mxu3 %vm4073_vm5, %v10189_v13 }
 0x6a7   : > { %12689 = vst [vmem:[#allocation43_spill] sm:$0xff] %v10560_v2  ;;  %v3990_v2 = vsel %vm707_vm0, %v3987_v56, %v3989_v35 }
 0x6a8   : > { %v10576_v5 = vpack.c.bf16 %v3990_v2, %v3988_v62  ;;  %v4524_v12 = vpop.f32.mrf.mxu0  ;;  %v3993_v62 = vrot.slane %v10209_v16, 7 }
 0x6a9   : > { %v4788_v47 = vpop.f32.mrf.mxu3  ;;  %v4661_v54 = vpop.f32.mrf.mxu1 }
 0x6aa   : > { %7759 = vmatmul.msk.bf16.gmra.mxu1 %vm4073_vm5, %v10576_v5 }
 0x6ae   : > { %v3877_v0 = vpop.f32.mrf.mxu2 }
 0x6af   : > { %v3991_v0 = vrot.slane %v10206_v17, 7 }
 0x6b0   : > { %v10585_v2 = vpop.f32.mrf.mxu0 }
 0x6b1   : > { %v4790_v35 = vpop.f32.mrf.mxu3  ;;  %v10589_v11 = vpop.f32.mrf.mxu1 }
 0x6b3   : > { %7726 = vmatmul.msk.bf16.gmra.mxu2 %vm4073_vm5, %v10522_v46  ;;  %7744 = vmatmul.msk.bf16.gmra.mxu0 %vm4073_vm5, %v10596_v26 }
 0x6b6   : > { %v4272_v56 = vpop.f32.mrf.mxu2  ;;  %7776 = vmatmul.msk.bf16.gmra.mxu3 %vm4073_vm5, %v10219_v45 }
 0x6b7   : > { %v4273_v13 = vadd.f32 %v4272_v56, %v10145_v29  ;;  %v3992_v29 = vsel %vm707_vm0, %v12669_v25, %v3991_v0  ;;  %v3994_v56 = vsel %vm707_vm0, %v3991_v0, %v3993_v62  ;;  %v4393_v62 = vrot.slane %v10209_v16, 1  ;;  %v12694_v16 = vld [vmem:[#allocation35_spill] sm:$0xff] }
 0x6b8   : > { %v10610_v60 = vpop.f32.mrf.mxu0 }
 0x6b9   : > { %v4597_v22 = vadd.f32 %v4517_v49, %v4273_v13  ;;  %v10605_v13 = vpack.c.bf16 %v3994_v56, %v3992_v29  ;;  %v4793_v19 = vpop.f32.mrf.mxu3  ;;  %v10612_v24 = vpop.f32.mrf.mxu1  ;;  %v12693_v29 = vld [vmem:[#allocation25_spill] sm:$0xff] }
 0x6bb   : > { %v4734_v46 = vadd.f32 %v4654_v31, %v4597_v22  ;;  %7760 = vmatmul.msk.bf16.gmra.mxu1 %vm4073_vm5, %v10605_v13 }
 0x6bd   : > { %v10601_v8 = vadd.f32 %v4783_v61, %v4734_v46  ;;  %v4392_v46 = vrot.slane %v10206_v17, 1  ;;  %v4395_v17 = vsel %vm1119_vm3, %v4393_v62, %v12670_v40 }
 0x6be   : > { %v4274_v49 = vpop.f32.mrf.mxu2 }
 0x6bf   : > { %12691 = vst [vmem:[#allocation45_spill] sm:$0xff] %v10601_v8  ;;  %v4275_v31 = vadd.f32 %v4274_v49, %v10153_v59 }
 0x6c0   : > { %v10621_v49 = vpop.f32.mrf.mxu0 }
 0x6c1   : > { %v4598_v22 = vadd.f32 %v4519_v21, %v4275_v31  ;;  %v4795_v59 = vpop.f32.mrf.mxu3  ;;  %v3995_v21 = vrot.slane %v10236_v9, 7  ;;  %v3997_v31 = vrot.slane %v10239_v39, 7 }
 0x6c3   : > { %v4735_v0 = vadd.f32 %v4656_v23, %v4598_v22  ;;  %7727 = vmatmul.msk.bf16.gmra.mxu2 %vm4073_vm5, %v10552_v3  ;;  %v10625_v22 = vpop.f32.mrf.mxu1 }
 0x6c5   : > { %v10616_v61 = vadd.f32 %v4785_v41, %v4735_v0  ;;  %v4394_v41 = vsel %vm1119_vm3, %v4392_v46, %v4393_v62 }
 0x6c6   : > { %v4277_v58 = vpop.f32.mrf.mxu2  ;;  %7777 = vmatmul.msk.bf16.gmra.mxu3 %vm4073_vm5, %v12694_v16 }
 0x6c7   : > { %12692 = vst [vmem:[#allocation46_spill] sm:$0xff] %v10616_v61  ;;  %v4278_v56 = vadd.f32 %v4277_v58, %v12693_v29  ;;  %v10632_v61 = vpack.c.bf16 %v4395_v17, %v4394_v41  ;;  %v3996_v58 = vsel %vm707_vm0, %v12669_v25, %v3995_v21  ;;  %v3998_v29 = vsel %vm707_vm0, %v3995_v21, %v3997_v31  ;;  %v3916_v31 = vld [vmem:[%s12319_s10 + $0xa] sm:$0x3] }
 0x6c9   : > { %v4599_v23 = vadd.f32 %v4522_v20, %v4278_v56  ;;  %7745 = vmatmul.msk.bf16.gmra.mxu0 %vm4073_vm5, %v10632_v61  ;;  %v10641_v20 = vpack.c.bf16 %v3998_v29, %v3996_v58  ;;  %v4798_v62 = vpop.f32.mrf.mxu3  ;;  %v4397_v58 = vrot.slane %v10239_v39, 1 }
 0x6cb   : > { %v4736_v0 = vadd.f32 %v4659_v4, %v4599_v23  ;;  %v12696_v4 = vld [vmem:[#allocation24_spill] sm:$0xff]  ;;  %7761 = vmatmul.msk.bf16.gmra.mxu1 %vm4073_vm5, %v10641_v20  ;;  %v10646_v23 = vpop.f32.mrf.mxu0  ;;  %v10648_v17 = vpop.f32.mrf.mxu1  ;;  %v4399_v39 = vsel %vm1119_vm3, %v4397_v58, %v12670_v40 }
 0x6cd   : > { %v10637_v8 = vadd.f32 %v4788_v47, %v4736_v0  ;;  %v4396_v0 = vrot.slane %v10236_v9, 1 }
 0x6ce   : > { %v4279_v46 = vpop.f32.mrf.mxu2 }
 0x6cf   : > { %12695 = vst [vmem:[#allocation25_spill] sm:$0xff] %v10637_v8  ;;  %v4280_v56 = vadd.f32 %v4279_v46, %v12696_v4  ;;  %v4902_v4 = vpack.c.bf16 %v3916_v31, %v3916_v31  ;;  %v4398_v9 = vsel %vm1119_vm3, %v4396_v0, %v4397_v58 }
 0x6d1   : > { %v4600_v41 = vadd.f32 %v4524_v12, %v4280_v56  ;;  %v4800_v46 = vpop.f32.mrf.mxu3  ;;  %v12698_v12 = vld [vmem:[#allocation28_spill] sm:$0xff] }
 0x6d3   : > { %v4737_v21 = vadd.f32 %v4661_v54, %v4600_v41  ;;  %7728 = vmatmul.msk.bf16.gmra.mxu2 %vm4073_vm5, %v10576_v5  ;;  %v10660_v8 = vpop.f32.mrf.mxu0  ;;  %v3999_v54 = vrot.slane %v10260_v36, 7  ;;  %v4907_v41 = vsel %vm707_vm0, %v4902_v4, 0 }
 0x6d4   : > { %4916 = vmatpush.bf16.msra.mxu2 %v4907_v41 }
 0x6d5   : > { %v10652_v47 = vadd.f32 %v4790_v35, %v4737_v21  ;;  %v4001_v35 = vrot.slane %v10263_v34, 7  ;;  %v4000_v4 = vsel %vm707_vm0, %v12669_v25, %v3999_v54 }
 0x6d6   : > { %v4282_v29 = vpop.f32.mrf.mxu2  ;;  %7778 = vmatmul.msk.bf16.gmra.mxu3 %vm4073_vm5, %v10267_v51  ;;  %v4003_v51 = vrot.slane %v10284_v18, 7 }
 0x6d7   : > { %12697 = vst [vmem:[#allocation35_spill] sm:$0xff] %v10652_v47  ;;  %v4283_v56 = vadd.f32 %v4282_v29, %v12698_v12  ;;  %v10666_v47 = vpop.f32.mrf.mxu1  ;;  %v10674_v29 = vpack.c.bf16 %v4399_v39, %v4398_v9 }
 0x6d9   : > { %v4601_v21 = vadd.f32 %v10585_v2, %v4283_v56  ;;  %v4002_v2 = vsel %vm707_vm0, %v3999_v54, %v4001_v35  ;;  %7746 = vmatmul.msk.bf16.gmra.mxu0 %vm4073_vm5, %v10674_v29  ;;  %v4803_v56 = vpop.f32.mrf.mxu3  ;;  %v4400_v35 = vrot.slane %v10260_v36, 1 }
 0x6da   : > { %v10683_v0 = vpack.c.bf16 %v4002_v2, %v4000_v4 }
 0x6db   : > { %v4738_v31 = vadd.f32 %v10589_v11, %v4601_v21  ;;  %v12700_v11 = vld [vmem:[#allocation9_spill] sm:$0xff]  ;;  %v4539_v21 = vpop.f32.mrf.mxu0 }
 0x6dc   : > { %7762 = vmatmul.msk.bf16.gmra.mxu1 %vm4073_vm5, %v10683_v0 }
 0x6dd   : > { %v10679_v12 = vadd.f32 %v4793_v19, %v4738_v31  ;;  %v4401_v31 = vrot.slane %v10263_v34, 1 }
 0x6de   : > { %v4284_v58 = vpop.f32.mrf.mxu2 }
 0x6df   : > { %12699 = vst [vmem:[#allocation24_spill] sm:$0xff] %v10679_v12  ;;  %v4285_v41 = vadd.f32 %v4284_v58, %v12700_v11  ;;  %v4676_v39 = vpop.f32.mrf.mxu1  ;;  %v12701_v58 = vld [vmem:[#allocation8_spill] sm:$0xff]  ;;  %v4403_v36 = vsel %vm1119_vm3, %v4401_v31, %v12670_v40 }
 0x6e1   : > { %v4602_v9 = vadd.f32 %v10610_v60, %v4285_v41  ;;  %v4805_v2 = vpop.f32.mrf.mxu3  ;;  %v4005_v60 = vrot.slane %v10287_v42, 7 }
 0x6e3   : > { %v4739_v54 = vadd.f32 %v10612_v24, %v4602_v9  ;;  %7729 = vmatmul.msk.bf16.gmra.mxu2 %vm4073_vm5, %v10605_v13  ;;  %v4542_v12 = vpop.f32.mrf.mxu0  ;;  %v12702_v9 = vld [vmem:[#allocation31_spill] sm:$0xff] }
 0x6e5   : > { %v10692_v19 = vadd.f32 %v4795_v59, %v4739_v54  ;;  %v4402_v59 = vsel %vm1119_vm3, %v4400_v35, %v4401_v31 }
 0x6e6   : > { %v4287_v4 = vpop.f32.mrf.mxu2  ;;  %7779 = vmatmul.msk.bf16.gmra.mxu3 %vm4073_vm5, %v12702_v9  ;;  %v10708_v54 = vpack.c.bf16 %v4403_v36, %v4402_v59 }
 0x6e7   : > { %v4288_v11 = vadd.f32 %v4287_v4, %v12701_v58  ;;  %v10700_v41 = vpop.f32.mrf.mxu1  ;;  %v4004_v4 = vsel %vm707_vm0, %v12669_v25, %v4003_v51  ;;  %v4006_v58 = vsel %vm707_vm0, %v4003_v51, %v4005_v60  ;;  %v4404_v60 = vrot.slane %v10284_v18, 1 }
 0x6e8   : > { %v10717_v35 = vpack.c.bf16 %v4006_v58, %v4004_v4 }
 0x6e9   : > { %v4603_v24 = vadd.f32 %v10621_v49, %v4288_v11  ;;  %7747 = vmatmul.msk.bf16.gmra.mxu0 %vm4073_vm5, %v10708_v54  ;;  %v4808_v11 = vpop.f32.mrf.mxu3 }
 0x6eb   : > { %v4740_v34 = vadd.f32 %v10625_v22, %v4603_v24  ;;  %v12704_v22 = vld [vmem:[#allocation33_spill] sm:$0xff]  ;;  %v10722_v59 = vpop.f32.mrf.mxu0 }
 0x6ec   : > { %7763 = vmatmul.msk.bf16.gmra.mxu1 %vm4073_vm5, %v10717_v35 }
 0x6ed   : > { %v10713_v49 = vadd.f32 %v4798_v62, %v4740_v34  ;;  %v4405_v34 = vrot.slane %v10287_v42, 1 }
 0x6ee   : > { %v4289_v31 = vpop.f32.mrf.mxu2 }
 0x6ef   : > { %12703 = vst [vmem:[#allocation28_spill] sm:$0xff] %v10713_v49  ;;  %v4290_v24 = vadd.f32 %v4289_v31, %v12704_v22  ;;  %v10725_v9 = vpop.f32.mrf.mxu1  ;;  %v12706_v31 = vld [vmem:[#allocation6_spill] sm:$0xff]  ;;  %v4407_v18 = vsel %vm1119_vm3, %v4405_v34, %v12670_v40 }
 0x6f1   : > { %v4604_v36 = vadd.f32 %v10646_v23, %v4290_v24  ;;  %v4810_v58 = vpop.f32.mrf.mxu3  ;;  %v4007_v23 = vrot.slane %v10306_v43, 7  ;;  %v4009_v24 = vrot.slane %v10309_v63, 7 }
 0x6f3   : > { %v4741_v51 = vadd.f32 %v10648_v17, %v4604_v36  ;;  %7730 = vmatmul.msk.bf16.gmra.mxu2 %vm4073_vm5, %v10641_v20  ;;  %v10735_v49 = vpop.f32.mrf.mxu0 }
 0x6f5   : > { %v10730_v62 = vadd.f32 %v4800_v46, %v4741_v51  ;;  %v4406_v46 = vsel %vm1119_vm3, %v4404_v60, %v4405_v34 }
 0x6f6   : > { %v4292_v4 = vpop.f32.mrf.mxu2  ;;  %7780 = vmatmul.msk.bf16.gmra.mxu3 %vm4073_vm5, %v10316_v1  ;;  %v10748_v51 = vpack.c.bf16 %v4407_v18, %v4406_v46  ;;  %v10774_v1 = vld [vmem:[%s9961_s22 + $0xf0] sm:$0xff] }
 0x6f7   : > { %12705 = vst [vmem:[#allocation9_spill] sm:$0xff] %v10730_v62  ;;  %v4293_v22 = vadd.f32 %v4292_v4, %v12706_v31  ;;  %v10740_v36 = vpop.f32.mrf.mxu1  ;;  %v4008_v4 = vsel %vm707_vm0, %v12669_v25, %v4007_v23  ;;  %v4010_v31 = vsel %vm707_vm0, %v4007_v23, %v4009_v24  ;;  %v10777_v62 = vld [vmem:[%s9961_s22 + $0xf8] sm:$0xff]  ;;  %s7994_s22 = sshll.u32 %s12873_s28, 3 }
 0x6f8   : > { %v10757_v60 = vpack.c.bf16 %v4010_v31, %v4008_v4  ;;  %v4409_v4 = vrot.slane %v10309_v63, 1  ;;  %12711 = vst [vmem:[#allocation6_spill] sm:$0xff] %v10777_v62  ;;  %s623_s29 = scalar_lea.vmem %s12871_s26, %s7994_s22  ;;  %s632_s0 = scalar_lea.vmem %s12327_s18, %s7994_s22 }
 0x6f9   : > { %v4605_v17 = vadd.f32 %v10660_v8, %v4293_v22  ;;  %7748 = vmatmul.msk.bf16.gmra.mxu0 %vm4073_vm5, %v10748_v51  ;;  %v12708_v22 = vld [vmem:[#allocation10_spill] sm:$0xff] }
 0x6fb   : > { %v4742_v42 = vadd.f32 %v10666_v47, %v4605_v17  ;;  %v4813_v47 = vpop.f32.mrf.mxu3  ;;  %v10762_v46 = vpop.f32.mrf.mxu0 }
 0x6fc   : > { %7764 = vmatmul.msk.bf16.gmra.mxu1 %vm4073_vm5, %v10757_v60 }
 0x6fd   : > { %v10753_v8 = vadd.f32 %v4803_v56, %v4742_v42  ;;  %v4408_v42 = vrot.slane %v10306_v43, 1 }
 0x6fe   : > { %v4294_v34 = vpop.f32.mrf.mxu2 }
 0x6ff   : > { %12707 = vst [vmem:[#allocation8_spill] sm:$0xff] %v10753_v8  ;;  %v4295_v17 = vadd.f32 %v4294_v34, %v12708_v22  ;;  %v10764_v23 = vpop.f32.mrf.mxu1  ;;  %v12710_v22 = vld [vmem:[#allocation30_spill] sm:$0xff]  ;;  %v4410_v63 = vsel %vm1119_vm3, %v4408_v42, %v4409_v4 }
 0x701   : > { %v4606_v18 = vadd.f32 %v4539_v21, %v4295_v17 }
 0x703   : > { %v4743_v56 = vadd.f32 %v4676_v39, %v4606_v18  ;;  %7731 = vmatmul.msk.bf16.gmra.mxu2 %vm4073_vm5, %v10683_v0  ;;  %v4815_v34 = vpop.f32.mrf.mxu3  ;;  %v4552_v17 = vpop.f32.mrf.mxu0  ;;  %v4631_v39 = vrot.slane %v10774_v1, 7  ;;  %v4633_v18 = vrot.slane %v10777_v62, 7 }
 0x705   : > { %v10768_v24 = vadd.f32 %v4805_v2, %v4743_v56  ;;  %v10783_v2 = vpack.c.bf16 %v10777_v62, %v10774_v1  ;;  %v4411_v56 = vsel %vm1119_vm3, %v4409_v4, %v12670_v40 }
 0x706   : > { %v4297_v31 = vpop.f32.mrf.mxu2 }
 0x707   : > { %12709 = vst [vmem:[#allocation33_spill] sm:$0xff] %v10768_v24  ;;  %v4298_v8 = vadd.f32 %v4297_v31, %v12710_v22  ;;  %v4689_v43 = vpop.f32.mrf.mxu1  ;;  %7781 = vmatmul.msk.bf16.gmra.mxu3 %vm4073_vm5, %v10783_v2  ;;  %v4634_v22 = vsel %vm707_vm0, %v4631_v39, %v4633_v18 }
 0x708   : > { %12712 = vst [vmem:[#allocation10_spill] sm:$0xff] %v10783_v2 }
 0x709   : > { %v4607_v21 = vadd.f32 %v4542_v12, %v4298_v8  ;;  %v10791_v12 = vpack.c.bf16 %v4411_v56, %v4410_v63  ;;  %v4632_v8 = vsel %vm707_vm0, %v12669_v25, %v4631_v39 }
 0x70a   : > { %v10800_v42 = vpack.c.bf16 %v4634_v22, %v4632_v8 }
 0x70b   : > { %v4744_v31 = vadd.f32 %v10700_v41, %v4607_v21  ;;  %7749 = vmatmul.msk.bf16.gmra.mxu0 %vm4073_vm5, %v10791_v12  ;;  %v4818_v62 = vpop.f32.mrf.mxu3  ;;  %v12714_v41 = vld [vmem:[#allocation26_spill] sm:$0xff]  ;;  %v4554_v56 = vpop.f32.mrf.mxu0 }
 0x70c   : > { %7765 = vmatmul.msk.bf16.gmra.mxu1 %vm4073_vm5, %v10800_v42 }
 0x70d   : > { %v10796_v24 = vadd.f32 %v4808_v11, %v4744_v31  ;;  %v3919_v11 = vld [vmem:[%s12319_s10 + $0x10] sm:$0x3] }
 0x70e   : > { %v4299_v4 = vpop.f32.mrf.mxu2  ;;  %v5280_v31 = vpack.c.bf16 %v3919_v11, %v3919_v11 }
 0x70f   : > { %12713 = vst [vmem:[#allocation30_spill] sm:$0xff] %v10796_v24  ;;  %v4300_v21 = vadd.f32 %v4299_v4, %v12714_v41  ;;  %v4691_v2 = vpop.f32.mrf.mxu1  ;;  %v12716_v4 = vld [vmem:[#allocation29_spill] sm:$0xff] }
 0x711   : > { %v4608_v63 = vadd.f32 %v10722_v59, %v4300_v21  ;;  %v3917_v59 = vld [vmem:[%s12319_s10 + $0xc] sm:$0x3] }
 0x712   : > { %v5030_v21 = vpack.c.bf16 %v3917_v59, %v3917_v59 }
 0x713   : > { %v4745_v39 = vadd.f32 %v10725_v9, %v4608_v63  ;;  %7732 = vmatmul.msk.bf16.gmra.mxu2 %vm4073_vm5, %v10717_v35  ;;  %v4820_v22 = vpop.f32.mrf.mxu3  ;;  %v5282_v9 = vsel %vm707_vm0, %v5280_v31, 0  ;;  %v3918_v63 = vld [vmem:[%s12319_s10 + $0xe] sm:$0x3] }
 0x714   : > { %5291 = vmatpush.bf16.msrb.mxu3 %v5282_v9  ;;  %v5155_v11 = vpack.c.bf16 %v3918_v63, %v3918_v63 }
 0x715   : > { %v10812_v18 = vadd.f32 %v4810_v58, %v4745_v39  ;;  %v5032_v39 = vsel %vm707_vm0, %v5030_v21, 0 }
 0x716   : > { %v4302_v8 = vpop.f32.mrf.mxu2  ;;  %5041 = vmatpush.bf16.msra.mxu0 %v5032_v39  ;;  %v5157_v31 = vsel %vm707_vm0, %v5155_v11, 0  ;;  %v12718_v39 = vld [vmem:[#allocation16_spill] sm:$0xff] }
 0x717   : > { %12715 = vst [vmem:[#allocation26_spill] sm:$0xff] %v10812_v18  ;;  %v4303_v41 = vadd.f32 %v4302_v8, %v12716_v4  ;;  %v4557_v18 = vpop.f32.mrf.mxu0  ;;  %7829 = vmatmul.msk.bf16.vlgmr.msrb.gmra.mxu3 %vm4073_vm5, %v10389_v14  ;;  %v4694_v8 = vpop.f32.mrf.mxu1  ;;  %5166 = vmatpush.bf16.msra.mxu1 %v5157_v31 }
 0x719   : > { %v4609_v58 = vadd.f32 %v10735_v49, %v4303_v41  ;;  %v12717_v41 = vld [vmem:[#allocation32_spill] sm:$0xff] }
 0x71b   : > { %v4746_v24 = vadd.f32 %v10740_v36, %v4609_v58  ;;  %7798 = vmatmul.msk.bf16.vlgmr.msra.gmra.mxu0 %vm4073_vm5, %v10365_v57  ;;  %v4823_v4 = vpop.f32.mrf.mxu3 }
 0x71c   : > { %7814 = vmatmul.msk.bf16.vlgmr.msra.gmra.mxu1 %vm4073_vm5, %v10004_v55 }
 0x71d   : > { %v10828_v59 = vadd.f32 %v4813_v47, %v4746_v24 }
 0x71e   : > { %v4304_v49 = vpop.f32.mrf.mxu2 }
 0x71f   : > { %v4305_v9 = vadd.f32 %v4304_v49, %v12717_v41  ;;  %v4559_v21 = vpop.f32.mrf.mxu0  ;;  %v4696_v47 = vpop.f32.mrf.mxu1 }
 0x721   : > { %v4610_v36 = vadd.f32 %v10762_v46, %v4305_v9 }
 0x723   : > { %v4747_v63 = vadd.f32 %v10764_v23, %v4610_v36  ;;  %7733 = vmatmul.msk.bf16.gmra.mxu2 %vm4073_vm5, %v10757_v60  ;;  %v4825_v57 = vpop.f32.mrf.mxu3 }
 0x725   : > { %v10839_v24 = vadd.f32 %v4815_v34, %v4747_v63 }
 0x726   : > { %v4307_v58 = vpop.f32.mrf.mxu2 }
 0x727   : > { %v4308_v11 = vadd.f32 %v4307_v58, %v12718_v39  ;;  %v4562_v49 = vpop.f32.mrf.mxu0  ;;  %7830 = vmatmul.msk.bf16.gmra.mxu3 %vm4073_vm5, %v10414_v27  ;;  %v4699_v55 = vpop.f32.mrf.mxu1 }
 0x729   : > { %v4611_v31 = vadd.f32 %v4552_v17, %v4308_v11 }
 0x72b   : > { %v4748_v41 = vadd.f32 %v4689_v43, %v4611_v31  ;;  %7799 = vmatmul.msk.bf16.gmra.mxu0 %vm4073_vm5, %v10391_v28  ;;  %v4828_v9 = vpop.f32.mrf.mxu3 }
 0x72c   : > { %7815 = vmatmul.msk.bf16.gmra.mxu1 %vm4073_vm5, %v10024_v37 }
 0x72d   : > { %v10844_v46 = vadd.f32 %v4818_v62, %v4748_v41 }
 0x72e   : > { %v4309_v23 = vpop.f32.mrf.mxu2 }
 0x72f   : > { %v4310_v34 = vadd.f32 %v4309_v23, %v10340_v53  ;;  %v4564_v17 = vpop.f32.mrf.mxu0  ;;  %v4701_v43 = vpop.f32.mrf.mxu1 }
 0x731   : > { %v4612_v36 = vadd.f32 %v4554_v56, %v4310_v34 }
 0x733   : > { %v4749_v63 = vadd.f32 %v4691_v2, %v4612_v36  ;;  %7782 = vmatmul.msk.bf16.vlgmr.msra.gmra.mxu2 %vm4073_vm5, %v10363_v50  ;;  %v4830_v39 = vpop.f32.mrf.mxu3 }
 0x735   : > { %v10853_v58 = vadd.f32 %v4820_v22, %v4749_v63 }
 0x736   : > { %v4312_v62 = vpop.f32.mrf.mxu2 }
 0x737   : > { %v4313_v28 = vadd.f32 %v4312_v62, %v10351_v38  ;;  %v4567_v31 = vpop.f32.mrf.mxu0  ;;  %7831 = vmatmul.msk.bf16.gmra.mxu3 %vm4073_vm5, %v10440_v7 }
 0x738   : > { %v4704_v37 = vpop.f32.mrf.mxu1 }
 0x739   : > { %v4613_v11 = vadd.f32 %v4557_v18, %v4313_v28 }
 0x73b   : > { %v4750_v41 = vadd.f32 %v4694_v8, %v4613_v11  ;;  %7800 = vmatmul.msk.bf16.gmra.mxu0 %vm4073_vm5, %v10416_v33  ;;  %v4833_v2 = vpop.f32.mrf.mxu3 }
 0x73c   : > { %7816 = vmatmul.msk.bf16.gmra.mxu1 %vm4073_vm5, %v10048_v10 }
 0x73d   : > { %v10858_v53 = vadd.f32 %v4823_v4, %v4750_v41 }
 0x73e   : > { %v4314_v50 = vpop.f32.mrf.mxu2 }
 0x73f   : > { %v4315_v56 = vadd.f32 %v4314_v50, %v10367_v48  ;;  %v4569_v18 = vpop.f32.mrf.mxu0 }
 0x740   : > { %v4706_v8 = vpop.f32.mrf.mxu1 }
 0x741   : > { %v4614_v38 = vadd.f32 %v4559_v21, %v4315_v56 }
 0x743   : > { %v4751_v22 = vadd.f32 %v4696_v47, %v4614_v38  ;;  %7783 = vmatmul.msk.bf16.gmra.mxu2 %vm4073_vm5, %v10389_v14  ;;  %v4835_v34 = vpop.f32.mrf.mxu3 }
 0x745   : > { %v10867_v23 = vadd.f32 %v4825_v57, %v4751_v22 }
 0x746   : > { %v4317_v4 = vpop.f32.mrf.mxu2 }
 0x747   : > { %v4318_v33 = vadd.f32 %v4317_v4, %v10375_v52  ;;  %v4572_v63 = vpop.f32.mrf.mxu0  ;;  %7832 = vmatmul.msk.bf16.gmra.mxu3 %vm4073_vm5, %v10466_v44  ;;  %v12722_v4 = vld [vmem:[#allocation19_spill] sm:$0xff] }
 0x748   : > { %v4709_v10 = vpop.f32.mrf.mxu1 }
 0x749   : > { %v4615_v36 = vadd.f32 %v4562_v49, %v4318_v33 }
 0x74b   : > { %v4752_v62 = vadd.f32 %v4699_v55, %v4615_v36  ;;  %7801 = vmatmul.msk.bf16.gmra.mxu0 %vm4073_vm5, %v10442_v6  ;;  %v4838_v21 = vpop.f32.mrf.mxu3 }
 0x74c   : > { %7817 = vmatmul.msk.bf16.gmra.mxu1 %vm4073_vm5, %v10071_v15 }
 0x74d   : > { %v10872_v48 = vadd.f32 %v4828_v9, %v4752_v62 }
 0x74e   : > { %v4319_v14 = vpop.f32.mrf.mxu2 }
 0x74f   : > { %v4320_v47 = vadd.f32 %v4319_v14, %v10393_v32  ;;  %v4574_v57 = vpop.f32.mrf.mxu0  ;;  %v12719_v32 = vld [vmem:[#allocation17_spill] sm:$0xff]  ;;  %v12723_v14 = vld [vmem:[#allocation11_spill] sm:$0xff] }
 0x750   : > { %v4711_v55 = vpop.f32.mrf.mxu1 }
 0x751   : > { %v4616_v52 = vadd.f32 %v4564_v17, %v4320_v47 }
 0x753   : > { %v4753_v49 = vadd.f32 %v4701_v43, %v4616_v52  ;;  %7784 = vmatmul.msk.bf16.gmra.mxu2 %vm4073_vm5, %v10414_v27  ;;  %v4840_v11 = vpop.f32.mrf.mxu3  ;;  %v12720_v43 = vld [vmem:[#allocation15_spill] sm:$0xff] }
 0x755   : > { %v10881_v28 = vadd.f32 %v4830_v39, %v4753_v49  ;;  %v12721_v39 = vld [vmem:[#allocation7_spill] sm:$0xff] }
 0x756   : > { %v4322_v9 = vpop.f32.mrf.mxu2 }
 0x757   : > { %v4323_v6 = vadd.f32 %v4322_v9, %v10401_v30  ;;  %v4577_v50 = vpop.f32.mrf.mxu0  ;;  %7833 = vmatmul.msk.bf16.gmra.mxu3 %vm4073_vm5, %v12719_v32 }
 0x759   : > { %v4617_v41 = vadd.f32 %v4567_v31, %v4323_v6  ;;  %v4714_v15 = vpop.f32.mrf.mxu1  ;;  %v12724_v6 = vld [vmem:[#allocation38_spill] sm:$0xff] }
 0x75b   : > { %v4754_v56 = vadd.f32 %v4704_v37, %v4617_v41  ;;  %7802 = vmatmul.msk.bf16.gmra.mxu0 %vm4073_vm5, %v12720_v43  ;;  %v4843_v38 = vpop.f32.mrf.mxu3 }
 0x75c   : > { %7818 = vmatmul.msk.bf16.gmra.mxu1 %vm4073_vm5, %v12722_v4 }
 0x75d   : > { %v10886_v17 = vadd.f32 %v4833_v2, %v4754_v56 }
 0x75e   : > { %v4324_v27 = vpop.f32.mrf.mxu2 }
 0x75f   : > { %v4325_v22 = vadd.f32 %v4324_v27, %v12721_v39  ;;  %v4579_v31 = vpop.f32.mrf.mxu0  ;;  %v12727_v27 = vld [vmem:[#allocation22_spill] sm:$0xff] }
 0x761   : > { %v4618_v30 = vadd.f32 %v4569_v18, %v4325_v22  ;;  %v4716_v37 = vpop.f32.mrf.mxu1 }
 0x763   : > { %v4755_v33 = vadd.f32 %v4706_v8, %v4618_v30  ;;  %7785 = vmatmul.msk.bf16.gmra.mxu2 %vm4073_vm5, %v10440_v7  ;;  %v4845_v62 = vpop.f32.mrf.mxu3  ;;  %v12725_v8 = vld [vmem:[#allocation2_spill] sm:$0xff] }
 0x765   : > { %v10895_v36 = vadd.f32 %v4835_v34, %v4755_v33  ;;  %v12726_v34 = vld [vmem:[#allocation18_spill] sm:$0xff] }
 0x766   : > { %v4327_v2 = vpop.f32.mrf.mxu2  ;;  %v12728_v33 = vld [vmem:[#allocation14_spill] sm:$0xff] }
 0x767   : > { %v4328_v47 = vadd.f32 %v4327_v2, %v12723_v14  ;;  %v4582_v49 = vpop.f32.mrf.mxu0  ;;  %7834 = vmatmul.msk.bf16.gmra.mxu3 %vm4073_vm5, %v12724_v6 }
 0x769   : > { %v4619_v52 = vadd.f32 %v4572_v63, %v4328_v47  ;;  %v4719_v41 = vpop.f32.mrf.mxu1 }
 0x76b   : > { %v4756_v9 = vadd.f32 %v4709_v10, %v4619_v52  ;;  %7803 = vmatmul.msk.bf16.gmra.mxu0 %vm4073_vm5, %v12725_v8  ;;  %v4848_v56 = vpop.f32.mrf.mxu3 }
 0x76c   : > { %7819 = vmatmul.msk.bf16.gmra.mxu1 %vm4073_vm5, %v12727_v27 }
 0x76d   : > { %v10900_v18 = vadd.f32 %v4838_v21, %v4756_v9  ;;  %v12729_v9 = vld [vmem:[#allocation42_spill] sm:$0xff] }
 0x76e   : > { %v4329_v7 = vpop.f32.mrf.mxu2 }
 0x76f   : > { %v4330_v43 = vadd.f32 %v4329_v7, %v12726_v34  ;;  %v4584_v63 = vpop.f32.mrf.mxu0 }
 0x771   : > { %v4620_v39 = vadd.f32 %v4574_v57, %v4330_v43  ;;  %v4721_v10 = vpop.f32.mrf.mxu1  ;;  %v12732_v43 = vld [vmem:[#allocation21_spill] sm:$0xff] }
 0x773   : > { %v4757_v22 = vadd.f32 %v4711_v55, %v4620_v39  ;;  %7786 = vmatmul.msk.bf16.gmra.mxu2 %vm4073_vm5, %v10466_v44  ;;  %v4850_v30 = vpop.f32.mrf.mxu3  ;;  %v12730_v55 = vld [vmem:[#allocation39_spill] sm:$0xff] }
 0x775   : > { %v10909_v4 = vadd.f32 %v4840_v11, %v4757_v22  ;;  %v12731_v11 = vld [vmem:[#allocation12_spill] sm:$0xff] }
 0x776   : > { %v4332_v21 = vpop.f32.mrf.mxu2 }
 0x777   : > { %v4333_v2 = vadd.f32 %v4332_v21, %v12728_v33  ;;  %v4587_v47 = vpop.f32.mrf.mxu0  ;;  %7835 = vmatmul.msk.bf16.gmra.mxu3 %vm4073_vm5, %v12729_v9  ;;  %v12733_v33 = vld [vmem:[#allocation20_spill] sm:$0xff] }
 0x779   : > { %v4621_v14 = vadd.f32 %v4577_v50, %v4333_v2  ;;  %v4724_v8 = vpop.f32.mrf.mxu1 }
 0x77b   : > { %v4758_v52 = vadd.f32 %v4714_v15, %v4621_v14  ;;  %7804 = vmatmul.msk.bf16.gmra.mxu0 %vm4073_vm5, %v12730_v55  ;;  %v4853_v7 = vpop.f32.mrf.mxu3 }
 0x77c   : > { %7820 = vmatmul.msk.bf16.gmra.mxu1 %vm4073_vm5, %v12732_v43  ;;  %v12737_v43 = vld [vmem:[#allocation23_spill] sm:$0xff] }
 0x77d   : > { %v10914_v57 = vadd.f32 %v4843_v38, %v4758_v52 }
 0x77e   : > { %v4334_v44 = vpop.f32.mrf.mxu2 }
 0x77f   : > { %v4335_v34 = vadd.f32 %v4334_v44, %v12731_v11  ;;  %v4589_v50 = vpop.f32.mrf.mxu0  ;;  %v12734_v44 = vld [vmem:[#allocation44_spill] sm:$0xff] }
 0x781   : > { %v4622_v27 = vadd.f32 %v4579_v31, %v4335_v34  ;;  %v4726_v15 = vpop.f32.mrf.mxu1 }
 0x783   : > { %v4759_v39 = vadd.f32 %v4716_v37, %v4622_v27  ;;  %7787 = vmatmul.msk.bf16.gmra.mxu2 %vm4073_vm5, %v12719_v32  ;;  %v4855_v21 = vpop.f32.mrf.mxu3 }
 0x785   : > { %v10923_v22 = vadd.f32 %v4845_v62, %v4759_v39  ;;  %v12736_v62 = vld [vmem:[#allocation3_spill] sm:$0xff] }
 0x786   : > { %v4337_v38 = vpop.f32.mrf.mxu2 }
 0x787   : > { %v4338_v2 = vadd.f32 %v4337_v38, %v12733_v33  ;;  %7836 = vmatmul.msk.bf16.gmra.mxu3 %vm4073_vm5, %v12734_v44 }
 0x788   : > { %v4592_v52 = vpop.f32.mrf.mxu0 }
 0x789   : > { %v4623_v14 = vadd.f32 %v4582_v49, %v4338_v2  ;;  %v4729_v11 = vpop.f32.mrf.mxu1  ;;  %v12738_v2 = vld [vmem:[#allocation36_spill] sm:$0xff] }
 0x78b   : > { %v4760_v55 = vadd.f32 %v4719_v41, %v4623_v14  ;;  %7805 = vmatmul.msk.bf16.gmra.mxu0 %vm4073_vm5, %v10552_v3  ;;  %v4858_v37 = vpop.f32.mrf.mxu3 }
 0x78c   : > { %7821 = vmatmul.msk.bf16.gmra.mxu1 %vm4073_vm5, %v12737_v43 }
 0x78d   : > { %v10928_v31 = vadd.f32 %v4848_v56, %v4760_v55 }
 0x78e   : > { %v4339_v32 = vpop.f32.mrf.mxu2 }
 0x78f   : > { %12735 = vst [vmem:[#allocation29_spill] sm:$0xff] %v10928_v31  ;;  %v4340_v34 = vadd.f32 %v4339_v32, %v12736_v62 }
 0x790   : > { %v4594_v49 = vpop.f32.mrf.mxu0 }
 0x791   : > { %v4624_v27 = vadd.f32 %v4584_v63, %v4340_v34  ;;  %v4731_v41 = vpop.f32.mrf.mxu1  ;;  %v12740_v34 = vld [vmem:[#allocation27_spill] sm:$0xff] }
 0x793   : > { %v4761_v39 = vadd.f32 %v4721_v10, %v4624_v27  ;;  %7788 = vmatmul.msk.bf16.gmra.mxu2 %vm4073_vm5, %v12724_v6  ;;  %v4860_v33 = vpop.f32.mrf.mxu3 }
 0x795   : > { %v10937_v38 = vadd.f32 %v4850_v30, %v4761_v39  ;;  %v12739_v30 = vld [vmem:[#allocation37_spill] sm:$0xff] }
 0x796   : > { %v4342_v56 = vpop.f32.mrf.mxu2 }
 0x797   : > { %v4343_v3 = vadd.f32 %v4342_v56, %v12738_v2  ;;  %7837 = vmatmul.msk.bf16.gmra.mxu3 %vm4073_vm5, %v10596_v26  ;;  %v12741_v56 = vld [vmem:[#allocation40_spill] sm:$0xff] }
 0x798   : > { %v5043_v55 = vpop.f32.mrf.mxu0 }
 0x799   : > { %v4625_v14 = vadd.f32 %v4587_v47, %v4343_v3  ;;  %v5168_v32 = vpop.f32.mrf.mxu1 }
 0x79b   : > { %v4762_v31 = vadd.f32 %v4724_v8, %v4625_v14  ;;  %7806 = vmatmul.msk.bf16.gmra.mxu0 %vm4073_vm5, %v10576_v5  ;;  %v5293_v10 = vpop.f32.mrf.mxu3 }
 0x79c   : > { %7822 = vmatmul.msk.bf16.gmra.mxu1 %vm4073_vm5, %v12740_v34 }
 0x79d   : > { %v10942_v63 = vadd.f32 %v4853_v7, %v4762_v31 }
 0x79e   : > { %v4344_v6 = vpop.f32.mrf.mxu2 }
 0x79f   : > { %v4345_v62 = vadd.f32 %v4344_v6, %v12739_v30 }
 0x7a0   : > { %v5045_v47 = vpop.f32.mrf.mxu0 }
 0x7a1   : > { %v4626_v43 = vadd.f32 %v4589_v50, %v4345_v62  ;;  %v5170_v8 = vpop.f32.mrf.mxu1 }
 0x7a3   : > { %v4763_v27 = vadd.f32 %v4726_v15, %v4626_v43  ;;  %7789 = vmatmul.msk.bf16.gmra.mxu2 %vm4073_vm5, %v12729_v9  ;;  %v5295_v31 = vpop.f32.mrf.mxu3 }
 0x7a5   : > { %v10951_v39 = vadd.f32 %v4855_v21, %v4763_v27  ;;  %v12742_v21 = vld [vmem:[#allocation41_spill] sm:$0xff] }
 0x7a6   : > { %v4347_v7 = vpop.f32.mrf.mxu2 }
 0x7a7   : > { %v4348_v5 = vadd.f32 %v4347_v7, %v12741_v56  ;;  %7838 = vmatmul.msk.bf16.gmra.mxu3 %vm4073_vm5, %v10632_v61  ;;  %v12743_v7 = vld [vmem:[#allocation45_spill] sm:$0xff] }
 0x7a8   : > { %v5048_v3 = vpop.f32.mrf.mxu0 }
 0x7a9   : > { %v4627_v2 = vadd.f32 %v4592_v52, %v4348_v5  ;;  %v5173_v6 = vpop.f32.mrf.mxu1 }
 0x7ab   : > { %v4764_v14 = vadd.f32 %v4729_v11, %v4627_v2  ;;  %7807 = vmatmul.msk.bf16.gmra.mxu0 %vm4073_vm5, %v10605_v13  ;;  %v5298_v15 = vpop.f32.mrf.mxu3 }
 0x7ac   : > { %7823 = vmatmul.msk.bf16.gmra.mxu1 %vm4073_vm5, %v10219_v45  ;;  %v10973_v45 = vld [vmem:[%s12320_s11] ss:$0 sm:$0xff] }
 0x7ad   : > { %v10956_v50 = vadd.f32 %v4858_v37, %v4764_v14 }
 0x7ae   : > { %v4349_v9 = vpop.f32.mrf.mxu2 }
 0x7af   : > { %v4350_v30 = vadd.f32 %v4349_v9, %v12742_v21 }
 0x7b0   : > { %v5050_v52 = vpop.f32.mrf.mxu0 }
 0x7b1   : > { %v4628_v62 = vadd.f32 %v4594_v49, %v4350_v30  ;;  %v5175_v11 = vpop.f32.mrf.mxu1 }
 0x7b3   : > { %v4765_v34 = vadd.f32 %v4731_v41, %v4628_v62  ;;  %7790 = vmatmul.msk.bf16.gmra.mxu2 %vm4073_vm5, %v12734_v44  ;;  %v5300_v27 = vpop.f32.mrf.mxu3 }
 0x7b5   : > { %v10965_v43 = vadd.f32 %v4860_v33, %v4765_v34 }
 0x7b6   : > { %v4918_v37 = vpop.f32.mrf.mxu2 }
 0x7b7   : > { %v4998_v13 = vadd.f32 %v4918_v37, %v12743_v7  ;;  %7839 = vmatmul.msk.bf16.gmra.mxu3 %vm4073_vm5, %v10674_v29 }
 0x7b8   : > { %v10968_v5 = vpop.f32.mrf.mxu0 }
 0x7b9   : > { %v5123_v56 = vadd.f32 %v5043_v55, %v4998_v13  ;;  %v10977_v44 = vpop.f32.mrf.mxu1 }
 0x7bb   : > { %v5248_v2 = vadd.f32 %v5168_v32, %v5123_v56  ;;  %7808 = vmatmul.msk.bf16.gmra.mxu0 %vm4073_vm5, %v10641_v20  ;;  %v10981_v33 = vpop.f32.mrf.mxu3  ;;  %v12744_v32 = vld [vmem:[#allocation46_spill] sm:$0xff] }
 0x7bc   : > { %7824 = vmatmul.msk.bf16.gmra.mxu1 %vm4073_vm5, %v12694_v16 }
 0x7bd   : > { %v5373_v49 = vadd.f32 %v5293_v10, %v5248_v2  ;;  %v5472_v10 = vld [vmem:[%s12321_s12] sm:$0xff]  ;;  %v5473_v2 = vld [vmem:[%s12321_s12 + $0x8] sm:$0xff] }
 0x7be   : > { %v4920_v41 = vpop.f32.mrf.mxu2 }
 0x7bf   : > { %v5408_v55 = vadd.f32 %v10973_v45, %v5373_v49  ;;  %v4999_v14 = vadd.f32 %v4920_v41, %v12744_v32 }
 0x7c0   : > { %v10987_v30 = vpop.f32.mrf.mxu0 }
 0x7c1   : > { %v5124_v9 = vadd.f32 %v5045_v47, %v4999_v14  ;;  %v5440_v21 = vmax.f32 %v5408_v55, 0.0  ;;  %v10994_v20 = vpop.f32.mrf.mxu1  ;;  %v12745_v47 = vld [vmem:[#allocation25_spill] sm:$0xff] }
 0x7c3   : > { %v5249_v62 = vadd.f32 %v5170_v8, %v5124_v9  ;;  %7791 = vmatmul.msk.bf16.gmra.mxu2 %vm4073_vm5, %v10596_v26  ;;  %v5504_v37 = vadd.f32 %v5472_v10, %v5440_v21  ;;  %v10996_v13 = vpop.f32.mrf.mxu3 }
 0x7c5   : > { %v5374_v34 = vadd.f32 %v5295_v31, %v5249_v62  ;;  %v5728_v41 = vrot.slane %v5504_v37, 7  ;;  %v6118_v31 = vrot.slane %v5504_v37, 1 }
 0x7c6   : > { %v4923_v7 = vpop.f32.mrf.mxu2 }
 0x7c7   : > { %v5409_v16 = vadd.f32 %v10973_v45, %v5374_v34  ;;  %v5000_v56 = vadd.f32 %v4923_v7, %v12745_v47  ;;  %7840 = vmatmul.msk.bf16.gmra.mxu3 %vm4073_vm5, %v10708_v54  ;;  %v12746_v47 = vld [vmem:[#allocation35_spill] sm:$0xff] }
 0x7c8   : > { %v11003_v55 = vpop.f32.mrf.mxu0 }
 0x7c9   : > { %v5441_v49 = vmax.f32 %v5409_v16, 0.0  ;;  %v5125_v8 = vadd.f32 %v5048_v3, %v5000_v56  ;;  %v11007_v14 = vpop.f32.mrf.mxu1  ;;  %v5729_v3 = vsel %vm707_vm0, %v12669_v25, %v5728_v41 }
 0x7cb   : > { %v5505_v26 = vadd.f32 %v5473_v2, %v5441_v49  ;;  %v5250_v32 = vadd.f32 %v5173_v6, %v5125_v8  ;;  %7809 = vmatmul.msk.bf16.gmra.mxu0 %vm4073_vm5, %v10683_v0  ;;  %v11015_v7 = vpop.f32.mrf.mxu3  ;;  %v12747_v2 = vld [vmem:[#allocation13_spill] sm:$0xff] }
 0x7cc   : > { %7825 = vmatmul.msk.bf16.gmra.mxu1 %vm4073_vm5, %v12747_v2 }
 0x7cd   : > { %v5730_v9 = vrot.slane %v5505_v26, 7  ;;  %v6119_v21 = vrot.slane %v5505_v26, 1  ;;  %v5375_v10 = vadd.f32 %v5298_v15, %v5250_v32  ;;  %v11011_v62 = vpack.c.bf16 %v5505_v26, %v5504_v37 }
 0x7ce   : > { %v4925_v34 = vpop.f32.mrf.mxu2 }
 0x7cf   : > { %v5731_v6 = vsel %vm707_vm0, %v5728_v41, %v5730_v9  ;;  %v5410_v16 = vadd.f32 %v10973_v45, %v5375_v10  ;;  %v5001_v56 = vadd.f32 %v4925_v34, %v12746_v47  ;;  %v6120_v15 = vsel %vm1119_vm3, %v6118_v31, %v6119_v21  ;;  %v5474_v41 = vld [vmem:[%s12321_s12 + $0x10] sm:$0xff]  ;;  %v5475_v47 = vld [vmem:[%s12321_s12 + $0x18] sm:$0xff] }
 0x7d0   : > { %v11023_v0 = vpack.c.bf16 %v5731_v6, %v5729_v3  ;;  %v6121_v37 = vsel %vm1119_vm3, %v6119_v21, %v12670_v40  ;;  %v11029_v32 = vpop.f32.mrf.mxu0  ;;  %v12748_v6 = vld [vmem:[#allocation24_spill] sm:$0xff] }
 0x7d1   : > { %v5126_v49 = vadd.f32 %v5050_v52, %v5001_v56  ;;  %v11027_v8 = vpack.c.bf16 %v6121_v37, %v6120_v15  ;;  %v5442_v26 = vmax.f32 %v5410_v16, 0.0  ;;  %v11036_v31 = vpop.f32.mrf.mxu1 }
 0x7d3   : > { %v5251_v9 = vadd.f32 %v5175_v11, %v5126_v49  ;;  %7792 = vmatmul.msk.bf16.gmra.mxu2 %vm4073_vm5, %v10632_v61  ;;  %v5506_v3 = vadd.f32 %v5474_v41, %v5442_v26  ;;  %v11038_v21 = vpop.f32.mrf.mxu3 }
 0x7d5   : > { %v5376_v10 = vadd.f32 %v5300_v27, %v5251_v9  ;;  %v5732_v2 = vrot.slane %v5506_v3, 7  ;;  %v6122_v37 = vrot.slane %v5506_v3, 1 }
 0x7d6   : > { %v4928_v34 = vpop.f32.mrf.mxu2 }
 0x7d7   : > { %v5411_v52 = vadd.f32 %v10973_v45, %v5376_v10  ;;  %v5002_v16 = vadd.f32 %v4928_v34, %v12748_v6  ;;  %7841 = vmatmul.msk.bf16.gmra.mxu3 %vm4073_vm5, %v10748_v51  ;;  %v5540_v10 = vld [vmem:[%s12322_s13 + $0x18] sm:$0xff] }
 0x7d8   : > { %v11046_v61 = vpop.f32.mrf.mxu0 }
 0x7d9   : > { %v5443_v56 = vmax.f32 %v5411_v52, 0.0  ;;  %v5127_v11 = vadd.f32 %v10968_v5, %v5002_v16  ;;  %v11051_v49 = vpop.f32.mrf.mxu1  ;;  %v5539_v5 = vld [vmem:[%s12322_s13 + $0x10] sm:$0xff] }
 0x7da   : > { %v5542_v52 = vpack.c.bf16 %v5540_v10, %v5539_v5 }
 0x7db   : > { %v5507_v15 = vadd.f32 %v5475_v47, %v5443_v56  ;;  %v5252_v27 = vadd.f32 %v10977_v44, %v5127_v11  ;;  %7810 = vmatmul.msk.bf16.gmra.mxu0 %vm4073_vm5, %v10717_v35  ;;  %v11064_v6 = vpop.f32.mrf.mxu3  ;;  %v12749_v56 = vld [vmem:[#allocation31_spill] sm:$0xff] }
 0x7dc   : > { %7826 = vmatmul.msk.bf16.gmra.mxu1 %vm4073_vm5, %v12749_v56  ;;  %5554 = vmatpush.bf16.msrb.mxu2 %v5542_v52 }
 0x7dd   : > { %v5734_v26 = vrot.slane %v5507_v15, 7  ;;  %v6123_v41 = vrot.slane %v5507_v15, 1  ;;  %v5377_v9 = vadd.f32 %v10981_v33, %v5252_v27  ;;  %v11062_v44 = vpack.c.bf16 %v5507_v15, %v5506_v3 }
 0x7de   : > { %v4930_v34 = vpop.f32.mrf.mxu2  ;;  %v5733_v33 = vsel %vm707_vm0, %v12669_v25, %v5732_v2 }
 0x7df   : > { %v5412_v16 = vadd.f32 %v10973_v45, %v5377_v9  ;;  %v5003_v47 = vadd.f32 %v4930_v34, %v10692_v19  ;;  %v5735_v11 = vsel %vm707_vm0, %v5732_v2, %v5734_v26  ;;  %v6124_v35 = vsel %vm1119_vm3, %v6122_v37, %v6123_v41  ;;  %v5476_v19 = vld [vmem:[%s12321_s12 + $0x20] sm:$0xff] }
 0x7e0   : > { %v11074_v3 = vpack.c.bf16 %v5735_v11, %v5733_v33  ;;  %v6125_v15 = vsel %vm1119_vm3, %v6123_v41, %v12670_v40  ;;  %v11081_v10 = vpop.f32.mrf.mxu0  ;;  %v12750_v33 = vld [vmem:[#allocation28_spill] sm:$0xff] }
 0x7e1   : > { %v5128_v27 = vadd.f32 %v10987_v30, %v5003_v47  ;;  %v11079_v5 = vpack.c.bf16 %v6125_v15, %v6124_v35  ;;  %v5444_v9 = vmax.f32 %v5412_v16, 0.0  ;;  %v11089_v37 = vpop.f32.mrf.mxu1  ;;  %v5477_v47 = vld [vmem:[%s12321_s12 + $0x28] sm:$0xff] }
 0x7e3   : > { %v5253_v2 = vadd.f32 %v10994_v20, %v5128_v27  ;;  %7793 = vmatmul.msk.bf16.gmra.mxu2 %vm4073_vm5, %v10674_v29  ;;  %v5508_v41 = vadd.f32 %v5476_v19, %v5444_v9  ;;  %v11092_v34 = vpop.f32.mrf.mxu3 }
 0x7e5   : > { %v5378_v26 = vadd.f32 %v10996_v13, %v5253_v2  ;;  %v5736_v29 = vrot.slane %v5508_v41, 7  ;;  %v6126_v15 = vrot.slane %v5508_v41, 1 }
 0x7e6   : > { %v4933_v30 = vpop.f32.mrf.mxu2 }
 0x7e7   : > { %v5413_v52 = vadd.f32 %v10973_v45, %v5378_v26  ;;  %v5004_v16 = vadd.f32 %v4933_v30, %v12750_v33  ;;  %7842 = vmatmul.msk.bf16.gmra.mxu3 %vm4073_vm5, %v10791_v12  ;;  %v12752_v33 = vld [vmem:[#allocation9_spill] sm:$0xff] }
 0x7e8   : > { %v11100_v11 = vpop.f32.mrf.mxu0 }
 0x7e9   : > { %v5445_v20 = vmax.f32 %v5413_v52, 0.0  ;;  %v5129_v56 = vadd.f32 %v11003_v55, %v5004_v16  ;;  %v11105_v27 = vpop.f32.mrf.mxu1 }
 0x7eb   : > { %v5509_v35 = vadd.f32 %v5477_v47, %v5445_v20  ;;  %v5254_v13 = vadd.f32 %v11007_v14, %v5129_v56  ;;  %7811 = vmatmul.msk.bf16.gmra.mxu0 %vm4073_vm5, %v10757_v60  ;;  %v11112_v30 = vpop.f32.mrf.mxu3  ;;  %v5737_v14 = vsel %vm707_vm0, %v12669_v25, %v5736_v29  ;;  %v12753_v47 = vld [vmem:[#allocation34_spill] sm:$0xff] }
 0x7ec   : > { %7827 = vmatmul.msk.bf16.gmra.mxu1 %vm4073_vm5, %v12753_v47 }
 0x7ed   : > { %v5738_v9 = vrot.slane %v5509_v35, 7  ;;  %v6127_v19 = vrot.slane %v5509_v35, 1  ;;  %v5379_v2 = vadd.f32 %v11015_v7, %v5254_v13  ;;  %v11110_v55 = vpack.c.bf16 %v5509_v35, %v5508_v41 }
 0x7ee   : > { %v4935_v26 = vpop.f32.mrf.mxu2 }
 0x7ef   : > { %12751 = vst [vmem:[#allocation32_spill] sm:$0xff] %v11110_v55  ;;  %v5414_v52 = vadd.f32 %v10973_v45, %v5379_v2  ;;  %v5005_v16 = vadd.f32 %v4935_v26, %v12752_v33  ;;  %v5739_v7 = vsel %vm707_vm0, %v5736_v29, %v5738_v9  ;;  %v6128_v20 = vsel %vm1119_vm3, %v6126_v15, %v6127_v19  ;;  %v5478_v26 = vld [vmem:[%s12321_s12 + $0x30] sm:$0xff]  ;;  %v12755_v9 = vld [vmem:[#allocation6_spill] sm:$0xff] }
 0x7f0   : > { %v11122_v60 = vpack.c.bf16 %v5739_v7, %v5737_v14  ;;  %v6129_v41 = vsel %vm1119_vm3, %v6127_v19, %v12670_v40  ;;  %v11129_v2 = vpop.f32.mrf.mxu0  ;;  %v4895_v15 = vrot.slane %v10774_v1, 1  ;;  %v4896_v19 = vrot.slane %v12755_v9, 1  ;;  %v12756_v7 = vld [vmem:[#allocation8_spill] sm:$0xff] }
 0x7f1   : > { %v5130_v56 = vadd.f32 %v11029_v32, %v5005_v16  ;;  %v11127_v35 = vpack.c.bf16 %v6129_v41, %v6128_v20  ;;  %v5446_v13 = vmax.f32 %v5414_v52, 0.0  ;;  %v11139_v14 = vpop.f32.mrf.mxu1 }
 0x7f2   : > { %v4897_v1 = vsel %vm1119_vm3, %v4895_v15, %v4896_v19 }
 0x7f3   : > { %12754 = vst [vmem:[#allocation16_spill] sm:$0xff] %v11127_v35  ;;  %v5255_v29 = vadd.f32 %v11036_v31, %v5130_v56  ;;  %7794 = vmatmul.msk.bf16.gmra.mxu2 %vm4073_vm5, %v10708_v54  ;;  %v5510_v52 = vadd.f32 %v5478_v26, %v5446_v13  ;;  %v11142_v16 = vpop.f32.mrf.mxu3  ;;  %v5479_v54 = vld [vmem:[%s12321_s12 + $0x38] sm:$0xff]  ;;  %v4898_v31 = vsel %vm1119_vm3, %v4896_v19, %v12670_v40 }
 0x7f4   : > { %v11153_v56 = vpack.c.bf16 %v4898_v31, %v4897_v1  ;;  %v12758_v1 = vld [vmem:[#allocation33_spill] sm:$0xff] }
 0x7f5   : > { %v5380_v32 = vadd.f32 %v11038_v21, %v5255_v29  ;;  %v5740_v13 = vrot.slane %v5510_v52, 7 }
 0x7f6   : > { %v4938_v33 = vpop.f32.mrf.mxu2 }
 0x7f7   : > { %v5415_v47 = vadd.f32 %v10973_v45, %v5380_v32  ;;  %v5006_v20 = vadd.f32 %v4938_v33, %v12756_v7  ;;  %7843 = vmatmul.msk.bf16.gmra.mxu3 %vm4073_vm5, %v11153_v56  ;;  %v6130_v32 = vrot.slane %v5510_v52, 1 }
 0x7f8   : > { %v11155_v26 = vpop.f32.mrf.mxu0 }
 0x7f9   : > { %v5447_v41 = vmax.f32 %v5415_v47, 0.0  ;;  %v5131_v21 = vadd.f32 %v11046_v61, %v5006_v20  ;;  %v11160_v33 = vpop.f32.mrf.mxu1 }
 0x7fb   : > { %v5511_v29 = vadd.f32 %v5479_v54, %v5447_v41  ;;  %v5256_v9 = vadd.f32 %v11051_v49, %v5131_v21  ;;  %7812 = vmatmul.msk.bf16.gmra.mxu0 %vm4073_vm5, %v10800_v42  ;;  %v11167_v20 = vpop.f32.mrf.mxu3  ;;  %v5741_v49 = vsel %vm707_vm0, %v12669_v25, %v5740_v13  ;;  %v12759_v41 = vld [vmem:[#allocation10_spill] sm:$0xff] }
 0x7fc   : > { %7828 = vmatmul.msk.bf16.gmra.mxu1 %vm4073_vm5, %v12759_v41  ;;  %v5481_v41 = vld [vmem:[%s12321_s12 + $0x48] sm:$0xff] }
 0x7fd   : > { %v5742_v15 = vrot.slane %v5511_v29, 7  ;;  %v6131_v7 = vrot.slane %v5511_v29, 1  ;;  %v5381_v19 = vadd.f32 %v11064_v6, %v5256_v9  ;;  %v11165_v61 = vpack.c.bf16 %v5511_v29, %v5510_v52 }
 0x7fe   : > { %v4940_v47 = vpop.f32.mrf.mxu2 }
 0x7ff   : > { %12757 = vst [vmem:[#allocation17_spill] sm:$0xff] %v11165_v61  ;;  %v5416_v54 = vadd.f32 %v10973_v45, %v5381_v19  ;;  %v5007_v31 = vadd.f32 %v4940_v47, %v12758_v1  ;;  %v5743_v6 = vsel %vm707_vm0, %v5740_v13, %v5742_v15  ;;  %v6132_v21 = vsel %vm1119_vm3, %v6130_v32, %v6131_v7  ;;  %v5480_v47 = vld [vmem:[%s12321_s12 + $0x40] sm:$0xff]  ;;  %v12762_v1 = vld [vmem:[#allocation30_spill] sm:$0xff] }
 0x800   : > { %v11177_v42 = vpack.c.bf16 %v5743_v6, %v5741_v49  ;;  %v6133_v52 = vsel %vm1119_vm3, %v6131_v7, %v12670_v40  ;;  %v11184_v19 = vpop.f32.mrf.mxu0 }
 0x801   : > { %v5132_v29 = vadd.f32 %v11081_v10, %v5007_v31  ;;  %v11182_v9 = vpack.c.bf16 %v6133_v52, %v6132_v21  ;;  %v5448_v61 = vmax.f32 %v5416_v54, 0.0  ;;  %v11192_v32 = vpop.f32.mrf.mxu1 }
 0x802   : > { %12760 = vst [vmem:[#allocation15_spill] sm:$0xff] %v11177_v42 }
 0x803   : > { %12761 = vst [vmem:[#allocation7_spill] sm:$0xff] %v11182_v9  ;;  %v5257_v13 = vadd.f32 %v11089_v37, %v5132_v29  ;;  %7795 = vmatmul.msk.bf16.gmra.mxu2 %vm4073_vm5, %v10748_v51  ;;  %v5512_v7 = vadd.f32 %v5480_v47, %v5448_v61  ;;  %v11195_v49 = vpop.f32.mrf.mxu3  ;;  %v12763_v61 = vld [vmem:[#allocation5_spill] sm:$0xff]  ;;  %v12767_v9 = vmov 0.0|0.0  }
 0x805   : > { %v5382_v15 = vadd.f32 %v11092_v34, %v5257_v13  ;;  %v5744_v51 = vrot.slane %v5512_v7, 7  ;;  %v6134_v29 = vrot.slane %v5512_v7, 1 }
 0x806   : > { %v4943_v10 = vpop.f32.mrf.mxu2 }
 0x807   : > { %v5417_v54 = vadd.f32 %v10973_v45, %v5382_v15  ;;  %v5008_v31 = vadd.f32 %v4943_v10, %v12762_v1  ;;  %7844 = vmatmul.msk.bf16.gmra.mxu3 %vm4073_vm5, %v12763_v61  ;;  %v12764_v1 = vld [vmem:[#allocation4_spill] sm:$0xff] }
 0x808   : > { %v11203_v21 = vpop.f32.mrf.mxu0 }
 0x809   : > { %v5449_v37 = vmax.f32 %v5417_v54, 0.0  ;;  %v5133_v6 = vadd.f32 %v11100_v11, %v5008_v31  ;;  %v11208_v47 = vpop.f32.mrf.mxu1 }
 0x80b   : > { %v5513_v52 = vadd.f32 %v5481_v41, %v5449_v37  ;;  %v5258_v34 = vadd.f32 %v11105_v27, %v5133_v6  ;;  %7813 = vmatmul.msk.bf16.gmra.mxu0 %vm4073_vm5, %v12764_v1  ;;  %v11215_v31 = vpop.f32.mrf.mxu3  ;;  %v5745_v27 = vsel %vm707_vm0, %v12669_v25, %v5744_v51  ;;  %v12766_v37 = vld [vmem:[#allocation26_spill] sm:$0xff] }
 0x80c   : > { %5242 = vmatmul.bf16.gmra.mxu1 %v12767_v9 }
 0x80d   : > { %v5746_v13 = vrot.slane %v5513_v52, 7  ;;  %v6135_v15 = vrot.slane %v5513_v52, 1  ;;  %v5383_v10 = vadd.f32 %v11112_v30, %v5258_v34  ;;  %v11213_v11 = vpack.c.bf16 %v5513_v52, %v5512_v7  ;;  %v5537_v30 = vld [vmem:[%s12322_s13] sm:$0xff]  ;;  %v5538_v7 = vld [vmem:[%s12322_s13 + $0x8] sm:$0xff] }
 0x80e   : > { %v4945_v54 = vpop.f32.mrf.mxu2 }
 0x80f   : > { %12765 = vst [vmem:[#allocation19_spill] sm:$0xff] %v11213_v11  ;;  %v5418_v41 = vadd.f32 %v10973_v45, %v5383_v10  ;;  %v5009_v6 = vadd.f32 %v4945_v54, %v12766_v37  ;;  %v5747_v52 = vsel %vm707_vm0, %v5744_v51, %v5746_v13  ;;  %v6136_v34 = vsel %vm1119_vm3, %v6134_v29, %v6135_v15  ;;  %v5482_v51 = vld [vmem:[%s12321_s12 + $0x50] sm:$0xff] }
 0x810   : > { %v5541_v11 = vpack.c.bf16 %v5538_v7, %v5537_v30  ;;  %v11230_v42 = vpack.c.bf16 %v5747_v52, %v5745_v27  ;;  %v6137_v10 = vsel %vm1119_vm3, %v6135_v15, %v12670_v40  ;;  %v11237_v55 = vpop.f32.mrf.mxu0  ;;  %v5483_v30 = vld [vmem:[%s12321_s12 + $0x58] sm:$0xff] }
 0x811   : > { %v5134_v54 = vadd.f32 %v11129_v2, %v5009_v6  ;;  %v11235_v37 = vpack.c.bf16 %v6137_v10, %v6136_v34  ;;  %v5450_v35 = vmax.f32 %v5418_v41, 0.0  ;;  %v11245_v13 = vpop.f32.mrf.mxu1 }
 0x812   : > { %5555 = vmatpush.bf16.msrb.mxu2 %v5541_v11 }
 0x813   : > { %v5259_v29 = vadd.f32 %v11139_v14, %v5134_v54  ;;  %7796 = vmatmul.msk.bf16.gmra.mxu2 %vm4073_vm5, %v10791_v12  ;;  %v5514_v2 = vadd.f32 %v5482_v51, %v5450_v35  ;;  %v11248_v6 = vpop.f32.mrf.mxu3 }
 0x815   : > { %v5384_v15 = vadd.f32 %v11142_v16, %v5259_v29  ;;  %v5748_v12 = vrot.slane %v5514_v2, 7  ;;  %v6138_v16 = vrot.slane %v5514_v2, 1 }
 0x816   : > { %v4948_v27 = vpop.f32.mrf.mxu2 }
 0x817   : > { %v5419_v41 = vadd.f32 %v10973_v45, %v5384_v15  ;;  %v5010_v11 = vadd.f32 %v4948_v27, %v10828_v59 }
 0x818   : > { %v11256_v52 = vpop.f32.mrf.mxu0 }
 0x819   : > { %v5451_v14 = vmax.f32 %v5419_v41, 0.0  ;;  %v5135_v7 = vadd.f32 %v11155_v26, %v5010_v11  ;;  %v11259_v10 = vpop.f32.mrf.mxu1  ;;  %v5749_v26 = vsel %vm707_vm0, %v12669_v25, %v5748_v12 }
 0x81b   : > { %v5515_v34 = vadd.f32 %v5483_v30, %v5451_v14  ;;  %v5260_v35 = vadd.f32 %v11160_v33, %v5135_v7  ;;  %v11264_v27 = vpop.f32.mrf.mxu3 }
 0x81d   : > { %v5750_v54 = vrot.slane %v5515_v34, 7  ;;  %v6139_v51 = vrot.slane %v5515_v34, 1  ;;  %v5385_v59 = vadd.f32 %v11167_v20, %v5260_v35  ;;  %v11262_v29 = vpack.c.bf16 %v5515_v34, %v5514_v2 }
 0x81e   : > { %v4950_v15 = vpop.f32.mrf.mxu2 }
 0x81f   : > { %12768 = vst [vmem:[#allocation11_spill] sm:$0xff] %v11262_v29  ;;  %v5420_v41 = vadd.f32 %v10973_v45, %v5385_v59  ;;  %v5011_v11 = vadd.f32 %v4950_v15, %v10839_v24  ;;  %v5751_v33 = vsel %vm707_vm0, %v5748_v12, %v5750_v54  ;;  %v6140_v30 = vsel %vm1119_vm3, %v6138_v16, %v6139_v51  ;;  %v5484_v24 = vld [vmem:[%s12321_s12 + $0x60] sm:$0xff] }
 0x820   : > { %v11272_v14 = vpack.c.bf16 %v5751_v33, %v5749_v26  ;;  %v6141_v20 = vsel %vm1119_vm3, %v6139_v51, %v12670_v40  ;;  %v11279_v35 = vpop.f32.mrf.mxu0 }
 0x821   : > { %v5136_v2 = vadd.f32 %v11184_v19, %v5011_v11  ;;  %v11277_v7 = vpack.c.bf16 %v6141_v20, %v6140_v30  ;;  %v5452_v34 = vmax.f32 %v5420_v41, 0.0  ;;  %v11287_v16 = vpop.f32.mrf.mxu1  ;;  %v5485_v41 = vld [vmem:[%s12321_s12 + $0x68] sm:$0xff]  ;;  %v12770_v20 = vld [vmem:[#allocation43_spill] sm:$0xff] }
 0x823   : > { %12769 = vst [vmem:[#allocation38_spill] sm:$0xff] %v11277_v7  ;;  %v5261_v12 = vadd.f32 %v11192_v32, %v5136_v2  ;;  %7797 = vmatmul.msk.bf16.gmra.mxu2 %vm4073_vm5, %v11153_v56  ;;  %v5516_v51 = vadd.f32 %v5484_v24, %v5452_v34  ;;  %v11290_v59 = vpop.f32.mrf.mxu3  ;;  %v3862_v56 = vld [vmem:[%s12318_s9] sm:$0x1] }
 0x824   : > { %v3876_v2 = vadd.f32 %v12770_v20, %v3862_v56 }
 0x825   : > { %v5386_v54 = vadd.f32 %v11195_v49, %v5261_v12  ;;  %v5752_v49 = vrot.slane %v5516_v51, 7  ;;  %v6142_v34 = vrot.slane %v5516_v51, 1 }
 0x826   : > { %v4953_v19 = vpop.f32.mrf.mxu2 }
 0x827   : > { %v5421_v15 = vadd.f32 %v10973_v45, %v5386_v54  ;;  %v5012_v26 = vadd.f32 %v4953_v19, %v10844_v46 }
 0x828   : > { %v11303_v24 = vpop.f32.mrf.mxu0 }
 0x829   : > { %v5453_v32 = vmax.f32 %v5421_v15, 0.0  ;;  %v5137_v11 = vadd.f32 %v11203_v21, %v5012_v26  ;;  %v11308_v29 = vpop.f32.mrf.mxu1  ;;  %v5753_v21 = vsel %vm707_vm0, %v12669_v25, %v5752_v49 }
 0x82b   : > { %v5517_v33 = vadd.f32 %v5485_v41, %v5453_v32  ;;  %v5262_v30 = vadd.f32 %v11208_v47, %v5137_v11  ;;  %v5338_v56 = vpop.f32.mrf.mxu3 }
 0x82d   : > { %v5754_v46 = vrot.slane %v5517_v33, 7  ;;  %v6143_v12 = vrot.slane %v5517_v33, 1  ;;  %v5387_v54 = vadd.f32 %v11215_v31, %v5262_v30  ;;  %v11306_v19 = vpack.c.bf16 %v5517_v33, %v5516_v51 }
 0x82e   : > { %v4955_v7 = vpop.f32.mrf.mxu2  ;;  %v5536_v51 = vpack.c.bf16 %v3876_v2, %v3876_v2 }
 0x82f   : > { %v5422_v15 = vadd.f32 %v10973_v45, %v5387_v54  ;;  %v5013_v47 = vadd.f32 %v4955_v7, %v10853_v58  ;;  %v5755_v26 = vsel %vm707_vm0, %v5752_v49, %v5754_v46  ;;  %v6144_v41 = vsel %vm1119_vm3, %v6142_v34, %v6143_v12  ;;  %v5486_v58 = vld [vmem:[%s12321_s12 + $0x70] sm:$0xff] }
 0x830   : > { %v11316_v32 = vpack.c.bf16 %v5755_v26, %v5753_v21  ;;  %v6145_v31 = vsel %vm1119_vm3, %v6143_v12, %v12670_v40  ;;  %v5090_v46 = vpop.f32.mrf.mxu0 }
 0x831   : > { %v5138_v11 = vadd.f32 %v11237_v55, %v5013_v47  ;;  %v11321_v33 = vpack.c.bf16 %v6145_v31, %v6144_v41  ;;  %v5454_v30 = vmax.f32 %v5422_v15, 0.0  ;;  %v5487_v55 = vld [vmem:[%s12321_s12 + $0x78] sm:$0xff]  ;;  %v5215_v54 = vpop.f32.mrf.mxu1 }
 0x833   : > { %v5263_v7 = vadd.f32 %v11245_v13, %v5138_v11  ;;  %7845 = vmatmul.msk.bf16.vlgmr.msrb.gmra.mxu2 %vm5544_vm6, %v5536_v51  ;;  %v5518_v20 = vadd.f32 %v5486_v58, %v5454_v30  ;;  %v5340_v13 = vpop.f32.mrf.mxu3 }
 0x835   : > { %v5388_v49 = vadd.f32 %v11248_v6, %v5263_v7  ;;  %v5756_v47 = vrot.slane %v5518_v20, 7  ;;  %v6146_v41 = vrot.slane %v5518_v20, 1 }
 0x836   : > { %v4958_v34 = vpop.f32.mrf.mxu2 }
 0x837   : > { %v5423_v12 = vadd.f32 %v10973_v45, %v5388_v49  ;;  %v5014_v2 = vadd.f32 %v4958_v34, %v10858_v53  ;;  %v5757_v58 = vsel %vm707_vm0, %v12669_v25, %v5756_v47 }
 0x839   : > { %v5455_v21 = vmax.f32 %v5423_v12, 0.0  ;;  %v5139_v15 = vadd.f32 %v11256_v52, %v5014_v2 }
 0x83b   : > { %v5519_v26 = vadd.f32 %v5487_v55, %v5455_v21  ;;  %v5264_v6 = vadd.f32 %v11259_v10, %v5139_v15  ;;  %v5093_v10 = vpop.f32.mrf.mxu0  ;;  %v5218_v21 = vpop.f32.mrf.mxu1 }
 0x83d   : > { %v5758_v31 = vrot.slane %v5519_v26, 7  ;;  %v6147_v51 = vrot.slane %v5519_v26, 1  ;;  %v5389_v11 = vadd.f32 %v11264_v27, %v5264_v6  ;;  %v11336_v30 = vpack.c.bf16 %v5519_v26, %v5518_v20 }
 0x83e   : > { %v4960_v53 = vpop.f32.mrf.mxu2 }
 0x83f   : > { %v5424_v7 = vadd.f32 %v10973_v45, %v5389_v11  ;;  %v5015_v52 = vadd.f32 %v4960_v53, %v10867_v23  ;;  %v5759_v49 = vsel %vm707_vm0, %v5756_v47, %v5758_v31  ;;  %v6148_v34 = vsel %vm1119_vm3, %v6146_v41, %v6147_v51  ;;  %v5488_v23 = vld [vmem:[%s12321_s12 + $0x80] sm:$0xff]  ;;  %v5343_v47 = vpop.f32.mrf.mxu3 }
 0x840   : > { %v11344_v12 = vpack.c.bf16 %v5759_v49, %v5757_v58  ;;  %v6149_v27 = vsel %vm1119_vm3, %v6147_v51, %v12670_v40 }
 0x841   : > { %v5140_v20 = vadd.f32 %v11279_v35, %v5015_v52  ;;  %v11349_v2 = vpack.c.bf16 %v6149_v27, %v6148_v34  ;;  %v5456_v55 = vmax.f32 %v5424_v7, 0.0  ;;  %v5489_v35 = vld [vmem:[%s12321_s12 + $0x88] sm:$0xff] }
 0x843   : > { %v5265_v15 = vadd.f32 %v11287_v16, %v5140_v20  ;;  %v5520_v6 = vadd.f32 %v5488_v23, %v5456_v55  ;;  %v5095_v7 = vpop.f32.mrf.mxu0 }
 0x845   : > { %v5390_v26 = vadd.f32 %v11290_v59, %v5265_v15  ;;  %v5760_v58 = vrot.slane %v5520_v6, 7  ;;  %v6150_v49 = vrot.slane %v5520_v6, 1  ;;  %v5220_v59 = vpop.f32.mrf.mxu1 }
 0x846   : > { %v4963_v41 = vpop.f32.mrf.mxu2 }
 0x847   : > { %v5425_v31 = vadd.f32 %v10973_v45, %v5390_v26  ;;  %v5016_v51 = vadd.f32 %v4963_v41, %v10872_v48  ;;  %v5345_v23 = vpop.f32.mrf.mxu3  ;;  %v5761_v15 = vsel %vm707_vm0, %v12669_v25, %v5760_v58 }
 0x849   : > { %v5457_v11 = vmax.f32 %v5425_v31, 0.0  ;;  %v5141_v53 = vadd.f32 %v11303_v24, %v5016_v51 }
 0x84b   : > { %v5521_v52 = vadd.f32 %v5489_v35, %v5457_v11  ;;  %v5266_v16 = vadd.f32 %v11308_v29, %v5141_v53  ;;  %v5490_v11 = vld [vmem:[%s12321_s12 + $0x90] sm:$0xff] }
 0x84d   : > { %v5762_v34 = vrot.slane %v5521_v52, 7  ;;  %v6151_v27 = vrot.slane %v5521_v52, 1  ;;  %v5391_v20 = vadd.f32 %v5338_v56, %v5266_v16  ;;  %v11363_v55 = vpack.c.bf16 %v5521_v52, %v5520_v6  ;;  %v5098_v52 = vpop.f32.mrf.mxu0 }
 0x84e   : > { %v4965_v48 = vpop.f32.mrf.mxu2 }
 0x84f   : > { %v5426_v26 = vadd.f32 %v10973_v45, %v5391_v20  ;;  %v5017_v24 = vadd.f32 %v4965_v48, %v10881_v28  ;;  %v5763_v41 = vsel %vm707_vm0, %v5760_v58, %v5762_v34  ;;  %v6152_v29 = vsel %vm1119_vm3, %v6150_v49, %v6151_v27  ;;  %v5223_v34 = vpop.f32.mrf.mxu1 }
 0x850   : > { %v11371_v31 = vpack.c.bf16 %v5763_v41, %v5761_v15  ;;  %v6153_v56 = vsel %vm1119_vm3, %v6151_v27, %v12670_v40  ;;  %v5348_v27 = vpop.f32.mrf.mxu3 }
 0x851   : > { %v5142_v6 = vadd.f32 %v5090_v46, %v5017_v24  ;;  %v11375_v51 = vpack.c.bf16 %v6153_v56, %v6152_v29  ;;  %v5458_v35 = vmax.f32 %v5426_v26, 0.0  ;;  %v5491_v46 = vld [vmem:[%s12321_s12 + $0x98] sm:$0xff] }
 0x853   : > { %v5267_v53 = vadd.f32 %v5215_v54, %v5142_v6  ;;  %v5522_v16 = vadd.f32 %v5490_v11, %v5458_v35 }
 0x855   : > { %v5392_v28 = vadd.f32 %v5340_v13, %v5267_v53  ;;  %v5764_v26 = vrot.slane %v5522_v16, 7  ;;  %v6154_v54 = vrot.slane %v5522_v16, 1  ;;  %v5100_v11 = vpop.f32.mrf.mxu0 }
 0x856   : > { %v4968_v58 = vpop.f32.mrf.mxu2 }
 0x857   : > { %v5427_v49 = vadd.f32 %v10973_v45, %v5392_v28  ;;  %v5018_v20 = vadd.f32 %v4968_v58, %v10886_v17  ;;  %v5765_v17 = vsel %vm707_vm0, %v12669_v25, %v5764_v26 }
 0x859   : > { %v5459_v48 = vmax.f32 %v5427_v49, 0.0  ;;  %v5143_v15 = vadd.f32 %v5093_v10, %v5018_v20 }
 0x85b   : > { %v5523_v24 = vadd.f32 %v5491_v46, %v5459_v48  ;;  %v5268_v41 = vadd.f32 %v5218_v21, %v5143_v15  ;;  %v5225_v21 = vpop.f32.mrf.mxu1  ;;  %v5350_v48 = vpop.f32.mrf.mxu3  ;;  %v5492_v15 = vld [vmem:[%s12321_s12 + $0xa0] sm:$0xff] }
 0x85d   : > { %v5766_v29 = vrot.slane %v5523_v24, 7  ;;  %v6155_v13 = vrot.slane %v5523_v24, 1  ;;  %v5393_v56 = vadd.f32 %v5343_v47, %v5268_v41  ;;  %v11385_v6 = vpack.c.bf16 %v5523_v24, %v5522_v16 }
 0x85e   : > { %v4970_v35 = vpop.f32.mrf.mxu2 }
 0x85f   : > { %v5428_v53 = vadd.f32 %v10973_v45, %v5393_v56  ;;  %v5019_v28 = vadd.f32 %v4970_v35, %v10895_v36  ;;  %v5767_v10 = vsel %vm707_vm0, %v5764_v26, %v5766_v29  ;;  %v6156_v58 = vsel %vm1119_vm3, %v6154_v54, %v6155_v13 }
 0x860   : > { %v11393_v49 = vpack.c.bf16 %v5767_v10, %v5765_v17  ;;  %v6157_v47 = vsel %vm1119_vm3, %v6155_v13, %v12670_v40  ;;  %v5103_v13 = vpop.f32.mrf.mxu0 }
 0x861   : > { %v5144_v16 = vadd.f32 %v5095_v7, %v5019_v28  ;;  %v11397_v20 = vpack.c.bf16 %v6157_v47, %v6156_v58  ;;  %v5460_v46 = vmax.f32 %v5428_v53, 0.0  ;;  %v5493_v7 = vld [vmem:[%s12321_s12 + $0xa8] sm:$0xff] }
 0x863   : > { %v5269_v36 = vadd.f32 %v5220_v59, %v5144_v16  ;;  %v5524_v26 = vadd.f32 %v5492_v15, %v5460_v46  ;;  %v5228_v53 = vpop.f32.mrf.mxu1  ;;  %v5353_v59 = vpop.f32.mrf.mxu3 }
 0x865   : > { %v5394_v24 = vadd.f32 %v5345_v23, %v5269_v36  ;;  %v5768_v17 = vrot.slane %v5524_v26, 7  ;;  %v6158_v58 = vrot.slane %v5524_v26, 1 }
 0x866   : > { %v4973_v41 = vpop.f32.mrf.mxu2 }
 0x867   : > { %v5429_v54 = vadd.f32 %v10973_v45, %v5394_v24  ;;  %v5020_v29 = vadd.f32 %v4973_v41, %v10900_v18  ;;  %v5769_v18 = vsel %vm707_vm0, %v12669_v25, %v5768_v17 }
 0x869   : > { %v5461_v56 = vmax.f32 %v5429_v54, 0.0  ;;  %v5145_v35 = vadd.f32 %v5098_v52, %v5020_v29 }
 0x86b   : > { %v5525_v28 = vadd.f32 %v5493_v7, %v5461_v56  ;;  %v5270_v10 = vadd.f32 %v5223_v34, %v5145_v35  ;;  %v5105_v7 = vpop.f32.mrf.mxu0  ;;  %v5494_v56 = vld [vmem:[%s12321_s12 + $0xb0] sm:$0xff] }
 0x86d   : > { %v5770_v23 = vrot.slane %v5525_v28, 7  ;;  %v6159_v47 = vrot.slane %v5525_v28, 1  ;;  %v5395_v16 = vadd.f32 %v5348_v27, %v5270_v10  ;;  %v11407_v46 = vpack.c.bf16 %v5525_v28, %v5524_v26 }
 0x86e   : > { %v4975_v15 = vpop.f32.mrf.mxu2 }
 0x86f   : > { %12771 = vst [vmem:[#allocation2_spill] sm:$0xff] %v11407_v46  ;;  %v5430_v36 = vadd.f32 %v10973_v45, %v5395_v16  ;;  %v5021_v24 = vadd.f32 %v4975_v15, %v10909_v4  ;;  %v5771_v52 = vsel %vm707_vm0, %v5768_v17, %v5770_v23  ;;  %v6160_v41 = vsel %vm1119_vm3, %v6158_v58, %v6159_v47  ;;  %v5230_v4 = vpop.f32.mrf.mxu1  ;;  %v5355_v58 = vpop.f32.mrf.mxu3 }
 0x870   : > { %v11415_v34 = vpack.c.bf16 %v5771_v52, %v5769_v18  ;;  %v6161_v54 = vsel %vm1119_vm3, %v6159_v47, %v12670_v40 }
 0x871   : > { %v5146_v27 = vadd.f32 %v5100_v11, %v5021_v24  ;;  %v11419_v26 = vpack.c.bf16 %v6161_v54, %v6160_v41  ;;  %v5462_v29 = vmax.f32 %v5430_v36, 0.0  ;;  %v5495_v11 = vld [vmem:[%s12321_s12 + $0xb8] sm:$0xff] }
 0x872   : > { %12772 = vst [vmem:[#allocation18_spill] sm:$0xff] %v11415_v34 }
 0x873   : > { %12773 = vst [vmem:[#allocation22_spill] sm:$0xff] %v11419_v26  ;;  %v5271_v35 = vadd.f32 %v5225_v21, %v5146_v27  ;;  %v5526_v17 = vadd.f32 %v5494_v56, %v5462_v29  ;;  %v5108_v21 = vpop.f32.mrf.mxu0 }
 0x875   : > { %v5396_v28 = vadd.f32 %v5350_v48, %v5271_v35  ;;  %v5772_v18 = vrot.slane %v5526_v17, 7  ;;  %v6162_v52 = vrot.slane %v5526_v17, 1 }
 0x876   : > { %v4978_v10 = vpop.f32.mrf.mxu2 }
 0x877   : > { %v5431_v23 = vadd.f32 %v10973_v45, %v5396_v28  ;;  %v5022_v16 = vadd.f32 %v4978_v10, %v10914_v57  ;;  %v5233_v56 = vpop.f32.mrf.mxu1  ;;  %v5773_v57 = vsel %vm707_vm0, %v12669_v25, %v5772_v18  ;;  %v5358_v10 = vpop.f32.mrf.mxu3 }
 0x879   : > { %v5463_v47 = vmax.f32 %v5431_v23, 0.0  ;;  %v5147_v15 = vadd.f32 %v5103_v13, %v5022_v16 }
 0x87b   : > { %v5527_v36 = vadd.f32 %v5495_v11, %v5463_v47  ;;  %v5272_v24 = vadd.f32 %v5228_v53, %v5147_v15  ;;  %v5496_v47 = vld [vmem:[%s12321_s12 + $0xc0] sm:$0xff] }
 0x87d   : > { %v5774_v41 = vrot.slane %v5527_v36, 7  ;;  %v6163_v48 = vrot.slane %v5527_v36, 1  ;;  %v5397_v54 = vadd.f32 %v5353_v59, %v5272_v24  ;;  %v11429_v27 = vpack.c.bf16 %v5527_v36, %v5526_v17  ;;  %v5110_v24 = vpop.f32.mrf.mxu0 }
 0x87e   : > { %v4980_v29 = vpop.f32.mrf.mxu2 }
 0x87f   : > { %12774 = vst [vmem:[#allocation14_spill] sm:$0xff] %v11429_v27  ;;  %v5432_v35 = vadd.f32 %v10973_v45, %v5397_v54  ;;  %v5023_v28 = vadd.f32 %v4980_v29, %v10923_v22  ;;  %v5775_v13 = vsel %vm707_vm0, %v5772_v18, %v5774_v41  ;;  %v6164_v53 = vsel %vm1119_vm3, %v6162_v52, %v6163_v48  ;;  %v12777_v41 = vld [vmem:[#allocation29_spill] sm:$0xff] }
 0x880   : > { %v11437_v23 = vpack.c.bf16 %v5775_v13, %v5773_v57  ;;  %v6165_v59 = vsel %vm1119_vm3, %v6163_v48, %v12670_v40  ;;  %v5235_v48 = vpop.f32.mrf.mxu1 }
 0x881   : > { %v5148_v17 = vadd.f32 %v5105_v7, %v5023_v28  ;;  %v11441_v16 = vpack.c.bf16 %v6165_v59, %v6164_v53  ;;  %v5464_v11 = vmax.f32 %v5432_v35, 0.0  ;;  %v5497_v7 = vld [vmem:[%s12321_s12 + $0xc8] sm:$0xff]  ;;  %v5360_v28 = vpop.f32.mrf.mxu3 }
 0x882   : > { %12775 = vst [vmem:[#allocation42_spill] sm:$0xff] %v11437_v23 }
 0x883   : > { %12776 = vst [vmem:[#allocation39_spill] sm:$0xff] %v11441_v16  ;;  %v5273_v15 = vadd.f32 %v5230_v4, %v5148_v17  ;;  %v5528_v36 = vadd.f32 %v5496_v47, %v5464_v11 }
 0x885   : > { %v5398_v22 = vadd.f32 %v5355_v58, %v5273_v15  ;;  %v5776_v35 = vrot.slane %v5528_v36, 7  ;;  %v6166_v4 = vrot.slane %v5528_v36, 1 }
 0x886   : > { %v4983_v18 = vpop.f32.mrf.mxu2 }
 0x887   : > { %v5433_v52 = vadd.f32 %v10973_v45, %v5398_v22  ;;  %v5024_v54 = vadd.f32 %v4983_v18, %v12777_v41  ;;  %v5777_v15 = vsel %vm707_vm0, %v12669_v25, %v5776_v35  ;;  %v5113_v41 = vpop.f32.mrf.mxu0 }
 0x889   : > { %v5465_v29 = vmax.f32 %v5433_v52, 0.0  ;;  %v5149_v57 = vadd.f32 %v5108_v21, %v5024_v54  ;;  %v5580_v54 = vlaneseq }
 0x88b   : > { %v5529_v13 = vadd.f32 %v5497_v7, %v5465_v29  ;;  %v5274_v53 = vadd.f32 %v5233_v56, %v5149_v57  ;;  %v5238_v57 = vpop.f32.mrf.mxu1 }
 0x88d   : > { %v5778_v58 = vrot.slane %v5529_v13, 7  ;;  %v6167_v59 = vrot.slane %v5529_v13, 1  ;;  %v5399_v17 = vadd.f32 %v5358_v10, %v5274_v53  ;;  %v11451_v11 = vpack.c.bf16 %v5529_v13, %v5528_v36  ;;  %v5363_v53 = vpop.f32.mrf.mxu3 }
 0x88e   : > { %v4985_v47 = vpop.f32.mrf.mxu2 }
 0x88f   : > { %12778 = vst [vmem:[#allocation12_spill] sm:$0xff] %v11451_v11  ;;  %v5434_v22 = vadd.f32 %v10973_v45, %v5399_v17  ;;  %v5025_v18 = vadd.f32 %v4985_v47, %v10937_v38  ;;  %v5779_v21 = vsel %vm707_vm0, %v5776_v35, %v5778_v58  ;;  %v6168_v52 = vsel %vm1119_vm3, %v6166_v4, %v6167_v59  ;;  %v5498_v38 = vld [vmem:[%s12321_s12 + $0xd0] sm:$0xff]  ;;  %v5499_v47 = vld [vmem:[%s12321_s12 + $0xd8] sm:$0xff] }
 0x890   : > { %v11459_v56 = vpack.c.bf16 %v5779_v21, %v5777_v15  ;;  %v6169_v10 = vsel %vm1119_vm3, %v6167_v59, %v12670_v40  ;;  %v11468_v35 = vshrl.u32 %v5580_v54, 7 }
 0x891   : > { %v5150_v36 = vadd.f32 %v5110_v24, %v5025_v18  ;;  %v11463_v7 = vpack.c.bf16 %v6169_v10, %v6168_v52  ;;  %v5466_v29 = vmax.f32 %v5434_v22, 0.0 }
 0x892   : > { %12779 = vst [vmem:[#allocation21_spill] sm:$0xff] %v11459_v56  ;;  %8009 = vset.pattern.permute.xlu0 %v11468_v35 }
 0x893   : > { %12780 = vst [vmem:[#allocation20_spill] sm:$0xff] %v11463_v7  ;;  %v5275_v13 = vadd.f32 %v5235_v48, %v5150_v36  ;;  %v5530_v58 = vadd.f32 %v5498_v38, %v5466_v29  ;;  %v5115_v48 = vpop.f32.mrf.mxu0 }
 0x895   : > { %v5400_v4 = vadd.f32 %v5360_v28, %v5275_v13  ;;  %v5780_v18 = vrot.slane %v5530_v58, 7  ;;  %v6170_v10 = vrot.slane %v5530_v58, 1  ;;  %v5240_v28 = vpop.f32.mrf.mxu1  ;;  %v5365_v13 = vpop.f32.mrf.mxu3 }
 0x896   : > { %v4988_v17 = vpop.f32.mrf.mxu2 }
 0x897   : > { %v5435_v24 = vadd.f32 %v10973_v45, %v5400_v4  ;;  %v5026_v59 = vadd.f32 %v4988_v17, %v10942_v63  ;;  %v5781_v63 = vsel %vm707_vm0, %v12669_v25, %v5780_v18 }
 0x899   : > { %v5467_v15 = vmax.f32 %v5435_v24, 0.0  ;;  %v5151_v22 = vadd.f32 %v5113_v41, %v5026_v59  ;;  %v8018_v41 = vld [vmem:[%s12320_s11] ss:$0 sm:$0xff] }
 0x89b   : > { %v5531_v21 = vadd.f32 %v5499_v47, %v5467_v15  ;;  %v5276_v52 = vadd.f32 %v5238_v57, %v5151_v22  ;;  %v5500_v22 = vld [vmem:[%s12321_s12 + $0xe0] sm:$0xff] }
 0x89d   : > { %v5782_v36 = vrot.slane %v5531_v21, 7  ;;  %v6171_v54 = vrot.slane %v5531_v21, 1  ;;  %v5401_v29 = vadd.f32 %v5363_v53, %v5276_v52  ;;  %v11476_v38 = vpack.c.bf16 %v5531_v21, %v5530_v58  ;;  %v5118_v52 = vpop.f32.mrf.mxu0 }
 0x89e   : > { %v4990_v45 = vpop.f32.mrf.mxu2 }
 0x89f   : > { %12781 = vst [vmem:[#allocation44_spill] sm:$0xff] %v11476_v38  ;;  %v5436_v4 = vadd.f32 %v8018_v41, %v5401_v29  ;;  %v5027_v17 = vadd.f32 %v4990_v45, %v10951_v39  ;;  %v5783_v57 = vsel %vm707_vm0, %v5780_v18, %v5782_v36  ;;  %v6172_v24 = vsel %vm1119_vm3, %v6170_v10, %v6171_v54  ;;  %v5243_v36 = vpop.f32.mrf.mxu1 }
 0x8a0   : > { %v11486_v59 = vpack.c.bf16 %v5783_v57, %v5781_v63  ;;  %v6173_v53 = vsel %vm1119_vm3, %v6171_v54, %v12670_v40  ;;  %v5368_v54 = vpop.f32.mrf.mxu3 }
 0x8a1   : > { %v5152_v58 = vadd.f32 %v5115_v48, %v5027_v17  ;;  %v11490_v47 = vpack.c.bf16 %v6173_v53, %v6172_v24  ;;  %v5468_v15 = vmax.f32 %v5436_v4, 0.0  ;;  %v5501_v48 = vld [vmem:[%s12321_s12 + $0xe8] sm:$0xff] }
 0x8a2   : > { %12782 = vst [vmem:[#allocation3_spill] sm:$0xff] %v11486_v59 }
 0x8a3   : > { %12783 = vst [vmem:[#allocation23_spill] sm:$0xff] %v11490_v47  ;;  %v5277_v21 = vadd.f32 %v5240_v28, %v5152_v58  ;;  %v5532_v29 = vadd.f32 %v5500_v22, %v5468_v15 }
 0x8a5   : > { %v5402_v39 = vadd.f32 %v5365_v13, %v5277_v21  ;;  %v5784_v17 = vrot.slane %v5532_v29, 7  ;;  %v6174_v53 = vrot.slane %v5532_v29, 1  ;;  %v5120_v21 = vpop.f32.mrf.mxu0 }
 0x8a6   : > { %v4993_v18 = vpop.f32.mrf.mxu2 }
 0x8a7   : > { %v5437_v10 = vadd.f32 %v8018_v41, %v5402_v39  ;;  %v5028_v45 = vadd.f32 %v4993_v18, %v10956_v50  ;;  %v5785_v50 = vsel %vm707_vm0, %v12669_v25, %v5784_v17 }
 0x8a9   : > { %v5469_v63 = vmax.f32 %v5437_v10, 0.0  ;;  %v5153_v4 = vadd.f32 %v5118_v52, %v5028_v45  ;;  %v5245_v45 = vpop.f32.mrf.mxu1 }
 0x8ab   : > { %v5533_v57 = vadd.f32 %v5501_v48, %v5469_v63  ;;  %v5278_v24 = vadd.f32 %v5243_v36, %v5153_v4  ;;  %v5370_v63 = vpop.f32.mrf.mxu3 }
 0x8ad   : > { %v5786_v28 = vrot.slane %v5533_v57, 7  ;;  %v6175_v58 = vrot.slane %v5533_v57, 1  ;;  %v5403_v13 = vadd.f32 %v5368_v54, %v5278_v24  ;;  %v11499_v15 = vpack.c.bf16 %v5533_v57, %v5532_v29 }
 0x8ae   : > { %v4995_v22 = vpop.f32.mrf.mxu2 }
 0x8af   : > { %12784 = vst [vmem:[#allocation36_spill] sm:$0xff] %v11499_v15  ;;  %v5438_v39 = vadd.f32 %v8018_v41, %v5403_v13  ;;  %v5029_v18 = vadd.f32 %v4995_v22, %v10965_v43  ;;  %v5787_v10 = vsel %vm707_vm0, %v5784_v17, %v5786_v28  ;;  %v6176_v52 = vsel %vm1119_vm3, %v6174_v53, %v6175_v58  ;;  %v5502_v43 = vld [vmem:[%s12321_s12 + $0xf0] sm:$0xff]  ;;  %v5543_v17 = vld [vmem:[%s12323_s14] sm:$0x1] }
 0x8b0   : > { %v11506_v36 = vpack.c.bf16 %v5787_v10, %v5785_v50  ;;  %v6177_v48 = vsel %vm1119_vm3, %v6175_v58, %v12670_v40  ;;  %v5503_v58 = vld [vmem:[%s12321_s12 + $0xf8] sm:$0xff] }
 0x8b1   : > { %v5154_v29 = vadd.f32 %v5120_v21, %v5029_v18  ;;  %v11510_v54 = vpack.c.bf16 %v6177_v48, %v6176_v52  ;;  %v5470_v4 = vmax.f32 %v5438_v39, 0.0 }
 0x8b2   : > { %12785 = vst [vmem:[#allocation37_spill] sm:$0xff] %v11506_v36 }
 0x8b3   : > { %12786 = vst [vmem:[#allocation27_spill] sm:$0xff] %v11510_v54  ;;  %v5279_v57 = vadd.f32 %v5245_v45, %v5154_v29  ;;  %v5534_v28 = vadd.f32 %v5502_v43, %v5470_v4  ;;  %v5588_v29 = vadd.s32 8, %v11468_v35  ;;  %v5561_v35 = vld [vmem:[%s12324_s15] sm:$0xff] }
 0x8b5   : > { %v5404_v24 = vadd.f32 %v5370_v63, %v5279_v57  ;;  %v6392_v39 = vrot.slane %v5534_v28, 7  ;;  %v6650_v10 = vrot.slane %v5534_v28, 1 }
 0x8b6   : > { %v5557_v53 = vpop.f32.mrf.mxu2 }
 0x8b7   : > { %v5439_v13 = vadd.f32 %v8018_v41, %v5404_v24  ;;  %v5558_v22 = vadd.f32 %v5557_v53, %v5543_v17  ;;  %v6393_v41 = vsel %vm707_vm0, %v12669_v25, %v6392_v39  ;;  %v5562_v25 = vld [vmem:[%s12324_s15 + $0x8] sm:$0xff] }
 0x8b9   : > { %v5471_v21 = vmax.f32 %v5439_v13, 0.0  ;;  %v5579_v50 = vperm.slane %v5558_v22, 0  ;;  %v5564_v22 = vld [vmem:[%s12324_s15 + $0x18] sm:$0xff] }
 0x8bb   : > { %v5535_v18 = vadd.f32 %v5503_v58, %v5471_v21  ;;  %5584 = vperm.xlu0 %8009, %v5579_v50  }
 0x8bd   : > { %v6394_v52 = vrot.slane %v5535_v18, 7  ;;  %v6651_v45 = vrot.slane %v5535_v18, 1  ;;  %v11521_v48 = vpack.c.bf16 %v5535_v18, %v5534_v28 }
 0x8be   : > { %v5559_v63 = vpop.f32.mrf.mxu2 }
 0x8bf   : > { %12787 = vst [vmem:[#allocation40_spill] sm:$0xff] %v11521_v48  ;;  %v6395_v4 = vsel %vm707_vm0, %v6392_v39, %v6394_v52  ;;  %v6652_v57 = vsel %vm1119_vm3, %v6650_v10, %v6651_v45  ;;  %v6653_v43 = vsel %vm1119_vm3, %v6651_v45, %v12670_v40  ;;  %v5563_v40 = vld [vmem:[%s12324_s15 + $0x10] sm:$0xff]  ;;  %v5566_v10 = vld [vmem:[%s12324_s15 + $0x28] sm:$0xff] }
 0x8c0   : > { %v11530_v17 = vpack.c.bf16 %v6395_v4, %v6393_v41  ;;  %v11532_v24 = vpack.c.bf16 %v6653_v43, %v6652_v57  ;;  %v5567_v63 = vld [vmem:[%s12324_s15 + $0x30] sm:$0xff] }
 0x8c2   : > { %12788 = vst [vmem:[#allocation41_spill] sm:$0xff] %v11530_v17 }
 0x8c3   : > { %12789 = vst [vmem:[#allocation45_spill] sm:$0xff] %v11532_v24  ;;  %8010 = vset.pattern.permute.xlu0 %v5588_v29 }
 0x8cb   : > { %5590 = vperm.xlu0 %8010, %v5579_v50   ;;  %v5565_v50 = vld [vmem:[%s12324_s15 + $0x20] sm:$0xff] }
 0x92d   : > { %v11534_v53 = vpop.permute.xlu0 %5584 }
 0x92e   : > { %v11546_v28 = vmul.f32 %v11534_v53, %v5561_v35  ;;  %v11557_v21 = vmul.f32 %v11534_v53, %v5563_v40  ;;  %v11571_v52 = vmul.f32 %v11534_v53, %v5565_v50  ;;  %v5568_v35 = vld [vmem:[%s12324_s15 + $0x38] sm:$0xff]  ;;  %v11591_v40 = vmul.f32 %v11534_v53, %v5567_v63  ;;  %v5570_v63 = vld [vmem:[%s12324_s15 + $0x48] sm:$0xff] }
 0x930   : > { %v5610_v18 = vmul.f32 %v11546_v28, %v11546_v28  ;;  %v5612_v29 = vmul.f32 %v11557_v21, %v11557_v21  ;;  %v5616_v48 = vmul.f32 %v11591_v40, %v11591_v40 }
 0x932   : > { %v5628_v57 = vsel %vm2416_vm4, %v5610_v18, 0.0  ;;  %v5631_v50 = vsel %vm2416_vm4, %v5612_v29, 0.0 }
 0x93d   : > { %v11548_v13 = vpop.permute.xlu0 %5590 }
 0x93e   : > { %v11554_v58 = vmul.f32 %v11548_v13, %v5562_v25  ;;  %v11563_v39 = vmul.f32 %v11548_v13, %v5564_v22  ;;  %v11581_v41 = vmul.f32 %v11548_v13, %v5566_v10  ;;  %v5614_v22 = vmul.f32 %v11571_v52, %v11571_v52  ;;  %v5569_v10 = vld [vmem:[%s12324_s15 + $0x40] sm:$0xff] }
 0x93f   : > { %v11609_v29 = vmul.f32 %v11534_v53, %v5569_v10  ;;  %v5572_v10 = vld [vmem:[%s12324_s15 + $0x58] sm:$0xff] }
 0x940   : > { %v5611_v45 = vmul.f32 %v11554_v58, %v11554_v58  ;;  %v5613_v4 = vmul.f32 %v11563_v39, %v11563_v39  ;;  %v5615_v24 = vmul.f32 %v11581_v41, %v11581_v41 }
 0x941   : > { %v5618_v54 = vmul.f32 %v11609_v29, %v11609_v29 }
 0x942   : > { %v5629_v43 = vsel %vm2416_vm4, %v5611_v45, 0.0  ;;  %v11600_v45 = vmul.f32 %v11548_v13, %v5568_v35  ;;  %v5571_v35 = vld [vmem:[%s12324_s15 + $0x50] sm:$0xff] }
 0x943   : > { %v5630_v25 = vadd.f32 %v5629_v43, %v5628_v57  ;;  %v5633_v57 = vsel %vm2416_vm4, %v5613_v4, 0.0  ;;  %v11618_v4 = vmul.f32 %v11548_v13, %v5570_v63  ;;  %v5573_v63 = vld [vmem:[%s12324_s15 + $0x60] sm:$0xff] }
 0x944   : > { %v5617_v17 = vmul.f32 %v11600_v45, %v11600_v45 }
 0x945   : > { %v5632_v18 = vadd.f32 %v5631_v50, %v5630_v25  ;;  %v5635_v25 = vsel %vm2416_vm4, %v5614_v22, 0.0  ;;  %v11627_v22 = vmul.f32 %v11534_v53, %v5571_v35  ;;  %v5619_v15 = vmul.f32 %v11618_v4, %v11618_v4  ;;  %v5574_v35 = vld [vmem:[%s12324_s15 + $0x68] sm:$0xff] }
 0x947   : > { %v5634_v43 = vadd.f32 %v5633_v57, %v5632_v18  ;;  %v5637_v18 = vsel %vm2416_vm4, %v5615_v24, 0.0  ;;  %v11636_v24 = vmul.f32 %v11548_v13, %v5572_v10  ;;  %v5620_v36 = vmul.f32 %v11627_v22, %v11627_v22  ;;  %v5575_v10 = vld [vmem:[%s12324_s15 + $0x70] sm:$0xff] }
 0x949   : > { %v5636_v50 = vadd.f32 %v5635_v25, %v5634_v43  ;;  %v5639_v43 = vsel %vm2416_vm4, %v5616_v48, 0.0  ;;  %v11645_v48 = vmul.f32 %v11534_v53, %v5573_v63  ;;  %v5621_v47 = vmul.f32 %v11636_v24, %v11636_v24  ;;  %v5576_v63 = vld [vmem:[%s12324_s15 + $0x78] sm:$0xff] }
 0x94b   : > { %v5638_v57 = vadd.f32 %v5637_v18, %v5636_v50  ;;  %v5641_v50 = vsel %vm2416_vm4, %v5617_v17, 0.0  ;;  %v11654_v17 = vmul.f32 %v11548_v13, %v5574_v35  ;;  %v5622_v38 = vmul.f32 %v11645_v48, %v11645_v48  ;;  %v5577_v35 = vld [vmem:[%s12324_s15 + $0x80] sm:$0xff] }
 0x94d   : > { %v5640_v25 = vadd.f32 %v5639_v43, %v5638_v57  ;;  %v5643_v57 = vsel %vm2416_vm4, %v5618_v54, 0.0  ;;  %v11663_v54 = vmul.f32 %v11534_v53, %v5575_v10  ;;  %v5623_v59 = vmul.f32 %v11654_v17, %v11654_v17  ;;  %v5578_v10 = vld [vmem:[%s12324_s15 + $0x88] sm:$0xff] }
 0x94f   : > { %v5642_v18 = vadd.f32 %v5641_v50, %v5640_v25  ;;  %v5645_v25 = vsel %vm2416_vm4, %v5619_v15, 0.0  ;;  %v11672_v15 = vmul.f32 %v11548_v13, %v5576_v63  ;;  %v5624_v7 = vmul.f32 %v11663_v54, %v11663_v54 }
 0x951   : > { %v5644_v43 = vadd.f32 %v5643_v57, %v5642_v18  ;;  %v5647_v18 = vsel %vm2416_vm4, %v5620_v36, 0.0  ;;  %v11681_v36 = vmul.f32 %v11534_v53, %v5577_v35  ;;  %v5625_v11 = vmul.f32 %v11672_v15, %v11672_v15 }
 0x952   : > { %v5655_v53 = vsel %vm2416_vm4, %v5624_v7, 0.0 }
 0x953   : > { %v5646_v50 = vadd.f32 %v5645_v25, %v5644_v43  ;;  %v5649_v43 = vsel %vm2416_vm4, %v5621_v47, 0.0  ;;  %v5653_v47 = vsel %vm2416_vm4, %v5623_v59, 0.0  ;;  %v5657_v16 = vsel %vm2416_vm4, %v5625_v11, 0.0 }
 0x955   : > { %v5648_v57 = vadd.f32 %v5647_v18, %v5646_v50  ;;  %v5651_v50 = vsel %vm2416_vm4, %v5622_v38, 0.0  ;;  %v5609_v18 = vmul.f32 %v11548_v13, %v5578_v10 }
 0x957   : > { %v5650_v25 = vadd.f32 %v5649_v43, %v5648_v57  ;;  %v5626_v57 = vmul.f32 %v11681_v36, %v11681_v36  ;;  %v5627_v43 = vmul.f32 %v5609_v18, %v5609_v18 }
 0x959   : > { %v5652_v63 = vadd.f32 %v5651_v50, %v5650_v25  ;;  %v5659_v38 = vsel %vm2416_vm4, %v5626_v57, 0.0  ;;  %v5661_v13 = vsel %vm2416_vm4, %v5627_v43, 0.0 }
 0x95b   : > { %v5654_v56 = vadd.f32 %v5653_v47, %v5652_v63 }
 0x95d   : > { %v5656_v35 = vadd.f32 %v5655_v53, %v5654_v56 }
 0x95f   : > { %v5658_v27 = vadd.f32 %v5657_v16, %v5656_v35 }
 0x961   : > { %v5660_v25 = vadd.f32 %v5659_v38, %v5658_v27 }
 0x963   : > { %v5662_v10 = vadd.f32 %v5661_v13, %v5660_v25 }
 0x965   : > { %v5663_v50 = vrot.slane %v5662_v10, 4 }
 0x967   : > { %v5664_v23 = vadd.f32 %v5663_v50, %v5662_v10 }
 0x969   : > { %v5665_v59 = vrot.slane %v5664_v23, 2 }
 0x96b   : > { %v5666_v63 = vadd.f32 %v5665_v59, %v5664_v23 }
 0x96d   : > { %v5667_v47 = vrot.slane %v5666_v63, 1 }
 0x96f   : > { %v5668_v26 = vadd.f32 %v5667_v47, %v5666_v63  ;;  %v12796_v47 = vld [vmem:[#allocation11_spill] sm:$0xff] }
 0x971   : > { %v5669_v46 = vadd.f32 1e-08, %v5668_v26 }
 0x973   : > { %8016 = vrsqrt.f32 %v5669_v46  ;;  %vm5676_vm8 = vweird.f32 %v5669_v46 }
 0x979   : > { %v8017_v7 = vpop.eup %8016 }
 0x97a   : > { %v5671_v56 = vmul.f32 %v8017_v7, %v5669_v46  ;;  %vm5677_vm7 = vweird.f32 %v8017_v7 }
 0x97b   : > { %vm5678_vm9 = vmor %vm5676_vm8, %vm5677_vm7 }
 0x97c   : > { %v5672_v53 = vmul.f32 %v8017_v7, %v5671_v56 }
 0x97e   : > { %v5673_v34 = vmul.f32 0.5, %v5672_v53 }
 0x980   : > { %v5674_v11 = vsub.f32 1.5, %v5673_v34 }
 0x982   : > { %v5675_v16 = vmul.f32 %v8017_v7, %v5674_v11 }
 0x984   : > { %v5679_v27 = vsel %vm5678_vm9, %v8017_v7, %v5675_v16  ;;  %v12797_v7 = vld [vmem:[#allocation38_spill] sm:$0xff] }
 0x985   : > { %v5682_v57 = vmul.f32 %v5679_v27, %v11557_v21  ;;  %v5683_v35 = vmul.f32 %v5679_v27, %v11563_v39  ;;  %v5680_v23 = vmul.f32 %v5679_v27, %v11546_v28  ;;  %v5681_v43 = vmul.f32 %v5679_v27, %v11554_v58 }
 0x986   : > { %v5684_v26 = vmul.f32 %v5679_v27, %v11571_v52  ;;  %v5685_v38 = vmul.f32 %v5679_v27, %v11581_v41  ;;  %v5686_v25 = vmul.f32 %v5679_v27, %v11591_v40  ;;  %v5687_v34 = vmul.f32 %v5679_v27, %v11600_v45 }
 0x987   : > { %v5849_v13 = vpack.c.bf16 %v5683_v35, %v5682_v57  ;;  %v5833_v46 = vpack.c.bf16 %v5681_v43, %v5680_v23  ;;  %v5688_v10 = vmul.f32 %v5679_v27, %v11609_v29  ;;  %v5689_v21 = vmul.f32 %v5679_v27, %v11618_v4 }
 0x988   : > { %v6223_v50 = vpack.c.bf16 %v5685_v38, %v5684_v26  ;;  %v6399_v39 = vpack.c.bf16 %v5687_v34, %v5686_v25  ;;  %v5690_v28 = vmul.f32 %v5679_v27, %v11627_v22  ;;  %v5691_v58 = vmul.f32 %v5679_v27, %v11636_v24 }
 0x989   : > { %5902 = vmatpush.bf16.msra.mxu2 %v5849_v13  ;;  %6036 = vmatpush.bf16.msrb.mxu0 %v5833_v46  ;;  %v6525_v52 = vpack.c.bf16 %v5689_v21, %v5688_v10  ;;  %v5692_v41 = vmul.f32 %v5679_v27, %v11645_v48  ;;  %v5693_v40 = vmul.f32 %v5679_v27, %v11654_v17  ;;  %v12790_v17 = vld [vmem:[#allocation32_spill] sm:$0xff] }
 0x98a   : > { %6276 = vmatpush.bf16.msrb.mxu1 %v6223_v50  ;;  %6410 = vmatpush.bf16.msra.mxu3 %v6399_v39  ;;  %v6657_v45 = vpack.c.bf16 %v5691_v58, %v5690_v28  ;;  %v5694_v29 = vmul.f32 %v5679_v27, %v11663_v54  ;;  %v5695_v4 = vmul.f32 %v5679_v27, %v11672_v15  ;;  %v12792_v54 = vld [vmem:[#allocation15_spill] sm:$0xff]  ;;  %v12793_v15 = vld [vmem:[#allocation17_spill] sm:$0xff] }
 0x98b   : > { %v6782_v59 = vpack.c.bf16 %v5693_v40, %v5692_v41  ;;  %v5696_v22 = vmul.f32 %v5679_v27, %v11681_v36  ;;  %v5697_v63 = vmul.f32 %v5679_v27, %v5609_v18  ;;  %v12794_v36 = vld [vmem:[#allocation7_spill] sm:$0xff] }
 0x98c   : > { %v6904_v24 = vpack.c.bf16 %v5695_v4, %v5694_v29  ;;  %5903 = vmatmul.bf16.vlgmr.msra.gmra.mxu2 %v12767_v9  ;;  %7861 = vmatmul.msk.bf16.vlgmr.msrb.gmra.mxu0 %vm2416_vm4, %v12764_v1  ;;  %v12795_v18 = vld [vmem:[#allocation19_spill] sm:$0xff] }
 0x98d   : > { %6536 = vmatpush.bf16.msrb.mxu2 %v6525_v52  ;;  %6668 = vmatpush.bf16.msra.mxu0 %v6657_v45  ;;  %v7026_v48 = vpack.c.bf16 %v5697_v63, %v5696_v22 }
 0x98e   : > { %6790 = vmatpush.bf16.msra.mxu1 %v6782_v59  ;;  %6912 = vmatpush.bf16.msrb.mxu3 %v6904_v24  ;;  %v12798_v24 = vld [vmem:[#allocation18_spill] sm:$0xff] }
 0x98f   : > { %7877 = vmatmul.msk.bf16.vlgmr.msrb.gmra.mxu1 %vm2416_vm4, %v12763_v61  ;;  %7893 = vmatmul.msk.bf16.vlgmr.msra.gmra.mxu3 %vm2416_vm4, %v11023_v0 }
 0x991   : > { %7034 = vmatpush.bf16.msra.mxu2 %v7026_v48 }
 0x99c   : > { %7846 = vmatmul.msk.bf16.gmra.mxu2 %vm2416_vm4, %v11011_v62  ;;  %7862 = vmatmul.msk.bf16.gmra.mxu0 %vm2416_vm4, %v11023_v0  ;;  %v12791_v0 = vld [vmem:[#allocation16_spill] sm:$0xff] }
 0x99f   : > { %7878 = vmatmul.msk.bf16.gmra.mxu1 %vm2416_vm4, %v11027_v8  ;;  %7894 = vmatmul.msk.bf16.gmra.mxu3 %vm2416_vm4, %v11074_v3 }
 0x9ac   : > { %7847 = vmatmul.msk.bf16.gmra.mxu2 %vm2416_vm4, %v11062_v44  ;;  %7863 = vmatmul.msk.bf16.gmra.mxu0 %vm2416_vm4, %v11074_v3 }
 0x9af   : > { %7879 = vmatmul.msk.bf16.gmra.mxu1 %vm2416_vm4, %v11079_v5  ;;  %7895 = vmatmul.msk.bf16.gmra.mxu3 %vm2416_vm4, %v11122_v60 }
 0x9bc   : > { %7848 = vmatmul.msk.bf16.gmra.mxu2 %vm2416_vm4, %v12790_v17  ;;  %7864 = vmatmul.msk.bf16.gmra.mxu0 %vm2416_vm4, %v11122_v60 }
 0x9bf   : > { %7880 = vmatmul.msk.bf16.gmra.mxu1 %vm2416_vm4, %v12791_v0  ;;  %7896 = vmatmul.msk.bf16.gmra.mxu3 %vm2416_vm4, %v12792_v54 }
 0x9cc   : > { %7849 = vmatmul.msk.bf16.gmra.mxu2 %vm2416_vm4, %v12793_v15  ;;  %7865 = vmatmul.msk.bf16.gmra.mxu0 %vm2416_vm4, %v12792_v54 }
 0x9cf   : > { %7881 = vmatmul.msk.bf16.gmra.mxu1 %vm2416_vm4, %v12794_v36  ;;  %7897 = vmatmul.msk.bf16.gmra.mxu3 %vm2416_vm4, %v11230_v42 }
 0x9dc   : > { %7850 = vmatmul.msk.bf16.gmra.mxu2 %vm2416_vm4, %v12795_v18  ;;  %7866 = vmatmul.msk.bf16.gmra.mxu0 %vm2416_vm4, %v11230_v42 }
 0x9df   : > { %7882 = vmatmul.msk.bf16.gmra.mxu1 %vm2416_vm4, %v11235_v37  ;;  %7898 = vmatmul.msk.bf16.gmra.mxu3 %vm2416_vm4, %v11272_v14 }
 0x9ec   : > { %7851 = vmatmul.msk.bf16.gmra.mxu2 %vm2416_vm4, %v12796_v47  ;;  %7867 = vmatmul.msk.bf16.gmra.mxu0 %vm2416_vm4, %v11272_v14 }
 0x9ef   : > { %7883 = vmatmul.msk.bf16.gmra.mxu1 %vm2416_vm4, %v12797_v7  ;;  %7899 = vmatmul.msk.bf16.gmra.mxu3 %vm2416_vm4, %v11316_v32 }
 0x9fc   : > { %7852 = vmatmul.msk.bf16.gmra.mxu2 %vm2416_vm4, %v11306_v19  ;;  %7868 = vmatmul.msk.bf16.gmra.mxu0 %vm2416_vm4, %v11316_v32 }
 0x9ff   : > { %7884 = vmatmul.msk.bf16.gmra.mxu1 %vm2416_vm4, %v11321_v33  ;;  %7900 = vmatmul.msk.bf16.gmra.mxu3 %vm2416_vm4, %v11344_v12 }
 0xa09   : > { %v6038_v56 = vpop.f32.mrf.mxu0 }
 0xa0c   : > { %v6278_v53 = vpop.f32.mrf.mxu1  ;;  %7853 = vmatmul.msk.bf16.gmra.mxu2 %vm2416_vm4, %v11336_v30  ;;  %7869 = vmatmul.msk.bf16.gmra.mxu0 %vm2416_vm4, %v11344_v12 }
 0xa0f   : > { %7885 = vmatmul.msk.bf16.gmra.mxu1 %vm2416_vm4, %v11349_v2  ;;  %7901 = vmatmul.msk.bf16.gmra.mxu3 %vm2416_vm4, %v11371_v31  ;;  %v5904_v11 = vpop.f32.mrf.mxu2 }
 0xa10   : > { %v6039_v16 = vadd.f32 %v6038_v56, %v5904_v11 }
 0xa11   : > { %v6040_v35 = vpop.f32.mrf.mxu0 }
 0xa12   : > { %v6358_v27 = vadd.f32 %v6278_v53, %v6039_v16  ;;  %v6412_v57 = vpop.f32.mrf.mxu3 }
 0xa14   : > { %v6280_v23 = vpop.f32.mrf.mxu1  ;;  %v11784_v43 = vadd.f32 %v6412_v57, %v6358_v27 }
 0xa17   : > { %v5906_v26 = vpop.f32.mrf.mxu2 }
 0xa18   : > { %v6041_v38 = vadd.f32 %v6040_v35, %v5906_v26 }
 0xa19   : > { %v6043_v13 = vpop.f32.mrf.mxu0 }
 0xa1a   : > { %v6359_v25 = vadd.f32 %v6280_v23, %v6041_v38  ;;  %v6414_v34 = vpop.f32.mrf.mxu3 }
 0xa1c   : > { %v6283_v46 = vpop.f32.mrf.mxu1  ;;  %v11786_v10 = vadd.f32 %v6414_v34, %v6359_v25  ;;  %7854 = vmatmul.msk.bf16.gmra.mxu2 %vm2416_vm4, %v11363_v55  ;;  %7870 = vmatmul.msk.bf16.gmra.mxu0 %vm2416_vm4, %v11371_v31 }
 0xa1f   : > { %7886 = vmatmul.msk.bf16.gmra.mxu1 %vm2416_vm4, %v11375_v51  ;;  %7902 = vmatmul.msk.bf16.gmra.mxu3 %vm2416_vm4, %v11393_v49  ;;  %v5909_v21 = vpop.f32.mrf.mxu2 }
 0xa20   : > { %v6044_v50 = vadd.f32 %v6043_v13, %v5909_v21  ;;  %v12800_v21 = vld [vmem:[#allocation22_spill] sm:$0xff] }
 0xa21   : > { %v6045_v58 = vpop.f32.mrf.mxu0 }
 0xa22   : > { %v6360_v39 = vadd.f32 %v6283_v46, %v6044_v50  ;;  %v6417_v28 = vpop.f32.mrf.mxu3  ;;  %v12799_v46 = vld [vmem:[#allocation2_spill] sm:$0xff] }
 0xa23   : > { %v12801_v50 = vld [vmem:[#allocation42_spill] sm:$0xff] }
 0xa24   : > { %v6285_v52 = vpop.f32.mrf.mxu1  ;;  %v11796_v41 = vadd.f32 %v6417_v28, %v6360_v39 }
 0xa27   : > { %v5911_v40 = vpop.f32.mrf.mxu2 }
 0xa28   : > { %v6046_v45 = vadd.f32 %v6045_v58, %v5911_v40 }
 0xa29   : > { %v6048_v59 = vpop.f32.mrf.mxu0 }
 0xa2a   : > { %v6361_v29 = vadd.f32 %v6285_v52, %v6046_v45  ;;  %v6419_v4 = vpop.f32.mrf.mxu3 }
 0xa2c   : > { %v6288_v22 = vpop.f32.mrf.mxu1  ;;  %v11798_v63 = vadd.f32 %v6419_v4, %v6361_v29  ;;  %7855 = vmatmul.msk.bf16.gmra.mxu2 %vm2416_vm4, %v11385_v6  ;;  %7871 = vmatmul.msk.bf16.gmra.mxu0 %vm2416_vm4, %v11393_v49 }
 0xa2f   : > { %7887 = vmatmul.msk.bf16.gmra.mxu1 %vm2416_vm4, %v11397_v20  ;;  %7903 = vmatmul.msk.bf16.gmra.mxu3 %vm2416_vm4, %v12798_v24  ;;  %v5914_v48 = vpop.f32.mrf.mxu2 }
 0xa30   : > { %v6049_v56 = vadd.f32 %v6048_v59, %v5914_v48 }
 0xa31   : > { %v6050_v16 = vpop.f32.mrf.mxu0 }
 0xa32   : > { %v6362_v53 = vadd.f32 %v6288_v22, %v6049_v56  ;;  %v6422_v11 = vpop.f32.mrf.mxu3 }
 0xa34   : > { %v6290_v27 = vpop.f32.mrf.mxu1  ;;  %v11808_v57 = vadd.f32 %v6422_v11, %v6362_v53 }
 0xa37   : > { %v5916_v35 = vpop.f32.mrf.mxu2 }
 0xa38   : > { %v6051_v23 = vadd.f32 %v6050_v16, %v5916_v35  ;;  %v12802_v16 = vld [vmem:[#allocation14_spill] sm:$0xff]  ;;  %v12804_v35 = vld [vmem:[#allocation21_spill] sm:$0xff] }
 0xa39   : > { %v6053_v25 = vpop.f32.mrf.mxu0 }
 0xa3a   : > { %v6363_v26 = vadd.f32 %v6290_v27, %v6051_v23  ;;  %v6424_v38 = vpop.f32.mrf.mxu3  ;;  %v12803_v27 = vld [vmem:[#allocation39_spill] sm:$0xff] }
 0xa3c   : > { %v6293_v34 = vpop.f32.mrf.mxu1  ;;  %v11810_v13 = vadd.f32 %v6424_v38, %v6363_v26  ;;  %7856 = vmatmul.msk.bf16.gmra.mxu2 %vm2416_vm4, %v12799_v46  ;;  %7872 = vmatmul.msk.bf16.gmra.mxu0 %vm2416_vm4, %v12798_v24 }
 0xa3f   : > { %7888 = vmatmul.msk.bf16.gmra.mxu1 %vm2416_vm4, %v12800_v21  ;;  %7904 = vmatmul.msk.bf16.gmra.mxu3 %vm2416_vm4, %v12801_v50  ;;  %v5919_v39 = vpop.f32.mrf.mxu2 }
 0xa40   : > { %v6054_v28 = vadd.f32 %v6053_v25, %v5919_v39 }
 0xa41   : > { %v6055_v40 = vpop.f32.mrf.mxu0 }
 0xa42   : > { %v6364_v58 = vadd.f32 %v6293_v34, %v6054_v28  ;;  %v6427_v52 = vpop.f32.mrf.mxu3 }
 0xa44   : > { %v6295_v45 = vpop.f32.mrf.mxu1  ;;  %v11820_v29 = vadd.f32 %v6427_v52, %v6364_v58 }
 0xa47   : > { %v5921_v4 = vpop.f32.mrf.mxu2 }
 0xa48   : > { %v6056_v59 = vadd.f32 %v6055_v40, %v5921_v4 }
 0xa49   : > { %v6058_v56 = vpop.f32.mrf.mxu0 }
 0xa4a   : > { %v6365_v22 = vadd.f32 %v6295_v45, %v6056_v59  ;;  %v6429_v48 = vpop.f32.mrf.mxu3 }
 0xa4c   : > { %v6298_v53 = vpop.f32.mrf.mxu1  ;;  %v11822_v11 = vadd.f32 %v6429_v48, %v6365_v22  ;;  %7857 = vmatmul.msk.bf16.gmra.mxu2 %vm2416_vm4, %v12802_v16  ;;  %7873 = vmatmul.msk.bf16.gmra.mxu0 %vm2416_vm4, %v12801_v50  ;;  %v12807_v48 = vld [vmem:[#allocation12_spill] sm:$0xff] }
 0xa4f   : > { %7889 = vmatmul.msk.bf16.gmra.mxu1 %vm2416_vm4, %v12803_v27  ;;  %7905 = vmatmul.msk.bf16.gmra.mxu3 %vm2416_vm4, %v12804_v35  ;;  %v5924_v23 = vpop.f32.mrf.mxu2 }
 0xa50   : > { %v6059_v26 = vadd.f32 %v6058_v56, %v5924_v23  ;;  %v12808_v56 = vld [vmem:[#allocation20_spill] sm:$0xff] }
 0xa51   : > { %v6060_v34 = vpop.f32.mrf.mxu0 }
 0xa52   : > { %v6366_v38 = vadd.f32 %v6298_v53, %v6059_v26  ;;  %v6432_v25 = vpop.f32.mrf.mxu3  ;;  %v12809_v53 = vld [vmem:[#allocation3_spill] sm:$0xff] }
 0xa54   : > { %v6300_v39 = vpop.f32.mrf.mxu1  ;;  %v11832_v28 = vadd.f32 %v6432_v25, %v6366_v38 }
 0xa56   : > { %12805 = vst [vmem:[#allocation46_spill] sm:$0xff] %v11832_v28  ;;  %v12812_v28 = vld [vmem:[#allocation44_spill] sm:$0xff] }
 0xa57   : > { %v5926_v58 = vpop.f32.mrf.mxu2 }
 0xa58   : > { %v6061_v52 = vadd.f32 %v6060_v34, %v5926_v58 }
 0xa59   : > { %v6063_v4 = vpop.f32.mrf.mxu0 }
 0xa5a   : > { %v6367_v40 = vadd.f32 %v6300_v39, %v6061_v52  ;;  %v6434_v45 = vpop.f32.mrf.mxu3 }
 0xa5c   : > { %v6303_v59 = vpop.f32.mrf.mxu1  ;;  %v11834_v22 = vadd.f32 %v6434_v45, %v6367_v40  ;;  %7858 = vmatmul.msk.bf16.gmra.mxu2 %vm2416_vm4, %v12807_v48  ;;  %7874 = vmatmul.msk.bf16.gmra.mxu0 %vm2416_vm4, %v12804_v35 }
 0xa5e   : > { %12806 = vst [vmem:[#allocation25_spill] sm:$0xff] %v11834_v22 }
 0xa5f   : > { %7890 = vmatmul.msk.bf16.gmra.mxu1 %vm2416_vm4, %v12808_v56  ;;  %7906 = vmatmul.msk.bf16.gmra.mxu3 %vm2416_vm4, %v12809_v53  ;;  %v5929_v23 = vpop.f32.mrf.mxu2 }
 0xa60   : > { %v6064_v26 = vadd.f32 %v6063_v4, %v5929_v23  ;;  %v12813_v4 = vld [vmem:[#allocation23_spill] sm:$0xff] }
 0xa61   : > { %v6065_v34 = vpop.f32.mrf.mxu0 }
 0xa62   : > { %v6368_v38 = vadd.f32 %v6303_v59, %v6064_v26  ;;  %v6437_v25 = vpop.f32.mrf.mxu3  ;;  %v12814_v59 = vld [vmem:[#allocation37_spill] sm:$0xff] }
 0xa64   : > { %v6305_v39 = vpop.f32.mrf.mxu1  ;;  %v11844_v58 = vadd.f32 %v6437_v25, %v6368_v38 }
 0xa66   : > { %12810 = vst [vmem:[#allocation35_spill] sm:$0xff] %v11844_v58 }
 0xa67   : > { %v5931_v52 = vpop.f32.mrf.mxu2 }
 0xa68   : > { %v6066_v40 = vadd.f32 %v6065_v34, %v5931_v52 }
 0xa69   : > { %v6068_v9 = vpop.f32.mrf.mxu0 }
 0xa6a   : > { %v6369_v45 = vadd.f32 %v6305_v39, %v6066_v40  ;;  %v6439_v61 = vpop.f32.mrf.mxu3 }
 0xa6c   : > { %v6308_v1 = vpop.f32.mrf.mxu1  ;;  %v11846_v22 = vadd.f32 %v6439_v61, %v6369_v45  ;;  %7859 = vmatmul.msk.bf16.gmra.mxu2 %vm2416_vm4, %v12812_v28  ;;  %7875 = vmatmul.msk.bf16.gmra.mxu0 %vm2416_vm4, %v12809_v53 }
 0xa6e   : > { %12811 = vst [vmem:[#allocation13_spill] sm:$0xff] %v11846_v22 }
 0xa6f   : > { %7891 = vmatmul.msk.bf16.gmra.mxu1 %vm2416_vm4, %v12813_v4  ;;  %7907 = vmatmul.msk.bf16.gmra.mxu3 %vm2416_vm4, %v12814_v59  ;;  %v5934_v23 = vpop.f32.mrf.mxu2  ;;  %v12817_v4 = vld [vmem:[#allocation36_spill] sm:$0xff] }
 0xa70   : > { %v6069_v26 = vadd.f32 %v6068_v9, %v5934_v23  ;;  %v12818_v9 = vld [vmem:[#allocation27_spill] sm:$0xff] }
 0xa71   : > { %v6070_v34 = vpop.f32.mrf.mxu0 }
 0xa72   : > { %v6370_v38 = vadd.f32 %v6308_v1, %v6069_v26  ;;  %v6442_v25 = vpop.f32.mrf.mxu3  ;;  %v12819_v1 = vld [vmem:[#allocation41_spill] sm:$0xff] }
 0xa74   : > { %v6310_v39 = vpop.f32.mrf.mxu1  ;;  %v11856_v61 = vadd.f32 %v6442_v25, %v6370_v38 }
 0xa76   : > { %12815 = vst [vmem:[#allocation24_spill] sm:$0xff] %v11856_v61 }
 0xa77   : > { %v5936_v52 = vpop.f32.mrf.mxu2 }
 0xa78   : > { %v6071_v40 = vadd.f32 %v6070_v34, %v5936_v52 }
 0xa79   : > { %v6073_v58 = vpop.f32.mrf.mxu0 }
 0xa7a   : > { %v6371_v45 = vadd.f32 %v6310_v39, %v6071_v40  ;;  %v6444_v22 = vpop.f32.mrf.mxu3 }
 0xa7c   : > { %v6313_v28 = vpop.f32.mrf.mxu1  ;;  %v11858_v53 = vadd.f32 %v6444_v22, %v6371_v45  ;;  %7860 = vmatmul.msk.bf16.gmra.mxu2 %vm2416_vm4, %v12817_v4  ;;  %7876 = vmatmul.msk.bf16.gmra.mxu0 %vm2416_vm4, %v12814_v59 }
 0xa7e   : > { %12816 = vst [vmem:[#allocation31_spill] sm:$0xff] %v11858_v53 }
 0xa7f   : > { %7892 = vmatmul.msk.bf16.gmra.mxu1 %vm2416_vm4, %v12818_v9  ;;  %7908 = vmatmul.msk.bf16.gmra.mxu3 %vm2416_vm4, %v12819_v1  ;;  %v5939_v23 = vpop.f32.mrf.mxu2 }
 0xa80   : > { %v6074_v26 = vadd.f32 %v6073_v58, %v5939_v23 }
 0xa81   : > { %v6075_v34 = vpop.f32.mrf.mxu0 }
 0xa82   : > { %v6372_v38 = vadd.f32 %v6313_v28, %v6074_v26  ;;  %v6447_v25 = vpop.f32.mrf.mxu3 }
 0xa84   : > { %v6315_v39 = vpop.f32.mrf.mxu1  ;;  %v11868_v22 = vadd.f32 %v6447_v25, %v6372_v38 }
 0xa87   : > { %v5941_v52 = vpop.f32.mrf.mxu2 }
 0xa88   : > { %v6076_v40 = vadd.f32 %v6075_v34, %v5941_v52 }
 0xa89   : > { %v6078_v61 = vpop.f32.mrf.mxu0 }
 0xa8a   : > { %v6373_v45 = vadd.f32 %v6315_v39, %v6076_v40  ;;  %v6449_v53 = vpop.f32.mrf.mxu3 }
 0xa8c   : > { %v6318_v4 = vpop.f32.mrf.mxu1  ;;  %v11870_v59 = vadd.f32 %v6449_v53, %v6373_v45  ;;  %7909 = vmatmul.msk.bf16.vlgmr.msrb.gmra.mxu2 %vm2416_vm4, %v11011_v62  ;;  %7925 = vmatmul.msk.bf16.vlgmr.msra.gmra.mxu0 %vm2416_vm4, %v11027_v8 }
 0xa8f   : > { %7941 = vmatmul.msk.bf16.vlgmr.msra.gmra.mxu1 %vm2416_vm4, %v11074_v3  ;;  %7957 = vmatmul.msk.bf16.vlgmr.msrb.gmra.mxu3 %vm2416_vm4, %v11062_v44  ;;  %v5944_v28 = vpop.f32.mrf.mxu2 }
 0xa90   : > { %v6079_v58 = vadd.f32 %v6078_v61, %v5944_v28 }
 0xa91   : > { %v6080_v38 = vpop.f32.mrf.mxu0 }
 0xa92   : > { %v6374_v23 = vadd.f32 %v6318_v4, %v6079_v58  ;;  %v6452_v26 = vpop.f32.mrf.mxu3 }
 0xa94   : > { %v6320_v25 = vpop.f32.mrf.mxu1  ;;  %v11880_v53 = vadd.f32 %v6452_v26, %v6374_v23 }
 0xa97   : > { %v5946_v34 = vpop.f32.mrf.mxu2 }
 0xa98   : > { %v6081_v39 = vadd.f32 %v6080_v38, %v5946_v34 }
 0xa99   : > { %v6083_v40 = vpop.f32.mrf.mxu0 }
 0xa9a   : > { %v6375_v62 = vadd.f32 %v6320_v25, %v6081_v39  ;;  %v6454_v52 = vpop.f32.mrf.mxu3 }
 0xa9c   : > { %v6323_v8 = vpop.f32.mrf.mxu1  ;;  %v11882_v45 = vadd.f32 %v6454_v52, %v6375_v62  ;;  %7910 = vmatmul.msk.bf16.gmra.mxu2 %vm2416_vm4, %v11062_v44  ;;  %7926 = vmatmul.msk.bf16.gmra.mxu0 %vm2416_vm4, %v11079_v5 }
 0xa9f   : > { %7942 = vmatmul.msk.bf16.gmra.mxu1 %vm2416_vm4, %v11122_v60  ;;  %7958 = vmatmul.msk.bf16.gmra.mxu3 %vm2416_vm4, %v12790_v17  ;;  %v5949_v3 = vpop.f32.mrf.mxu2 }
 0xaa0   : > { %v6084_v4 = vadd.f32 %v6083_v40, %v5949_v3 }
 0xaa1   : > { %v6085_v58 = vpop.f32.mrf.mxu0 }
 0xaa2   : > { %v6376_v61 = vadd.f32 %v6323_v8, %v6084_v4  ;;  %v6457_v28 = vpop.f32.mrf.mxu3 }
 0xaa4   : > { %v6325_v23 = vpop.f32.mrf.mxu1  ;;  %v11892_v26 = vadd.f32 %v6457_v28, %v6376_v61 }
 0xaa7   : > { %v5951_v38 = vpop.f32.mrf.mxu2 }
 0xaa8   : > { %v6086_v25 = vadd.f32 %v6085_v58, %v5951_v38 }
 0xaa9   : > { %v6088_v39 = vpop.f32.mrf.mxu0 }
 0xaaa   : > { %v6377_v44 = vadd.f32 %v6325_v23, %v6086_v25  ;;  %v6459_v34 = vpop.f32.mrf.mxu3 }
 0xaac   : > { %v6328_v62 = vpop.f32.mrf.mxu1  ;;  %v11894_v52 = vadd.f32 %v6459_v34, %v6377_v44  ;;  %7911 = vmatmul.msk.bf16.gmra.mxu2 %vm2416_vm4, %v12790_v17  ;;  %7927 = vmatmul.msk.bf16.gmra.mxu0 %vm2416_vm4, %v12791_v0 }
 0xaaf   : > { %7943 = vmatmul.msk.bf16.gmra.mxu1 %vm2416_vm4, %v12792_v54  ;;  %7959 = vmatmul.msk.bf16.gmra.mxu3 %vm2416_vm4, %v12793_v15  ;;  %v5954_v60 = vpop.f32.mrf.mxu2 }
 0xab0   : > { %v6089_v40 = vadd.f32 %v6088_v39, %v5954_v60 }
 0xab1   : > { %v6090_v4 = vpop.f32.mrf.mxu0 }
 0xab2   : > { %v6378_v8 = vadd.f32 %v6328_v62, %v6089_v40  ;;  %v6462_v3 = vpop.f32.mrf.mxu3 }
 0xab4   : > { %v6330_v61 = vpop.f32.mrf.mxu1  ;;  %v11904_v28 = vadd.f32 %v6462_v3, %v6378_v8 }
 0xab7   : > { %v5956_v58 = vpop.f32.mrf.mxu2 }
 0xab8   : > { %v6091_v23 = vadd.f32 %v6090_v4, %v5956_v58 }
 0xab9   : > { %v6093_v25 = vpop.f32.mrf.mxu0 }
 0xaba   : > { %v6379_v17 = vadd.f32 %v6330_v61, %v6091_v23  ;;  %v6464_v38 = vpop.f32.mrf.mxu3 }
 0xabc   : > { %v6333_v44 = vpop.f32.mrf.mxu1  ;;  %v11906_v34 = vadd.f32 %v6464_v38, %v6379_v17  ;;  %7912 = vmatmul.msk.bf16.gmra.mxu2 %vm2416_vm4, %v12793_v15  ;;  %7928 = vmatmul.msk.bf16.gmra.mxu0 %vm2416_vm4, %v12794_v36 }
 0xabf   : > { %7944 = vmatmul.msk.bf16.gmra.mxu1 %vm2416_vm4, %v11230_v42  ;;  %7960 = vmatmul.msk.bf16.gmra.mxu3 %vm2416_vm4, %v12795_v18  ;;  %v5959_v54 = vpop.f32.mrf.mxu2 }
 0xac0   : > { %v6094_v39 = vadd.f32 %v6093_v25, %v5959_v54 }
 0xac1   : > { %v6095_v40 = vpop.f32.mrf.mxu0 }
 0xac2   : > { %v6380_v62 = vadd.f32 %v6333_v44, %v6094_v39  ;;  %v6467_v60 = vpop.f32.mrf.mxu3 }
 0xac4   : > { %v6335_v8 = vpop.f32.mrf.mxu1  ;;  %v11916_v3 = vadd.f32 %v6467_v60, %v6380_v62 }
 0xac7   : > { %v5961_v4 = vpop.f32.mrf.mxu2 }
 0xac8   : > { %v6096_v61 = vadd.f32 %v6095_v40, %v5961_v4 }
 0xac9   : > { %v6098_v23 = vpop.f32.mrf.mxu0 }
 0xaca   : > { %v6381_v15 = vadd.f32 %v6335_v8, %v6096_v61  ;;  %v6469_v58 = vpop.f32.mrf.mxu3 }
 0xacc   : > { %v6338_v17 = vpop.f32.mrf.mxu1  ;;  %v11918_v38 = vadd.f32 %v6469_v58, %v6381_v15  ;;  %7913 = vmatmul.msk.bf16.gmra.mxu2 %vm2416_vm4, %v12795_v18  ;;  %7929 = vmatmul.msk.bf16.gmra.mxu0 %vm2416_vm4, %v11235_v37 }
 0xacf   : > { %7945 = vmatmul.msk.bf16.gmra.mxu1 %vm2416_vm4, %v11272_v14  ;;  %7961 = vmatmul.msk.bf16.gmra.mxu3 %vm2416_vm4, %v12796_v47  ;;  %v5964_v42 = vpop.f32.mrf.mxu2 }
 0xad0   : > { %v6099_v25 = vadd.f32 %v6098_v23, %v5964_v42 }
 0xad1   : > { %v6100_v39 = vpop.f32.mrf.mxu0 }
 0xad2   : > { %v6382_v44 = vadd.f32 %v6338_v17, %v6099_v25  ;;  %v6472_v54 = vpop.f32.mrf.mxu3 }
 0xad4   : > { %v6340_v62 = vpop.f32.mrf.mxu1  ;;  %v11928_v60 = vadd.f32 %v6472_v54, %v6382_v44 }
 0xad7   : > { %v5966_v40 = vpop.f32.mrf.mxu2 }
 0xad8   : > { %v6101_v8 = vadd.f32 %v6100_v39, %v5966_v40 }
 0xad9   : > { %v6103_v61 = vpop.f32.mrf.mxu0 }
 0xada   : > { %v6383_v18 = vadd.f32 %v6340_v62, %v6101_v8  ;;  %v6474_v4 = vpop.f32.mrf.mxu3 }
 0xadc   : > { %v6343_v15 = vpop.f32.mrf.mxu1  ;;  %v11930_v58 = vadd.f32 %v6474_v4, %v6383_v18  ;;  %7914 = vmatmul.msk.bf16.gmra.mxu2 %vm2416_vm4, %v12796_v47  ;;  %7930 = vmatmul.msk.bf16.gmra.mxu0 %vm2416_vm4, %v12797_v7 }
 0xadf   : > { %7946 = vmatmul.msk.bf16.gmra.mxu1 %vm2416_vm4, %v11316_v32  ;;  %7962 = vmatmul.msk.bf16.gmra.mxu3 %vm2416_vm4, %v11306_v19  ;;  %v5969_v14 = vpop.f32.mrf.mxu2 }
 0xae0   : > { %v6104_v23 = vadd.f32 %v6103_v61, %v5969_v14 }
 0xae1   : > { %v6105_v25 = vpop.f32.mrf.mxu0 }
 0xae2   : > { %v6384_v17 = vadd.f32 %v6343_v15, %v6104_v23  ;;  %v6477_v42 = vpop.f32.mrf.mxu3 }
 0xae4   : > { %v6345_v44 = vpop.f32.mrf.mxu1  ;;  %v11940_v54 = vadd.f32 %v6477_v42, %v6384_v17 }
 0xae7   : > { %v5971_v39 = vpop.f32.mrf.mxu2 }
 0xae8   : > { %v6106_v62 = vadd.f32 %v6105_v25, %v5971_v39 }
 0xae9   : > { %v6108_v8 = vpop.f32.mrf.mxu0 }
 0xaea   : > { %v6385_v47 = vadd.f32 %v6345_v44, %v6106_v62  ;;  %v6479_v40 = vpop.f32.mrf.mxu3 }
 0xaec   : > { %v6348_v18 = vpop.f32.mrf.mxu1  ;;  %v11942_v4 = vadd.f32 %v6479_v40, %v6385_v47  ;;  %7915 = vmatmul.msk.bf16.gmra.mxu2 %vm2416_vm4, %v11306_v19  ;;  %7931 = vmatmul.msk.bf16.gmra.mxu0 %vm2416_vm4, %v11321_v33 }
 0xaef   : > { %7947 = vmatmul.msk.bf16.gmra.mxu1 %vm2416_vm4, %v11344_v12  ;;  %7963 = vmatmul.msk.bf16.gmra.mxu3 %vm2416_vm4, %v11336_v30  ;;  %v5974_v32 = vpop.f32.mrf.mxu2 }
 0xaf0   : > { %v6109_v61 = vadd.f32 %v6108_v8, %v5974_v32 }
 0xaf1   : > { %v6110_v23 = vpop.f32.mrf.mxu0 }
 0xaf2   : > { %v6386_v15 = vadd.f32 %v6348_v18, %v6109_v61  ;;  %v6482_v14 = vpop.f32.mrf.mxu3 }
 0xaf4   : > { %v6350_v17 = vpop.f32.mrf.mxu1  ;;  %v11952_v42 = vadd.f32 %v6482_v14, %v6386_v15 }
 0xaf7   : > { %v5976_v25 = vpop.f32.mrf.mxu2 }
 0xaf8   : > { %v6111_v44 = vadd.f32 %v6110_v23, %v5976_v25 }
 0xaf9   : > { %v6113_v62 = vpop.f32.mrf.mxu0 }
 0xafa   : > { %v6387_v19 = vadd.f32 %v6350_v17, %v6111_v44  ;;  %v6484_v39 = vpop.f32.mrf.mxu3 }
 0xafc   : > { %v6353_v47 = vpop.f32.mrf.mxu1  ;;  %v11954_v40 = vadd.f32 %v6484_v39, %v6387_v19  ;;  %7916 = vmatmul.msk.bf16.gmra.mxu2 %vm2416_vm4, %v11336_v30  ;;  %7932 = vmatmul.msk.bf16.gmra.mxu0 %vm2416_vm4, %v11349_v2 }
 0xaff   : > { %7948 = vmatmul.msk.bf16.gmra.mxu1 %vm2416_vm4, %v11371_v31  ;;  %7964 = vmatmul.msk.bf16.gmra.mxu3 %vm2416_vm4, %v11363_v55  ;;  %v5979_v12 = vpop.f32.mrf.mxu2 }
 0xb00   : > { %v6114_v8 = vadd.f32 %v6113_v62, %v5979_v12 }
 0xb01   : > { %v6115_v61 = vpop.f32.mrf.mxu0 }
 0xb02   : > { %v6388_v18 = vadd.f32 %v6353_v47, %v6114_v8  ;;  %v6487_v32 = vpop.f32.mrf.mxu3 }
 0xb04   : > { %v6355_v15 = vpop.f32.mrf.mxu1  ;;  %v11964_v14 = vadd.f32 %v6487_v32, %v6388_v18 }
 0xb07   : > { %v5981_v23 = vpop.f32.mrf.mxu2 }
 0xb08   : > { %v6116_v17 = vadd.f32 %v6115_v61, %v5981_v23 }
 0xb09   : > { %v6670_v44 = vpop.f32.mrf.mxu0 }
 0xb0a   : > { %v6389_v30 = vadd.f32 %v6355_v15, %v6116_v17  ;;  %v6489_v25 = vpop.f32.mrf.mxu3 }
 0xb0c   : > { %v6792_v19 = vpop.f32.mrf.mxu1  ;;  %v11966_v39 = vadd.f32 %v6489_v25, %v6389_v30  ;;  %7917 = vmatmul.msk.bf16.gmra.mxu2 %vm2416_vm4, %v11363_v55  ;;  %7933 = vmatmul.msk.bf16.gmra.mxu0 %vm2416_vm4, %v11375_v51 }
 0xb0f   : > { %7949 = vmatmul.msk.bf16.gmra.mxu1 %vm2416_vm4, %v11393_v49  ;;  %7965 = vmatmul.msk.bf16.gmra.mxu3 %vm2416_vm4, %v11385_v6  ;;  %v6538_v31 = vpop.f32.mrf.mxu2 }
 0xb10   : > { %v6618_v62 = vadd.f32 %v6538_v31, %v11784_v43 }
 0xb11   : > { %v6672_v8 = vpop.f32.mrf.mxu0 }
 0xb12   : > { %v6750_v47 = vadd.f32 %v6670_v44, %v6618_v62  ;;  %v6914_v12 = vpop.f32.mrf.mxu3 }
 0xb14   : > { %v6794_v18 = vpop.f32.mrf.mxu1  ;;  %v6872_v32 = vadd.f32 %v6792_v19, %v6750_v47 }
 0xb16   : > { %v11977_v61 = vadd.f32 %v6914_v12, %v6872_v32 }
 0xb17   : > { %v6540_v55 = vpop.f32.mrf.mxu2 }
 0xb18   : > { %v6619_v15 = vadd.f32 %v6540_v55, %v11786_v10 }
 0xb19   : > { %v6675_v30 = vpop.f32.mrf.mxu0 }
 0xb1a   : > { %v6751_v23 = vadd.f32 %v6672_v8, %v6619_v15  ;;  %v6916_v17 = vpop.f32.mrf.mxu3 }
 0xb1c   : > { %v6797_v49 = vpop.f32.mrf.mxu1  ;;  %v6873_v25 = vadd.f32 %v6794_v18, %v6751_v23  ;;  %7918 = vmatmul.msk.bf16.gmra.mxu2 %vm2416_vm4, %v11385_v6  ;;  %7934 = vmatmul.msk.bf16.gmra.mxu0 %vm2416_vm4, %v11397_v20 }
 0xb1e   : > { %v11984_v43 = vadd.f32 %v6916_v17, %v6873_v25 }
 0xb1f   : > { %7950 = vmatmul.msk.bf16.gmra.mxu1 %vm2416_vm4, %v12798_v24  ;;  %7966 = vmatmul.msk.bf16.gmra.mxu3 %vm2416_vm4, %v12799_v46  ;;  %v6543_v10 = vpop.f32.mrf.mxu2 }
 0xb20   : > { %v6620_v44 = vadd.f32 %v6543_v10, %v11796_v41 }
 0xb21   : > { %v6677_v62 = vpop.f32.mrf.mxu0 }
 0xb22   : > { %v6752_v19 = vadd.f32 %v6675_v30, %v6620_v44  ;;  %v6919_v31 = vpop.f32.mrf.mxu3 }
 0xb24   : > { %v6799_v47 = vpop.f32.mrf.mxu1  ;;  %v6874_v12 = vadd.f32 %v6797_v49, %v6752_v19 }
 0xb26   : > { %v11991_v6 = vadd.f32 %v6919_v31, %v6874_v12 }
 0xb27   : > { %v6545_v8 = vpop.f32.mrf.mxu2 }
 0xb28   : > { %v6621_v18 = vadd.f32 %v6545_v8, %v11798_v63 }
 0xb29   : > { %v6680_v15 = vpop.f32.mrf.mxu0 }
 0xb2a   : > { %v6753_v32 = vadd.f32 %v6677_v62, %v6621_v18  ;;  %v6921_v55 = vpop.f32.mrf.mxu3 }
 0xb2c   : > { %v6802_v24 = vpop.f32.mrf.mxu1  ;;  %v6875_v23 = vadd.f32 %v6799_v47, %v6753_v32  ;;  %7919 = vmatmul.msk.bf16.gmra.mxu2 %vm2416_vm4, %v12799_v46  ;;  %7935 = vmatmul.msk.bf16.gmra.mxu0 %vm2416_vm4, %v12800_v21 }
 0xb2e   : > { %v11998_v41 = vadd.f32 %v6921_v55, %v6875_v23 }
 0xb2f   : > { %7951 = vmatmul.msk.bf16.gmra.mxu1 %vm2416_vm4, %v12801_v50  ;;  %7967 = vmatmul.msk.bf16.gmra.mxu3 %vm2416_vm4, %v12802_v16  ;;  %v6548_v63 = vpop.f32.mrf.mxu2 }
 0xb30   : > { %v6622_v17 = vadd.f32 %v6548_v63, %v11808_v57 }
 0xb31   : > { %v6682_v25 = vpop.f32.mrf.mxu0 }
 0xb32   : > { %v6754_v30 = vadd.f32 %v6680_v15, %v6622_v17  ;;  %v6924_v49 = vpop.f32.mrf.mxu3 }
 0xb34   : > { %v6804_v10 = vpop.f32.mrf.mxu1  ;;  %v6876_v44 = vadd.f32 %v6802_v24, %v6754_v30 }
 0xb36   : > { %v12005_v46 = vadd.f32 %v6924_v49, %v6876_v44  ;;  %v12820_v44 = vld [vmem:[#allocation3_spill] sm:$0xff] }
 0xb37   : > { %v6550_v19 = vpop.f32.mrf.mxu2 }
 0xb38   : > { %v6623_v31 = vadd.f32 %v6550_v19, %v11810_v13  ;;  %v12821_v19 = vld [vmem:[#allocation44_spill] sm:$0xff] }
 0xb39   : > { %v6685_v12 = vpop.f32.mrf.mxu0 }
 0xb3a   : > { %v6755_v62 = vadd.f32 %v6682_v25, %v6623_v31  ;;  %v6926_v47 = vpop.f32.mrf.mxu3  ;;  %v12822_v31 = vld [vmem:[#allocation46_spill] sm:$0xff] }
 0xb3c   : > { %v6807_v50 = vpop.f32.mrf.mxu1  ;;  %v6877_v8 = vadd.f32 %v6804_v10, %v6755_v62  ;;  %7920 = vmatmul.msk.bf16.gmra.mxu2 %vm2416_vm4, %v12802_v16  ;;  %7936 = vmatmul.msk.bf16.gmra.mxu0 %vm2416_vm4, %v12803_v27 }
 0xb3e   : > { %v12012_v57 = vadd.f32 %v6926_v47, %v6877_v8 }
 0xb3f   : > { %7952 = vmatmul.msk.bf16.gmra.mxu1 %vm2416_vm4, %v12804_v35  ;;  %7968 = vmatmul.msk.bf16.gmra.mxu3 %vm2416_vm4, %v12807_v48  ;;  %v6553_v13 = vpop.f32.mrf.mxu2 }
 0xb40   : > { %v6624_v18 = vadd.f32 %v6553_v13, %v11820_v29 }
 0xb41   : > { %v6687_v15 = vpop.f32.mrf.mxu0 }
 0xb42   : > { %v6756_v32 = vadd.f32 %v6685_v12, %v6624_v18  ;;  %v6929_v55 = vpop.f32.mrf.mxu3 }
 0xb44   : > { %v6809_v24 = vpop.f32.mrf.mxu1  ;;  %v6878_v23 = vadd.f32 %v6807_v50, %v6756_v32  ;;  %v12823_v32 = vld [vmem:[#allocation25_spill] sm:$0xff] }
 0xb46   : > { %v12019_v16 = vadd.f32 %v6929_v55, %v6878_v23 }
 0xb47   : > { %v6555_v63 = vpop.f32.mrf.mxu2 }
 0xb48   : > { %v6625_v17 = vadd.f32 %v6555_v63, %v11822_v11 }
 0xb49   : > { %v6690_v25 = vpop.f32.mrf.mxu0 }
 0xb4a   : > { %v6757_v30 = vadd.f32 %v6687_v15, %v6625_v17  ;;  %v6931_v49 = vpop.f32.mrf.mxu3 }
 0xb4c   : > { %v6812_v35 = vpop.f32.mrf.mxu1  ;;  %v6879_v10 = vadd.f32 %v6809_v24, %v6757_v30  ;;  %7921 = vmatmul.msk.bf16.gmra.mxu2 %vm2416_vm4, %v12807_v48  ;;  %7937 = vmatmul.msk.bf16.gmra.mxu0 %vm2416_vm4, %v12808_v56  ;;  %v12824_v30 = vld [vmem:[#allocation23_spill] sm:$0xff] }
 0xb4e   : > { %v12026_v29 = vadd.f32 %v6931_v49, %v6879_v10 }
 0xb4f   : > { %7953 = vmatmul.msk.bf16.gmra.mxu1 %vm2416_vm4, %v12820_v44  ;;  %7969 = vmatmul.msk.bf16.gmra.mxu3 %vm2416_vm4, %v12821_v19  ;;  %v6558_v11 = vpop.f32.mrf.mxu2  ;;  %v12827_v44 = vld [vmem:[#allocation35_spill] sm:$0xff] }
 0xb50   : > { %v6626_v62 = vadd.f32 %v6558_v11, %v12822_v31 }
 0xb51   : > { %v6692_v50 = vpop.f32.mrf.mxu0 }
 0xb52   : > { %v6758_v47 = vadd.f32 %v6690_v25, %v6626_v62  ;;  %v6934_v12 = vpop.f32.mrf.mxu3  ;;  %v12825_v25 = vld [vmem:[#allocation37_spill] sm:$0xff] }
 0xb54   : > { %v6814_v8 = vpop.f32.mrf.mxu1  ;;  %v6880_v13 = vadd.f32 %v6812_v35, %v6758_v47  ;;  %v12826_v35 = vld [vmem:[#allocation36_spill] sm:$0xff] }
 0xb56   : > { %v12033_v48 = vadd.f32 %v6934_v12, %v6880_v13  ;;  %v12828_v12 = vld [vmem:[#allocation13_spill] sm:$0xff] }
 0xb57   : > { %v6560_v18 = vpop.f32.mrf.mxu2 }
 0xb58   : > { %v6627_v55 = vadd.f32 %v6560_v18, %v12823_v32  ;;  %v12832_v32 = vld [vmem:[#allocation40_spill] sm:$0xff] }
 0xb59   : > { %v12036_v23 = vpop.f32.mrf.mxu0 }
 0xb5a   : > { %v6759_v15 = vadd.f32 %v6692_v50, %v6627_v55  ;;  %v6936_v24 = vpop.f32.mrf.mxu3 }
 0xb5c   : > { %v12038_v63 = vpop.f32.mrf.mxu1  ;;  %v6881_v17 = vadd.f32 %v6814_v8, %v6759_v15  ;;  %7922 = vmatmul.msk.bf16.gmra.mxu2 %vm2416_vm4, %v12821_v19  ;;  %7938 = vmatmul.msk.bf16.gmra.mxu0 %vm2416_vm4, %v12824_v30  ;;  %v12833_v15 = vld [vmem:[#allocation24_spill] sm:$0xff] }
 0xb5e   : > { %v12044_v49 = vadd.f32 %v6936_v24, %v6881_v17 }
 0xb5f   : > { %7954 = vmatmul.msk.bf16.gmra.mxu1 %vm2416_vm4, %v12825_v25  ;;  %7970 = vmatmul.msk.bf16.gmra.mxu3 %vm2416_vm4, %v12826_v35  ;;  %v6563_v10 = vpop.f32.mrf.mxu2 }
 0xb60   : > { %v12051_v11 = vadd.f32 %v6563_v10, %v12827_v44  ;;  %v12838_v44 = vld [vmem:[#allocation31_spill] sm:$0xff] }
 0xb61   : > { %v12055_v62 = vpop.f32.mrf.mxu0 }
 0xb62   : > { %v12053_v31 = vpop.f32.mrf.mxu3 }
 0xb64   : > { %v12057_v19 = vpop.f32.mrf.mxu1 }
 0xb67   : > { %v6565_v47 = vpop.f32.mrf.mxu2 }
 0xb68   : > { %v12060_v50 = vadd.f32 %v6565_v47, %v12828_v12 }
 0xb69   : > { %v12064_v13 = vpop.f32.mrf.mxu0 }
 0xb6a   : > { %v12062_v8 = vpop.f32.mrf.mxu3  ;;  %12830 = vst [vmem:[#allocation9_spill] sm:$0xff] %v12064_v13 }
 0xb6b   : > { %12829 = vst [vmem:[#allocation28_spill] sm:$0xff] %v12062_v8 }
 0xb6c   : > { %v12066_v18 = vpop.f32.mrf.mxu1  ;;  %7923 = vmatmul.msk.bf16.gmra.mxu2 %vm2416_vm4, %v12826_v35  ;;  %7939 = vmatmul.msk.bf16.gmra.mxu0 %vm2416_vm4, %v12818_v9 }
 0xb6d   : > { %12831 = vst [vmem:[#allocation34_spill] sm:$0xff] %v12066_v18 }
 0xb6f   : > { %7955 = vmatmul.msk.bf16.gmra.mxu1 %vm2416_vm4, %v12819_v1  ;;  %7971 = vmatmul.msk.bf16.gmra.mxu3 %vm2416_vm4, %v12832_v32  ;;  %v6568_v55 = vpop.f32.mrf.mxu2 }
 0xb70   : > { %v12077_v24 = vadd.f32 %v6568_v55, %v12833_v15  ;;  %v12843_v55 = vld [vmem:[#allocation45_spill] sm:$0xff]  ;;  %v12844_v15 = vld [vmem:[#allocation4_spill] sm:$0xff] }
 0xb71   : > { %v12081_v25 = vpop.f32.mrf.mxu0 }
 0xb72   : > { %12834 = vst [vmem:[#allocation6_spill] sm:$0xff] %v12077_v24  ;;  %v12079_v17 = vpop.f32.mrf.mxu3 }
 0xb73   : > { %12835 = vst [vmem:[#allocation8_spill] sm:$0xff] %v12079_v17 }
 0xb74   : > { %12836 = vst [vmem:[#allocation33_spill] sm:$0xff] %v12081_v25  ;;  %v12083_v10 = vpop.f32.mrf.mxu1 }
 0xb75   : > { %12837 = vst [vmem:[#allocation10_spill] sm:$0xff] %v12083_v10  ;;  %v12845_v10 = vmov 0.0|0.0  }
 0xb77   : > { %v6570_v35 = vpop.f32.mrf.mxu2 }
 0xb78   : > { %v12086_v47 = vadd.f32 %v6570_v35, %v12838_v44 }
 0xb79   : > { %v12090_v1 = vpop.f32.mrf.mxu0 }
 0xb7a   : > { %12839 = vst [vmem:[#allocation30_spill] sm:$0xff] %v12086_v47  ;;  %v12088_v12 = vpop.f32.mrf.mxu3 }
 0xb7b   : > { %12840 = vst [vmem:[#allocation26_spill] sm:$0xff] %v12088_v12 }
 0xb7c   : > { %12841 = vst [vmem:[#allocation43_spill] sm:$0xff] %v12090_v1  ;;  %v12092_v18 = vpop.f32.mrf.mxu1  ;;  %7924 = vmatmul.msk.bf16.gmra.mxu2 %vm2416_vm4, %v12832_v32  ;;  %7940 = vmatmul.msk.bf16.gmra.mxu0 %vm2416_vm4, %v12843_v55 }
 0xb7d   : > { %12842 = vst [vmem:[#allocation29_spill] sm:$0xff] %v12092_v18 }
 0xb7f   : > { %7956 = vmatmul.msk.bf16.gmra.mxu1 %vm2416_vm4, %v12844_v15  ;;  %v6573_v17 = vpop.f32.mrf.mxu2  ;;  %6988 = vmatmul.bf16.gmra.mxu3 %v12845_v10 }
 0xb80   : > { %v12102_v35 = vadd.f32 %v6573_v17, %v11868_v22 }
 0xb81   : > { %v12106_v1 = vpop.f32.mrf.mxu0 }
 0xb82   : > { %12846 = vst [vmem:[#allocation32_spill] sm:$0xff] %v12102_v35  ;;  %v12104_v44 = vpop.f32.mrf.mxu3 }
 0xb83   : > { %12847 = vst [vmem:[#allocation16_spill] sm:$0xff] %v12104_v44 }
 0xb84   : > { %12848 = vst [vmem:[#allocation15_spill] sm:$0xff] %v12106_v1  ;;  %v12108_v18 = vpop.f32.mrf.mxu1 }
 0xb85   : > { %12849 = vst [vmem:[#allocation17_spill] sm:$0xff] %v12108_v18 }
 0xb87   : > { %v6575_v12 = vpop.f32.mrf.mxu2 }
 0xb88   : > { %v12111_v32 = vadd.f32 %v6575_v12, %v11870_v59 }
 0xb89   : > { %v6710_v47 = vpop.f32.mrf.mxu0 }
 0xb8a   : > { %12850 = vst [vmem:[#allocation7_spill] sm:$0xff] %v12111_v32  ;;  %v12113_v25 = vpop.f32.mrf.mxu3 }
 0xb8b   : > { %12851 = vst [vmem:[#allocation19_spill] sm:$0xff] %v12113_v25 }
 0xb8c   : > { %v6832_v15 = vpop.f32.mrf.mxu1  ;;  %7972 = vmatmul.msk.bf16.vlgmr.msra.gmra.mxu2 %vm2416_vm4, %v11079_v5 }
 0xb8f   : > { %v6578_v10 = vpop.f32.mrf.mxu2 }
 0xb90   : > { %v6634_v22 = vadd.f32 %v6578_v10, %v11880_v53 }
 0xb91   : > { %v6712_v35 = vpop.f32.mrf.mxu0 }
 0xb92   : > { %v6766_v17 = vadd.f32 %v6710_v47, %v6634_v22  ;;  %v6954_v44 = vpop.f32.mrf.mxu3 }
 0xb94   : > { %v6834_v1 = vpop.f32.mrf.mxu1  ;;  %v6888_v55 = vadd.f32 %v6832_v15, %v6766_v17 }
 0xb96   : > { %v12118_v18 = vadd.f32 %v6954_v44, %v6888_v55 }
 0xb97   : > { %v6580_v13 = vpop.f32.mrf.mxu2 }
 0xb98   : > { %v6635_v59 = vadd.f32 %v6580_v13, %v11882_v45 }
 0xb99   : > { %v6715_v32 = vpop.f32.mrf.mxu0 }
 0xb9a   : > { %v6767_v12 = vadd.f32 %v6712_v35, %v6635_v59  ;;  %v6956_v25 = vpop.f32.mrf.mxu3 }
 0xb9c   : > { %v6837_v24 = vpop.f32.mrf.mxu1  ;;  %v6889_v8 = vadd.f32 %v6834_v1, %v6767_v12  ;;  %7973 = vmatmul.msk.bf16.gmra.mxu2 %vm2416_vm4, %v12791_v0 }
 0xb9e   : > { %v12123_v5 = vadd.f32 %v6956_v25, %v6889_v8 }
 0xb9f   : > { %v6583_v53 = vpop.f32.mrf.mxu2 }
 0xba0   : > { %v6636_v47 = vadd.f32 %v6583_v53, %v11892_v26 }
 0xba1   : > { %v6717_v55 = vpop.f32.mrf.mxu0 }
 0xba2   : > { %v6768_v10 = vadd.f32 %v6715_v32, %v6636_v47  ;;  %v6959_v15 = vpop.f32.mrf.mxu3 }
 0xba4   : > { %v6839_v44 = vpop.f32.mrf.mxu1  ;;  %v6890_v22 = vadd.f32 %v6837_v24, %v6768_v10 }
 0xba6   : > { %v12126_v17 = vadd.f32 %v6959_v15, %v6890_v22 }
 0xba7   : > { %v6585_v45 = vpop.f32.mrf.mxu2 }
 0xba8   : > { %v6637_v13 = vadd.f32 %v6585_v45, %v11894_v52 }
 0xba9   : > { %v6720_v59 = vpop.f32.mrf.mxu0 }
 0xbaa   : > { %v6769_v35 = vadd.f32 %v6717_v55, %v6637_v13  ;;  %v6961_v1 = vpop.f32.mrf.mxu3 }
 0xbac   : > { %v6842_v12 = vpop.f32.mrf.mxu1  ;;  %v6891_v0 = vadd.f32 %v6839_v44, %v6769_v35  ;;  %7974 = vmatmul.msk.bf16.gmra.mxu2 %vm2416_vm4, %v12794_v36 }
 0xbae   : > { %v12131_v8 = vadd.f32 %v6961_v1, %v6891_v0 }
 0xbaf   : > { %v6588_v26 = vpop.f32.mrf.mxu2 }
 0xbb0   : > { %v6638_v25 = vadd.f32 %v6588_v26, %v11904_v28 }
 0xbb1   : > { %v6722_v53 = vpop.f32.mrf.mxu0 }
 0xbb2   : > { %v6770_v32 = vadd.f32 %v6720_v59, %v6638_v25  ;;  %v6964_v24 = vpop.f32.mrf.mxu3 }
 0xbb4   : > { %v6844_v47 = vpop.f32.mrf.mxu1  ;;  %v6892_v10 = vadd.f32 %v6842_v12, %v6770_v32 }
 0xbb6   : > { %v12134_v15 = vadd.f32 %v6964_v24, %v6892_v10 }
 0xbb7   : > { %v6590_v52 = vpop.f32.mrf.mxu2 }
 0xbb8   : > { %v6639_v55 = vadd.f32 %v6590_v52, %v11906_v34 }
 0xbb9   : > { %v6725_v45 = vpop.f32.mrf.mxu0 }
 0xbba   : > { %v6771_v22 = vadd.f32 %v6722_v53, %v6639_v55  ;;  %v6966_v44 = vpop.f32.mrf.mxu3 }
 0xbbc   : > { %v6893_v13 = vadd.f32 %v6844_v47, %v6771_v22  ;;  %7975 = vmatmul.msk.bf16.gmra.mxu2 %vm2416_vm4, %v11235_v37  ;;  %v6847_v36 = vpop.f32.mrf.mxu1 }
 0xbbe   : > { %v12139_v35 = vadd.f32 %v6966_v44, %v6893_v13 }
 0xbbf   : > { %v6593_v28 = vpop.f32.mrf.mxu2 }
 0xbc0   : > { %v6640_v1 = vadd.f32 %v6593_v28, %v11916_v3 }
 0xbc1   : > { %v6727_v26 = vpop.f32.mrf.mxu0 }
 0xbc2   : > { %v6772_v59 = vadd.f32 %v6725_v45, %v6640_v1  ;;  %v6969_v12 = vpop.f32.mrf.mxu3 }
 0xbc4   : > { %v6894_v0 = vadd.f32 %v6847_v36, %v6772_v59  ;;  %v6849_v34 = vpop.f32.mrf.mxu1 }
 0xbc6   : > { %v12142_v25 = vadd.f32 %v6969_v12, %v6894_v0 }
 0xbc7   : > { %v6595_v32 = vpop.f32.mrf.mxu2 }
 0xbc8   : > { %v6641_v24 = vadd.f32 %v6595_v32, %v11918_v38 }
 0xbc9   : > { %v6730_v52 = vpop.f32.mrf.mxu0 }
 0xbca   : > { %v6773_v53 = vadd.f32 %v6727_v26, %v6641_v24  ;;  %v6971_v47 = vpop.f32.mrf.mxu3 }
 0xbcc   : > { %v6895_v10 = vadd.f32 %v6849_v34, %v6773_v53  ;;  %7976 = vmatmul.msk.bf16.gmra.mxu2 %vm2416_vm4, %v12797_v7  ;;  %v6852_v22 = vpop.f32.mrf.mxu1 }
 0xbce   : > { %v12147_v37 = vadd.f32 %v6971_v47, %v6895_v10 }
 0xbcf   : > { %v6598_v3 = vpop.f32.mrf.mxu2 }
 0xbd0   : > { %v6642_v55 = vadd.f32 %v6598_v3, %v11928_v60 }
 0xbd1   : > { %v6732_v1 = vpop.f32.mrf.mxu0 }
 0xbd2   : > { %v6774_v44 = vadd.f32 %v6730_v52, %v6642_v55  ;;  %v6974_v45 = vpop.f32.mrf.mxu3 }
 0xbd4   : > { %v6896_v13 = vadd.f32 %v6852_v22, %v6774_v44  ;;  %v6854_v12 = vpop.f32.mrf.mxu1 }
 0xbd6   : > { %v12150_v36 = vadd.f32 %v6974_v45, %v6896_v13 }
 0xbd7   : > { %v6600_v28 = vpop.f32.mrf.mxu2 }
 0xbd8   : > { %v6643_v38 = vadd.f32 %v6600_v28, %v11930_v58 }
 0xbda   : > { %v6775_v59 = vadd.f32 %v6732_v1, %v6643_v38  ;;  %v6976_v7 = vpop.f32.mrf.mxu3 }
 0xbdc   : > { %v6897_v0 = vadd.f32 %v6854_v12, %v6775_v59  ;;  %7977 = vmatmul.msk.bf16.gmra.mxu2 %vm2416_vm4, %v11321_v33 }
 0xbde   : > { %v12155_v26 = vadd.f32 %v6976_v7, %v6897_v0 }
 0xbdf   : > { %v6603_v60 = vpop.f32.mrf.mxu2 }
 0xbe0   : > { %v12158_v34 = vadd.f32 %v6603_v60, %v11940_v54 }
 0xbe7   : > { %v6605_v32 = vpop.f32.mrf.mxu2 }
 0xbe8   : > { %v12161_v24 = vadd.f32 %v6605_v32, %v11942_v4 }
 0xbec   : > { %7978 = vmatmul.msk.bf16.gmra.mxu2 %vm2416_vm4, %v11349_v2 }
 0xbef   : > { %v6608_v58 = vpop.f32.mrf.mxu2 }
 0xbf0   : > { %v12166_v53 = vadd.f32 %v6608_v58, %v11952_v42 }
 0xbf7   : > { %v6610_v47 = vpop.f32.mrf.mxu2 }
 0xbf8   : > { %v12169_v33 = vadd.f32 %v6610_v47, %v11954_v40 }
 0xbfc   : > { %7979 = vmatmul.msk.bf16.gmra.mxu2 %vm2416_vm4, %v11375_v51 }
 0xbff   : > { %v6613_v54 = vpop.f32.mrf.mxu2 }
 0xc00   : > { %v12174_v10 = vadd.f32 %v6613_v54, %v11964_v14 }
 0xc07   : > { %v6615_v4 = vpop.f32.mrf.mxu2 }
 0xc08   : > { %v12177_v52 = vadd.f32 %v6615_v4, %v11966_v39 }
 0xc0c   : > { %7980 = vmatmul.msk.bf16.gmra.mxu2 %vm2416_vm4, %v11397_v20 }
 0xc0f   : > { %v7036_v2 = vpop.f32.mrf.mxu2 }
 0xc10   : > { %v7116_v42 = vadd.f32 %v7036_v2, %v11977_v61 }
 0xc12   : > { %v7148_v55 = vmax.f32 %v7116_v42, 0.0 }
 0xc17   : > { %v7038_v3 = vpop.f32.mrf.mxu2 }
 0xc18   : > { %v7117_v40 = vadd.f32 %v7038_v3, %v11984_v43 }
 0xc1a   : > { %v7149_v22 = vmax.f32 %v7117_v40, 0.0 }
 0xc1c   : > { %7981 = vmatmul.msk.bf16.gmra.mxu2 %vm2416_vm4, %v12800_v21  ;;  %v12185_v51 = vpack.c.bf16 %v7149_v22, %v7148_v55 }
 0xc1f   : > { %v7041_v14 = vpop.f32.mrf.mxu2 }
 0xc20   : > { %v7118_v39 = vadd.f32 %v7041_v14, %v11991_v6  ;;  %v12853_v14 = vld [vmem:[#allocation6_spill] sm:$0xff] }
 0xc22   : > { %v7150_v20 = vmax.f32 %v7118_v39, 0.0  ;;  %v12854_v39 = vld [vmem:[#allocation9_spill] sm:$0xff] }
 0xc27   : > { %v7043_v44 = vpop.f32.mrf.mxu2 }
 0xc28   : > { %v7119_v45 = vadd.f32 %v7043_v44, %v11998_v41 }
 0xc2a   : > { %v7151_v13 = vmax.f32 %v7119_v45, 0.0  ;;  %v12855_v45 = vld [vmem:[#allocation45_spill] sm:$0xff] }
 0xc2c   : > { %7982 = vmatmul.msk.bf16.gmra.mxu2 %vm2416_vm4, %v12803_v27  ;;  %v12191_v61 = vpack.c.bf16 %v7151_v13, %v7150_v20  ;;  %v12858_v20 = vld [vmem:[#allocation34_spill] sm:$0xff] }
 0xc2d   : > { %v12859_v13 = vld [vmem:[#allocation10_spill] sm:$0xff] }
 0xc2f   : > { %v7046_v43 = vpop.f32.mrf.mxu2 }
 0xc30   : > { %v7120_v28 = vadd.f32 %v7046_v43, %v12005_v46 }
 0xc32   : > { %v7152_v1 = vmax.f32 %v7120_v28, 0.0  ;;  %v12860_v28 = vld [vmem:[#allocation8_spill] sm:$0xff] }
 0xc37   : > { %v7048_v38 = vpop.f32.mrf.mxu2 }
 0xc38   : > { %v7121_v21 = vadd.f32 %v7048_v38, %v12012_v57 }
 0xc3a   : > { %v7153_v59 = vmax.f32 %v7121_v21, 0.0  ;;  %v12861_v21 = vld [vmem:[#allocation26_spill] sm:$0xff] }
 0xc3c   : > { %7983 = vmatmul.msk.bf16.gmra.mxu2 %vm2416_vm4, %v12808_v56  ;;  %v12197_v6 = vpack.c.bf16 %v7153_v59, %v7152_v1 }
 0xc3f   : > { %v7051_v41 = vpop.f32.mrf.mxu2 }
 0xc40   : > { %v7122_v12 = vadd.f32 %v7051_v41, %v12019_v16  ;;  %v6760_v16 = vadd.f32 %v12036_v23, %v12051_v11 }
 0xc42   : > { %v7154_v7 = vmax.f32 %v7122_v12, 0.0  ;;  %v6882_v2 = vadd.f32 %v12038_v63, %v6760_v16  ;;  %v12857_v63 = vld [vmem:[#allocation33_spill] sm:$0xff] }
 0xc44   : > { %v7004_v42 = vadd.f32 %v12053_v31, %v6882_v2  ;;  %v12868_v2 = vld [vmem:[#allocation17_spill] sm:$0xff] }
 0xc47   : > { %v7053_v0 = vpop.f32.mrf.mxu2 }
 0xc48   : > { %v7123_v27 = vadd.f32 %v7053_v0, %v12026_v29  ;;  %v6761_v29 = vadd.f32 %v12055_v62, %v12060_v50  ;;  %v12856_v62 = vld [vmem:[#allocation30_spill] sm:$0xff] }
 0xc49   : > { %v6763_v50 = vadd.f32 %v12857_v63, %v12856_v62 }
 0xc4a   : > { %v7155_v60 = vmax.f32 %v7123_v27, 0.0 }
 0xc4b   : > { %v6885_v43 = vadd.f32 %v12859_v13, %v6763_v50 }
 0xc4c   : > { %7984 = vmatmul.msk.bf16.gmra.mxu2 %vm2416_vm4, %v12824_v30  ;;  %v12203_v46 = vpack.c.bf16 %v7155_v60, %v7154_v7  ;;  %v12862_v7 = vld [vmem:[#allocation32_spill] sm:$0xff]  ;;  %v12863_v60 = vld [vmem:[#allocation43_spill] sm:$0xff] }
 0xc4d   : > { %v7007_v1 = vadd.f32 %v12861_v21, %v6885_v43 }
 0xc4f   : > { %v7056_v57 = vpop.f32.mrf.mxu2 }
 0xc50   : > { %v7124_v32 = vadd.f32 %v7056_v57, %v12033_v48  ;;  %v6883_v48 = vadd.f32 %v12057_v19, %v6761_v29  ;;  %v6764_v57 = vadd.f32 %v12863_v60, %v12862_v7  ;;  %v12867_v29 = vld [vmem:[#allocation29_spill] sm:$0xff] }
 0xc52   : > { %v7156_v47 = vmax.f32 %v7124_v32, 0.0 }
 0xc57   : > { %v7058_v58 = vpop.f32.mrf.mxu2 }
 0xc58   : > { %v7125_v56 = vadd.f32 %v7058_v58, %v12044_v49  ;;  %v12852_v49 = vld [vmem:[#allocation28_spill] sm:$0xff]  ;;  %v12864_v58 = vld [vmem:[#allocation5_spill] sm:$0xff] }
 0xc59   : > { %v7005_v3 = vadd.f32 %v12852_v49, %v6883_v48 }
 0xc5a   : > { %v7157_v54 = vmax.f32 %v7125_v56, 0.0  ;;  %v12865_v56 = vld [vmem:[#allocation7_spill] sm:$0xff] }
 0xc5c   : > { %v7186_v4 = vpack.c.bf16 %v7157_v54, %v7156_v47  ;;  %7985 = vmatmul.msk.bf16.gmra.mxu2 %vm2416_vm4, %v12818_v9  ;;  %v6762_v9 = vadd.f32 %v12854_v39, %v12853_v14  ;;  %v12866_v47 = vld [vmem:[#allocation15_spill] sm:$0xff] }
 0xc5d   : > { %v6765_v54 = vadd.f32 %v12866_v47, %v12865_v56  ;;  %v6735_v47 = vpop.f32.mrf.mxu0 }
 0xc5e   : > { %v6884_v31 = vadd.f32 %v12858_v20, %v6762_v9  ;;  %v7220_v21 = vsel %vm2416_vm4, %v7186_v4, 0 }
 0xc5f   : > { %v7061_v30 = vpop.f32.mrf.mxu2  ;;  %v6887_v48 = vadd.f32 %v12868_v2, %v6765_v54 }
 0xc60   : > { %v7126_v40 = vadd.f32 %v7061_v30, %v7004_v42  ;;  %v7006_v38 = vadd.f32 %v12860_v28, %v6884_v31  ;;  %v6886_v30 = vadd.f32 %v12867_v29, %v6764_v57  ;;  %v12869_v42 = vld [vmem:[#allocation16_spill] sm:$0xff]  ;;  %v7211_v57 = vsel %vm2416_vm4, %v12191_v61, 0 }
 0xc62   : > { %v7158_v23 = vmax.f32 %v7126_v40, 0.0  ;;  %v7008_v49 = vadd.f32 %v12869_v42, %v6886_v30  ;;  %v6979_v30 = vpop.f32.mrf.mxu3 }
 0xc65   : > { %v6737_v2 = vpop.f32.mrf.mxu0 }
 0xc67   : > { %v7063_v55 = vpop.f32.mrf.mxu2 }
 0xc68   : > { %v7127_v22 = vadd.f32 %v7063_v55, %v7005_v3  ;;  %v12870_v3 = vld [vmem:[#allocation19_spill] sm:$0xff] }
 0xc69   : > { %v7009_v40 = vadd.f32 %v12870_v3, %v6887_v48  ;;  %v6776_v3 = vadd.f32 %v6735_v47, %v12158_v34 }
 0xc6a   : > { %v7159_v11 = vmax.f32 %v7127_v22, 0.0 }
 0xc6c   : > { %v7187_v44 = vpack.c.bf16 %v7159_v11, %v7158_v23  ;;  %7986 = vmatmul.msk.bf16.gmra.mxu2 %vm2416_vm4, %v12855_v45 }
 0xc6e   : > { %v7223_v43 = vsel %vm2416_vm4, %v7187_v44, 0 }
 0xc6f   : > { %v7066_v19 = vpop.f32.mrf.mxu2 }
 0xc70   : > { %v7128_v59 = vadd.f32 %v7066_v19, %v7006_v38 }
 0xc72   : > { %v7160_v0 = vmax.f32 %v7128_v59, 0.0 }
 0xc77   : > { %v7068_v41 = vpop.f32.mrf.mxu2 }
 0xc78   : > { %v7129_v12 = vadd.f32 %v7068_v41, %v7007_v1 }
 0xc7a   : > { %v7161_v27 = vmax.f32 %v7129_v12, 0.0 }
 0xc7c   : > { %v7188_v32 = vpack.c.bf16 %v7161_v27, %v7160_v0  ;;  %7987 = vmatmul.msk.bf16.gmra.mxu2 %vm2416_vm4, %v12864_v58 }
 0xc7e   : > { %v7226_v63 = vsel %vm2416_vm4, %v7188_v32, 0 }
 0xc7f   : > { %v7071_v16 = vpop.f32.mrf.mxu2 }
 0xc80   : > { %v7130_v55 = vadd.f32 %v7071_v16, %v7008_v49  ;;  %v6857_v16 = vpop.f32.mrf.mxu1 }
 0xc82   : > { %v7162_v11 = vmax.f32 %v7130_v55, 0.0  ;;  %v6777_v55 = vadd.f32 %v6737_v2, %v12161_v24 }
 0xc87   : > { %v7073_v22 = vpop.f32.mrf.mxu2 }
 0xc88   : > { %v7131_v23 = vadd.f32 %v7073_v22, %v7009_v40  ;;  %v6859_v42 = vpop.f32.mrf.mxu1  ;;  %v6981_v40 = vpop.f32.mrf.mxu3 }
 0xc89   : > { %v6740_v22 = vpop.f32.mrf.mxu0 }
 0xc8a   : > { %v7163_v14 = vmax.f32 %v7131_v23, 0.0  ;;  %v6778_v34 = vadd.f32 %v6740_v22, %v12166_v53  ;;  %v7281_v22 = vld [vmem:[%s627_s23] sm:$0x3] }
 0xc8c   : > { %v7189_v39 = vpack.c.bf16 %v7163_v14, %v7162_v11  ;;  %v6898_v11 = vadd.f32 %v6857_v16, %v6776_v3  ;;  %v6899_v14 = vadd.f32 %v6859_v42, %v6777_v55  ;;  %v7180_v42 = vld [vmem:[%s12325_s16] sm:$0x7] }
 0xc8d   : > { %v7198_v3 = vld [vmem:[%s12326_s17] sm:$0x7] }
 0xc8e   : > { %v7229_v9 = vsel %vm2416_vm4, %v7189_v39, 0 }
 0xc8f   : > { %v7076_v45 = vpop.f32.mrf.mxu2  ;;  %7255 = vmatpush.bf16.xpose.msrb.mxu0 %v7229_v9  ;;  %v7021_v9 = vadd.f32 %v6981_v40, %v6899_v14  ;;  %v8030_v40 = vmov 0   ;;  %v7289_v14 = vld [vmem:[%s623_s29] sm:$0x77] }
 0xc90   : > { %v7132_v62 = vadd.f32 %v7076_v45, %v12118_v18  ;;  %v6862_v39 = vpop.f32.mrf.mxu1  ;;  %8011 = vset.pattern.permute.xlu1 %v8030_v40  ;;  %8012 = vset.pattern.permute.xlu0 %v8030_v40 }
 0xc91   : > { %7201 = vperm.xlu1 %8011, %v7198_v3  }
 0xc92   : > { %v7164_v20 = vmax.f32 %v7132_v62, 0.0  ;;  %v6984_v62 = vpop.f32.mrf.mxu3 }
 0xc97   : > { %v7078_v50 = vpop.f32.mrf.mxu2  ;;  %7256 = vmatpush.bf16.xpose.msrb.mxu0 %v7226_v63 }
 0xc98   : > { %v7133_v19 = vadd.f32 %v7078_v50, %v12123_v5  ;;  %v7217_v5 = vsel %vm2416_vm4, %v12203_v46, 0  ;;  %v6742_v50 = vpop.f32.mrf.mxu0 }
 0xc99   : > { %v6779_v24 = vadd.f32 %v6742_v50, %v12169_v33 }
 0xc9a   : > { %v7165_v31 = vmax.f32 %v7133_v19, 0.0 }
 0xc9c   : > { %v12241_v13 = vpack.c.bf16 %v7165_v31, %v7164_v20 }
 0xc9f   : > { %v7081_v28 = vpop.f32.mrf.mxu2  ;;  %7257 = vmatpush.bf16.xpose.msrb.mxu0 %v7223_v43  ;;  %v6864_v43 = vpop.f32.mrf.mxu1 }
 0xca0   : > { %v7134_v38 = vadd.f32 %v7081_v28, %v12126_v17  ;;  %v7214_v17 = vsel %vm2416_vm4, %v12197_v6, 0 }
 0xca2   : > { %v7166_v59 = vmax.f32 %v7134_v38, 0.0  ;;  %v6900_v38 = vadd.f32 %v6862_v39, %v6778_v34 }
 0xca7   : > { %v7083_v1 = vpop.f32.mrf.mxu2  ;;  %7258 = vmatpush.bf16.xpose.msrb.mxu0 %v7220_v21  ;;  %v6986_v21 = vpop.f32.mrf.mxu3 }
 0xca8   : > { %v7135_v18 = vadd.f32 %v7083_v1, %v12131_v8  ;;  %v6901_v1 = vadd.f32 %v6864_v43, %v6779_v24 }
 0xcaa   : > { %v7167_v41 = vmax.f32 %v7135_v18, 0.0  ;;  %v6745_v18 = vpop.f32.mrf.mxu0 }
 0xcab   : > { %v6780_v53 = vadd.f32 %v6745_v18, %v12174_v10 }
 0xcac   : > { %v12247_v12 = vpack.c.bf16 %v7167_v41, %v7166_v59  ;;  %v7022_v59 = vadd.f32 %v6984_v62, %v6900_v38  ;;  %v6867_v41 = vpop.f32.mrf.mxu1 }
 0xcae   : > { %v7235_v55 = vsel %vm2416_vm4, %v12247_v12, 0 }
 0xcaf   : > { %v7086_v0 = vpop.f32.mrf.mxu2  ;;  %7259 = vmatpush.bf16.xpose.msrb.mxu0 %v7217_v5  ;;  %v7023_v5 = vadd.f32 %v6986_v21, %v6901_v1 }
 0xcb0   : > { %v7136_v44 = vadd.f32 %v7086_v0, %v12134_v15  ;;  %v7208_v15 = vsel %vm2416_vm4, %v12185_v51, 0 }
 0xcb2   : > { %v7168_v7 = vmax.f32 %v7136_v44, 0.0 }
 0xcb7   : > { %v7088_v27 = vpop.f32.mrf.mxu2  ;;  %7260 = vmatpush.bf16.xpose.msrb.mxu0 %v7214_v17 }
 0xcb8   : > { %v7137_v4 = vadd.f32 %v7088_v27, %v12139_v35  ;;  %v6989_v27 = vpop.f32.mrf.mxu3 }
 0xcba   : > { %v7169_v8 = vmax.f32 %v7137_v4, 0.0 }
 0xcbc   : > { %v12255_v60 = vpack.c.bf16 %v7169_v8, %v7168_v7 }
 0xcbf   : > { %v7091_v32 = vpop.f32.mrf.mxu2  ;;  %7261 = vmatpush.bf16.xpose.msrb.mxu0 %v7211_v57  ;;  %v6747_v57 = vpop.f32.mrf.mxu0 }
 0xcc0   : > { %v7138_v46 = vadd.f32 %v7091_v32, %v12142_v25  ;;  %v6781_v33 = vadd.f32 %v6747_v57, %v12177_v52  ;;  %v6869_v32 = vpop.f32.mrf.mxu1 }
 0xcc2   : > { %v7170_v56 = vmax.f32 %v7138_v46, 0.0 }
 0xcc7   : > { %v7093_v58 = vpop.f32.mrf.mxu2  ;;  %7262 = vmatpush.bf16.xpose.msrb.mxu0 %v7208_v15  ;;  %v6902_v15 = vadd.f32 %v6867_v41, %v6780_v53 }
 0xcc8   : > { %v7139_v6 = vadd.f32 %v7093_v58, %v12147_v37  ;;  %v6903_v58 = vadd.f32 %v6869_v32, %v6781_v33 }
 0xcca   : > { %v7171_v35 = vmax.f32 %v7139_v6, 0.0  ;;  %v6991_v6 = vpop.f32.mrf.mxu3 }
 0xccc   : > { %v12263_v54 = vpack.c.bf16 %v7171_v35, %v7170_v56  ;;  %v7024_v56 = vadd.f32 %v6989_v27, %v6902_v15  ;;  %v7025_v35 = vadd.f32 %v6991_v6, %v6903_v58 }
 0xccf   : > { %v7096_v29 = vpop.f32.mrf.mxu2 }
 0xcd0   : > { %v7140_v61 = vadd.f32 %v7096_v29, %v12150_v36  ;;  %v7020_v36 = vadd.f32 %v6979_v30, %v6898_v11 }
 0xcd2   : > { %v7172_v51 = vmax.f32 %v7140_v61, 0.0 }
 0xcd7   : > { %v7098_v48 = vpop.f32.mrf.mxu2 }
 0xcd8   : > { %v7141_v25 = vadd.f32 %v7098_v48, %v12155_v26 }
 0xcda   : > { %v7173_v49 = vmax.f32 %v7141_v25, 0.0 }
 0xcdc   : > { %v7194_v37 = vpack.c.bf16 %v7173_v49, %v7172_v51  ;;  %v7181_v51 = vpack.c.bf16 %v7180_v42, %v7180_v42  ;;  %v7241_v49 = vsel %vm2416_vm4, %v12263_v54, 0  ;;  %v7232_v54 = vsel %vm2416_vm4, %v12241_v13, 0 }
 0xcde   : > { %v7244_v25 = vsel %vm2416_vm4, %v7194_v37, 0  ;;  %7988 = vmatmul.msk.bf16.vlgmr.msrb.gmra.mxu0 %vm2416_vm4, %v7181_v51  ;;  %v7238_v37 = vsel %vm2416_vm4, %v12255_v60, 0 }
 0xcdf   : > { %v7101_v23 = vpop.f32.mrf.mxu2 }
 0xce0   : > { %v7142_v45 = vadd.f32 %v7101_v23, %v7020_v36  ;;  %v7290_v23 = vsub.f32 1.0, %v7281_v22 }
 0xce2   : > { %v7174_v19 = vmax.f32 %v7142_v45, 0.0  ;;  %v7293_v60 = vperm.slane %v7290_v23, 1  ;;  %v7292_v12 = vperm.slane %v7290_v23, 0 }
 0xce4   : > { %v7294_v11 = vrot.slane %v7293_v60, 4 }
 0xce6   : > { %v7296_v39 = vsel %vm7295_vm10, %v7292_v12, %v7294_v11 }
 0xce7   : > { %v7103_v63 = vpop.f32.mrf.mxu2  ;;  %v7298_v36 = vmul.f32 %v7296_v39, %v7289_v14 }
 0xce8   : > { %v7143_v26 = vadd.f32 %v7103_v63, %v7021_v9  ;;  %v7283_v63 = vperm.slane %v7281_v22, 0 }
 0xce9   : > { %7300 = vst [vmem:[#allocation1] ss:$2 sm:$0xff] %v7298_v36 }
 0xcea   : > { %v7175_v20 = vmax.f32 %v7143_v26, 0.0  ;;  %v7284_v26 = vperm.slane %v7281_v22, 1 }
 0xcec   : > { %v7195_v31 = vpack.c.bf16 %v7175_v20, %v7174_v19 }
 0xcee   : > { %v7247_v52 = vsel %vm2416_vm4, %v7195_v31, 0 }
 0xcef   : > { %v7106_v28 = vpop.f32.mrf.mxu2 }
 0xcf0   : > { %v7144_v0 = vadd.f32 %v7106_v28, %v7022_v59  ;;  %v7302_v20 = vld.sshfl [vmem:[#allocation1 + $0x8] sm:$0xff pattern:$0x75316420]  ;;  %v7301_v43 = vld.sshfl [vmem:[#allocation1] sm:$0xff pattern:$0x75316420] }
 0xcf2   : > { %v7176_v4 = vmax.f32 %v7144_v0, 0.0 }
 0xcf7   : > { %v7108_v44 = vpop.f32.mrf.mxu2 }
 0xcf8   : > { %v7145_v17 = vadd.f32 %v7108_v44, %v7023_v5 }
 0xcfa   : > { %v7177_v7 = vmax.f32 %v7145_v17, 0.0 }
 0xcfc   : > { %v7196_v8 = vpack.c.bf16 %v7177_v7, %v7176_v4 }
 0xcfe   : > { %v7250_v10 = vsel %vm2416_vm4, %v7196_v8, 0 }
 0xcff   : > { %v7111_v46 = vpop.f32.mrf.mxu2 }
 0xd00   : > { %v7146_v47 = vadd.f32 %v7111_v46, %v7024_v56 }
 0xd02   : > { %v7178_v61 = vmax.f32 %v7146_v47, 0.0 }
 0xd03   : > { %v7202_v45 = vpop.permute.xlu1 %7201 }
 0xd07   : > { %v7113_v16 = vpop.f32.mrf.mxu2 }
 0xd08   : > { %v7147_v29 = vadd.f32 %v7113_v16, %v7025_v35 }
 0xd0a   : > { %v7179_v30 = vmax.f32 %v7147_v29, 0.0 }
 0xd0c   : > { %v7197_v2 = vpack.c.bf16 %v7179_v30, %v7178_v61 }
 0xd0e   : > { %v7253_v48 = vsel %vm2416_vm4, %v7197_v2, 0 }
 0xd0f   : > { %7268 = vmatpush.bf16.xpose.msrb.mxu1 %v7253_v48 }
 0xd17   : > { %7269 = vmatpush.bf16.xpose.msrb.mxu1 %v7250_v10 }
 0xd1f   : > { %7270 = vmatpush.bf16.xpose.msrb.mxu1 %v7247_v52 }
 0xd27   : > { %7271 = vmatpush.bf16.xpose.msrb.mxu1 %v7244_v25 }
 0xd2f   : > { %7272 = vmatpush.bf16.xpose.msrb.mxu1 %v7241_v49 }
 0xd37   : > { %7273 = vmatpush.bf16.xpose.msrb.mxu1 %v7238_v37 }
 0xd3f   : > { %7274 = vmatpush.bf16.xpose.msrb.mxu1 %v7235_v55 }
 0xd47   : > { %7275 = vmatpush.bf16.xpose.msrb.mxu1 %v7232_v54 }
 0xd4e   : > { %7989 = vmatmul.msk.bf16.vlgmr.msrb.gmra.mxu1 %vm2416_vm4, %v7181_v51 }
 0xd5b   : > { %v7264_v13 = vpop.f32.mrf.mxu0 }
 0xd5c   : > { %v7265_v62 = vadd.f32 %v7264_v13, %v7202_v45 }
 0xd5e   : > { %v7287_v34 = vmul.f32 %v7283_v63, %v7265_v62 }
 0xd60   : > { %v7305_v28 = vadd.f32 %v7301_v43, %v7287_v34 }
 0xd63   : > { %v7266_v9 = vpop.f32.mrf.mxu0 }
 0xdcb   : > { %v7277_v50 = vpop.f32.mrf.mxu1 }
 0xdcc   : > { %v7278_v19 = vadd.f32 %v7277_v50, %v7202_v45 }
 0xdce   : > { %v7288_v31 = vmul.f32 %v7284_v26, %v7278_v19 }
 0xdd0   : > { %v7306_v24 = vadd.f32 %v7302_v20, %v7288_v31 }
 0xdd2   : > { %v7309_v38 = vrot.slane %v7306_v24, 4 }
 0xdd3   : > { %v7279_v21 = vpop.f32.mrf.mxu1 }
 0xdd4   : > { %v7310_v1 = vsel %vm7295_vm10, %v7305_v28, %v7309_v38 }
 0xdd5   : > { %7312 = vst [vmem:[%s632_s0] sm:$0x77] %v7310_v1 }
 0xdd6 PF: > { %s28_s27 = sadd.s32 1, %s8025_s27  }
 0xdd7   : > { %p25_p4 = scmp.ge.s32.totalorder %s28_s27, 4  }
 0xdd9   :  { %27 = sbr.rel (!%p25_p4) target bundleno = 4 (0x4), region = 131 }

</bundles_post_ra>
